<compile_context>
chip_gen: v7x
topology: tpu7x:2x2x1
jax: 0.10.0
libtpu: 0.0.40
codegen_flags: <defaults>
</compile_context>

<pallas_src>
import functools

import jax
import jax.numpy as jnp
from jax.experimental import pallas as pl
from jax.experimental.pallas import tpu as pltpu

LEAKY_SLOPE = 0.2
DROP_P = 0.3
KEEP_P = 1.0 - DROP_P

H1, H2, H3 = 1024, 512, 256
TB = 256  # batch tile: fills the 256-wide MXU on v6e/v7x, 2x128 passes on v5e


def _round_up(x, m):
    return (x + m - 1) // m * m


def _leaky_relu(x):
    return jnp.where(x > 0, x, LEAKY_SLOPE * x)


def discriminator_kernel(x_ref,
                         w1_ref, b1_ref, m1_ref,
                         w2_ref, b2_ref, m2_ref,
                         w3_ref, b3_ref, m3_ref,
                         w4_ref, b4_ref,
                         o_ref):
    # ---- fc1 + LeakyReLU + Dropout -------------------------------------
    h = jnp.dot(x_ref[...].astype(jnp.bfloat16), w1_ref[...],
                preferred_element_type=jnp.float32) + b1_ref[...]
    h = _leaky_relu(h) * m1_ref[...]

    # ---- fc2 + LeakyReLU + Dropout -------------------------------------
    h = jnp.dot(h.astype(jnp.bfloat16), w2_ref[...],
                preferred_element_type=jnp.float32) + b2_ref[...]
    h = _leaky_relu(h) * m2_ref[...]

    # ---- fc3 + LeakyReLU + Dropout -------------------------------------
    h = jnp.dot(h.astype(jnp.bfloat16), w3_ref[...],
                preferred_element_type=jnp.float32) + b3_ref[...]
    h = _leaky_relu(h) * m3_ref[...]

    # ---- fc4 (out_features=1) + Sigmoid ---------------------------------
    # N=1 matmul wastes 255/256 MXU columns -> VPU multiply + lane reduce.
    logits = jnp.sum(h * w4_ref[...], axis=-1, keepdims=True) + b4_ref[...]
    o_ref[...] = jax.nn.sigmoid(logits)


@jax.jit
def discriminator_forward(x, params, key):
    """x: (B, D) float32; params: (w1,b1,w2,b2,w3,b3,w4_row,b4); key: PRNGKey.

    Returns (B, 1) float32 in [0, 1].  Dropout is applied (training mode),
    matching PyTorch's F.dropout default.
    """
    w1, b1, w2, b2, w3, b3, w4r, b4 = params
    B, D = x.shape
    D_pad = _round_up(D, 128)
    B_pad = _round_up(B, TB)

    # Zero-pad batch to a TB multiple and features to a lane multiple.
    x_p = jnp.pad(x.astype(jnp.float32), ((0, B_pad - B), (0, D_pad - D)))
    w1_p = jnp.pad(w1, ((0, D_pad - D), (0, 0)))

    # Inverted-dropout masks (already scaled to {0, 1/0.7}), generated with
    # standard JAX RNG so the kernel also runs under CPU/interpret mode.
    k1, k2, k3 = jax.random.split(key, 3)
    scale = jnp.float32(1.0 / KEEP_P)
    m1 = jax.random.bernoulli(k1, KEEP_P, (B_pad, H1)).astype(jnp.float32) * scale
    m2 = jax.random.bernoulli(k2, KEEP_P, (B_pad, H2)).astype(jnp.float32) * scale
    m3 = jax.random.bernoulli(k3, KEEP_P, (B_pad, H3)).astype(jnp.float32) * scale

    n_tiles = B_pad // TB

    def full_spec(shape):
        nd = len(shape)
        return pl.BlockSpec(shape, lambda i, _nd=nd: (0,) * _nd)

    def batch_spec(cols):
        return pl.BlockSpec((TB, cols), lambda i: (i, 0))

    in_specs = [
        batch_spec(D_pad),                                    # x
        full_spec(w1_p.shape), full_spec(b1.shape), batch_spec(H1),
        full_spec(w2.shape),   full_spec(b2.shape), batch_spec(H2),
        full_spec(w3.shape),   full_spec(b3.shape), batch_spec(H3),
        full_spec(w4r.shape),  full_spec(b4.shape),
    ]
    out_specs = pl.BlockSpec((TB, 1), lambda i: (i, 0))

    flops = 2 * B_pad * (D_pad * H1 + H1 * H2 + H2 * H3 + H3)
    bytes_accessed = (
        x_p.size * 4
        + (w1_p.size + w2.size + w3.size) * 2          # bf16 weights
        + (b1.size + b2.size + b3.size + w4r.size + b4.size) * 4
        + (m1.size + m2.size + m3.size) * 4
        + B_pad * 4                                     # output
    )

    out = pl.pallas_call(
        discriminator_kernel,
        out_shape=jax.ShapeDtypeStruct((B_pad, 1), jnp.float32),
        grid=(n_tiles,),
        in_specs=in_specs,
        out_specs=out_specs,
        compiler_params=pltpu.CompilerParams(
            dimension_semantics=("parallel",),      # 2 TCs on v7x; no-op v5e/v6e
            vmem_limit_bytes=64 * 1024 * 1024,      # plenty of headroom everywhere
        ),
        cost_estimate=pl.CostEstimate(
            flops=flops,
            transcendentals=B_pad,                  # sigmoid
            bytes_accessed=bytes_accessed,
        ),
    )(x_p, w1_p, b1, m1, w2, b2, m2, w3, b3, m3, w4r, b4)

    return out[:B]


def init_discriminator_params(key, d_input_dim):
    """Deterministic init mimicking nn.Linear (U[-1/sqrt(fan_in), 1/sqrt(fan_in)]).

    Weights of fc1..fc3 are stored bf16 (MXU-native, half the HBM traffic);
    fc4's weight is stored as an f32 (1, 256) row for the VPU reduction path.
    """
    dims = [d_input_dim, H1, H2, H3, 1]
    raw = []
    for i in range(4):
        fan_in, fan_out = dims[i], dims[i + 1]
        key, kw, kb = jax.random.split(key, 3)
        bound = 1.0 / (fan_in ** 0.5)
        w = jax.random.uniform(kw, (fan_in, fan_out), jnp.float32, -bound, bound)
        b = jax.random.uniform(kb, (1, fan_out), jnp.float32, -bound, bound)
        raw.append((w, b))
    (w1, b1), (w2, b2), (w3, b3), (w4, b4) = raw
    return (w1.astype(jnp.bfloat16), b1,
            w2.astype(jnp.bfloat16), b2,
            w3.astype(jnp.bfloat16), b3,
            w4.T, b4)  # w4.T: (1, 256) f32; b4: (1, 1) f32


if __name__ == "__main__":
    key = jax.random.PRNGKey(0)
    k_params, k_x, k_drop = jax.random.split(key, 3)

    B = 512          # two batch tiles of TB=256 -> exercises the pipelined grid
    D_IN = 128       # d_input_dim (lane-aligned)

    params = init_discriminator_params(k_params, D_IN)
    x = jax.random.normal(k_x, (B, D_IN), jnp.float32)

    out = discriminator_forward(x, params, k_drop)
    out = jax.block_until_ready(out)

    assert out.shape == (B, 1)
    assert bool(jnp.all((out >= 0.0) & (out <= 1.0)))
    assert bool(jnp.all(jnp.isfinite(out)))
    print("KERNEL_OK")
</pallas_src>

<mosaic_0001>
module attributes {stable_mosaic.version = 11 : i64} {
  func.func @discriminator_kernel(%arg0: i32, %arg1: memref<256x128xf32, #tpu.memory_space<vmem>>, %arg2: memref<128x1024xbf16, #tpu.memory_space<vmem>>, %arg3: memref<1x1024xf32, #tpu.memory_space<vmem>>, %arg4: memref<256x1024xf32, #tpu.memory_space<vmem>>, %arg5: memref<1024x512xbf16, #tpu.memory_space<vmem>>, %arg6: memref<1x512xf32, #tpu.memory_space<vmem>>, %arg7: memref<256x512xf32, #tpu.memory_space<vmem>>, %arg8: memref<512x256xbf16, #tpu.memory_space<vmem>>, %arg9: memref<1x256xf32, #tpu.memory_space<vmem>>, %arg10: memref<256x256xf32, #tpu.memory_space<vmem>>, %arg11: memref<1x256xf32, #tpu.memory_space<vmem>>, %arg12: memref<1x1xf32, #tpu.memory_space<vmem>>, %arg13: memref<256x1xf32, #tpu.memory_space<vmem>>) attributes {dimension_semantics = [#tpu.dimension_semantics<parallel>], iteration_bounds = array<i64: 2>, scalar_prefetch = 0 : i64, scratch_operands = 0 : i64, tpu.core_type = #tpu.core_type<tc>, window_params = [{transform_indices = @transform_0, window_bounds = array<i64: 256, 128>}, {pipeline_mode = #tpu.pipeline_mode<synchronous>, transform_indices = @transform_1, window_bounds = array<i64: 128, 1024>}, {pipeline_mode = #tpu.pipeline_mode<synchronous>, transform_indices = @transform_2, window_bounds = array<i64: 1, 1024>}, {transform_indices = @transform_3, window_bounds = array<i64: 256, 1024>}, {pipeline_mode = #tpu.pipeline_mode<synchronous>, transform_indices = @transform_4, window_bounds = array<i64: 1024, 512>}, {pipeline_mode = #tpu.pipeline_mode<synchronous>, transform_indices = @transform_5, window_bounds = array<i64: 1, 512>}, {transform_indices = @transform_6, window_bounds = array<i64: 256, 512>}, {pipeline_mode = #tpu.pipeline_mode<synchronous>, transform_indices = @transform_7, window_bounds = array<i64: 512, 256>}, {pipeline_mode = #tpu.pipeline_mode<synchronous>, transform_indices = @transform_8, window_bounds = array<i64: 1, 256>}, {transform_indices = @transform_9, window_bounds = array<i64: 256, 256>}, {pipeline_mode = #tpu.pipeline_mode<synchronous>, transform_indices = @transform_10, window_bounds = array<i64: 1, 256>}, {pipeline_mode = #tpu.pipeline_mode<synchronous>, transform_indices = @transform_11, window_bounds = array<i64: 1, 1>}, {transform_indices = @transform_12, window_bounds = array<i64: 256, 1>}]} {
    %c0 = arith.constant 0 : index
    %c0_0 = arith.constant 0 : index
    %0 = vector.load %arg1[%c0, %c0_0] : memref<256x128xf32, #tpu.memory_space<vmem>>, vector<256x128xf32>
    %1 = arith.truncf %0 : vector<256x128xf32> to vector<256x128xbf16>
    %c0_1 = arith.constant 0 : index
    %c0_2 = arith.constant 0 : index
    %2 = vector.load %arg2[%c0_1, %c0_2] : memref<128x1024xbf16, #tpu.memory_space<vmem>>, vector<128x1024xbf16>
    %cst = arith.constant dense<0.000000e+00> : vector<256x1024xf32>
    %3 = tpu.matmul %1, %2, %cst {dimension_numbers = #tpu.dot_dimension_numbers<[1], [0], [0], [1], [0, 0, 1, 1], [], []>} : vector<256x128xbf16>, vector<128x1024xbf16>, vector<256x1024xf32> -> vector<256x1024xf32>
    %c0_3 = arith.constant 0 : index
    %c0_4 = arith.constant 0 : index
    %4 = vector.load %arg3[%c0_3, %c0_4] : memref<1x1024xf32, #tpu.memory_space<vmem>>, vector<1x1024xf32>
    %5 = vector.broadcast %4 : vector<1x1024xf32> to vector<256x1024xf32>
    %6 = arith.addf %3, %5 : vector<256x1024xf32>
    %cst_5 = arith.constant 0.000000e+00 : f32
    %7 = vector.broadcast %cst_5 : f32 to vector<256x1024xf32>
    %8 = arith.cmpf ogt, %6, %7 : vector<256x1024xf32>
    %cst_6 = arith.constant 2.000000e-01 : f32
    %9 = vector.broadcast %cst_6 : f32 to vector<256x1024xf32>
    %10 = arith.mulf %9, %6 : vector<256x1024xf32>
    %11 = arith.select %8, %6, %10 : vector<256x1024xi1>, vector<256x1024xf32>
    %c0_7 = arith.constant 0 : index
    %c0_8 = arith.constant 0 : index
    %12 = vector.load %arg4[%c0_7, %c0_8] : memref<256x1024xf32, #tpu.memory_space<vmem>>, vector<256x1024xf32>
    %13 = arith.mulf %11, %12 : vector<256x1024xf32>
    %14 = arith.truncf %13 : vector<256x1024xf32> to vector<256x1024xbf16>
    %c0_9 = arith.constant 0 : index
    %c0_10 = arith.constant 0 : index
    %15 = vector.load %arg5[%c0_9, %c0_10] : memref<1024x512xbf16, #tpu.memory_space<vmem>>, vector<1024x512xbf16>
    %cst_11 = arith.constant dense<0.000000e+00> : vector<256x512xf32>
    %16 = tpu.matmul %14, %15, %cst_11 {dimension_numbers = #tpu.dot_dimension_numbers<[1], [0], [0], [1], [0, 0, 1, 1], [], []>} : vector<256x1024xbf16>, vector<1024x512xbf16>, vector<256x512xf32> -> vector<256x512xf32>
    %c0_12 = arith.constant 0 : index
    %c0_13 = arith.constant 0 : index
    %17 = vector.load %arg6[%c0_12, %c0_13] : memref<1x512xf32, #tpu.memory_space<vmem>>, vector<1x512xf32>
    %18 = vector.broadcast %17 : vector<1x512xf32> to vector<256x512xf32>
    %19 = arith.addf %16, %18 : vector<256x512xf32>
    %cst_14 = arith.constant 0.000000e+00 : f32
    %20 = vector.broadcast %cst_14 : f32 to vector<256x512xf32>
    %21 = arith.cmpf ogt, %19, %20 : vector<256x512xf32>
    %cst_15 = arith.constant 2.000000e-01 : f32
    %22 = vector.broadcast %cst_15 : f32 to vector<256x512xf32>
    %23 = arith.mulf %22, %19 : vector<256x512xf32>
    %24 = arith.select %21, %19, %23 : vector<256x512xi1>, vector<256x512xf32>
    %c0_16 = arith.constant 0 : index
    %c0_17 = arith.constant 0 : index
    %25 = vector.load %arg7[%c0_16, %c0_17] : memref<256x512xf32, #tpu.memory_space<vmem>>, vector<256x512xf32>
    %26 = arith.mulf %24, %25 : vector<256x512xf32>
    %27 = arith.truncf %26 : vector<256x512xf32> to vector<256x512xbf16>
    %c0_18 = arith.constant 0 : index
    %c0_19 = arith.constant 0 : index
    %28 = vector.load %arg8[%c0_18, %c0_19] : memref<512x256xbf16, #tpu.memory_space<vmem>>, vector<512x256xbf16>
    %cst_20 = arith.constant dense<0.000000e+00> : vector<256x256xf32>
    %29 = tpu.matmul %27, %28, %cst_20 {dimension_numbers = #tpu.dot_dimension_numbers<[1], [0], [0], [1], [0, 0, 1, 1], [], []>} : vector<256x512xbf16>, vector<512x256xbf16>, vector<256x256xf32> -> vector<256x256xf32>
    %c0_21 = arith.constant 0 : index
    %c0_22 = arith.constant 0 : index
    %30 = vector.load %arg9[%c0_21, %c0_22] : memref<1x256xf32, #tpu.memory_space<vmem>>, vector<1x256xf32>
    %31 = vector.broadcast %30 : vector<1x256xf32> to vector<256x256xf32>
    %32 = arith.addf %29, %31 : vector<256x256xf32>
    %cst_23 = arith.constant 0.000000e+00 : f32
    %33 = vector.broadcast %cst_23 : f32 to vector<256x256xf32>
    %34 = arith.cmpf ogt, %32, %33 : vector<256x256xf32>
    %cst_24 = arith.constant 2.000000e-01 : f32
    %35 = vector.broadcast %cst_24 : f32 to vector<256x256xf32>
    %36 = arith.mulf %35, %32 : vector<256x256xf32>
    %37 = arith.select %34, %32, %36 : vector<256x256xi1>, vector<256x256xf32>
    %c0_25 = arith.constant 0 : index
    %c0_26 = arith.constant 0 : index
    %38 = vector.load %arg10[%c0_25, %c0_26] : memref<256x256xf32, #tpu.memory_space<vmem>>, vector<256x256xf32>
    %39 = arith.mulf %37, %38 : vector<256x256xf32>
    %c0_27 = arith.constant 0 : index
    %c0_28 = arith.constant 0 : index
    %40 = vector.load %arg11[%c0_27, %c0_28] : memref<1x256xf32, #tpu.memory_space<vmem>>, vector<1x256xf32>
    %41 = vector.broadcast %40 : vector<1x256xf32> to vector<256x256xf32>
    %42 = arith.mulf %39, %41 : vector<256x256xf32>
    %cst_29 = arith.constant dense<0.000000e+00> : vector<256xf32>
    %43 = vector.multi_reduction <add>, %42, %cst_29 [1] : vector<256x256xf32> to vector<256xf32>
    %44 = vector.shape_cast %43 : vector<256xf32> to vector<256x1xf32>
    %c0_30 = arith.constant 0 : index
    %c0_31 = arith.constant 0 : index
    %45 = vector.load %arg12[%c0_30, %c0_31] : memref<1x1xf32, #tpu.memory_space<vmem>>, vector<1x1xf32>
    %46 = vector.broadcast %45 : vector<1x1xf32> to vector<256x1xf32>
    %47 = arith.addf %44, %46 : vector<256x1xf32>
    %48 = arith.negf %47 : vector<256x1xf32>
    %49 = math.exp %48 : vector<256x1xf32>
    %cst_32 = arith.constant 1.000000e+00 : f32
    %50 = vector.broadcast %cst_32 : f32 to vector<256x1xf32>
    %51 = arith.addf %50, %49 : vector<256x1xf32>
    %52 = arith.divf %50, %51 : vector<256x1xf32>
    %c0_33 = arith.constant 0 : index
    %c0_34 = arith.constant 0 : index
    %53 = vector.load %arg13[%c0_33, %c0_34] : memref<256x1xf32, #tpu.memory_space<vmem>>, vector<256x1xf32>
    tpu.vector_store %arg13[%c0_33, %c0_34], %52 {strides = array<i32>} : memref<256x1xf32, #tpu.memory_space<vmem>>, vector<256x1xf32>,
    return
  }
  func.func @transform_0(%arg0: i32) -> (i32, i32) {
    %c0_i32 = arith.constant 0 : i32
    %c0_i32_0 = arith.constant 0 : i32
    return %arg0, %c0_i32 : i32, i32
  }
  func.func @transform_1(%arg0: i32) -> (i32, i32) {
    %c0_i32 = arith.constant 0 : i32
    %c0_i32_0 = arith.constant 0 : i32
    %c0_i32_1 = arith.constant 0 : i32
    return %c0_i32, %c0_i32_0 : i32, i32
  }
  func.func @transform_2(%arg0: i32) -> (i32, i32) {
    %c0_i32 = arith.constant 0 : i32
    %c0_i32_0 = arith.constant 0 : i32
    %c0_i32_1 = arith.constant 0 : i32
    return %c0_i32, %c0_i32_0 : i32, i32
  }
  func.func @transform_3(%arg0: i32) -> (i32, i32) {
    %c0_i32 = arith.constant 0 : i32
    %c0_i32_0 = arith.constant 0 : i32
    return %arg0, %c0_i32 : i32, i32
  }
  func.func @transform_4(%arg0: i32) -> (i32, i32) {
    %c0_i32 = arith.constant 0 : i32
    %c0_i32_0 = arith.constant 0 : i32
    %c0_i32_1 = arith.constant 0 : i32
    return %c0_i32, %c0_i32_0 : i32, i32
  }
  func.func @transform_5(%arg0: i32) -> (i32, i32) {
    %c0_i32 = arith.constant 0 : i32
    %c0_i32_0 = arith.constant 0 : i32
    %c0_i32_1 = arith.constant 0 : i32
    return %c0_i32, %c0_i32_0 : i32, i32
  }
  func.func @transform_6(%arg0: i32) -> (i32, i32) {
    %c0_i32 = arith.constant 0 : i32
    %c0_i32_0 = arith.constant 0 : i32
    return %arg0, %c0_i32 : i32, i32
  }
  func.func @transform_7(%arg0: i32) -> (i32, i32) {
    %c0_i32 = arith.constant 0 : i32
    %c0_i32_0 = arith.constant 0 : i32
    %c0_i32_1 = arith.constant 0 : i32
    return %c0_i32, %c0_i32_0 : i32, i32
  }
  func.func @transform_8(%arg0: i32) -> (i32, i32) {
    %c0_i32 = arith.constant 0 : i32
    %c0_i32_0 = arith.constant 0 : i32
    %c0_i32_1 = arith.constant 0 : i32
    return %c0_i32, %c0_i32_0 : i32, i32
  }
  func.func @transform_9(%arg0: i32) -> (i32, i32) {
    %c0_i32 = arith.constant 0 : i32
    %c0_i32_0 = arith.constant 0 : i32
    return %arg0, %c0_i32 : i32, i32
  }
  func.func @transform_10(%arg0: i32) -> (i32, i32) {
    %c0_i32 = arith.constant 0 : i32
    %c0_i32_0 = arith.constant 0 : i32
    %c0_i32_1 = arith.constant 0 : i32
    return %c0_i32, %c0_i32_0 : i32, i32
  }
  func.func @transform_11(%arg0: i32) -> (i32, i32) {
    %c0_i32 = arith.constant 0 : i32
    %c0_i32_0 = arith.constant 0 : i32
    %c0_i32_1 = arith.constant 0 : i32
    return %c0_i32, %c0_i32_0 : i32, i32
  }
  func.func @transform_12(%arg0: i32) -> (i32, i32) {
    %c0_i32 = arith.constant 0 : i32
    %c0_i32_0 = arith.constant 0 : i32
    return %arg0, %c0_i32 : i32, i32
  }
}

</mosaic_0001>

<bundles_post_ra>
// kernel: discriminator_forward.3
= control target key start
LH: loop header
LB: loop body
LE: loop exit
PB: predicated region body
PF: predicated region fallthrough
CT: control target
= control target key end

     0   :  { %s14467_s0 = inlined_call_operand.hbm [shape: f32[512,128], index: 0, kind: input, shape index: {}]   ;;  %s14468_s1 = inlined_call_operand.hbm [shape: bf16[128,1024], index: 1, kind: input, shape index: {}]   ;;  %s14469_s2 = inlined_call_operand.hbm [shape: f32[1,1024], index: 2, kind: input, shape index: {}]   ;;  %s14470_s3 = inlined_call_operand.hbm [shape: f32[512,1024], index: 3, kind: input, shape index: {}]   ;;  %s14471_s4 = inlined_call_operand.hbm [shape: bf16[1024,512], index: 4, kind: input, shape index: {}]   ;;  %s14472_s5 = inlined_call_operand.hbm [shape: f32[1,512], index: 5, kind: input, shape index: {}]   ;;  %s14473_s6 = inlined_call_operand.hbm [shape: f32[512,512], index: 6, kind: input, shape index: {}]   ;;  %s14474_s7 = inlined_call_operand.hbm [shape: bf16[512,256], index: 7, kind: input, shape index: {}]   ;;  %s14475_s8 = inlined_call_operand.hbm [shape: f32[1,256], index: 8, kind: input, shape index: {}]   ;;  %s14476_s9 = inlined_call_operand.hbm [shape: f32[512,256], index: 9, kind: input, shape index: {}]   ;;  %s14477_s10 = inlined_call_operand.hbm [shape: f32[1,256], index: 10, kind: input, shape index: {}]   ;;  %s14478_s11 = inlined_call_operand.<no memory space> [shape: f32[1,1], index: 11, kind: input, shape index: {}]   ;;  %s14479_s12 = inlined_call_operand.hbm [shape: f32[512,1], index: 12, kind: output, shape index: {}]  }
   0x1   :  { %14600 = sst [smem:[#allocation121_spill]] %s14467_s0  ;;  %v17_v0 = vstv %s14478_s11 }
   0x2   :  { %14601 = sst [smem:[#allocation122_spill]] %s14468_s1  ;;  %18 = vst [vmem:[#allocation2] sm:$0x1] %v17_v0 }
   0x3   :  { %14602 = sst [smem:[#allocation123_spill]] %s14469_s2 }
   0x4   :  { %14603 = sst [smem:[#allocation124_spill]] %s14471_s4 }
   0x5   :  { %14604 = sst [smem:[#allocation125_spill]] %s14476_s9 }
   0x6   :  { %14605 = sst [smem:[#allocation126_spill]] %s14479_s12 }
   0x7   :  { %19 = vsyncpa [#allocation4], 0 }
   0x8   :  { %21 = vsyncpa [#allocation4 + $0x1], 0 }
   0x9   :  { %22 = vsyncpa [#allocation7], 0 }
   0xa   :  { %23 = vsyncpa [#allocation10], 0 }
   0xb   :  { %25 = vsyncpa [#allocation10 + $0x1], 0 }
   0xc   :  { %26 = vsyncpa [#allocation13], 0 }
   0xd   :  { %27 = vsyncpa [#allocation5], 0 }
   0xe   :  { %29 = vsyncpa [#allocation5 + $0x1], 0  ;;  %s11234_s23 = smov 0   ;;  %s11236_s24 = smov 0  }
   0xf   :  { %s11238_s25 = smov 0   ;;  %s11240_s26 = smov 0  }
  0x10 LB: > { %14606 = sst [smem:[#allocation31_spill]] %s11129_s23  ;;  %s11143_s11 = smov [#allocation6]   ;;  %s11141_s26 = sphi %s11240_s26, %s14921_s26   ;;  %s11137_s25 = sphi %s11238_s25, %s14923_s25   ;;  %s11133_s24 = sphi %s11236_s24, %s14925_s24   ;;  %s11129_s23 = sphi %s11234_s23, %s14924_s23  }
  0x11   : > { %14607 = sst [smem:[#allocation32_spill]] %s11137_s25  ;;  %s350_s27 = sshll.u32 %s11143_s11, 4  ;;  %s11260_s27 = int_to_ptr.vmem [resolvable:$true] %s350_s27 }
  0x12   : > { %s11255_s28 = sadd.s32 4294967295, %s11141_s26   ;;  %p8863_p0 = scmp.ge.s32.totalorder %s11141_s26, 1 }
  0x13   : > { %p14488_p1 = scmp.eq.s32.totalorder %s11255_s28, 0  ;;  %p338_p2 = scmp.lt.s32.totalorder %s11141_s26, 3 }
  0x14   : > { %s11144_s30 = smov [#allocation8]   ;;  %s11145_s15 = smov [#allocation11]  }
  0x15   : > { %p11262_p3 = pnand %p8863_p0, %p338_p2  ;;  %s364_s13 = sshll.u32 %s11144_s30, 4  ;;  %s11275_s13 = int_to_ptr.vmem [resolvable:$true] %s364_s13 }
  0x16   : > { %s374_s16 = sshll.u32 %s11145_s15, 4  ;;  %s14611_s1 = sld [smem:[#allocation122_spill]]  ;;  %s11277_s16 = int_to_ptr.vmem [resolvable:$true] %s374_s16 }
  0x17   : > { %s14608_s29 = scalar_select %p11262_p3, 1, 0 }
  0x18   : > { %p10008_p5 = pneg %p11262_p3 }
  0x19   : > { %14609 = sst [smem:[#allocation33_spill]] %s14608_s29 }
  0x1a   : > { %p11271_p6 = pnand %p10008_p5, %p14488_p1 }
  0x1c   : > { %s14610_s14 = scalar_select %p11271_p6, 1, 0 }
  0x1d   : > { %s10723_s19 = scalar_lea.hbm %s14611_s1, 8192  ;;  %p11287_p8 = pneg %p11271_p6 }
  0x1e   : > { %p10724_p7 = scmp.ne.s32.totalorder %s14611_s1, %s10723_s19  ;;  %p10730_p11 = scmp.lt.u32.totalorder %s10723_s19, %s14611_s1 }
  0x1f   : > { %s14612_s22 = scalar_select %p11287_p8, 1, 0 }
  0x20   : > { %p10726_p9 = pnand %p11287_p8, %p10724_p7 }
  0x22   : > { %p10727_p10 = pneg %p10726_p9 }
  0x24   : > { %p10732_p12 = pnand %p10730_p11, %p10727_p10 }
  0x26   : > { %10735 = shalt.err (!%p10732_p12)
}
  0x27   : > { %s10736_s15 = scalar_lea.vmem %s11260_s27, 8192  ;;  %p10744_p5 = scmp.lt.s32.totalorder %s11260_s27, %s11260_s27 }
  0x28   : > { %p10737_p13 = scmp.ne.s32.totalorder %s11260_s27, %s10736_s15  ;;  %p10745_p4 = scmp.lt.s32.totalorder %s10736_s15, %s10736_s15 }
  0x2a   : > { %p10739_p0 = pnand %p10737_p13, %p11287_p8  ;;  %p10746_p7 = por %p10745_p4, %p10744_p5 }
  0x2c   : > { %p10740_p2 = pneg %p10739_p0 }
  0x2e   : > { %p10747_p9 = pnand %p10746_p7, %p10740_p2 }
  0x30   : > { %10750 = shalt.err (!%p10747_p9)
}
  0x31   : > { %s14485_s17 = smov 512   ;;  %s14486_s18 = smov 32  }
  0x32   : > { %10011 = dma.hbm_to_vmem [thread:$0]  (!%p11271_p6), %s14611_s1, 8192, %s11260_s27, [#allocation7], %s14485_s17, %s14485_s17, %s14486_s18  }
  0x33   : > { %s14613_s2 = sld [smem:[#allocation123_spill]] }
  0x39   : > { %s10751_s30 = scalar_lea.hbm %s14613_s2, 128 }
  0x3a   : > { %p10752_p4 = scmp.ne.s32.totalorder %s14613_s2, %s10751_s30  ;;  %p10758_p12 = scmp.lt.u32.totalorder %s10751_s30, %s14613_s2 }
  0x3c   : > { %p10754_p10 = pnand %p10752_p4, %p11287_p8 }
  0x3e   : > { %p10755_p11 = pneg %p10754_p10 }
  0x40   : > { %p10760_p13 = pnand %p10758_p12, %p10755_p11 }
  0x42   : > { %10763 = shalt.err (!%p10760_p13)
}
  0x43   : > { %s10764_s27 = scalar_lea.vmem %s11275_s13, 128  ;;  %p10772_p7 = scmp.lt.s32.totalorder %s11275_s13, %s11275_s13 }
  0x44   : > { %p10765_p0 = scmp.ne.s32.totalorder %s11275_s13, %s10764_s27  ;;  %p10773_p9 = scmp.lt.s32.totalorder %s10764_s27, %s10764_s27 }
  0x46   : > { %p10767_p2 = pnand %p10765_p0, %p11287_p8  ;;  %p10774_p4 = por %p10773_p9, %p10772_p7 }
  0x48   : > { %p10768_p5 = pneg %p10767_p2 }
  0x4a   : > { %p10775_p10 = pnand %p10774_p4, %p10768_p5 }
  0x4c   : > { %10778 = shalt.err (!%p10775_p10)
}
  0x4d   : > { %10014 = dma.hbm_to_vmem [thread:$0]  (!%p11271_p6), %s14613_s2, 128, %s11275_s13, [#allocation7]  }
  0x4e   : > { %s14614_s4 = sld [smem:[#allocation124_spill]] }
  0x54   : > { %s10779_s20 = scalar_lea.hbm %s14614_s4, 32768 }
  0x55   : > { %p10780_p11 = scmp.ne.s32.totalorder %s14614_s4, %s10779_s20  ;;  %p10786_p0 = scmp.lt.u32.totalorder %s10779_s20, %s14614_s4 }
  0x57   : > { %p10782_p12 = pnand %p10780_p11, %p11287_p8 }
  0x59   : > { %p10783_p13 = pneg %p10782_p12 }
  0x5b   : > { %p10788_p2 = pnand %p10786_p0, %p10783_p13 }
  0x5d   : > { %10791 = shalt.err (!%p10788_p2)
}
  0x5e   : > { %s10792_s13 = scalar_lea.vmem %s11277_s16, 32768  ;;  %p10800_p4 = scmp.lt.s32.totalorder %s11277_s16, %s11277_s16 }
  0x5f   : > { %p10793_p5 = scmp.ne.s32.totalorder %s11277_s16, %s10792_s13  ;;  %p10801_p10 = scmp.lt.s32.totalorder %s10792_s13, %s10792_s13 }
  0x61   : > { %p10795_p7 = pnand %p10793_p5, %p11287_p8  ;;  %p10802_p11 = por %p10801_p10, %p10800_p4 }
  0x63   : > { %p10796_p9 = pneg %p10795_p7 }
  0x65   : > { %p10803_p12 = pnand %p10802_p11, %p10796_p9 }
  0x67   : > { %10806 = shalt.err (!%p10803_p12)
}
  0x68   : > { %s14483_s27 = smov 256   ;;  %s14484_s9 = smov 16  }
  0x69   : > { %10017 = dma.hbm_to_vmem [thread:$0]  (!%p11271_p6), %s14614_s4, 32768, %s11277_s16, [#allocation10], %s14483_s27, %s14483_s27, %s14484_s9  }
  0x6a   : > { %s8862_s19 = sadd.s32 4294967294, %s11141_s26   ;;  %s11362_s20 = sadd.s32 1, %s11141_s26  }
  0x6b   : > { %14615 = sst [smem:[#allocation34_spill]] %s11362_s20  ;;  %s42_s21 = sadd.s32 1, %s11137_s25 }
  0x6c   : > { %s39_s11 = ssub.s32 %s11141_s26, %s11362_s20  ;;  %p49_p13 = scmp.ne.s32.totalorder %s11137_s25, %s11133_s24 }
  0x6d   : > { %p40_p0 = scmp.eq.s32.totalorder %s39_s11, 0  ;;  %p50_p2 = scmp.eq.s32.totalorder %s11141_s26, 0 }
  0x6e   : > { %p55_p5 = scmp.ne.s32.totalorder %s11133_s24, %s11129_s23  ;;  %p325_p7 = scmp.eq.s32.totalorder %s11255_s28, 1 }
  0x6f   : > { %s11374_s30 = scalar_select %p40_p0, %s11137_s25, %s42_s21  }
  0x70   : > { %p11376_p9 = por %p50_p2, %p49_p13  ;;  %p11382_p4 = por %p14488_p1, %p55_p5 }
  0x71   : > { %14616 = sst [smem:[#allocation35_spill]] %s11374_s30  ;;  %p11386_p10 = por %p325_p7, %p49_p13 }
  0x72   : > { %s14618_s16 = scalar_select %p11382_p4, 1, 0 }
  0x73   : > { %s14619_s13 = scalar_select %p11386_p10, 1, 0 }
  0x74   : > { %p331_p11 = scmp.eq.s32.totalorder %s8862_s19, 1  ;;  %p10054_p0 = scmp.lt.s32.totalorder %s11141_s26, 2 }
  0x75   : > { %s11397_s21 = sand.u32 1, %s11137_s25   ;;  %s9322_s27 = sshll.u32 %s11141_s26, 12 }
  0x76   : > { %p11390_p12 = por %p331_p11, %p55_p5  ;;  %s8872_s11 = sshll.u32 %s11397_s21, 8 }
  0x77   : > { %s14622_s0 = sld [smem:[#allocation121_spill]]  ;;  %s441_s19 = scalar_lea.vmem [#allocation3], %s8872_s11 }
  0x78   : > { %s14620_s12 = scalar_select %p11390_p12, 1, 0 }
  0x79   : > { %s448_s1 = sshll.u32 %s441_s19, 4  ;;  %p11410_p13 = pnand %p10054_p0, %p11376_p9  ;;  %s11406_s1 = int_to_ptr.vmem [resolvable:$true] %s448_s1 }
  0x7a   : > { %14621 = sst [smem:[#allocation36_spill]] %s14620_s12  ;;  %s11150_s2 = smov [#allocation15]  }
  0x7b   : > { %s14623_s29 = scalar_select %p11410_p13, 1, 0 }
  0x7c   : > { %s11414_s4 = sshll.u32 %s11150_s2, 4  ;;  %s14624_s17 = sand.u32 1, %s11141_s26   ;;  %s399_s4 = int_to_ptr.vmem [resolvable:$true] %s11414_s4 }
  0x7d   : > { %s11404_s18 = scalar_lea.hbm %s14622_s0, %s9322_s27  ;;  %s11418_s27 = scalar_lea.sflag [#allocation4], %s14624_s17 }
  0x7e   : > { %s10807_s9 = scalar_lea.hbm %s11404_s18, 4096  ;;  %p11424_p5 = pneg %p11410_p13 }
  0x7f   : > { %p10808_p2 = scmp.ne.s32.totalorder %s11404_s18, %s10807_s9  ;;  %s10812_s30 = scalar_lea.hbm %s14622_s0, 8192 }
  0x80   : > { %s14625_s11 = scalar_select %p11424_p5, 1, 0 }
  0x81   : > { %p10810_p7 = pnand %p11424_p5, %p10808_p2  ;;  %p10813_p11 = scmp.lt.u32.totalorder %s11404_s18, %s14622_s0 }
  0x82   : > { %p10814_p0 = scmp.lt.u32.totalorder %s10812_s30, %s10807_s9  ;;  %p10816_p12 = scmp.lt.u32.totalorder %s10807_s9, %s11404_s18 }
  0x83   : > { %p10811_p9 = pneg %p10810_p7 }
  0x84   : > { %p10815_p1 = por %p10814_p0, %p10813_p11 }
  0x86   : > { %p10817_p10 = por %p10816_p12, %p10815_p1 }
  0x88   : > { %p10818_p4 = pnand %p10817_p10, %p10811_p9 }
  0x8a   : > { %10821 = shalt.err (!%p10818_p4)
}
  0x8b   : > { %s10822_s17 = scalar_lea.vmem %s11406_s1, 4096  ;;  %s11151_s15 = smov [#allocation3]  }
  0x8c   : > { %p10823_p2 = scmp.ne.s32.totalorder %s11406_s1, %s10822_s17  ;;  %s10827_s19 = sshll.u32 %s11151_s15, 4  ;;  %s10828_s19 = int_to_ptr.vmem [resolvable:$false] %s10827_s19 }
  0x8d   : > { %s10829_s25 = scalar_lea.vmem %s10828_s19, 8192  ;;  %p10830_p6 = scmp.lt.s32.totalorder %s11406_s1, %s10828_s19 }
  0x8e   : > { %p10825_p7 = pnand %p10823_p2, %p11424_p5  ;;  %p10831_p8 = scmp.lt.s32.totalorder %s10829_s25, %s10822_s17 }
  0x90   : > { %p10826_p3 = pneg %p10825_p7  ;;  %p10832_p11 = por %p10831_p8, %p10830_p6 }
  0x92   : > { %p10833_p0 = pnand %p10832_p11, %p10826_p3 }
  0x94   : > { %10836 = shalt.err (!%p10833_p0)
}
  0x95   : > { %s11152_s30 = smov 128   ;;  %s11153_s9 = smov 8  }
  0x96   : > { %10033 = dma.hbm_to_vmem [thread:$0]  (!%p11410_p13), %s11404_s18, 4096, %s11406_s1, %s11418_s27, %s11152_s30, %s11152_s30, %s11153_s9  }
  0x97   : > { %s10837_s0 = scalar_lea.hbm %s14474_s7, 8192  ;;  %p14626_p3 = scmp.ne.s32.totalorder %s14612_s22, 0 }
  0x98   : > { %p10838_p1 = scmp.ne.s32.totalorder %s14474_s7, %s10837_s0  ;;  %p10844_p4 = scmp.lt.u32.totalorder %s10837_s0, %s14474_s7 }
  0x9a   : > { %p10840_p6 = pnand %p10838_p1, %p14626_p3 }
  0x9c   : > { %p10841_p8 = pneg %p10840_p6 }
  0x9e   : > { %p10846_p10 = pnand %p10844_p4, %p10841_p8 }
  0xa0   : > { %10849 = shalt.err (!%p10846_p10)
}
  0xa1   : > { %s10850_s12 = scalar_lea.vmem %s399_s4, 8192  ;;  %p10858_p7 = scmp.lt.s32.totalorder %s399_s4, %s399_s4 }
  0xa2   : > { %p10851_p12 = scmp.ne.s32.totalorder %s399_s4, %s10850_s12  ;;  %p10859_p11 = scmp.lt.s32.totalorder %s10850_s12, %s10850_s12 }
  0xa4   : > { %p10853_p9 = pnand %p10851_p12, %p14626_p3  ;;  %p10860_p0 = por %p10859_p11, %p10858_p7 }
  0xa6   : > { %p10854_p2 = pneg %p10853_p9 }
  0xa8   : > { %p10861_p13 = pnand %p10860_p0, %p10854_p2 }
  0xaa   : > { %10864 = shalt.err (!%p10861_p13)
}
  0xab   : > { %p14627_p1 = scmp.ne.s32.totalorder %s14610_s14, 0  ;;  %s11154_s0 = smov [#allocation16]  }
  0xac   : > { %s412_s20 = sshll.u32 %s11154_s0, 4  ;;  %s8879_s2 = sshll.u32 %s11397_s21, 10  ;;  %s413_s20 = int_to_ptr.vmem [resolvable:$true] %s412_s20 }
  0xad   : > { %10023 = dma.hbm_to_vmem [thread:$0]  (!%p14627_p1), %s14474_s7, 8192, %s399_s4, [#allocation7], %s11152_s30, %s11152_s30, %s11153_s9  }
  0xae   : > { %s10865_s17 = scalar_lea.hbm %s14475_s8, 32 }
  0xaf   : > { %p10866_p13 = scmp.ne.s32.totalorder %s14475_s8, %s10865_s17  ;;  %p10872_p4 = scmp.lt.u32.totalorder %s10865_s17, %s14475_s8 }
  0xb1   : > { %p10868_p6 = pnand %p10866_p13, %p14626_p3 }
  0xb3   : > { %p10869_p8 = pneg %p10868_p6 }
  0xb5   : > { %p10874_p10 = pnand %p10872_p4, %p10869_p8 }
  0xb7   : > { %10877 = shalt.err (!%p10874_p10)
}
  0xb8   : > { %s10878_s4 = scalar_lea.vmem %s413_s20, 32  ;;  %p10886_p7 = scmp.lt.s32.totalorder %s413_s20, %s413_s20 }
  0xb9   : > { %p10879_p12 = scmp.ne.s32.totalorder %s413_s20, %s10878_s4  ;;  %p10887_p11 = scmp.lt.s32.totalorder %s10878_s4, %s10878_s4 }
  0xbb   : > { %p10881_p9 = pnand %p10879_p12, %p14626_p3  ;;  %p10888_p0 = por %p10887_p11, %p10886_p7 }
  0xbd   : > { %p10882_p2 = pneg %p10881_p9 }
  0xbf   : > { %p10889_p5 = pnand %p10888_p0, %p10882_p2 }
  0xc1   : > { %10892 = shalt.err (!%p10889_p5)
}
  0xc2   : > { %10026 = dma.hbm_to_vmem [thread:$0]  (!%p14627_p1), %s14475_s8, 32, %s413_s20, [#allocation10]  }
  0xc3   : > { %s9326_s23 = sshll.u32 %s11141_s26, 14  ;;  %s484_s18 = scalar_lea.vmem [#allocation14], %s8879_s2 }
  0xc4   : > { %s492_s0 = sshll.u32 %s484_s18, 4  ;;  %s11490_s17 = scalar_lea.hbm %s14473_s6, %s9326_s23  ;;  %s11492_s0 = int_to_ptr.vmem [resolvable:$true] %s492_s0 }
  0xc5   : > { %s10893_s12 = scalar_lea.hbm %s11490_s17, 16384  ;;  %p14628_p13 = scmp.ne.s32.totalorder %s14625_s11, 0 }
  0xc6   : > { %p10894_p5 = scmp.ne.s32.totalorder %s11490_s17, %s10893_s12  ;;  %s10898_s2 = scalar_lea.hbm %s14473_s6, 32768 }
  0xc7   : > { %p10899_p4 = scmp.lt.u32.totalorder %s11490_s17, %s14473_s6  ;;  %p10900_p10 = scmp.lt.u32.totalorder %s10898_s2, %s10893_s12 }
  0xc8   : > { %p10896_p6 = pnand %p10894_p5, %p14628_p13  ;;  %p10902_p9 = scmp.lt.u32.totalorder %s10893_s12, %s11490_s17 }
  0xc9   : > { %p10901_p12 = por %p10900_p10, %p10899_p4 }
  0xca   : > { %p10897_p8 = pneg %p10896_p6 }
  0xcb   : > { %p10903_p2 = por %p10902_p9, %p10901_p12 }
  0xcd   : > { %p10904_p7 = pnand %p10903_p2, %p10897_p8 }
  0xcf   : > { %10907 = shalt.err (!%p10904_p7)
}
  0xd0   : > { %s10908_s30 = scalar_lea.vmem %s11492_s0, 16384  ;;  %s11155_s9 = smov [#allocation14]  }
  0xd1   : > { %p10909_p11 = scmp.ne.s32.totalorder %s11492_s0, %s10908_s30  ;;  %s10913_s23 = sshll.u32 %s11155_s9, 4  ;;  %s10914_s23 = int_to_ptr.vmem [resolvable:$false] %s10913_s23 }
  0xd2   : > { %s10915_s18 = scalar_lea.vmem %s10914_s23, 32768  ;;  %p10916_p6 = scmp.lt.s32.totalorder %s11492_s0, %s10914_s23 }
  0xd3   : > { %p10911_p0 = pnand %p10909_p11, %p14628_p13  ;;  %p10917_p1 = scmp.lt.s32.totalorder %s10915_s18, %s10908_s30 }
  0xd5   : > { %p10912_p5 = pneg %p10911_p0  ;;  %p10918_p4 = por %p10917_p1, %p10916_p6 }
  0xd7   : > { %p10919_p10 = pnand %p10918_p4, %p10912_p5 }
  0xd9   : > { %10922 = shalt.err (!%p10919_p10)
}
  0xda   : > { %p14629_p8 = scmp.ne.s32.totalorder %s14623_s29, 0  ;;  %s14630_s15 = smov 32  }
  0xdb   : > { %s14631_s19 = smov 512   ;;  %s11156_s12 = smov [#allocation12]  }
  0xdc   : > { %10039 = dma.hbm_to_vmem [thread:$0]  (!%p14629_p8), %s11490_s17, 16384, %s11492_s0, %s11418_s27, %s14631_s19, %s14631_s19, %s14630_s15  }
  0xdd   : > { %s388_s20 = sshll.u32 %s11156_s12, 4  ;;  %s11157_s25 = smov [#allocation18]   ;;  %s389_s20 = int_to_ptr.vmem [resolvable:$true] %s388_s20 }
  0xde   : > { %s423_s2 = sshll.u32 %s11157_s25, 4  ;;  %s10923_s30 = scalar_lea.hbm %s14472_s5, 64  ;;  %s11519_s2 = int_to_ptr.vmem [resolvable:$true] %s423_s2 }
  0xdf   : > { %p10924_p1 = scmp.ne.s32.totalorder %s14472_s5, %s10923_s30  ;;  %p10930_p2 = scmp.lt.u32.totalorder %s10923_s30, %s14472_s5 }
  0xe1   : > { %p10926_p12 = pnand %p10924_p1, %p14626_p3 }
  0xe3   : > { %p10927_p9 = pneg %p10926_p12 }
  0xe5   : > { %p10932_p7 = pnand %p10930_p2, %p10927_p9 }
  0xe7   : > { %10935 = shalt.err (!%p10932_p7)
}
  0xe8   : > { %s10936_s17 = scalar_lea.vmem %s389_s20, 64  ;;  %p10944_p6 = scmp.lt.s32.totalorder %s389_s20, %s389_s20 }
  0xe9   : > { %p10937_p11 = scmp.ne.s32.totalorder %s389_s20, %s10936_s17  ;;  %p10945_p4 = scmp.lt.s32.totalorder %s10936_s17, %s10936_s17 }
  0xeb   : > { %p10939_p0 = pnand %p10937_p11, %p14626_p3  ;;  %p10946_p10 = por %p10945_p4, %p10944_p6 }
  0xed   : > { %p10940_p5 = pneg %p10939_p0 }
  0xef   : > { %p10947_p8 = pnand %p10946_p10, %p10940_p5 }
  0xf1   : > { %10950 = shalt.err (!%p10947_p8)
}
  0xf2   : > { %p14632_p1 = scmp.ne.s32.totalorder %s14610_s14, 0  ;;  %s10951_s1 = scalar_lea.hbm %s14477_s10, 32 }
  0xf3   : > { %p10952_p12 = scmp.ne.s32.totalorder %s14477_s10, %s10951_s1  ;;  %p10958_p8 = scmp.lt.u32.totalorder %s10951_s1, %s14477_s10 }
  0xf4   : > { %10020 = dma.hbm_to_vmem [thread:$0]  (!%p14632_p1), %s14472_s5, 64, %s389_s20, [#allocation13]  }
  0xf5   : > { %p10954_p9 = pnand %p10952_p12, %p14626_p3 }
  0xf7   : > { %p10955_p2 = pneg %p10954_p9 }
  0xf9   : > { %p10960_p7 = pnand %p10958_p8, %p10955_p2 }
  0xfb   : > { %10963 = shalt.err (!%p10960_p7)
}
  0xfc   : > { %s10964_s20 = scalar_lea.vmem %s11519_s2, 32  ;;  %p10972_p6 = scmp.lt.s32.totalorder %s11519_s2, %s11519_s2 }
  0xfd   : > { %p10965_p11 = scmp.ne.s32.totalorder %s11519_s2, %s10964_s20  ;;  %p10973_p4 = scmp.lt.s32.totalorder %s10964_s20, %s10964_s20 }
  0xff   : > { %p10967_p0 = pnand %p10965_p11, %p14626_p3  ;;  %p10974_p10 = por %p10973_p4, %p10972_p6 }
 0x101   : > { %p10968_p5 = pneg %p10967_p0 }
 0x103   : > { %p10975_p12 = pnand %p10974_p10, %p10968_p5 }
 0x105   : > { %10978 = shalt.err (!%p10975_p12)
}
 0x106   : > { %10029 = dma.hbm_to_vmem [thread:$0]  (!%p14632_p1), %s14477_s10, 32, %s11519_s2, [#allocation7]  }
 0x107   : > { %s8875_s22 = sshll.u32 %s11397_s21, 11  ;;  %s9324_s17 = sshll.u32 %s11141_s26, 15 }
 0x108   : > { %s11567_s12 = scalar_lea.hbm %s14470_s3, %s9324_s17  ;;  %s462_s14 = scalar_lea.vmem [#allocation9], %s8875_s22 }
 0x109   : > { %s470_s25 = sshll.u32 %s462_s14, 4  ;;  %s14633_s1 = sand.u32 1, %s11141_s26   ;;  %s11569_s25 = int_to_ptr.vmem [resolvable:$true] %s470_s25 }
 0x10a   : > { %s11573_s4 = scalar_lea.sflag [#allocation10], %s14633_s1  ;;  %s10979_s30 = scalar_lea.hbm %s11567_s12, 32768 }
 0x10b   : > { %p10980_p3 = scmp.ne.s32.totalorder %s11567_s12, %s10979_s30  ;;  %s10984_s23 = scalar_lea.hbm %s14470_s3, 65536 }
 0x10c   : > { %p10985_p2 = scmp.lt.u32.totalorder %s11567_s12, %s14470_s3  ;;  %p10986_p8 = scmp.lt.u32.totalorder %s10984_s23, %s10979_s30 }
 0x10d   : > { %p10982_p1 = pnand %p10980_p3, %p14628_p13  ;;  %p10988_p11 = scmp.lt.u32.totalorder %s10979_s30, %s11567_s12 }
 0x10e   : > { %p10987_p7 = por %p10986_p8, %p10985_p2 }
 0x10f   : > { %p10983_p9 = pneg %p10982_p1 }
 0x110   : > { %p10989_p0 = por %p10988_p11, %p10987_p7 }
 0x112   : > { %p10990_p5 = pnand %p10989_p0, %p10983_p9 }
 0x114   : > { %10993 = shalt.err (!%p10990_p5)
}
 0x115   : > { %s10994_s0 = scalar_lea.vmem %s11569_s25, 32768  ;;  %s11158_s22 = smov [#allocation9]  }
 0x116   : > { %p10995_p6 = scmp.ne.s32.totalorder %s11569_s25, %s10994_s0  ;;  %s10999_s17 = sshll.u32 %s11158_s22, 4  ;;  %s11000_s17 = int_to_ptr.vmem [resolvable:$false] %s10999_s17 }
 0x117   : > { %s11001_s15 = scalar_lea.vmem %s11000_s17, 65536  ;;  %p11002_p12 = scmp.lt.s32.totalorder %s11569_s25, %s11000_s17 }
 0x118   : > { %p10997_p4 = pnand %p10995_p6, %p14628_p13  ;;  %p11003_p3 = scmp.lt.s32.totalorder %s11001_s15, %s10994_s0 }
 0x11a   : > { %p10998_p10 = pneg %p10997_p4  ;;  %p11004_p1 = por %p11003_p3, %p11002_p12 }
 0x11c   : > { %p11005_p2 = pnand %p11004_p1, %p10998_p10 }
 0x11e   : > { %11008 = shalt.err (!%p11005_p2)
}
 0x11f   : > { %s11159_s19 = smov 1024   ;;  %s11160_s14 = smov 64  }
 0x120   : > { %p14634_p9 = scmp.ne.s32.totalorder %s14623_s29, 0  ;;  %s8883_s1 = sshll.u32 %s11397_s21, 9 }
 0x121   : > { %s9328_s30 = sshll.u32 %s11141_s26, 13  ;;  %s14635_s23 = sld [smem:[#allocation125_spill]] }
 0x122   : > { %10036 = dma.hbm_to_vmem [thread:$0]  (!%p14634_p9), %s11567_s12, 32768, %s11569_s25, %s11573_s4, %s11159_s19, %s11159_s19, %s11160_s14  }
 0x123   : > { %s506_s0 = scalar_lea.vmem [#allocation17], %s8883_s1 }
 0x124   : > { %s514_s22 = sshll.u32 %s506_s0, 4  ;;  %s11604_s22 = int_to_ptr.vmem [resolvable:$true] %s514_s22 }
 0x127   : > { %s14636_s20 = smov %s14635_s23  ;;  %s11602_s18 = scalar_lea.hbm %s14635_s23, %s9328_s30 }
 0x128   : > { %s11009_s17 = scalar_lea.hbm %s11602_s18, 8192  ;;  %s11014_s25 = scalar_lea.hbm %s14636_s20, 16384 }
 0x129   : > { %p11010_p8 = scmp.ne.s32.totalorder %s11602_s18, %s11009_s17  ;;  %p11015_p0 = scmp.lt.u32.totalorder %s11602_s18, %s14636_s20 }
 0x12a   : > { %p11016_p5 = scmp.lt.u32.totalorder %s11014_s25, %s11009_s17  ;;  %p11018_p4 = scmp.lt.u32.totalorder %s11009_s17, %s11602_s18 }
 0x12b   : > { %p11012_p7 = pnand %p11010_p8, %p14628_p13 }
 0x12c   : > { %p11017_p6 = por %p11016_p5, %p11015_p0 }
 0x12d   : > { %p11013_p11 = pneg %p11012_p7 }
 0x12e   : > { %p11019_p10 = por %p11018_p4, %p11017_p6 }
 0x130   : > { %p11020_p12 = pnand %p11019_p10, %p11013_p11 }
 0x132   : > { %11023 = shalt.err (!%p11020_p12)
}
 0x133   : > { %s11024_s19 = scalar_lea.vmem %s11604_s22, 8192  ;;  %s11161_s14 = smov [#allocation17]  }
 0x134   : > { %p11025_p3 = scmp.ne.s32.totalorder %s11604_s22, %s11024_s19  ;;  %s11029_s1 = sshll.u32 %s11161_s14, 4  ;;  %s11030_s1 = int_to_ptr.vmem [resolvable:$false] %s11029_s1 }
 0x135   : > { %s11031_s30 = scalar_lea.vmem %s11030_s1, 16384  ;;  %p11032_p8 = scmp.lt.s32.totalorder %s11604_s22, %s11030_s1 }
 0x136   : > { %p11027_p1 = pnand %p11025_p3, %p14628_p13  ;;  %p11033_p7 = scmp.lt.s32.totalorder %s11031_s30, %s11024_s19 }
 0x138   : > { %p11028_p2 = pneg %p11027_p1  ;;  %p11034_p0 = por %p11033_p7, %p11032_p8 }
 0x13a   : > { %p11035_p5 = pnand %p11034_p0, %p11028_p2 }
 0x13c   : > { %11038 = shalt.err (!%p11035_p5)
}
 0x13d   : > { %s14637_s2 = smov 16   ;;  %s14638_s9 = smov 256  }
 0x13e   : > { %10042 = dma.hbm_to_vmem [thread:$0]  (!%p14634_p9), %s11602_s18, 8192, %s11604_s22, %s11418_s27, %s14638_s9, %s14638_s9, %s14637_s2  }
 0x13f   : > { %s14639_s11 = sld [smem:[#allocation33_spill]] }
 0x145   : > { %p14640_p13 = scmp.ne.s32.totalorder %s14639_s11, 0 }
 0x147   : > { %526 = sbr.rel (%p14640_p13) target bundleno = 1931 (0x78b), region = 68 }
 0x14e   : > { %s528_s23 = sand.u32 1, %s11255_s28   ;;  %s11635_s0 = sand.u32 1, %s11133_s24  }
 0x14f   : > { %s8888_s17 = sshll.u32 %s11635_s0, 8  ;;  %s529_s29 = scalar_lea.sflag [#allocation4], %s528_s23 }
 0x150   : > { %s11640_s21 = scalar_lea.vmem [#allocation3], %s8888_s17  ;;  %p14641_p11 = scmp.ne.s32.totalorder %s14618_s16, 0 }
 0x152   : > { %11084 = dma.done.wait (%p14641_p11), %s529_s29, 4096  }
 0x153   : > { %11086 = vsyncadd (%p14641_p11), %s529_s29, 4294963200  ;;  %p14642_p9 = scmp.eq.s32.totalorder %s11255_s28, 0 }
 0x155   : > { %11088 = dma.done.wait (%p14642_p9), [#allocation7], 8320   ;;  %p14643_p6 = pmov %p14642_p9 }
 0x156   : > { %s8891_s27 = sshll.u32 %s11635_s0, 11  ;;  %s546_s18 = scalar_lea.sflag [#allocation10], %s528_s23 }
 0x157   : > { %11090 = vsyncadd (%p14643_p6), [#allocation7], 4294958976  ;;  %s11651_s22 = scalar_lea.vmem [#allocation9], %s8891_s27 }
 0x158   : > { %11092 = dma.done.wait (%p14641_p11), %s546_s18, 32768  }
 0x159   : > { %11094 = vsyncadd (%p14641_p11), %s546_s18, 4294934528  ;;  %p14644_p4 = pmov %p14643_p6 }
 0x15b   : > { %11096 = dma.done.wait (%p14644_p4), [#allocation10], 32768   ;;  %p14645_p10 = pmov %p14644_p4 }
 0x15c   : > { %p14646_p12 = pmov %p14644_p4 }
 0x15d   : > { %11098 = vsyncadd (%p14645_p10), [#allocation10], 4294934528 }
 0x15e   : > { %11100 = dma.done.wait (%p14646_p12), [#allocation13], 64   ;;  %p14647_p3 = pmov %p14644_p4 }
 0x15f   : > { %s8894_s12 = sshll.u32 %s11635_s0, 10 }
 0x160   : > { %11102 = vsyncadd (%p14647_p3), [#allocation13], 4294967232  ;;  %s11666_s25 = scalar_lea.vmem [#allocation14], %s8894_s12 }
 0x161   : > { %11104 = dma.done.wait (%p14641_p11), %s529_s29, 16384  }
 0x162   : > { %11106 = vsyncadd (%p14641_p11), %s529_s29, 4294950912  ;;  %p14648_p1 = pmov %p14647_p3 }
 0x164   : > { %11108 = dma.done.wait (%p14648_p1), [#allocation7], 8192   ;;  %p14649_p2 = pmov %p14648_p1 }
 0x165   : > { %p14650_p8 = pmov %p14648_p1 }
 0x166   : > { %11110 = vsyncadd (%p14649_p2), [#allocation7], 4294959104 }
 0x167   : > { %11112 = dma.done.wait (%p14650_p8), [#allocation10], 32   ;;  %p14651_p7 = pmov %p14648_p1 }
 0x168   : > { %s8897_s4 = sshll.u32 %s11635_s0, 9 }
 0x169   : > { %11114 = vsyncadd (%p14651_p7), [#allocation10], 4294967264  ;;  %s11681_s15 = scalar_lea.vmem [#allocation17], %s8897_s4 }
 0x16a   : > { %11116 = dma.done.wait (%p14641_p11), %s529_s29, 8192  }
 0x16b   : > { %11118 = vsyncadd (%p14641_p11), %s529_s29, 4294959104  ;;  %p14652_p0 = pmov %p14648_p1 }
 0x16d   : > { %11120 = dma.done.wait (%p14652_p0), [#allocation7], 32   ;;  %p14653_p5 = pmov %p14652_p0 }
 0x16e   : > { %v14507_v1 = vmov 0   ;;  %v697_v2 = vld [vmem:[#allocation6] sm:$0xff]  ;;  %v699_v23 = vld [vmem:[#allocation6 + $0x10] sm:$0xff]  ;;  %v650_v51 = vld [vmem:[%s11640_s21 + $0x8] sm:$0xff]  ;;  %s14326_s16 = scalar_lea.vmem [#allocation19], %s8888_s17  ;;  %s9329_s19 = sshll.u32 %s11255_s28, 12 }
 0x16f   : > { %11122 = vsyncadd (%p14653_p5), [#allocation7], 4294967264  ;;  %1155 = vmatprep.mubr.bf16.mxu1 %v14507_v1  ;;  %1541 = vmatprep.mubr.bf16.mxu0 %v14507_v1  ;;  %v701_v3 = vld [vmem:[#allocation6 + $0x20] sm:$0xff]  ;;  %v703_v24 = vld [vmem:[#allocation6 + $0x30] sm:$0xff]  ;;  %s8661_s14 = sshll.u32 %s14326_s16, 4  ;;  %s14915_s2 = sld [smem:[#allocation126_spill]]  ;;  %s14419_s14 = int_to_ptr.vmem [resolvable:$true] %s8661_s14 }
 0x170   : > { %v705_v4 = vld [vmem:[#allocation6 + $0x40] sm:$0xff]  ;;  %v8901_v5 = vcombine.high %v697_v2, %v701_v3  ;;  %v8900_v6 = vcombine.low %v697_v2, %v701_v3  ;;  %v707_v25 = vld [vmem:[#allocation6 + $0x50] sm:$0xff]  ;;  %v8905_v28 = vcombine.high %v699_v23, %v703_v24  ;;  %v8904_v29 = vcombine.low %v699_v23, %v703_v24  ;;  %v698_v52 = vld [vmem:[#allocation6 + $0x8] sm:$0xff]  ;;  %s8648_s11 = scalar_lea.sflag [#allocation5], %s11635_s0  ;;  %s11039_s23 = scalar_lea.vmem %s14419_s14, 4096 }
 0x171   : > { %v709_v7 = vld [vmem:[#allocation6 + $0x60] sm:$0xff]  ;;  %v711_v26 = vld [vmem:[#allocation6 + $0x70] sm:$0xff]  ;;  %v702_v53 = vld [vmem:[#allocation6 + $0x28] sm:$0xff]  ;;  %p11040_p13 = scmp.ne.s32.totalorder %s14419_s14, %s11039_s23  ;;  %p14916_p11 = scmp.ne.s32.totalorder %s14619_s13, 0 }
 0x172   : > { %v8909_v8 = vcombine.high %v705_v4, %v709_v7  ;;  %v713_v9 = vld [vmem:[#allocation6 + $0x80] sm:$0xff]  ;;  %1123 = vmatprep.subr.bf16.mxu1 %v8901_v5  ;;  %v8908_v11 = vcombine.low %v705_v4, %v709_v7  ;;  %v8913_v30 = vcombine.high %v707_v25, %v711_v26  ;;  %v715_v32 = vld [vmem:[#allocation6 + $0x90] sm:$0xff]  ;;  %1509 = vmatprep.subr.bf16.mxu0 %v8905_v28  ;;  %v706_v56 = vld [vmem:[#allocation6 + $0x48] sm:$0xff]  ;;  %s11163_s28 = smov [#allocation19]  }
 0x173   : > { %v717_v10 = vld [vmem:[#allocation6 + $0xa0] sm:$0xff]  ;;  %1124 = vmatpush1.bf16.msra.mxu1 %v8900_v6  ;;  %v719_v33 = vld [vmem:[#allocation6 + $0xb0] sm:$0xff]  ;;  %1510 = vmatpush1.bf16.msra.mxu0 %v8904_v29  ;;  %v8912_v36 = vcombine.low %v707_v25, %v711_v26  ;;  %v710_v57 = vld [vmem:[#allocation6 + $0x68] sm:$0xff]  ;;  %v8903_v61 = vcombine.high %v698_v52, %v702_v53  ;;  %v8902_v3 = vcombine.low %v698_v52, %v702_v53  ;;  %p11041_p9 = pnand %p11040_p13, %p14916_p11  ;;  %s11043_s17 = sshll.u32 %s11163_s28, 4  ;;  %s11044_s17 = int_to_ptr.vmem [resolvable:$false] %s11043_s17 }
 0x174   : > { %1125 = vmatprep.subr.bf16.mxu1 %v8909_v8  ;;  %v8917_v12 = vcombine.high %v713_v9, %v717_v10  ;;  %v721_v13 = vld [vmem:[#allocation6 + $0xc0] sm:$0xff]  ;;  %v8916_v15 = vcombine.low %v713_v9, %v717_v10  ;;  %1511 = vmatprep.subr.bf16.mxu0 %v8913_v30  ;;  %v8921_v38 = vcombine.high %v715_v32, %v719_v33  ;;  %v723_v40 = vld [vmem:[#allocation6 + $0xd0] sm:$0xff]  ;;  %v714_v4 = vld [vmem:[#allocation6 + $0x88] sm:$0xff]  ;;  %s11045_s29 = scalar_lea.vmem %s11044_s17, 8192  ;;  %p11046_p4 = scmp.lt.s32.totalorder %s14419_s14, %s11044_s17 }
 0x175   : > { %v725_v14 = vld [vmem:[#allocation6 + $0xe0] sm:$0xff]  ;;  %v727_v41 = vld [vmem:[#allocation6 + $0xf0] sm:$0xff]  ;;  %v8920_v44 = vcombine.low %v715_v32, %v719_v33  ;;  %v718_v5 = vld [vmem:[#allocation6 + $0xa8] sm:$0xff]  ;;  %v8911_v6 = vcombine.high %v706_v56, %v710_v57  ;;  %s14417_s9 = scalar_lea.hbm %s14915_s2, %s9329_s19  ;;  %p11042_p6 = pneg %p11041_p9 }
 0x176   : > { %v8925_v16 = vcombine.high %v721_v13, %v725_v14  ;;  %v729_v17 = vld [vmem:[#allocation6 + $0x100] sm:$0xff]  ;;  %v8924_v19 = vcombine.low %v721_v13, %v725_v14  ;;  %v8929_v46 = vcombine.high %v723_v40, %v727_v41  ;;  %v731_v48 = vld [vmem:[#allocation6 + $0x110] sm:$0xff]  ;;  %v8928_v54 = vcombine.low %v723_v40, %v727_v41  ;;  %v652_v9 = vld [vmem:[%s11640_s21 + $0x18] sm:$0xff]  ;;  %p11047_p10 = scmp.lt.s32.totalorder %s11045_s29, %s11039_s23 }
 0x177   : > { %1126 = vmatpush1.bf16.msra.mxu1 %v8908_v11  ;;  %v733_v18 = vld [vmem:[#allocation6 + $0x120] sm:$0xff]  ;;  %1512 = vmatpush1.bf16.msra.mxu0 %v8912_v36  ;;  %v735_v49 = vld [vmem:[#allocation6 + $0x130] sm:$0xff]  ;;  %v11700_v11 = vld [vmem:[#allocation6 + $0x18] sm:$0xff]  ;;  %v8910_v13 = vcombine.low %v706_v56, %v710_v57  ;;  %v8918_v23 = vcombine.low %v714_v4, %v718_v5 }
 0x178   : > { %1127 = vmatprep.subr.bf16.mxu1 %v8917_v12  ;;  %v8933_v20 = vcombine.high %v729_v17, %v733_v18  ;;  %v737_v21 = vld [vmem:[#allocation6 + $0x140] sm:$0xff]  ;;  %v8932_v27 = vcombine.low %v729_v17, %v733_v18  ;;  %1513 = vmatprep.subr.bf16.mxu0 %v8921_v38  ;;  %v8937_v58 = vcombine.high %v731_v48, %v735_v49  ;;  %v739_v59 = vld [vmem:[#allocation6 + $0x150] sm:$0xff]  ;;  %v11702_v12 = vld [vmem:[#allocation6 + $0x38] sm:$0xff]  ;;  %p11048_p12 = por %p11047_p10, %p11046_p4 }
 0x179   : > { %v741_v22 = vld [vmem:[#allocation6 + $0x160] sm:$0xff]  ;;  %v743_v60 = vld [vmem:[#allocation6 + $0x170] sm:$0xff]  ;;  %v8936_v63 = vcombine.low %v731_v48, %v735_v49  ;;  %v722_v14 = vld [vmem:[#allocation6 + $0xc8] sm:$0xff] }
 0x17a   : > { %v8941_v31 = vcombine.high %v737_v21, %v741_v22  ;;  %v745_v34 = vld [vmem:[#allocation6 + $0x180] sm:$0xff]  ;;  %v8940_v37 = vcombine.low %v737_v21, %v741_v22  ;;  %v747_v0 = vld [vmem:[#allocation6 + $0x190] sm:$0xff]  ;;  %v8945_v7 = vcombine.high %v739_v59, %v743_v60  ;;  %v8944_v10 = vcombine.low %v739_v59, %v743_v60  ;;  %v730_v24 = vld [vmem:[#allocation6 + $0x108] sm:$0xff]  ;;  %p11049_p3 = pnand %p11048_p12, %p11042_p6 }
 0x17b   : > { %1128 = vmatpush1.bf16.msra.mxu1 %v8916_v15  ;;  %v749_v35 = vld [vmem:[#allocation6 + $0x1a0] sm:$0xff]  ;;  %1514 = vmatpush1.bf16.msra.mxu0 %v8920_v44  ;;  %v751_v2 = vld [vmem:[#allocation6 + $0x1b0] sm:$0xff]  ;;  %v726_v15 = vld [vmem:[#allocation6 + $0xe8] sm:$0xff]  ;;  %v8907_v60 = vcombine.high %v11700_v11, %v11702_v12 }
 0x17c   : > { %1129 = vmatprep.subr.bf16.mxu1 %v8925_v16  ;;  %v8949_v39 = vcombine.high %v745_v34, %v749_v35  ;;  %v753_v42 = vld [vmem:[#allocation6 + $0x1c0] sm:$0xff]  ;;  %v8948_v45 = vcombine.low %v745_v34, %v749_v35  ;;  %1515 = vmatprep.subr.bf16.mxu0 %v8929_v46  ;;  %v651_v8 = vld [vmem:[%s11640_s21 + $0x10] sm:$0xff]  ;;  %v8953_v16 = vcombine.high %v747_v0, %v751_v2  ;;  %v734_v25 = vld [vmem:[#allocation6 + $0x128] sm:$0xff] }
 0x17d   : > { %v757_v43 = vld [vmem:[#allocation6 + $0x1e0] sm:$0xff]  ;;  %v755_v17 = vld [vmem:[#allocation6 + $0x1d0] sm:$0xff]  ;;  %v11707_v21 = vpack.c.bf16 %v652_v9, %v651_v8  ;;  %v8952_v22 = vcombine.low %v747_v0, %v751_v2  ;;  %v8927_v26 = vcombine.high %v722_v14, %v726_v15  ;;  %v654_v29 = vld [vmem:[%s11640_s21 + $0x28] sm:$0xff]  ;;  %v8926_v32 = vcombine.low %v722_v14, %v726_v15 }
 0x17e   : > { %v8957_v47 = vcombine.high %v753_v42, %v757_v43  ;;  %v649_v50 = vld [vmem:[%s11640_s21] sm:$0xff]  ;;  %v8956_v55 = vcombine.low %v753_v42, %v757_v43  ;;  %v759_v18 = vld [vmem:[#allocation6 + $0x1f0] sm:$0xff]  ;;  %v738_v33 = vld [vmem:[#allocation6 + $0x148] sm:$0xff]  ;;  %v8935_v35 = vcombine.high %v730_v24, %v734_v25  ;;  %v8934_v38 = vcombine.low %v730_v24, %v734_v25 }
 0x17f   : > { %1130 = vmatpush1.bf16.msra.mxu1 %v8924_v19  ;;  %v11695_v62 = vpack.c.bf16 %v650_v51, %v649_v50  ;;  %1516 = vmatpush1.bf16.msra.mxu0 %v8928_v54  ;;  %v8906_v19 = vcombine.low %v11700_v11, %v11702_v12  ;;  %v653_v28 = vld [vmem:[%s11640_s21 + $0x20] sm:$0xff]  ;;  %v8960_v30 = vcombine.low %v755_v17, %v759_v18  ;;  %v742_v34 = vld [vmem:[#allocation6 + $0x168] sm:$0xff]  ;;  %v655_v43 = vld [vmem:[%s11640_s21 + $0x30] sm:$0xff] }
 0x180   : > { %1131 = vmatprep.subr.bf16.mxu1 %v8933_v20  ;;  %1517 = vmatprep.subr.bf16.mxu0 %v8937_v58  ;;  %v8919_v20 = vcombine.high %v714_v4, %v718_v5  ;;  %v11713_v36 = vpack.c.bf16 %v654_v29, %v653_v28  ;;  %v750_v40 = vld [vmem:[#allocation6 + $0x1a8] sm:$0xff]  ;;  %v8943_v42 = vcombine.high %v738_v33, %v742_v34  ;;  %v656_v44 = vld [vmem:[%s11640_s21 + $0x38] sm:$0xff]  ;;  %v661_v5 = vld [vmem:[%s11640_s21 + $0x60] sm:$0xff] }
 0x181   : > { %v10118_v41 = vld [vmem:[#allocation11 + $0x24] ss:$16 sps:$4 sm:$0xff]   ;;  %v8942_v46 = vcombine.low %v738_v33, %v742_v34  ;;  %v11721_v51 = vpack.c.bf16 %v656_v44, %v655_v43  ;;  %v10119_v52 = vld [vmem:[#allocation11 + $0x40] ss:$16 sps:$4 sm:$0xff]   ;;  %v667_v25 = vld [vmem:[%s11640_s21 + $0x90] sm:$0xff] }
 0x182   : > { %v758_v48 = vld [vmem:[#allocation6 + $0x1e8] sm:$0xff]  ;;  %v660_v0 = vld [vmem:[%s11640_s21 + $0x58] sm:$0xff] }
 0x183   : > { %1132 = vmatpush1.bf16.msra.mxu1 %v8932_v27  ;;  %1518 = vmatpush1.bf16.msra.mxu0 %v8936_v63  ;;  %v8961_v27 = vcombine.high %v755_v17, %v759_v18  ;;  %v10121_v49 = vld [vmem:[#allocation11 + $0x44] ss:$16 sps:$4 sm:$0xff]   ;;  %v10122_v57 = vld [vmem:[#allocation11 + $0x60] ss:$16 sps:$4 sm:$0xff]   ;;  %v659_v63 = vld [vmem:[%s11640_s21 + $0x50] sm:$0xff] }
 0x184   : > { %1133 = vmatprep.subr.bf16.mxu1 %v8941_v31  ;;  %1519 = vmatprep.subr.bf16.mxu0 %v8945_v7  ;;  %v10115_v31 = vld [vmem:[#allocation11 + $0x4] ss:$16 sps:$4 sm:$0xff]   ;;  %v10125_v2 = vld [vmem:[#allocation11 + $0x80] ss:$16 sps:$4 sm:$0xff]   ;;  %v11739_v4 = vpack.c.bf16 %v660_v0, %v659_v63  ;;  %v665_v17 = vld [vmem:[%s11640_s21 + $0x80] sm:$0xff] }
 0x185   : > { %v658_v56 = vld [vmem:[%s11640_s21 + $0x48] sm:$0xff]  ;;  %v680_v63 = vld [vmem:[%s11640_s21 + $0xf8] sm:$0xff] }
 0x186   : > { %v10124_v58 = vld [vmem:[#allocation11 + $0x64] ss:$16 sps:$4 sm:$0xff]   ;;  %v10128_v7 = vld [vmem:[#allocation11 + $0xa0] ss:$16 sps:$4 sm:$0xff]  }
 0x187   : > { %1134 = vmatpush1.bf16.msra.mxu1 %v8940_v37  ;;  %1520 = vmatpush1.bf16.msra.mxu0 %v8944_v10  ;;  %v10113_v37 = vld [vmem:[#allocation11] ss:$16 sps:$4 sm:$0xff]   ;;  %v10130_v8 = vld [vmem:[#allocation11 + $0xa4] ss:$16 sps:$4 sm:$0xff]   ;;  %v663_v10 = vld [vmem:[%s11640_s21 + $0x70] sm:$0xff] }
 0x188   : > { %1135 = vmatprep.subr.bf16.mxu1 %v8949_v39  ;;  %1521 = vmatprep.subr.bf16.mxu0 %v8953_v16  ;;  %v746_v39 = vld [vmem:[#allocation6 + $0x188] sm:$0xff] }
 0x189   : > { %v8951_v50 = vcombine.high %v746_v39, %v750_v40  ;;  %v8950_v53 = vcombine.low %v746_v39, %v750_v40  ;;  %v10131_v14 = vld [vmem:[#allocation11 + $0xc0] ss:$16 sps:$4 sm:$0xff]   ;;  %v10133_v15 = vld [vmem:[#allocation11 + $0xc4] ss:$16 sps:$4 sm:$0xff]   ;;  %v671_v40 = vld [vmem:[%s11640_s21 + $0xb0] sm:$0xff] }
 0x18a   : > { %v666_v18 = vld [vmem:[%s11640_s21 + $0x88] sm:$0xff] }
 0x18b   : > { %1136 = vmatpush1.bf16.msra.mxu1 %v8948_v45  ;;  %1522 = vmatpush1.bf16.msra.mxu0 %v8952_v22  ;;  %v10116_v45 = vld [vmem:[#allocation11 + $0x20] ss:$16 sps:$4 sm:$0xff]   ;;  %v10136_v22 = vld [vmem:[#allocation11 + $0xe4] ss:$16 sps:$4 sm:$0xff]  }
 0x18c   : > { %1137 = vmatprep.subr.bf16.mxu1 %v8957_v47  ;;  %1523 = vmatprep.subr.bf16.mxu0 %v8961_v27  ;;  %v754_v47 = vld [vmem:[#allocation6 + $0x1c8] sm:$0xff] }
 0x18d   : > { %v8959_v54 = vcombine.high %v754_v47, %v758_v48  ;;  %v8958_v59 = vcombine.low %v754_v47, %v758_v48  ;;  %v10139_v24 = vld [vmem:[#allocation11 + $0x104] ss:$16 sps:$4 sm:$0xff]   ;;  %v10137_v27 = vld [vmem:[#allocation11 + $0x100] ss:$16 sps:$4 sm:$0xff]   ;;  %v673_v47 = vld [vmem:[%s11640_s21 + $0xc0] sm:$0xff] }
 0x18e   : > { %v10140_v28 = vld [vmem:[#allocation11 + $0x120] ss:$16 sps:$4 sm:$0xff]   ;;  %v10142_v29 = vld [vmem:[#allocation11 + $0x124] ss:$16 sps:$4 sm:$0xff]  }
 0x18f   : > { %1138 = vmatpush1.bf16.msra.mxu1 %v8956_v55  ;;  %1524 = vmatpush1.bf16.msra.mxu0 %v8960_v30  ;;  %v657_v55 = vld [vmem:[%s11640_s21 + $0x40] sm:$0xff]  ;;  %v10145_v33 = vld [vmem:[#allocation11 + $0x144] ss:$16 sps:$4 sm:$0xff]   ;;  %v10143_v34 = vld [vmem:[#allocation11 + $0x140] ss:$16 sps:$4 sm:$0xff]  }
 0x190   : > { %1316 = vmatprep.subr.bf16.mxu1 %v8903_v61  ;;  %4861 = vmatprep.subr.bf16.mxu0 %v10115_v31  ;;  %v11731_v61 = vpack.c.bf16 %v658_v56, %v657_v55  ;;  %v669_v31 = vld [vmem:[%s11640_s21 + $0xa0] sm:$0xff]  ;;  %v10151_v39 = vld [vmem:[#allocation11 + $0x184] ss:$16 sps:$4 sm:$0xff]   ;;  %v10155_v48 = vld [vmem:[#allocation11 + $0x1c0] ss:$16 sps:$4 sm:$0xff]  }
 0x191   : > { %v10154_v43 = vld [vmem:[#allocation11 + $0x1a4] ss:$16 sps:$4 sm:$0xff]  }
 0x192   : > { %1156 = vmatmul.mubr.bf16.vlgmr.msra.gmra.mrb[0].mxu1 %v11695_v62  ;;  %1542 = vmatmul.mubr.bf16.vlgmr.msra.gmra.mrb[0].mxu0 %v11695_v62  ;;  %v676_v55 = vld [vmem:[%s11640_s21 + $0xd8] sm:$0xff] }
 0x193   : > { %1317 = vmatpush1.bf16.msra.mxu1 %v8902_v3  ;;  %1165 = vmatprep.mubr.bf16.mxu1 %v14507_v1  ;;  %v10127_v3 = vld [vmem:[#allocation11 + $0x84] ss:$16 sps:$4 sm:$0xff]  }
 0x194   : > { %1318 = vmatprep.subr.bf16.mxu1 %v8911_v6  ;;  %1551 = vmatprep.mubr.bf16.mxu0 %v14507_v1  ;;  %v662_v6 = vld [vmem:[%s11640_s21 + $0x68] sm:$0xff] }
 0x195   : > { %4862 = vmatpush1.bf16.msra.mxu0 %v10113_v37  ;;  %v11747_v9 = vpack.c.bf16 %v662_v6, %v661_v5  ;;  %v10148_v37 = vld [vmem:[#allocation11 + $0x164] ss:$16 sps:$4 sm:$0xff]  }
 0x196   : > { %4863 = vmatprep.subr.bf16.mxu0 %v10118_v41  ;;  %v10149_v41 = vld [vmem:[#allocation11 + $0x180] ss:$16 sps:$4 sm:$0xff]  }
 0x197   : > { %1319 = vmatpush1.bf16.msra.mxu1 %v8910_v13  ;;  %v664_v13 = vld [vmem:[%s11640_s21 + $0x78] sm:$0xff] }
 0x198   : > { %1320 = vmatprep.subr.bf16.mxu1 %v8919_v20  ;;  %v11755_v16 = vpack.c.bf16 %v664_v13, %v663_v10  ;;  %v10134_v20 = vld [vmem:[#allocation11 + $0xe0] ss:$16 sps:$4 sm:$0xff]  }
 0x199   : > { %4864 = vmatpush1.bf16.msra.mxu0 %v10116_v45  ;;  %v10152_v45 = vld [vmem:[#allocation11 + $0x1a0] ss:$16 sps:$4 sm:$0xff]  }
 0x19a   : > { %1166 = vmatmul.mubr.bf16.gmra.mrb[4].mxu1 %v11707_v21  ;;  %1552 = vmatmul.mubr.bf16.gmra.mrb[4].mxu0 %v11707_v21  ;;  %v716_v6 = vld [vmem:[#allocation6 + $0x98] sm:$0xff] }
 0x19b   : > { %1175 = vmatprep.mubr.bf16.mxu1 %v14507_v1  ;;  %1321 = vmatpush1.bf16.msra.mxu1 %v8918_v23  ;;  %v11763_v23 = vpack.c.bf16 %v666_v18, %v665_v17  ;;  %v724_v13 = vld [vmem:[#allocation6 + $0xd8] sm:$0xff] }
 0x19c   : > { %1322 = vmatprep.subr.bf16.mxu1 %v8927_v26  ;;  %4865 = vmatprep.subr.bf16.mxu0 %v10121_v49  ;;  %v668_v26 = vld [vmem:[%s11640_s21 + $0x98] sm:$0xff]  ;;  %v674_v49 = vld [vmem:[%s11640_s21 + $0xc8] sm:$0xff] }
 0x19d   : > { %1561 = vmatprep.mubr.bf16.mxu0 %v14507_v1  ;;  %4866 = vmatpush1.bf16.msra.mxu0 %v10119_v52  ;;  %v11771_v30 = vpack.c.bf16 %v668_v26, %v667_v25  ;;  %v11795_v52 = vpack.c.bf16 %v674_v49, %v673_v47 }
 0x19e   : > { %4867 = vmatprep.subr.bf16.mxu0 %v10124_v58  ;;  %v678_v58 = vld [vmem:[%s11640_s21 + $0xe8] sm:$0xff] }
 0x19f   : > { %1323 = vmatpush1.bf16.msra.mxu1 %v8926_v32  ;;  %v670_v32 = vld [vmem:[%s11640_s21 + $0xa8] sm:$0xff] }
 0x1a0   : > { %1324 = vmatprep.subr.bf16.mxu1 %v8935_v35  ;;  %v10146_v35 = vld [vmem:[#allocation11 + $0x160] ss:$16 sps:$4 sm:$0xff]  }
 0x1a1   : > { %4868 = vmatpush1.bf16.msra.mxu0 %v10122_v57  ;;  %v677_v57 = vld [vmem:[%s11640_s21 + $0xe0] sm:$0xff] }
 0x1a2   : > { %1176 = vmatmul.mubr.bf16.gmra.mrb[8].mxu1 %v11713_v36  ;;  %1562 = vmatmul.mubr.bf16.gmra.mrb[8].mxu0 %v11713_v36 }
 0x1a3   : > { %1185 = vmatprep.mubr.bf16.mxu1 %v14507_v1  ;;  %1325 = vmatpush1.bf16.msra.mxu1 %v8934_v38  ;;  %v11779_v38 = vpack.c.bf16 %v670_v32, %v669_v31  ;;  %v756_v32 = vld [vmem:[#allocation6 + $0x1d8] sm:$0xff] }
 0x1a4   : > { %1326 = vmatprep.subr.bf16.mxu1 %v8943_v42  ;;  %1571 = vmatprep.mubr.bf16.mxu0 %v14507_v1  ;;  %v672_v42 = vld [vmem:[%s11640_s21 + $0xb8] sm:$0xff] }
 0x1a5   : > { %4869 = vmatprep.subr.bf16.mxu0 %v10127_v3  ;;  %v11787_v44 = vpack.c.bf16 %v672_v42, %v671_v40  ;;  %v712_v3 = vld [vmem:[#allocation6 + $0x78] sm:$0xff]  ;;  %v763_v40 = vlaneseq }
 0x1a6   : > { %4870 = vmatpush1.bf16.msra.mxu0 %v10125_v2  ;;  %v708_v2 = vld [vmem:[#allocation6 + $0x58] sm:$0xff] }
 0x1a7   : > { %1327 = vmatpush1.bf16.msra.mxu1 %v8942_v46  ;;  %4871 = vmatprep.subr.bf16.mxu0 %v10130_v8  ;;  %v10157_v46 = vld [vmem:[#allocation11 + $0x1c4] ss:$16 sps:$4 sm:$0xff]   ;;  %v8915_v5 = vcombine.high %v708_v2, %v712_v3  ;;  %v8914_v8 = vcombine.low %v708_v2, %v712_v3 }
 0x1a8   : > { %1328 = vmatprep.subr.bf16.mxu1 %v8951_v50  ;;  %v10160_v50 = vld [vmem:[#allocation11 + $0x1e4] ss:$16 sps:$4 sm:$0xff]  }
 0x1a9   : > { %v2663_v3 = vld [vmem:[%s11651_s22] sm:$0xff] }
 0x1aa   : > { %1186 = vmatmul.mubr.bf16.gmra.mrb[12].mxu1 %v11721_v51  ;;  %1572 = vmatmul.mubr.bf16.gmra.mrb[12].mxu0 %v11721_v51 }
 0x1ab   : > { %1195 = vmatprep.mubr.bf16.mxu1 %v14507_v1  ;;  %1329 = vmatpush1.bf16.msra.mxu1 %v8950_v53  ;;  %v10158_v53 = vld [vmem:[#allocation11 + $0x1e0] ss:$16 sps:$4 sm:$0xff]  }
 0x1ac   : > { %1330 = vmatprep.subr.bf16.mxu1 %v8959_v54  ;;  %1581 = vmatprep.mubr.bf16.mxu0 %v14507_v1  ;;  %v675_v54 = vld [vmem:[%s11640_s21 + $0xd0] sm:$0xff] }
 0x1ad   : > { %4872 = vmatpush1.bf16.msra.mxu0 %v10128_v7  ;;  %v11803_v56 = vpack.c.bf16 %v676_v55, %v675_v54  ;;  %v720_v7 = vld [vmem:[#allocation6 + $0xb8] sm:$0xff] }
 0x1ae   : > { %4873 = vmatprep.subr.bf16.mxu0 %v10133_v15  ;;  %v8923_v10 = vcombine.high %v716_v6, %v720_v7  ;;  %v10163_v15 = vld [vmem:[#allocation11 + $0x204] ss:$16 sps:$4 sm:$0xff]   ;;  %v8922_v17 = vcombine.low %v716_v6, %v720_v7 }
 0x1af   : > { %1331 = vmatpush1.bf16.msra.mxu1 %v8958_v59  ;;  %v11811_v59 = vpack.c.bf16 %v678_v58, %v677_v57  ;;  %v2671_v6 = vld [vmem:[%s11651_s22 + $0x40] sm:$0xff] }
 0x1b0   : > { %1702 = vmatprep.subr.bf16.mxu1 %v8907_v60  ;;  %v679_v60 = vld [vmem:[%s11640_s21 + $0xf0] sm:$0xff] }
 0x1b1   : > { %4874 = vmatpush1.bf16.msra.mxu0 %v10131_v14  ;;  %v11819_v0 = vpack.c.bf16 %v680_v63, %v679_v60  ;;  %v728_v14 = vld [vmem:[#allocation6 + $0xf8] sm:$0xff] }
 0x1b2   : > { %1196 = vmatmul.mubr.bf16.gmra.mrb[16].mxu1 %v11731_v61  ;;  %1582 = vmatmul.mubr.bf16.gmra.mrb[16].mxu0 %v11731_v61  ;;  %v8931_v18 = vcombine.high %v724_v13, %v728_v14  ;;  %v8930_v11 = vcombine.low %v724_v13, %v728_v14  ;;  %v2672_v13 = vld [vmem:[%s11651_s22 + $0x48] sm:$0xff] }
 0x1b3   : > { %1205 = vmatprep.mubr.bf16.mxu1 %v14507_v1  ;;  %1591 = vmatprep.mubr.bf16.mxu0 %v14507_v1 }
 0x1b4   : > { %4875 = vmatprep.subr.bf16.mxu0 %v10136_v22  ;;  %v736_v22 = vld [vmem:[#allocation6 + $0x138] sm:$0xff] }
 0x1b5   : > { %4876 = vmatpush1.bf16.msra.mxu0 %v10134_v20  ;;  %v732_v20 = vld [vmem:[#allocation6 + $0x118] sm:$0xff] }
 0x1b6   : > { %4877 = vmatprep.subr.bf16.mxu0 %v10139_v24  ;;  %v8939_v12 = vcombine.high %v732_v20, %v736_v22  ;;  %v744_v24 = vld [vmem:[#allocation6 + $0x178] sm:$0xff]  ;;  %v8938_v25 = vcombine.low %v732_v20, %v736_v22 }
 0x1b9   : > { %4878 = vmatpush1.bf16.msra.mxu0 %v10137_v27  ;;  %v748_v27 = vld [vmem:[#allocation6 + $0x198] sm:$0xff] }
 0x1ba   : > { %1206 = vmatmul.mubr.bf16.gmra.mrb[20].mxu1 %v11739_v4  ;;  %1592 = vmatmul.mubr.bf16.gmra.mrb[20].mxu0 %v11739_v4 }
 0x1bb   : > { %1215 = vmatprep.mubr.bf16.mxu1 %v14507_v1  ;;  %1601 = vmatprep.mubr.bf16.mxu0 %v14507_v1 }
 0x1bc   : > { %4879 = vmatprep.subr.bf16.mxu0 %v10142_v29 }
 0x1bd   : > { %4880 = vmatpush1.bf16.msra.mxu0 %v10140_v28  ;;  %v752_v28 = vld [vmem:[#allocation6 + $0x1b8] sm:$0xff] }
 0x1be   : > { %4881 = vmatprep.subr.bf16.mxu0 %v10145_v33  ;;  %v8955_v31 = vcombine.high %v748_v27, %v752_v28  ;;  %v760_v33 = vld [vmem:[#allocation6 + $0x1f8] sm:$0xff] }
 0x1c1   : > { %4882 = vmatpush1.bf16.msra.mxu0 %v10143_v34  ;;  %v8954_v34 = vcombine.low %v748_v27, %v752_v28 }
 0x1c2   : > { %1216 = vmatmul.mubr.bf16.gmra.mrb[24].mxu1 %v11747_v9  ;;  %1602 = vmatmul.mubr.bf16.gmra.mrb[24].mxu0 %v11747_v9 }
 0x1c3   : > { %1225 = vmatprep.mubr.bf16.mxu1 %v14507_v1  ;;  %1611 = vmatprep.mubr.bf16.mxu0 %v14507_v1 }
 0x1c4   : > { %4883 = vmatprep.subr.bf16.mxu0 %v10148_v37  ;;  %v8962_v37 = vcombine.low %v756_v32, %v760_v33 }
 0x1c5   : > { %4884 = vmatpush1.bf16.msra.mxu0 %v10146_v35  ;;  %v8963_v35 = vcombine.high %v756_v32, %v760_v33 }
 0x1c6   : > { %4885 = vmatprep.subr.bf16.mxu0 %v10151_v39  ;;  %v10166_v39 = vld [vmem:[#allocation11 + $0xc] ss:$16 sps:$4 sm:$0xff]  }
 0x1c9   : > { %4886 = vmatpush1.bf16.msra.mxu0 %v10149_v41  ;;  %v11850_v41 = vshrl.u32 %v763_v40, 7 }
 0x1ca   : > { %1226 = vmatmul.mubr.bf16.gmra.mrb[28].mxu1 %v11755_v16  ;;  %1612 = vmatmul.mubr.bf16.gmra.mrb[28].mxu0 %v11755_v16 }
 0x1cb   : > { %1235 = vmatprep.mubr.bf16.mxu1 %v14507_v1  ;;  %1621 = vmatprep.mubr.bf16.mxu0 %v14507_v1  ;;  %14654 = vst [vmem:[#allocation37_spill] sm:$0xff] %v11850_v41  ;;  %v11854_v42 = vsub.s32 0, %v11850_v41  ;;  %v781_v22 = vsub.s32 4, %v11850_v41  ;;  %v785_v28 = vsub.s32 5, %v11850_v41 }
 0x1cc   : > { %4887 = vmatprep.subr.bf16.mxu0 %v10154_v43  ;;  %v11856_v43 = vld [vmem:[#allocation8] sm:$0xff] }
 0x1cd   : > { %4888 = vmatpush1.bf16.msra.mxu0 %v10152_v45  ;;  %14655 = vst [vmem:[#allocation38_spill] sm:$0xff] %v11854_v42  ;;  %v11859_v45 = vsub.s32 1, %v11850_v41  ;;  %v11892_v40 = vrot.slane %v11856_v43, %v781_v22 }
 0x1ce   : > { %4889 = vmatprep.subr.bf16.mxu0 %v10157_v46  ;;  %v11864_v46 = vrot.slane %v11856_v43, %v11854_v42  ;;  %v10203_v42 = vld [vmem:[#allocation11 + $0x2e0] ss:$16 sps:$4 sm:$0xff]  }
 0x1cf   : > { %14656 = vst [vmem:[#allocation39_spill] sm:$0xff] %v11859_v45  ;;  %v11868_v47 = vrot.slane %v11856_v43, %v11859_v45 }
 0x1d1   : > { %4890 = vmatpush1.bf16.msra.mxu0 %v10155_v48 }
 0x1d2   : > { %1236 = vmatmul.mubr.bf16.gmra.mrb[32].mxu1 %v11763_v23  ;;  %1622 = vmatmul.mubr.bf16.gmra.mrb[32].mxu0 %v11763_v23 }
 0x1d3   : > { %1245 = vmatprep.mubr.bf16.mxu1 %v14507_v1  ;;  %1631 = vmatprep.mubr.bf16.mxu0 %v14507_v1 }
 0x1d4   : > { %4891 = vmatprep.subr.bf16.mxu0 %v10160_v50 }
 0x1d5   : > { %4892 = vmatpush1.bf16.msra.mxu0 %v10158_v53 }
 0x1d6   : > { %5054 = vmatprep.subr.bf16.mxu0 %v10163_v15 }
 0x1da   : > { %1246 = vmatmul.mubr.bf16.gmra.mrb[36].mxu1 %v11771_v30  ;;  %1632 = vmatmul.mubr.bf16.gmra.mrb[36].mxu0 %v11771_v30 }
 0x1db   : > { %1255 = vmatprep.mubr.bf16.mxu1 %v14507_v1  ;;  %1641 = vmatprep.mubr.bf16.mxu0 %v14507_v1 }
 0x1e2   : > { %1256 = vmatmul.mubr.bf16.gmra.mrb[40].mxu1 %v11779_v38  ;;  %1642 = vmatmul.mubr.bf16.gmra.mrb[40].mxu0 %v11779_v38 }
 0x1e3   : > { %1265 = vmatprep.mubr.bf16.mxu1 %v14507_v1  ;;  %1651 = vmatprep.mubr.bf16.mxu0 %v14507_v1 }
 0x1ea   : > { %1266 = vmatmul.mubr.bf16.gmra.mrb[44].mxu1 %v11787_v44  ;;  %1652 = vmatmul.mubr.bf16.gmra.mrb[44].mxu0 %v11787_v44 }
 0x1eb   : > { %1275 = vmatprep.mubr.bf16.mxu1 %v14507_v1  ;;  %1661 = vmatprep.mubr.bf16.mxu0 %v14507_v1 }
 0x1f2   : > { %1276 = vmatmul.mubr.bf16.gmra.mrb[48].mxu1 %v11795_v52  ;;  %1662 = vmatmul.mubr.bf16.gmra.mrb[48].mxu0 %v11795_v52 }
 0x1f3   : > { %1285 = vmatprep.mubr.bf16.mxu1 %v14507_v1  ;;  %1671 = vmatprep.mubr.bf16.mxu0 %v14507_v1 }
 0x1fa   : > { %1286 = vmatmul.mubr.bf16.gmra.mrb[52].mxu1 %v11803_v56  ;;  %1672 = vmatmul.mubr.bf16.gmra.mrb[52].mxu0 %v11803_v56 }
 0x1fb   : > { %1295 = vmatprep.mubr.bf16.mxu1 %v14507_v1  ;;  %1681 = vmatprep.mubr.bf16.mxu0 %v14507_v1 }
 0x202   : > { %1296 = vmatmul.mubr.bf16.gmra.mrb[56].mxu1 %v11811_v59  ;;  %1682 = vmatmul.mubr.bf16.gmra.mrb[56].mxu0 %v11811_v59 }
 0x203   : > { %1305 = vmatprep.mubr.bf16.mxu1 %v14507_v1  ;;  %1691 = vmatprep.mubr.bf16.mxu0 %v14507_v1 }
 0x20a   : > { %1306 = vmatmul.mubr.bf16.gmra.mrb[60].mxu1 %v11819_v0  ;;  %1692 = vmatmul.mubr.bf16.gmra.mrb[60].mxu0 %v11819_v0 }
 0x20b   : > { %1348 = vmatprep.mubr.bf16.mxu1 %v14507_v1 }
 0x212   : > { %1349 = vmatmul.mubr.bf16.vlgmr.msra.gmra.mrb[64].mxu1 %v11695_v62 }
 0x213   : > { %1703 = vmatpush1.bf16.msra.mxu1 %v8906_v19  ;;  %1358 = vmatprep.mubr.bf16.mxu1 %v14507_v1  ;;  %v740_v19 = vld [vmem:[#allocation6 + $0x158] sm:$0xff] }
 0x214   : > { %1704 = vmatprep.subr.bf16.mxu1 %v8915_v5  ;;  %v8947_v26 = vcombine.high %v740_v19, %v744_v24  ;;  %v8946_v29 = vcombine.low %v740_v19, %v744_v24 }
 0x217   : > { %1705 = vmatpush1.bf16.msra.mxu1 %v8914_v8 }
 0x218   : > { %1706 = vmatprep.subr.bf16.mxu1 %v8923_v10  ;;  %v2664_v10 = vld [vmem:[%s11651_s22 + $0x8] sm:$0xff] }
 0x21a   : > { %1359 = vmatmul.mubr.bf16.gmra.mrb[68].mxu1 %v11707_v21 }
 0x21b   : > { %1368 = vmatprep.mubr.bf16.mxu1 %v14507_v1  ;;  %1707 = vmatpush1.bf16.msra.mxu1 %v8922_v17 }
 0x21c   : > { %1708 = vmatprep.subr.bf16.mxu1 %v8931_v18 }
 0x21f   : > { %1709 = vmatpush1.bf16.msra.mxu1 %v8930_v11 }
 0x220   : > { %1710 = vmatprep.subr.bf16.mxu1 %v8939_v12 }
 0x222   : > { %1369 = vmatmul.mubr.bf16.gmra.mrb[72].mxu1 %v11713_v36 }
 0x223   : > { %1378 = vmatprep.mubr.bf16.mxu1 %v14507_v1  ;;  %1711 = vmatpush1.bf16.msra.mxu1 %v8938_v25 }
 0x224   : > { %1712 = vmatprep.subr.bf16.mxu1 %v8947_v26 }
 0x227   : > { %1713 = vmatpush1.bf16.msra.mxu1 %v8946_v29 }
 0x228   : > { %1714 = vmatprep.subr.bf16.mxu1 %v8955_v31 }
 0x22a   : > { %1379 = vmatmul.mubr.bf16.gmra.mrb[76].mxu1 %v11721_v51 }
 0x22b   : > { %1388 = vmatprep.mubr.bf16.mxu1 %v14507_v1  ;;  %1715 = vmatpush1.bf16.msra.mxu1 %v8954_v34  ;;  %v10161_v34 = vld [vmem:[#allocation11 + $0x200] ss:$16 sps:$4 sm:$0xff]  }
 0x22c   : > { %1716 = vmatprep.subr.bf16.mxu1 %v8963_v35 }
 0x22f   : > { %1717 = vmatpush1.bf16.msra.mxu1 %v8962_v37 }
 0x230   : > { %5633 = vmatprep.subr.bf16.mxu1 %v10166_v39  ;;  %v10169_v39 = vld [vmem:[#allocation11 + $0x224] ss:$16 sps:$4 sm:$0xff]  }
 0x232   : > { %1389 = vmatmul.mubr.bf16.gmra.mrb[80].mxu1 %v11731_v61 }
 0x233   : > { %1398 = vmatprep.mubr.bf16.mxu1 %v14507_v1 }
 0x23a   : > { %1399 = vmatmul.mubr.bf16.gmra.mrb[84].mxu1 %v11739_v4 }
 0x23b   : > { %1408 = vmatprep.mubr.bf16.mxu1 %v14507_v1 }
 0x242   : > { %1409 = vmatmul.mubr.bf16.gmra.mrb[88].mxu1 %v11747_v9 }
 0x243   : > { %1418 = vmatprep.mubr.bf16.mxu1 %v14507_v1 }
 0x24a   : > { %1419 = vmatmul.mubr.bf16.gmra.mrb[92].mxu1 %v11755_v16 }
 0x24b   : > { %1428 = vmatprep.mubr.bf16.mxu1 %v14507_v1 }
 0x252   : > { %1429 = vmatmul.mubr.bf16.gmra.mrb[96].mxu1 %v11763_v23 }
 0x253   : > { %1438 = vmatprep.mubr.bf16.mxu1 %v14507_v1 }
 0x25a   : > { %1439 = vmatmul.mubr.bf16.gmra.mrb[100].mxu1 %v11771_v30 }
 0x25b   : > { %1448 = vmatprep.mubr.bf16.mxu1 %v14507_v1 }
 0x262   : > { %1449 = vmatmul.mubr.bf16.gmra.mrb[104].mxu1 %v11779_v38 }
 0x263   : > { %1458 = vmatprep.mubr.bf16.mxu1 %v14507_v1 }
 0x265   : > { %v1157_v48 = vpop.f32.mrb[0].mxu1 }
 0x266   : > { %v1158_v49 = vadd.f32 %v1157_v48, %v11864_v46  ;;  %v1159_v50 = vpop.f32.mrb[1].mxu1 }
 0x267   : > { %v1160_v53 = vadd.f32 %v1159_v50, %v11868_v47  ;;  %v1161_v54 = vpop.f32.mrb[2].mxu1  ;;  %v2679_v50 = vld [vmem:[%s11651_s22 + $0x80] sm:$0xff] }
 0x268   : > { %vm1895_vm0 = vcmp.gt.f32.partialorder %v1158_v49, 0.0  ;;  %v2151_v55 = vmul.f32 0.2, %v1158_v49  ;;  %v1162_v57 = vadd.f32 %v1161_v54, %v11864_v46  ;;  %v1163_v58 = vpop.f32.mrb[3].mxu1 }
 0x269   : > { %vm1896_vm1 = vcmp.gt.f32.partialorder %v1160_v53, 0.0  ;;  %v2152_v60 = vmul.f32 0.2, %v1160_v53  ;;  %v1164_v63 = vadd.f32 %v1163_v58, %v11868_v47  ;;  %v2688_v58 = vld [vmem:[%s11651_s22 + $0xc8] sm:$0xff] }
 0x26a   : > { %v2407_v2 = vsel %vm1895_vm0, %v1158_v49, %v2151_v55  ;;  %vm1903_vm2 = vcmp.gt.f32.partialorder %v1162_v57, 0.0  ;;  %v2159_v5 = vmul.f32 0.2, %v1162_v57  ;;  %1459 = vmatmul.mubr.bf16.gmra.mrb[108].mxu1 %v11787_v44 }
 0x26b   : > { %v2408_v7 = vsel %vm1896_vm1, %v1160_v53, %v2152_v60  ;;  %vm1904_vm3 = vcmp.gt.f32.partialorder %v1164_v63, 0.0  ;;  %v2160_v8 = vmul.f32 0.2, %v1164_v63  ;;  %1468 = vmatprep.mubr.bf16.mxu1 %v14507_v1  ;;  %v2919_v15 = vmul.f32 %v2663_v3, %v2407_v2  ;;  %v2687_v53 = vld [vmem:[%s11651_s22 + $0xc0] sm:$0xff]  ;;  %v1543_v2 = vpop.f32.mrb[0].mxu0 }
 0x26c   : > { %v2415_v14 = vsel %vm1903_vm2, %v1162_v57, %v2159_v5  ;;  %v2920_v19 = vmul.f32 %v2664_v10, %v2408_v7  ;;  %v2680_v57 = vld [vmem:[%s11651_s22 + $0x88] sm:$0xff]  ;;  %v11903_v3 = vrot.slane %v11856_v43, %v785_v28  ;;  %v14506_v5 = vsub.s32 2, %v11850_v41 }
 0x26d   : > { %v2927_v17 = vmul.f32 %v2671_v6, %v2415_v14  ;;  %v2416_v18 = vsel %vm1904_vm3, %v1164_v63, %v2160_v8  ;;  %v1167_v20 = vpop.f32.mrb[4].mxu1  ;;  %v10167_v63 = vld [vmem:[#allocation11 + $0x220] ss:$16 sps:$4 sm:$0xff]   ;;  %v1544_v14 = vadd.f32 %v1543_v2, %v11892_v40  ;;  %v2704_v2 = vld [vmem:[%s11651_s22 + $0x148] sm:$0xff] }
 0x26e   : > { %v1168_v11 = vadd.f32 %v1167_v20, %v11864_v46  ;;  %v1169_v12 = vpop.f32.mrb[5].mxu1  ;;  %v2928_v24 = vmul.f32 %v2672_v13, %v2416_v18  ;;  %v10175_v13 = vld [vmem:[#allocation11 + $0x244] ss:$16 sps:$4 sm:$0xff]  }
 0x26f   : > { %v11883_v25 = vpack.c.bf16 %v2927_v17, %v2919_v15  ;;  %v1170_v26 = vadd.f32 %v1169_v12, %v11868_v47  ;;  %v1171_v27 = vpop.f32.mrb[6].mxu1  ;;  %v1545_v15 = vpop.f32.mrb[1].mxu0  ;;  %v14505_v12 = vsub.s32 3, %v11850_v41  ;;  %vm1899_vm8 = vcmp.gt.f32.partialorder %v1544_v14, 0.0 }
 0x270   : > { %vm1911_vm4 = vcmp.gt.f32.partialorder %v1168_v11, 0.0  ;;  %v2167_v29 = vmul.f32 0.2, %v1168_v11  ;;  %v1172_v31 = vadd.f32 %v1171_v27, %v11864_v46  ;;  %v1173_v32 = vpop.f32.mrb[7].mxu1  ;;  %v11888_v33 = vpack.c.bf16 %v2928_v24, %v2920_v19 }
 0x271   : > { %14657 = vst [vmem:[#allocation40_spill] sm:$0xff] %v11883_v25  ;;  %vm1912_vm5 = vcmp.gt.f32.partialorder %v1170_v26, 0.0  ;;  %v2168_v35 = vmul.f32 0.2, %v1170_v26  ;;  %v1174_v37 = vadd.f32 %v1173_v32, %v11868_v47  ;;  %v2155_v27 = vmul.f32 0.2, %v1544_v14 }
 0x272   : > { %v2423_v48 = vsel %vm1911_vm4, %v1168_v11, %v2167_v29  ;;  %vm1919_vm6 = vcmp.gt.f32.partialorder %v1172_v31, 0.0  ;;  %v2175_v49 = vmul.f32 0.2, %v1172_v31  ;;  %1469 = vmatmul.mubr.bf16.gmra.mrb[112].mxu1 %v11795_v52  ;;  %4893 = vmatprep.mubr.bf16.mxu0 %v11888_v33  ;;  %v1547_v11 = vpop.f32.mrb[2].mxu0 }
 0x273   : > { %v2424_v54 = vsel %vm1912_vm5, %v1170_v26, %v2168_v35  ;;  %vm1920_vm7 = vcmp.gt.f32.partialorder %v1174_v37, 0.0  ;;  %v2176_v55 = vmul.f32 0.2, %v1174_v37  ;;  %4894 = vmatmul.mubr.bf16.vlgmr.msra.gmra.mrb[64].mxu0 %v11883_v25  ;;  %1478 = vmatprep.mubr.bf16.mxu1 %v14507_v1  ;;  %v2935_v8 = vmul.f32 %v2679_v50, %v2423_v48  ;;  %v1549_v28 = vpop.f32.mrb[3].mxu0  ;;  %v10173_v35 = vld [vmem:[#allocation11 + $0x240] ss:$16 sps:$4 sm:$0xff]  }
 0x274   : > { %v2431_v60 = vsel %vm1919_vm6, %v1172_v31, %v2175_v49  ;;  %5055 = vmatpush1.bf16.msra.mxu0 %v10161_v34  ;;  %v2936_v20 = vmul.f32 %v2680_v57, %v2424_v54  ;;  %v10181_v48 = vld [vmem:[#allocation11 + $0x264] ss:$16 sps:$4 sm:$0xff]   ;;  %v2411_v49 = vsel %vm1899_vm8, %v1544_v14, %v2155_v27  ;;  %v11936_v14 = vrot.slane %v11856_v43, %v14505_v12  ;;  %v10242_v25 = vld [vmem:[#allocation11 + $0x3e0] ss:$16 sps:$4 sm:$0xff]  }
 0x275   : > { %v2432_v6 = vsel %vm1920_vm7, %v1174_v37, %v2176_v55  ;;  %v1177_v7 = vpop.f32.mrb[8].mxu1  ;;  %v2943_v10 = vmul.f32 %v2687_v53, %v2431_v60  ;;  %5056 = vmatprep.subr.bf16.mxu0 %v10169_v39  ;;  %v2667_v50 = vld [vmem:[%s11651_s22 + $0x20] sm:$0xff]  ;;  %v1548_v27 = vadd.f32 %v1547_v11, %v11892_v40 }
 0x276   : > { %v1178_v17 = vadd.f32 %v1177_v7, %v11864_v46  ;;  %v1179_v18 = vpop.f32.mrb[9].mxu1  ;;  %v2944_v22 = vmul.f32 %v2688_v58, %v2432_v6  ;;  %v2695_v55 = vld [vmem:[%s11651_s22 + $0x100] sm:$0xff]  ;;  %v11928_v6 = vrot.slane %v11856_v43, %v14506_v5  ;;  %v11943_v43 = vadd.f32 %v1549_v28, %v11903_v3 }
 0x277   : > { %v1180_v19 = vadd.f32 %v1179_v18, %v11868_v47  ;;  %v1181_v24 = vpop.f32.mrb[10].mxu1  ;;  %v11910_v26 = vpack.c.bf16 %v2943_v10, %v2935_v8  ;;  %v2703_v57 = vld [vmem:[%s11651_s22 + $0x140] sm:$0xff]  ;;  %v2923_v10 = vmul.f32 %v2667_v50, %v2411_v49  ;;  %vm1907_vm13 = vcmp.gt.f32.partialorder %v1548_v27, 0.0 }
 0x278   : > { %vm1927_vm9 = vcmp.gt.f32.partialorder %v1178_v17, 0.0  ;;  %v2183_v29 = vmul.f32 0.2, %v1178_v17  ;;  %v1182_v31 = vadd.f32 %v1181_v24, %v11864_v46  ;;  %v1183_v32 = vpop.f32.mrb[11].mxu1  ;;  %v11913_v34 = vpack.c.bf16 %v2944_v22, %v2936_v20  ;;  %5057 = vmatpush1.bf16.msra.mxu0 %v10167_v63  ;;  %v2696_v63 = vld [vmem:[%s11651_s22 + $0x108] sm:$0xff]  ;;  %v2675_v11 = vld [vmem:[%s11651_s22 + $0x60] sm:$0xff] }
 0x279   : > { %14658 = vst [vmem:[#allocation41_spill] sm:$0xff] %v11910_v26  ;;  %vm1928_vm10 = vcmp.gt.f32.partialorder %v1180_v19, 0.0  ;;  %v2184_v37 = vmul.f32 0.2, %v1180_v19  ;;  %v1184_v39 = vadd.f32 %v1183_v32, %v11868_v47  ;;  %5058 = vmatprep.subr.bf16.mxu0 %v10175_v13  ;;  %v10179_v8 = vld [vmem:[#allocation11 + $0x260] ss:$16 sps:$4 sm:$0xff]   ;;  %v11931_v13 = vadd.f32 %v1545_v15, %v11903_v3 }
 0x27a   : > { %14659 = vst [vmem:[#allocation42_spill] sm:$0xff] %v11913_v34  ;;  %v2439_v53 = vsel %vm1927_vm9, %v1178_v17, %v2183_v29  ;;  %vm1935_vm11 = vcmp.gt.f32.partialorder %v1182_v31, 0.0  ;;  %v2191_v54 = vmul.f32 0.2, %v1182_v31  ;;  %1479 = vmatmul.mubr.bf16.gmra.mrb[116].mxu1 %v11803_v56  ;;  %4903 = vmatprep.mubr.bf16.mxu0 %v11913_v34  ;;  %v1553_v17 = vpop.f32.mrb[4].mxu0  ;;  %vm1908_vm3 = vcmp.gt.f32.partialorder %v11943_v43, 0.0 }
 0x27b   : > { %v2440_v58 = vsel %vm1928_vm10, %v1180_v19, %v2184_v37  ;;  %vm1936_vm12 = vcmp.gt.f32.partialorder %v1184_v39, 0.0  ;;  %v2192_v60 = vmul.f32 0.2, %v1184_v39  ;;  %4904 = vmatmul.mubr.bf16.gmra.mrb[68].mxu0 %v11910_v26  ;;  %1488 = vmatprep.mubr.bf16.mxu1 %v14507_v1  ;;  %v2951_v22 = vmul.f32 %v2695_v55, %v2439_v53  ;;  %v10187_v24 = vld [vmem:[#allocation11 + $0x284] ss:$16 sps:$4 sm:$0xff]   ;;  %v11939_v29 = vpop.f32.mrb[5].mxu0 }
 0x27c   : > { %v2447_v7 = vsel %vm1935_vm11, %v1182_v31, %v2191_v54  ;;  %5059 = vmatpush1.bf16.msra.mxu0 %v10173_v35  ;;  %v2952_v32 = vmul.f32 %v2696_v63, %v2440_v58  ;;  %v11945_v37 = vpop.f32.mrb[6].mxu0  ;;  %v10185_v58 = vld [vmem:[#allocation11 + $0x280] ss:$16 sps:$4 sm:$0xff]   ;;  %vm1900_vm2 = vcmp.gt.f32.partialorder %v11931_v13, 0.0  ;;  %v10199_v5 = vld [vmem:[#allocation11 + $0x2c4] ss:$16 sps:$4 sm:$0xff]  }
 0x27d   : > { %v2448_v18 = vsel %vm1936_vm12, %v1184_v39, %v2192_v60  ;;  %v1187_v20 = vpop.f32.mrb[12].mxu1  ;;  %v2959_v19 = vmul.f32 %v2703_v57, %v2447_v7  ;;  %5060 = vmatprep.subr.bf16.mxu0 %v10181_v48  ;;  %v2163_v48 = vmul.f32 0.2, %v1548_v27  ;;  %v11951_v53 = vpop.f32.mrb[7].mxu0 }
 0x27e   : > { %v1188_v15 = vadd.f32 %v1187_v20, %v11864_v46  ;;  %v1189_v31 = vpop.f32.mrb[13].mxu1  ;;  %v2960_v35 = vmul.f32 %v2704_v2, %v2448_v18  ;;  %v10193_v2 = vld [vmem:[#allocation11 + $0x2a4] ss:$16 sps:$4 sm:$0xff]  }
 0x27f   : > { %v1190_v39 = vadd.f32 %v1189_v31, %v11868_v47  ;;  %v1191_v49 = vpop.f32.mrb[14].mxu1  ;;  %v11948_v50 = vpack.c.bf16 %v2959_v19, %v2951_v22  ;;  %v2419_v7 = vsel %vm1907_vm13, %v1548_v27, %v2163_v48  ;;  %v2712_v22 = vld [vmem:[%s11651_s22 + $0x188] sm:$0xff]  ;;  %v2711_v19 = vld [vmem:[%s11651_s22 + $0x180] sm:$0xff]  ;;  %v1554_v27 = vadd.f32 %v1553_v17, %v11892_v40 }
 0x280   : > { %vm1943_vm14 = vcmp.gt.f32.partialorder %v1188_v15, 0.0  ;;  %v2199_v54 = vmul.f32 0.2, %v1188_v15  ;;  %v1192_v55 = vadd.f32 %v1191_v49, %v11864_v46  ;;  %v1193_v57 = vpop.f32.mrb[15].mxu1  ;;  %v11954_v28 = vpack.c.bf16 %v2960_v35, %v2952_v32  ;;  %5061 = vmatpush1.bf16.msra.mxu0 %v10179_v8  ;;  %v2719_v8 = vld [vmem:[%s11651_s22 + $0x1c0] sm:$0xff] }
 0x281   : > { %14660 = vst [vmem:[#allocation43_spill] sm:$0xff] %v11948_v50  ;;  %vm1944_vm15 = vcmp.gt.f32.partialorder %v1190_v39, 0.0  ;;  %v2200_v60 = vmul.f32 0.2, %v1190_v39  ;;  %v1194_v63 = vadd.f32 %v1193_v57, %v11868_v47  ;;  %5062 = vmatprep.subr.bf16.mxu0 %v10187_v24  ;;  %v2931_v31 = vmul.f32 %v2675_v11, %v2419_v7  ;;  %v2720_v24 = vld [vmem:[%s11651_s22 + $0x1c8] sm:$0xff]  ;;  %v11971_v11 = vpop.f32.mrb[8].mxu0 }
 0x282   : > { %14661 = vst [vmem:[#allocation44_spill] sm:$0xff] %v11954_v28  ;;  %v2455_v18 = vsel %vm1943_vm14, %v1188_v15, %v2199_v54  ;;  %vm1951_vm0 = vcmp.gt.f32.partialorder %v1192_v55, 0.0  ;;  %v2207_v20 = vmul.f32 0.2, %v1192_v55  ;;  %1489 = vmatmul.mubr.bf16.gmra.mrb[120].mxu1 %v11811_v59  ;;  %4913 = vmatprep.mubr.bf16.mxu0 %v11954_v28  ;;  %v10191_v49 = vld [vmem:[#allocation11 + $0x2a0] ss:$16 sps:$4 sm:$0xff]  }
 0x283   : > { %v2456_v32 = vsel %vm1944_vm15, %v1190_v39, %v2200_v60  ;;  %vm1952_vm1 = vcmp.gt.f32.partialorder %v1194_v63, 0.0  ;;  %v2208_v35 = vmul.f32 0.2, %v1194_v63  ;;  %4914 = vmatmul.mubr.bf16.gmra.mrb[72].mxu0 %v11948_v50  ;;  %1498 = vmatprep.mubr.bf16.mxu1 %v14507_v1  ;;  %v2156_v48 = vmul.f32 0.2, %v11931_v13  ;;  %v11973_v1 = vpop.f32.mrb[9].mxu0 }
 0x284   : > { %v2463_v15 = vsel %vm1951_vm0, %v1192_v55, %v2207_v20  ;;  %5063 = vmatpush1.bf16.msra.mxu0 %v10185_v58  ;;  %v11969_v54 = vpack.c.bf16 %v2931_v31, %v2923_v10  ;;  %v2968_v60 = vmul.f32 %v2712_v22, %v2456_v32  ;;  %v2967_v7 = vmul.f32 %v2711_v19, %v2455_v18  ;;  %v11978_v20 = vpop.f32.mrb[10].mxu0 }
 0x285   : > { %v2464_v39 = vsel %vm1952_vm1, %v1194_v63, %v2208_v35  ;;  %v1197_v57 = vpop.f32.mrb[16].mxu1  ;;  %v2975_v12 = vmul.f32 %v2719_v8, %v2463_v15  ;;  %5064 = vmatprep.subr.bf16.mxu0 %v10193_v2  ;;  %v2164_v10 = vmul.f32 0.2, %v11943_v43  ;;  %v2171_v18 = vmul.f32 0.2, %v1554_v27  ;;  %v11987_v19 = vpop.f32.mrb[11].mxu0 }
 0x286   : > { %14662 = vst [vmem:[#allocation45_spill] sm:$0xff] %v11969_v54  ;;  %v1198_v17 = vadd.f32 %v1197_v57, %v11864_v46  ;;  %v1199_v55 = vpop.f32.mrb[17].mxu1  ;;  %v2976_v58 = vmul.f32 %v2720_v24, %v2464_v39  ;;  %v11985_v2 = vadd.f32 %v11939_v29, %v11903_v3  ;;  %v10205_v29 = vld [vmem:[#allocation11 + $0x2e4] ss:$16 sps:$4 sm:$0xff]   ;;  %vm1915_vm6 = vcmp.gt.f32.partialorder %v1554_v27, 0.0 }
 0x287   : > { %v1200_v63 = vadd.f32 %v1199_v55, %v11868_v47  ;;  %v1201_v31 = vpop.f32.mrb[18].mxu1  ;;  %v11981_v22 = vpack.c.bf16 %v2975_v12, %v2967_v7  ;;  %v10197_v12 = vld [vmem:[#allocation11 + $0x2c0] ss:$16 sps:$4 sm:$0xff]  }
 0x288   : > { %vm1959_vm4 = vcmp.gt.f32.partialorder %v1198_v17, 0.0  ;;  %v2215_v8 = vmul.f32 0.2, %v1198_v17  ;;  %v1202_v32 = vadd.f32 %v1201_v31, %v11864_v46  ;;  %v1203_v35 = vpop.f32.mrb[19].mxu1  ;;  %v11990_v24 = vpack.c.bf16 %v2976_v58, %v2968_v60  ;;  %5065 = vmatpush1.bf16.msra.mxu0 %v10191_v49  ;;  %v2728_v60 = vld [vmem:[%s11651_s22 + $0x208] sm:$0xff]  ;;  %v2727_v55 = vld [vmem:[%s11651_s22 + $0x200] sm:$0xff] }
 0x289   : > { %14663 = vst [vmem:[#allocation46_spill] sm:$0xff] %v11981_v22  ;;  %vm1960_vm5 = vcmp.gt.f32.partialorder %v1200_v63, 0.0  ;;  %v2216_v15 = vmul.f32 0.2, %v1200_v63  ;;  %v1204_v39 = vadd.f32 %v1203_v35, %v11868_v47  ;;  %5066 = vmatprep.subr.bf16.mxu0 %v10199_v5  ;;  %v2735_v58 = vld [vmem:[%s11651_s22 + $0x240] sm:$0xff]  ;;  %v12001_v49 = vsel %vm1900_vm2, %v11931_v13, %v2156_v48 }
 0x28a   : > { %14664 = vst [vmem:[#allocation47_spill] sm:$0xff] %v11990_v24  ;;  %v2471_v57 = vsel %vm1959_vm4, %v1198_v17, %v2215_v8  ;;  %vm1967_vm7 = vcmp.gt.f32.partialorder %v1202_v32, 0.0  ;;  %v2223_v7 = vmul.f32 0.2, %v1202_v32  ;;  %1499 = vmatmul.mubr.bf16.gmra.mrb[124].mxu1 %v11819_v0  ;;  %4923 = vmatprep.mubr.bf16.mxu0 %v11990_v24  ;;  %14665 = vst [vmem:[#allocation48_spill] sm:$0xff] %v12001_v49  ;;  %v14666_v17 = vmov 0  }
 0x28b   : > { %v2472_v31 = vsel %vm1960_vm5, %v1200_v63, %v2216_v15  ;;  %vm1968_vm8 = vcmp.gt.f32.partialorder %v1204_v39, 0.0  ;;  %v2224_v5 = vmul.f32 0.2, %v1204_v39  ;;  %4924 = vmatmul.mubr.bf16.gmra.mrb[76].mxu0 %v11981_v22  ;;  %1734 = vmatprep.mubr.bf16.mxu1 %v14666_v17  ;;  %v2736_v8 = vld [vmem:[%s11651_s22 + $0x248] sm:$0xff]  ;;  %v12008_v35 = vadd.f32 %v11945_v37, %v11892_v40  ;;  %v12019_v63 = vpop.f32.mrb[12].mxu0 }
 0x28c   : > { %v2479_v45 = vsel %vm1967_vm7, %v1202_v32, %v2223_v7  ;;  %5067 = vmatpush1.bf16.msra.mxu0 %v10197_v12  ;;  %v12013_v13 = vsel %vm1908_vm3, %v11943_v43, %v2164_v10  ;;  %v12016_v48 = vsel %vm1915_vm6, %v1554_v27, %v2171_v18  ;;  %vm1916_vm9 = vcmp.gt.f32.partialorder %v11985_v2, 0.0  ;;  %v10211_v32 = vld [vmem:[#allocation11 + $0x304] ss:$16 sps:$4 sm:$0xff]   ;;  %v12021_v12 = vpop.f32.mrb[13].mxu0 }
 0x28d   : > { %14667 = vst [vmem:[#allocation49_spill] sm:$0xff] %v12013_v13  ;;  %14668 = vst [vmem:[#allocation50_spill] sm:$0xff] %v12016_v48  ;;  %v2480_v15 = vsel %vm1968_vm8, %v1204_v39, %v2224_v5  ;;  %v1207_v54 = vpop.f32.mrb[20].mxu1  ;;  %v2984_v49 = vmul.f32 %v2728_v60, %v2472_v31  ;;  %v2983_v37 = vmul.f32 %v2727_v55, %v2471_v57  ;;  %5068 = vmatprep.subr.bf16.mxu0 %v10205_v29  ;;  %v10164_v13 = vld [vmem:[#allocation11 + $0x8] ss:$16 sps:$4 sm:$0xff]   ;;  %v12027_v39 = vpop.f32.mrb[14].mxu0 }
 0x28e   : > { %v2991_v41 = vmul.f32 %v2735_v58, %v2479_v45  ;;  %v1208_v7 = vadd.f32 %v1207_v54, %v11864_v46  ;;  %v1209_v43 = vpop.f32.mrb[21].mxu1  ;;  %v2992_v10 = vmul.f32 %v2736_v8, %v2480_v15  ;;  %v2172_v27 = vmul.f32 0.2, %v11985_v2  ;;  %v10172_v60 = vld [vmem:[#allocation11 + $0x2c] ss:$16 sps:$4 sm:$0xff]   ;;  %v12037_v58 = vpop.f32.mrb[15].mxu0 }
 0x28f   : > { %v1560_v18 = vadd.f32 %v11951_v53, %v11903_v3  ;;  %v1210_v45 = vadd.f32 %v1209_v43, %v11868_v47  ;;  %v1211_v29 = vpop.f32.mrb[22].mxu1  ;;  %v2179_v54 = vmul.f32 0.2, %v12008_v35  ;;  %v12035_v55 = vadd.f32 %v11971_v11, %v11892_v40  ;;  %v2743_v15 = vld [vmem:[%s11651_s22 + $0x280] sm:$0xff]  ;;  %v2744_v11 = vld [vmem:[%s11651_s22 + $0x288] sm:$0xff] }
 0x290   : > { %v12030_v57 = vpack.c.bf16 %v2991_v41, %v2983_v37  ;;  %vm1975_vm10 = vcmp.gt.f32.partialorder %v1208_v7, 0.0  ;;  %v2231_v31 = vmul.f32 0.2, %v1208_v7  ;;  %v1212_v53 = vadd.f32 %v1211_v29, %v11864_v46  ;;  %v1213_v5 = vpop.f32.mrb[23].mxu1  ;;  %v2751_v41 = vld [vmem:[%s11651_s22 + $0x2c0] sm:$0xff]  ;;  %5069 = vmatpush1.bf16.msra.mxu0 %v10203_v42 }
 0x291   : > { %v12040_v8 = vpack.c.bf16 %v2992_v10, %v2984_v49  ;;  %v10209_v37 = vld [vmem:[#allocation11 + $0x300] ss:$16 sps:$4 sm:$0xff]   ;;  %vm1976_vm11 = vcmp.gt.f32.partialorder %v1210_v45, 0.0  ;;  %v2232_v43 = vmul.f32 0.2, %v1210_v45  ;;  %v1214_v48 = vadd.f32 %v1213_v5, %v11868_v47  ;;  %5070 = vmatprep.subr.bf16.mxu0 %v10211_v32  ;;  %v2752_v49 = vld [vmem:[%s11651_s22 + $0x2c8] sm:$0xff] }
 0x292   : > { %14669 = vst [vmem:[#allocation51_spill] sm:$0xff] %v12030_v57  ;;  %v10217_v22 = vld [vmem:[#allocation11 + $0x324] ss:$16 sps:$4 sm:$0xff]   ;;  %vm1923_vm12 = vcmp.gt.f32.partialorder %v12008_v35, 0.0  ;;  %v2487_v24 = vsel %vm1975_vm10, %v1208_v7, %v2231_v31  ;;  %vm1983_vm13 = vcmp.gt.f32.partialorder %v1212_v53, 0.0  ;;  %1735 = vmatmul.mubr.bf16.vlgmr.msra.gmra.mrb[128].mxu1 %v11695_v62  ;;  %vm1924_vm15 = vcmp.gt.f32.partialorder %v1560_v18, 0.0 }
 0x293   : > { %14670 = vst [vmem:[#allocation52_spill] sm:$0xff] %v12040_v8  ;;  %v2239_v29 = vmul.f32 0.2, %v1212_v53  ;;  %4933 = vmatprep.mubr.bf16.mxu0 %v12040_v8  ;;  %v2180_v42 = vmul.f32 0.2, %v1560_v18  ;;  %v2488_v10 = vsel %vm1976_vm11, %v1210_v45, %v2232_v43  ;;  %vm1984_vm14 = vcmp.gt.f32.partialorder %v1214_v48, 0.0  ;;  %5634 = vmatpush1.bf16.msra.mxu1 %v10164_v13 }
 0x294   : > { %v2240_v50 = vmul.f32 0.2, %v1214_v48  ;;  %4934 = vmatmul.mubr.bf16.gmra.mrb[80].mxu0 %v12030_v57  ;;  %v10170_v32 = vld [vmem:[#allocation11 + $0x28] ss:$16 sps:$4 sm:$0xff]   ;;  %1744 = vmatprep.mubr.bf16.mxu1 %v14666_v17  ;;  %v10178_v7 = vld [vmem:[#allocation11 + $0x4c] ss:$16 sps:$4 sm:$0xff]   ;;  %v12056_v62 = vsel %vm1916_vm9, %v11985_v2, %v2172_v27  ;;  %v12061_v45 = vsel %vm1923_vm12, %v12008_v35, %v2179_v54  ;;  %v2999_v43 = vmul.f32 %v2743_v15, %v2487_v24 }
 0x295   : > { %v2495_v5 = vsel %vm1983_vm13, %v1212_v53, %v2239_v29  ;;  %5635 = vmatprep.subr.bf16.mxu1 %v10172_v60  ;;  %14671 = vst [vmem:[#allocation53_spill] sm:$0xff] %v12056_v62  ;;  %14672 = vst [vmem:[#allocation54_spill] sm:$0xff] %v12061_v45  ;;  %vm1931_vm0 = vcmp.gt.f32.partialorder %v12035_v55, 0.0  ;;  %v12064_v13 = vpop.f32.mrb[16].mxu0  ;;  %v1217_v53 = vpop.f32.mrb[24].mxu1  ;;  %5071 = vmatpush1.bf16.msra.mxu0 %v10209_v37  ;;  %v1566_v57 = vadd.f32 %v11973_v1, %v11903_v3 }
 0x296   : > { %v2496_v31 = vsel %vm1984_vm14, %v1214_v48, %v2240_v50  ;;  %v3007_v29 = vmul.f32 %v2751_v41, %v2495_v5  ;;  %v10215_v60 = vld [vmem:[#allocation11 + $0x320] ss:$16 sps:$4 sm:$0xff]   ;;  %v12068_v2 = vpop.f32.mrb[17].mxu0  ;;  %v1218_v27 = vadd.f32 %v1217_v53, %v11864_v46  ;;  %v1219_v62 = vpop.f32.mrb[25].mxu1  ;;  %v3000_v35 = vmul.f32 %v2744_v11, %v2488_v10  ;;  %v10176_v45 = vld [vmem:[#allocation11 + $0x48] ss:$16 sps:$4 sm:$0xff]   ;;  %5072 = vmatprep.subr.bf16.mxu0 %v10217_v22 }
 0x297   : > { %v3008_v54 = vmul.f32 %v2752_v49, %v2496_v31  ;;  %v12072_v8 = vsel %vm1924_vm15, %v1560_v18, %v2180_v42  ;;  %v12074_v50 = vpop.f32.mrb[18].mxu0  ;;  %v1220_v24 = vadd.f32 %v1219_v62, %v11868_v47  ;;  %v1221_v48 = vpop.f32.mrb[26].mxu1  ;;  %5636 = vmatpush1.bf16.msra.mxu1 %v10170_v32  ;;  %v10184_v1 = vld [vmem:[#allocation11 + $0x6c] ss:$16 sps:$4 sm:$0xff]   ;;  %v2187_v41 = vmul.f32 0.2, %v12035_v55 }
 0x298   : > { %14673 = vst [vmem:[#allocation55_spill] sm:$0xff] %v12072_v8  ;;  %v12077_v15 = vpack.c.bf16 %v3007_v29, %v2999_v43  ;;  %v2188_v37 = vmul.f32 0.2, %v1566_v57  ;;  %v12080_v11 = vpop.f32.mrb[19].mxu0  ;;  %vm1991_vm1 = vcmp.gt.f32.partialorder %v1218_v27, 0.0  ;;  %v1222_v18 = vadd.f32 %v1221_v48, %v11864_v46  ;;  %v1223_v49 = vpop.f32.mrb[27].mxu1  ;;  %5637 = vmatprep.subr.bf16.mxu1 %v10178_v7 }
 0x299   : > { %v2247_v22 = vmul.f32 0.2, %v1218_v27  ;;  %v12083_v42 = vpack.c.bf16 %v3008_v54, %v3000_v35  ;;  %v2759_v10 = vld [vmem:[%s11651_s22 + $0x300] sm:$0xff]  ;;  %vm1992_vm2 = vcmp.gt.f32.partialorder %v1220_v24, 0.0  ;;  %v2248_v62 = vmul.f32 0.2, %v1220_v24  ;;  %5073 = vmatpush1.bf16.msra.mxu0 %v10215_v60 }
 0x29a   : > { %14674 = vst [vmem:[#allocation56_spill] sm:$0xff] %v12077_v15  ;;  %v10223_v5 = vld [vmem:[#allocation11 + $0x344] ss:$16 sps:$4 sm:$0xff]   ;;  %v1224_v32 = vadd.f32 %v1223_v49, %v11868_v47  ;;  %v10221_v31 = vld [vmem:[#allocation11 + $0x340] ss:$16 sps:$4 sm:$0xff]   ;;  %vm1932_vm3 = vcmp.gt.f32.partialorder %v1566_v57, 0.0  ;;  %1745 = vmatmul.mubr.bf16.gmra.mrb[132].mxu1 %v11707_v21  ;;  %v12092_v35 = vadd.f32 %v11978_v20, %v11892_v40  ;;  %v12100_v21 = vadd.f32 %v11987_v19, %v11903_v3 }
 0x29b   : > { %14675 = vst [vmem:[#allocation57_spill] sm:$0xff] %v12083_v42  ;;  %v2503_v53 = vsel %vm1991_vm1, %v1218_v27, %v2247_v22  ;;  %vm1999_vm4 = vcmp.gt.f32.partialorder %v1222_v18, 0.0  ;;  %v2255_v43 = vmul.f32 0.2, %v1222_v18  ;;  %4943 = vmatprep.mubr.bf16.mxu0 %v12083_v42  ;;  %v2767_v29 = vld [vmem:[%s11651_s22 + $0x340] sm:$0xff]  ;;  %v2504_v54 = vsel %vm1992_vm2, %v1220_v24, %v2248_v62  ;;  %1754 = vmatprep.mubr.bf16.mxu1 %v14666_v17  ;;  %v2760_v27 = vld [vmem:[%s11651_s22 + $0x308] sm:$0xff] }
 0x29c   : > { %v10226_v7 = vld [vmem:[#allocation11 + $0x364] ss:$16 sps:$4 sm:$0xff]   ;;  %vm2000_vm5 = vcmp.gt.f32.partialorder %v1224_v32, 0.0  ;;  %v2256_v60 = vmul.f32 0.2, %v1224_v32  ;;  %4944 = vmatmul.mubr.bf16.gmra.mrb[84].mxu0 %v12077_v15  ;;  %v2768_v48 = vld [vmem:[%s11651_s22 + $0x348] sm:$0xff]  ;;  %5638 = vmatpush1.bf16.msra.mxu1 %v10176_v45  ;;  %v12105_v20 = vsel %vm1931_vm0, %v12035_v55, %v2187_v41  ;;  %v12108_v24 = vsel %vm1932_vm3, %v1566_v57, %v2188_v37 }
 0x29d   : > { %v2511_v22 = vsel %vm1999_vm4, %v1222_v18, %v2255_v43  ;;  %v10182_v49 = vld [vmem:[#allocation11 + $0x68] ss:$16 sps:$4 sm:$0xff]   ;;  %5074 = vmatprep.subr.bf16.mxu0 %v10223_v5  ;;  %14676 = vst [vmem:[#allocation58_spill] sm:$0xff] %v12105_v20  ;;  %14677 = vst [vmem:[#allocation59_spill] sm:$0xff] %v12108_v24  ;;  %v12110_v62 = vpop.f32.mrb[20].mxu0  ;;  %v1227_v15 = vpop.f32.mrb[28].mxu1  ;;  %v3015_v42 = vmul.f32 %v2759_v10, %v2503_v53  ;;  %5639 = vmatprep.subr.bf16.mxu1 %v10184_v1 }
 0x29e   : > { %v2512_v8 = vsel %vm2000_vm5, %v1224_v32, %v2256_v60  ;;  %v3023_v28 = vmul.f32 %v2767_v29, %v2511_v22  ;;  %v10190_v19 = vld [vmem:[#allocation11 + $0x8c] ss:$16 sps:$4 sm:$0xff]   ;;  %5075 = vmatpush1.bf16.msra.mxu0 %v10221_v31  ;;  %v10224_v45 = vld [vmem:[#allocation11 + $0x360] ss:$16 sps:$4 sm:$0xff]   ;;  %v12112_v18 = vpop.f32.mrb[21].mxu0  ;;  %v1228_v5 = vadd.f32 %v1227_v15, %v11864_v46  ;;  %v1229_v43 = vpop.f32.mrb[29].mxu1  ;;  %v3016_v55 = vmul.f32 %v2760_v27, %v2504_v54 }
 0x29f   : > { %v3024_v41 = vmul.f32 %v2768_v48, %v2512_v8  ;;  %v10188_v20 = vld [vmem:[#allocation11 + $0x88] ss:$16 sps:$4 sm:$0xff]   ;;  %5076 = vmatprep.subr.bf16.mxu0 %v10226_v7  ;;  %vm1939_vm6 = vcmp.gt.f32.partialorder %v12092_v35, 0.0  ;;  %v12116_v57 = vpop.f32.mrb[22].mxu0  ;;  %v1230_v37 = vadd.f32 %v1229_v43, %v11868_v47  ;;  %v1231_v1 = vpop.f32.mrb[30].mxu1  ;;  %v2775_v60 = vld [vmem:[%s11651_s22 + $0x380] sm:$0xff] }
 0x2a0   : > { %v12119_v10 = vpack.c.bf16 %v3023_v28, %v3015_v42  ;;  %v10196_v32 = vld [vmem:[#allocation11 + $0xac] ss:$16 sps:$4 sm:$0xff]   ;;  %v2195_v31 = vmul.f32 0.2, %v12092_v35  ;;  %v2196_v15 = vmul.f32 0.2, %v12100_v21  ;;  %v1232_v29 = vadd.f32 %v1231_v1, %v11864_v46  ;;  %5640 = vmatpush1.bf16.msra.mxu1 %v10182_v49 }
 0x2a1   : > { %v12123_v53 = vpop.f32.mrb[23].mxu0  ;;  %vm2007_vm7 = vcmp.gt.f32.partialorder %v1228_v5, 0.0  ;;  %v2263_v8 = vmul.f32 0.2, %v1228_v5  ;;  %v1233_v7 = vpop.f32.mrb[31].mxu1  ;;  %v12126_v54 = vpack.c.bf16 %v3024_v41, %v3016_v55  ;;  %vm2008_vm8 = vcmp.gt.f32.partialorder %v1230_v37, 0.0  ;;  %5641 = vmatprep.subr.bf16.mxu1 %v10190_v19 }
 0x2a2   : > { %14678 = vst [vmem:[#allocation60_spill] sm:$0xff] %v12119_v10  ;;  %v10232_v27 = vld [vmem:[#allocation11 + $0x384] ss:$16 sps:$4 sm:$0xff]   ;;  %v2264_v28 = vmul.f32 0.2, %v1230_v37  ;;  %v1234_v42 = vadd.f32 %v1233_v7, %v11868_v47  ;;  %5077 = vmatpush1.bf16.msra.mxu0 %v10224_v45  ;;  %vm1940_vm9 = vcmp.gt.f32.partialorder %v12100_v21, 0.0  ;;  %1755 = vmatmul.mubr.bf16.gmra.mrb[136].mxu1 %v11713_v36  ;;  %v12136_v41 = vadd.f32 %v12019_v63, %v11892_v40 }
 0x2a3   : > { %14679 = vst [vmem:[#allocation61_spill] sm:$0xff] %v12126_v54  ;;  %v10230_v48 = vld [vmem:[#allocation11 + $0x380] ss:$16 sps:$4 sm:$0xff]   ;;  %v2519_v22 = vsel %vm2007_vm7, %v1228_v5, %v2263_v8  ;;  %vm2015_vm10 = vcmp.gt.f32.partialorder %v1232_v29, 0.0  ;;  %v2271_v43 = vmul.f32 0.2, %v1232_v29  ;;  %4953 = vmatprep.mubr.bf16.mxu0 %v12126_v54  ;;  %1764 = vmatprep.mubr.bf16.mxu1 %v14666_v17  ;;  %v12145_v36 = vsel %vm1939_vm6, %v12092_v35, %v2195_v31 }
 0x2a4   : > { %v2783_v49 = vld [vmem:[%s11651_s22 + $0x3c0] sm:$0xff]  ;;  %v2520_v19 = vsel %vm2008_vm8, %v1230_v37, %v2264_v28  ;;  %vm2016_vm11 = vcmp.gt.f32.partialorder %v1234_v42, 0.0  ;;  %v2272_v45 = vmul.f32 0.2, %v1234_v42  ;;  %4954 = vmatmul.mubr.bf16.gmra.mrb[88].mxu0 %v12119_v10  ;;  %v2776_v5 = vld [vmem:[%s11651_s22 + $0x388] sm:$0xff]  ;;  %14680 = vst [vmem:[#allocation62_spill] sm:$0xff] %v12145_v36  ;;  %5642 = vmatpush1.bf16.msra.mxu1 %v10188_v20  ;;  %v12150_v63 = vsel %vm1940_vm9, %v12100_v21, %v2196_v15 }
 0x2a5   : > { %v10235_v55 = vld [vmem:[#allocation11 + $0x3a4] ss:$16 sps:$4 sm:$0xff]   ;;  %v2784_v1 = vld [vmem:[%s11651_s22 + $0x3c8] sm:$0xff]  ;;  %v2527_v8 = vsel %vm2015_vm10, %v1232_v29, %v2271_v43  ;;  %5078 = vmatprep.subr.bf16.mxu0 %v10232_v27  ;;  %14681 = vst [vmem:[#allocation63_spill] sm:$0xff] %v12150_v63  ;;  %v12154_v37 = vadd.f32 %v12021_v12, %v11903_v3  ;;  %v12156_v28 = vpop.f32.mrb[24].mxu0  ;;  %v1237_v10 = vpop.f32.mrb[32].mxu1  ;;  %v3031_v54 = vmul.f32 %v2775_v60, %v2519_v22 }
 0x2a6   : > { %v10194_v7 = vld [vmem:[#allocation11 + $0xa8] ss:$16 sps:$4 sm:$0xff]   ;;  %v2528_v24 = vsel %vm2016_vm11, %v1234_v42, %v2272_v45  ;;  %v3039_v35 = vmul.f32 %v2783_v49, %v2527_v8  ;;  %5643 = vmatprep.subr.bf16.mxu1 %v10196_v32  ;;  %v10202_v31 = vld [vmem:[#allocation11 + $0xcc] ss:$16 sps:$4 sm:$0xff]   ;;  %5079 = vmatpush1.bf16.msra.mxu0 %v10230_v48  ;;  %v10233_v20 = vld [vmem:[#allocation11 + $0x3a0] ss:$16 sps:$4 sm:$0xff]   ;;  %v1238_v27 = vadd.f32 %v1237_v10, %v11864_v46 }
 0x2a7   : > { %v12158_v29 = vpop.f32.mrb[25].mxu0  ;;  %v1239_v21 = vpop.f32.mrb[33].mxu1  ;;  %v3032_v15 = vmul.f32 %v2776_v5, %v2520_v19  ;;  %v3040_v43 = vmul.f32 %v2784_v1, %v2528_v24  ;;  %v10200_v36 = vld [vmem:[#allocation11 + $0xc8] ss:$16 sps:$4 sm:$0xff]   ;;  %5080 = vmatprep.subr.bf16.mxu0 %v10235_v55  ;;  %vm1947_vm12 = vcmp.gt.f32.partialorder %v12136_v41, 0.0  ;;  %v12170_v24 = vadd.f32 %v12027_v39, %v11892_v40 }
 0x2a8   : > { %v12162_v12 = vpop.f32.mrb[26].mxu0  ;;  %v1240_v60 = vadd.f32 %v1239_v21, %v11868_v47  ;;  %v1241_v32 = vpop.f32.mrb[34].mxu1  ;;  %v12165_v42 = vpack.c.bf16 %v3039_v35, %v3031_v54  ;;  %v10208_v48 = vld [vmem:[#allocation11 + $0xec] ss:$16 sps:$4 sm:$0xff]   ;;  %v2203_v10 = vmul.f32 0.2, %v12136_v41  ;;  %5644 = vmatpush1.bf16.msra.mxu1 %v10194_v7  ;;  %v12183_v63 = vadd.f32 %v12037_v58, %v11903_v3 }
 0x2a9   : > { %v12172_v22 = vpop.f32.mrb[27].mxu0  ;;  %vm2023_vm13 = vcmp.gt.f32.partialorder %v1238_v27, 0.0  ;;  %v2279_v49 = vmul.f32 0.2, %v1238_v27  ;;  %v1242_v55 = vadd.f32 %v1241_v32, %v11864_v46  ;;  %v1243_v19 = vpop.f32.mrb[35].mxu1  ;;  %v12175_v45 = vpack.c.bf16 %v3040_v43, %v3032_v15  ;;  %v2791_v54 = vld [vmem:[%s11651_s22 + $0x400] sm:$0xff]  ;;  %5645 = vmatprep.subr.bf16.mxu1 %v10202_v31 }
 0x2aa   : > { %14682 = vst [vmem:[#allocation64_spill] sm:$0xff] %v12165_v42  ;;  %v10241_v5 = vld [vmem:[#allocation11 + $0x3c4] ss:$16 sps:$4 sm:$0xff]   ;;  %vm2024_vm14 = vcmp.gt.f32.partialorder %v1240_v60, 0.0  ;;  %v2280_v1 = vmul.f32 0.2, %v1240_v60  ;;  %v1244_v8 = vadd.f32 %v1243_v19, %v11868_v47  ;;  %5081 = vmatpush1.bf16.msra.mxu0 %v10233_v20  ;;  %1765 = vmatmul.mubr.bf16.gmra.mrb[140].mxu1 %v11721_v51  ;;  %v12196_v51 = vsel %vm1947_vm12, %v12136_v41, %v2203_v10 }
 0x2ab   : > { %14683 = vst [vmem:[#allocation65_spill] sm:$0xff] %v12175_v45  ;;  %v2792_v35 = vld [vmem:[%s11651_s22 + $0x408] sm:$0xff]  ;;  %v2799_v21 = vld [vmem:[%s11651_s22 + $0x440] sm:$0xff]  ;;  %v2535_v15 = vsel %vm2023_vm13, %v1238_v27, %v2279_v49  ;;  %vm2031_vm15 = vcmp.gt.f32.partialorder %v1242_v55, 0.0  ;;  %v2287_v43 = vmul.f32 0.2, %v1242_v55  ;;  %4963 = vmatprep.mubr.bf16.mxu0 %v12175_v45  ;;  %1774 = vmatprep.mubr.bf16.mxu1 %v14666_v17 }
 0x2ac   : > { %v10239_v39 = vld [vmem:[#allocation11 + $0x3c0] ss:$16 sps:$4 sm:$0xff]   ;;  %v10206_v7 = vld [vmem:[#allocation11 + $0xe8] ss:$16 sps:$4 sm:$0xff]   ;;  %v10244_v32 = vld [vmem:[#allocation11 + $0x3e4] ss:$16 sps:$4 sm:$0xff]   ;;  %v2536_v31 = vsel %vm2024_vm14, %v1240_v60, %v2280_v1  ;;  %4964 = vmatmul.mubr.bf16.gmra.mrb[92].mxu0 %v12165_v42  ;;  %5646 = vmatpush1.bf16.msra.mxu1 %v10200_v36  ;;  %v3047_v26 = vmul.f32 %v2791_v54, %v2535_v15 }
 0x2ad   : > { %vm1948_vm0 = vcmp.gt.f32.partialorder %v12154_v37, 0.0  ;;  %vm2032_vm1 = vcmp.gt.f32.partialorder %v1244_v8, 0.0  ;;  %v2288_v20 = vmul.f32 0.2, %v1244_v8  ;;  %v2800_v58 = vld [vmem:[%s11651_s22 + $0x448] sm:$0xff]  ;;  %14684 = vst [vmem:[#allocation66_spill] sm:$0xff] %v12196_v51  ;;  %v2543_v49 = vsel %vm2031_vm15, %v1242_v55, %v2287_v43  ;;  %5082 = vmatprep.subr.bf16.mxu0 %v10241_v5  ;;  %5647 = vmatprep.subr.bf16.mxu1 %v10208_v48 }
 0x2ae   : > { %v10214_v27 = vld [vmem:[#allocation11 + $0x10c] ss:$16 sps:$4 sm:$0xff]   ;;  %v2204_v19 = vmul.f32 0.2, %v12154_v37  ;;  %vm1955_vm2 = vcmp.gt.f32.partialorder %v12170_v24, 0.0  ;;  %v12201_v1 = vpop.f32.mrb[28].mxu0  ;;  %v3055_v34 = vmul.f32 %v2799_v21, %v2543_v49  ;;  %5083 = vmatpush1.bf16.msra.mxu0 %v10239_v39  ;;  %v3048_v55 = vmul.f32 %v2792_v35, %v2536_v31 }
 0x2af   : > { %v2211_v60 = vmul.f32 0.2, %v12170_v24  ;;  %v2544_v42 = vsel %vm2032_vm1, %v1244_v8, %v2288_v20  ;;  %v1247_v45 = vpop.f32.mrb[36].mxu1  ;;  %vm1956_vm3 = vcmp.gt.f32.partialorder %v12183_v63, 0.0  ;;  %v12204_v41 = vpop.f32.mrb[29].mxu0  ;;  %5084 = vmatprep.subr.bf16.mxu0 %v10244_v32  ;;  %v12215_v39 = vadd.f32 %v12064_v13, %v11892_v40  ;;  %v2807_v20 = vld [vmem:[%s11651_s22 + $0x480] sm:$0xff] }
 0x2b0   : > { %v1248_v36 = vadd.f32 %v1247_v45, %v11864_v46  ;;  %v1249_v10 = vpop.f32.mrb[37].mxu1  ;;  %v3056_v5 = vmul.f32 %v2800_v58, %v2544_v42  ;;  %v2212_v43 = vmul.f32 0.2, %v12183_v63  ;;  %v12208_v8 = vpop.f32.mrb[30].mxu0  ;;  %v12211_v21 = vpack.c.bf16 %v3055_v34, %v3047_v26  ;;  %5648 = vmatpush1.bf16.msra.mxu1 %v10206_v7  ;;  %v10212_v26 = vld [vmem:[#allocation11 + $0x108] ss:$16 sps:$4 sm:$0xff]  }
 0x2b1   : > { %v1250_v54 = vadd.f32 %v1249_v10, %v11868_v47  ;;  %v1251_v48 = vpop.f32.mrb[38].mxu1  ;;  %v12219_v45 = vadd.f32 %v12068_v2, %v11903_v3  ;;  %v12221_v42 = vpop.f32.mrb[31].mxu0  ;;  %v2808_v58 = vld [vmem:[%s11651_s22 + $0x488] sm:$0xff]  ;;  %5649 = vmatprep.subr.bf16.mxu1 %v10214_v27  ;;  %v12232_v49 = vsel %vm1948_vm0, %v12154_v37, %v2204_v19  ;;  %v2815_v7 = vld [vmem:[%s11651_s22 + $0x4c0] sm:$0xff]  ;;  %v12241_v27 = vsel %vm1955_vm2, %v12170_v24, %v2211_v60 }
 0x2b2   : > { %14685 = vst [vmem:[#allocation67_spill] sm:$0xff] %v12211_v21  ;;  %vm2039_vm4 = vcmp.gt.f32.partialorder %v1248_v36, 0.0  ;;  %v2295_v35 = vmul.f32 0.2, %v1248_v36  ;;  %v1252_v15 = vadd.f32 %v1251_v48, %v11864_v46  ;;  %v1253_v32 = vpop.f32.mrb[39].mxu1  ;;  %v12224_v31 = vpack.c.bf16 %v3056_v5, %v3048_v55  ;;  %5085 = vmatpush1.bf16.msra.mxu0 %v10242_v25  ;;  %14686 = vst [vmem:[#allocation68_spill] sm:$0xff] %v12232_v49 }
 0x2b3   : > { %vm2040_vm5 = vcmp.gt.f32.partialorder %v1250_v54, 0.0  ;;  %v2296_v34 = vmul.f32 0.2, %v1250_v54  ;;  %v1254_v13 = vadd.f32 %v1253_v32, %v11868_v47  ;;  %v10220_v2 = vld [vmem:[#allocation11 + $0x12c] ss:$16 sps:$4 sm:$0xff]   ;;  %1775 = vmatmul.mubr.bf16.gmra.mrb[144].mxu1 %v11731_v61  ;;  %14687 = vst [vmem:[#allocation69_spill] sm:$0xff] %v12241_v27  ;;  %v12250_v61 = vsel %vm1956_vm3, %v12183_v63, %v2212_v43 }
 0x2b4   : > { %v2551_v10 = vsel %vm2039_vm4, %v1248_v36, %v2295_v35  ;;  %vm2047_vm6 = vcmp.gt.f32.partialorder %v1252_v15, 0.0  ;;  %v2303_v55 = vmul.f32 0.2, %v1252_v15  ;;  %4973 = vmatprep.mubr.bf16.mxu0 %v12224_v31  ;;  %v10259_v25 = vld [vmem:[#allocation11 + $0x404] ss:$16 sps:$4 sm:$0xff]   ;;  %1784 = vmatprep.mubr.bf16.mxu1 %v14666_v17  ;;  %v2816_v19 = vld [vmem:[%s11651_s22 + $0x4c8] sm:$0xff]  ;;  %v1588_v63 = vadd.f32 %v12074_v50, %v11892_v40 }
 0x2b5   : > { %v2552_v5 = vsel %vm2040_vm5, %v1250_v54, %v2296_v34  ;;  %vm2048_vm7 = vcmp.gt.f32.partialorder %v1254_v13, 0.0  ;;  %v2304_v37 = vmul.f32 0.2, %v1254_v13  ;;  %4974 = vmatmul.mubr.bf16.gmra.mrb[96].mxu0 %v12211_v21  ;;  %v10218_v36 = vld [vmem:[#allocation11 + $0x128] ss:$16 sps:$4 sm:$0xff]   ;;  %14688 = vst [vmem:[#allocation70_spill] sm:$0xff] %v12250_v61  ;;  %5650 = vmatpush1.bf16.msra.mxu1 %v10212_v26  ;;  %v3063_v32 = vmul.f32 %v2807_v20, %v2551_v10 }
 0x2b6   : > { %v2559_v48 = vsel %vm2047_vm6, %v1252_v15, %v2303_v55  ;;  %vm1963_vm8 = vcmp.gt.f32.partialorder %v12215_v39, 0.0  ;;  %v2219_v24 = vmul.f32 0.2, %v12215_v39  ;;  %vm1964_vm9 = vcmp.gt.f32.partialorder %v12219_v45, 0.0  ;;  %v12255_v60 = vpop.f32.mrb[32].mxu0  ;;  %v1257_v35 = vpop.f32.mrb[40].mxu1  ;;  %5651 = vmatprep.subr.bf16.mxu1 %v10220_v2  ;;  %5247 = vmatprep.subr.bf16.mxu0 %v10259_v25 }
 0x2b7   : > { %v2560_v54 = vsel %vm2048_vm7, %v1254_v13, %v2304_v37  ;;  %v3071_v34 = vmul.f32 %v2815_v7, %v2559_v48  ;;  %v10229_v27 = vld [vmem:[#allocation11 + $0x14c] ss:$16 sps:$4 sm:$0xff]   ;;  %v12259_v43 = vpop.f32.mrb[33].mxu0  ;;  %v1258_v15 = vadd.f32 %v1257_v35, %v11864_v46  ;;  %v1259_v26 = vpop.f32.mrb[41].mxu1  ;;  %v3064_v55 = vmul.f32 %v2808_v58, %v2552_v5  ;;  %v10227_v10 = vld [vmem:[#allocation11 + $0x148] ss:$16 sps:$4 sm:$0xff]  }
 0x2b8   : > { %v3072_v51 = vmul.f32 %v2816_v19, %v2560_v54  ;;  %v2220_v61 = vmul.f32 0.2, %v12219_v45  ;;  %v12263_v49 = vpop.f32.mrb[34].mxu0  ;;  %v1260_v20 = vadd.f32 %v1259_v26, %v11868_v47  ;;  %v1261_v13 = vpop.f32.mrb[42].mxu1  ;;  %v12270_v50 = vadd.f32 %v12080_v11, %v11903_v3  ;;  %v10238_v48 = vld [vmem:[#allocation11 + $0x16c] ss:$16 sps:$4 sm:$0xff]  }
 0x2b9   : > { %v12266_v2 = vpack.c.bf16 %v3071_v34, %v3063_v32  ;;  %v12274_v7 = vadd.f32 %v12110_v62, %v11892_v40  ;;  %v12276_v58 = vpop.f32.mrb[35].mxu0  ;;  %vm2055_vm10 = vcmp.gt.f32.partialorder %v1258_v15, 0.0  ;;  %v2311_v25 = vmul.f32 0.2, %v1258_v15  ;;  %v1263_v37 = vpop.f32.mrb[43].mxu1  ;;  %5652 = vmatpush1.bf16.msra.mxu1 %v10218_v36  ;;  %v2823_v34 = vld [vmem:[%s11651_s22 + $0x500] sm:$0xff] }
 0x2ba   : > { %v1262_v5 = vadd.f32 %v1261_v13, %v11864_v46  ;;  %v12279_v19 = vpack.c.bf16 %v3072_v51, %v3064_v55  ;;  %vm2056_vm11 = vcmp.gt.f32.partialorder %v1260_v20, 0.0  ;;  %v2312_v11 = vmul.f32 0.2, %v1260_v20  ;;  %5653 = vmatprep.subr.bf16.mxu1 %v10229_v27  ;;  %v2831_v51 = vld [vmem:[%s11651_s22 + $0x540] sm:$0xff]  ;;  %v2824_v27 = vld [vmem:[%s11651_s22 + $0x508] sm:$0xff] }
 0x2bb   : > { %14689 = vst [vmem:[#allocation71_spill] sm:$0xff] %v12266_v2  ;;  %v1264_v54 = vadd.f32 %v1263_v37, %v11868_v47  ;;  %v2227_v62 = vmul.f32 0.2, %v1588_v63  ;;  %v2567_v35 = vsel %vm2055_vm10, %v1258_v15, %v2311_v25  ;;  %1785 = vmatmul.mubr.bf16.gmra.mrb[148].mxu1 %v11739_v4  ;;  %vm1971_vm13 = vcmp.gt.f32.partialorder %v1588_v63, 0.0  ;;  %v2832_v55 = vld [vmem:[%s11651_s22 + $0x548] sm:$0xff]  ;;  %v12302_v37 = vpop.f32.mrb[36].mxu0 }
 0x2bc   : > { %14690 = vst [vmem:[#allocation72_spill] sm:$0xff] %v12279_v19  ;;  %vm2063_vm12 = vcmp.gt.f32.partialorder %v1262_v5, 0.0  ;;  %v2319_v32 = vmul.f32 0.2, %v1262_v5  ;;  %4983 = vmatprep.mubr.bf16.mxu0 %v12279_v19  ;;  %v2568_v36 = vsel %vm2056_vm11, %v1260_v20, %v2312_v11  ;;  %1794 = vmatprep.mubr.bf16.mxu1 %v14666_v17  ;;  %v12293_v15 = vsel %vm1963_vm8, %v12215_v39, %v2219_v24  ;;  %v10236_v13 = vld [vmem:[#allocation11 + $0x168] ss:$16 sps:$4 sm:$0xff]  }
 0x2bd   : > { %vm2064_vm14 = vcmp.gt.f32.partialorder %v1264_v54, 0.0  ;;  %v2320_v26 = vmul.f32 0.2, %v1264_v54  ;;  %4984 = vmatmul.mubr.bf16.gmra.mrb[100].mxu0 %v12266_v2  ;;  %14691 = vst [vmem:[#allocation73_spill] sm:$0xff] %v12293_v15  ;;  %5654 = vmatpush1.bf16.msra.mxu1 %v10227_v10  ;;  %v12298_v20 = vsel %vm1964_vm9, %v12219_v45, %v2220_v61  ;;  %vm1972_vm15 = vcmp.gt.f32.partialorder %v12270_v50, 0.0  ;;  %v1267_v2 = vpop.f32.mrb[44].mxu1 }
 0x2be   : > { %v2575_v4 = vsel %vm2063_vm12, %v1262_v5, %v2319_v32  ;;  %14692 = vst [vmem:[#allocation74_spill] sm:$0xff] %v12298_v20  ;;  %v2228_v25 = vmul.f32 0.2, %v12270_v50  ;;  %v3079_v19 = vmul.f32 %v2823_v34, %v2567_v35  ;;  %5655 = vmatprep.subr.bf16.mxu1 %v10238_v48  ;;  %v10247_v39 = vld [vmem:[#allocation11 + $0x18c] ss:$16 sps:$4 sm:$0xff]   ;;  %v12305_v24 = vsel %vm1971_vm13, %v1588_v63, %v2227_v62  ;;  %v12307_v10 = vpop.f32.mrb[37].mxu0 }
 0x2bf   : > { %v2576_v11 = vsel %vm2064_vm14, %v1264_v54, %v2320_v26  ;;  %v3087_v21 = vmul.f32 %v2831_v51, %v2575_v4  ;;  %14693 = vst [vmem:[#allocation75_spill] sm:$0xff] %v12305_v24  ;;  %v1268_v45 = vadd.f32 %v1267_v2, %v11864_v46  ;;  %v1269_v61 = vpop.f32.mrb[45].mxu1  ;;  %v3080_v5 = vmul.f32 %v2824_v27, %v2568_v36  ;;  %v12311_v15 = vpop.f32.mrb[38].mxu0 }
 0x2c0   : > { %v3088_v32 = vmul.f32 %v2832_v55, %v2576_v11  ;;  %vm1979_vm0 = vcmp.gt.f32.partialorder %v12274_v7, 0.0  ;;  %v1270_v54 = vadd.f32 %v1269_v61, %v11868_v47  ;;  %v1271_v35 = vpop.f32.mrb[46].mxu1  ;;  %v2235_v48 = vmul.f32 0.2, %v12274_v7  ;;  %v12321_v62 = vpop.f32.mrb[39].mxu0  ;;  %v2847_v61 = vld [vmem:[%s11651_s22 + $0x5c0] sm:$0xff] }
 0x2c1   : > { %v12314_v34 = vpack.c.bf16 %v3087_v21, %v3079_v19  ;;  %v12319_v63 = vadd.f32 %v12112_v18, %v11903_v3  ;;  %vm2071_vm1 = vcmp.gt.f32.partialorder %v1268_v45, 0.0  ;;  %v2327_v2 = vmul.f32 0.2, %v1268_v45  ;;  %v1273_v36 = vpop.f32.mrb[47].mxu1  ;;  %5656 = vmatpush1.bf16.msra.mxu1 %v10236_v13  ;;  %v10245_v21 = vld [vmem:[#allocation11 + $0x188] ss:$16 sps:$4 sm:$0xff]  }
 0x2c2   : > { %v1272_v51 = vadd.f32 %v1271_v35, %v11864_v46  ;;  %v12324_v26 = vpack.c.bf16 %v3088_v32, %v3080_v5  ;;  %vm2072_vm2 = vcmp.gt.f32.partialorder %v1270_v54, 0.0  ;;  %v2328_v19 = vmul.f32 0.2, %v1270_v54  ;;  %5657 = vmatprep.subr.bf16.mxu1 %v10247_v39  ;;  %v10250_v18 = vld [vmem:[#allocation11 + $0x1ac] ss:$16 sps:$4 sm:$0xff]   ;;  %v2839_v13 = vld [vmem:[%s11651_s22 + $0x580] sm:$0xff] }
 0x2c3   : > { %14694 = vst [vmem:[#allocation76_spill] sm:$0xff] %v12314_v34  ;;  %v1274_v27 = vadd.f32 %v1273_v36, %v11868_v47  ;;  %v12329_v55 = vadd.f32 %v12116_v57, %v11892_v40  ;;  %v2583_v4 = vsel %vm2071_vm1, %v1268_v45, %v2327_v2  ;;  %1795 = vmatmul.mubr.bf16.gmra.mrb[152].mxu1 %v11747_v9  ;;  %v2840_v57 = vld [vmem:[%s11651_s22 + $0x588] sm:$0xff]  ;;  %vm1980_vm5 = vcmp.gt.f32.partialorder %v12319_v63, 0.0 }
 0x2c4   : > { %14695 = vst [vmem:[#allocation77_spill] sm:$0xff] %v12324_v26  ;;  %vm2079_vm3 = vcmp.gt.f32.partialorder %v1272_v51, 0.0  ;;  %v2335_v11 = vmul.f32 0.2, %v1272_v51  ;;  %4993 = vmatprep.mubr.bf16.mxu0 %v12324_v26  ;;  %v12338_v39 = vsel %vm1972_vm15, %v12270_v50, %v2228_v25  ;;  %v2584_v5 = vsel %vm2072_vm2, %v1270_v54, %v2328_v19  ;;  %1804 = vmatprep.mubr.bf16.mxu1 %v14666_v17  ;;  %v2848_v45 = vld [vmem:[%s11651_s22 + $0x5c8] sm:$0xff]  ;;  %v12353_v54 = vpop.f32.mrb[40].mxu0 }
 0x2c5   : > { %14696 = vst [vmem:[#allocation78_spill] sm:$0xff] %v12338_v39  ;;  %vm2080_vm4 = vcmp.gt.f32.partialorder %v1274_v27, 0.0  ;;  %v2336_v32 = vmul.f32 0.2, %v1274_v27  ;;  %4994 = vmatmul.mubr.bf16.gmra.mrb[104].mxu0 %v12314_v34  ;;  %v1600_v9 = vadd.f32 %v12123_v53, %v11903_v3  ;;  %5658 = vmatpush1.bf16.msra.mxu1 %v10245_v21  ;;  %v10248_v2 = vld [vmem:[#allocation11 + $0x1a8] ss:$16 sps:$4 sm:$0xff]   ;;  %v12349_v50 = vsel %vm1979_vm0, %v12274_v7, %v2235_v48 }
 0x2c6   : > { %v2591_v35 = vsel %vm2079_vm3, %v1272_v51, %v2335_v11  ;;  %14697 = vst [vmem:[#allocation79_spill] sm:$0xff] %v12349_v50  ;;  %v2236_v25 = vmul.f32 0.2, %v12319_v63  ;;  %v1277_v19 = vpop.f32.mrb[48].mxu1  ;;  %v3095_v34 = vmul.f32 %v2839_v13, %v2583_v4  ;;  %5659 = vmatprep.subr.bf16.mxu1 %v10250_v18  ;;  %v10253_v53 = vld [vmem:[#allocation11 + $0x1cc] ss:$16 sps:$4 sm:$0xff]   ;;  %v3096_v48 = vmul.f32 %v2840_v57, %v2584_v5 }
 0x2c7   : > { %v2592_v36 = vsel %vm2080_vm4, %v1274_v27, %v2336_v32  ;;  %v3103_v24 = vmul.f32 %v2847_v61, %v2591_v35  ;;  %vm1987_vm6 = vcmp.gt.f32.partialorder %v12329_v55, 0.0  ;;  %v12356_v51 = vpop.f32.mrb[41].mxu0  ;;  %v1278_v21 = vadd.f32 %v1277_v19, %v11864_v46  ;;  %v1279_v7 = vpop.f32.mrb[49].mxu1 }
 0x2c8   : > { %v3104_v11 = vmul.f32 %v2848_v45, %v2592_v36  ;;  %v2243_v50 = vmul.f32 0.2, %v12329_v55  ;;  %v12360_v39 = vpop.f32.mrb[42].mxu0  ;;  %v1280_v27 = vadd.f32 %v1279_v7, %v11868_v47  ;;  %v1281_v32 = vpop.f32.mrb[50].mxu1  ;;  %v2244_v18 = vmul.f32 0.2, %v1600_v9 }
 0x2c9   : > { %v12363_v4 = vpack.c.bf16 %v3103_v24, %v3095_v34  ;;  %v12367_v13 = vadd.f32 %v12156_v28, %v11892_v40  ;;  %v12369_v61 = vpop.f32.mrb[43].mxu0  ;;  %vm2087_vm7 = vcmp.gt.f32.partialorder %v1278_v21, 0.0  ;;  %v2343_v35 = vmul.f32 0.2, %v1278_v21  ;;  %v1283_v57 = vpop.f32.mrb[51].mxu1  ;;  %5660 = vmatpush1.bf16.msra.mxu1 %v10248_v2 }
 0x2ca   : > { %v1282_v5 = vadd.f32 %v1281_v32, %v11864_v46  ;;  %v12372_v45 = vpack.c.bf16 %v3104_v11, %v3096_v48  ;;  %v10251_v36 = vld [vmem:[#allocation11 + $0x1c8] ss:$16 sps:$4 sm:$0xff]   ;;  %vm2088_vm8 = vcmp.gt.f32.partialorder %v1280_v27, 0.0  ;;  %v2344_v24 = vmul.f32 0.2, %v1280_v27  ;;  %5661 = vmatprep.subr.bf16.mxu1 %v10253_v53  ;;  %v2855_v48 = vld [vmem:[%s11651_s22 + $0x600] sm:$0xff] }
 0x2cb   : > { %14698 = vst [vmem:[#allocation80_spill] sm:$0xff] %v12363_v4  ;;  %v1284_v34 = vadd.f32 %v1283_v57, %v11868_v47  ;;  %v10256_v28 = vld [vmem:[#allocation11 + $0x1ec] ss:$16 sps:$4 sm:$0xff]   ;;  %vm1988_vm9 = vcmp.gt.f32.partialorder %v1600_v9, 0.0  ;;  %v2599_v19 = vsel %vm2087_vm7, %v1278_v21, %v2343_v35  ;;  %1805 = vmatmul.mubr.bf16.gmra.mrb[156].mxu1 %v11755_v16  ;;  %v2863_v11 = vld [vmem:[%s11651_s22 + $0x640] sm:$0xff]  ;;  %v12381_v2 = vadd.f32 %v12158_v29, %v11903_v3 }
 0x2cc   : > { %14699 = vst [vmem:[#allocation81_spill] sm:$0xff] %v12372_v45  ;;  %vm2095_vm10 = vcmp.gt.f32.partialorder %v1282_v5, 0.0  ;;  %v2351_v7 = vmul.f32 0.2, %v1282_v5  ;;  %5003 = vmatprep.mubr.bf16.mxu0 %v12372_v45  ;;  %v2600_v32 = vsel %vm2088_vm8, %v1280_v27, %v2344_v24  ;;  %1814 = vmatprep.mubr.bf16.mxu1 %v14666_v17  ;;  %v2856_v21 = vld [vmem:[%s11651_s22 + $0x608] sm:$0xff]  ;;  %v12390_v16 = vsel %vm1980_vm5, %v12319_v63, %v2236_v25  ;;  %v12401_v24 = vpop.f32.mrb[44].mxu0 }
 0x2cd   : > { %vm2096_vm11 = vcmp.gt.f32.partialorder %v1284_v34, 0.0  ;;  %v2352_v53 = vmul.f32 0.2, %v1284_v34  ;;  %5004 = vmatmul.mubr.bf16.gmra.mrb[108].mxu0 %v12363_v4  ;;  %v2864_v35 = vld [vmem:[%s11651_s22 + $0x648] sm:$0xff]  ;;  %5662 = vmatpush1.bf16.msra.mxu1 %v10251_v36  ;;  %v12395_v29 = vsel %vm1987_vm6, %v12329_v55, %v2243_v50  ;;  %v12398_v27 = vsel %vm1988_vm9, %v1600_v9, %v2244_v18  ;;  %v1287_v20 = vpop.f32.mrb[52].mxu1  ;;  %v12404_v36 = vpop.f32.mrb[45].mxu0 }
 0x2ce   : > { %v2607_v57 = vsel %vm2095_vm10, %v1282_v5, %v2351_v7  ;;  %v10254_v45 = vld [vmem:[#allocation11 + $0x1e8] ss:$16 sps:$4 sm:$0xff]   ;;  %14700 = vst [vmem:[#allocation82_spill] sm:$0xff] %v12395_v29  ;;  %14701 = vst [vmem:[#allocation83_spill] sm:$0xff] %v12398_v27  ;;  %vm1995_vm12 = vcmp.gt.f32.partialorder %v12367_v13, 0.0  ;;  %v3111_v26 = vmul.f32 %v2855_v48, %v2599_v19  ;;  %5663 = vmatprep.subr.bf16.mxu1 %v10256_v28  ;;  %v1289_v50 = vpop.f32.mrb[53].mxu1 }
 0x2cf   : > { %v2608_v4 = vsel %vm2096_vm11, %v1284_v34, %v2352_v53  ;;  %v3119_v63 = vmul.f32 %v2863_v11, %v2607_v57  ;;  %v2251_v25 = vmul.f32 0.2, %v12367_v13  ;;  %v10262_v5 = vld [vmem:[#allocation11 + $0x20c] ss:$16 sps:$4 sm:$0xff]   ;;  %v1288_v55 = vadd.f32 %v1287_v20, %v11864_v46  ;;  %v12408_v18 = vpop.f32.mrb[46].mxu0  ;;  %v1291_v53 = vpop.f32.mrb[54].mxu1 }
 0x2d0   : > { %v3112_v7 = vmul.f32 %v2856_v21, %v2600_v32  ;;  %v3120_v9 = vmul.f32 %v2864_v35, %v2608_v4  ;;  %vm1996_vm13 = vcmp.gt.f32.partialorder %v12381_v2, 0.0  ;;  %v1290_v34 = vadd.f32 %v1289_v50, %v11868_v47  ;;  %v12418_v11 = vpop.f32.mrb[47].mxu0  ;;  %v1293_v32 = vpop.f32.mrb[55].mxu1  ;;  %v2871_v50 = vld [vmem:[%s11651_s22 + $0x680] sm:$0xff] }
 0x2d1   : > { %v12411_v19 = vpack.c.bf16 %v3119_v63, %v3111_v26  ;;  %v2252_v28 = vmul.f32 0.2, %v12381_v2  ;;  %v12416_v48 = vadd.f32 %v12162_v12, %v11892_v40  ;;  %vm2103_vm14 = vcmp.gt.f32.partialorder %v1288_v55, 0.0  ;;  %5664 = vmatpush1.bf16.msra.mxu1 %v10254_v45  ;;  %v2879_v45 = vld [vmem:[%s11651_s22 + $0x6c0] sm:$0xff] }
 0x2d2   : > { %v2359_v20 = vmul.f32 0.2, %v1288_v55  ;;  %v1292_v4 = vadd.f32 %v1291_v53, %v11864_v46  ;;  %v12421_v21 = vpack.c.bf16 %v3120_v9, %v3112_v7  ;;  %vm2104_vm15 = vcmp.gt.f32.partialorder %v1290_v34, 0.0  ;;  %5826 = vmatprep.subr.bf16.mxu1 %v10262_v5 }
 0x2d3   : > { %14702 = vst [vmem:[#allocation84_spill] sm:$0xff] %v12411_v19  ;;  %v2360_v26 = vmul.f32 0.2, %v1290_v34  ;;  %v1294_v35 = vadd.f32 %v1293_v32, %v11868_v47  ;;  %v12426_v12 = vadd.f32 %v12172_v22, %v11903_v3  ;;  %1815 = vmatmul.mubr.bf16.gmra.mrb[160].mxu1 %v11763_v23  ;;  %v12435_v7 = vsel %vm1995_vm12, %v12367_v13, %v2251_v25  ;;  %v2872_v22 = vld [vmem:[%s11651_s22 + $0x688] sm:$0xff]  ;;  %v12450_v25 = vpop.f32.mrb[48].mxu0 }
 0x2d4   : > { %14703 = vst [vmem:[#allocation85_spill] sm:$0xff] %v12421_v21  ;;  %v2615_v57 = vsel %vm2103_vm14, %v1288_v55, %v2359_v20  ;;  %vm2111_vm0 = vcmp.gt.f32.partialorder %v1292_v4, 0.0  ;;  %v2367_v63 = vmul.f32 0.2, %v1292_v4  ;;  %5013 = vmatprep.mubr.bf16.mxu0 %v12421_v21  ;;  %14704 = vst [vmem:[#allocation86_spill] sm:$0xff] %v12435_v7  ;;  %1824 = vmatprep.mubr.bf16.mxu1 %v14666_v17  ;;  %v2880_v55 = vld [vmem:[%s11651_s22 + $0x6c8] sm:$0xff] }
 0x2d5   : > { %v2616_v5 = vsel %vm2104_vm15, %v1290_v34, %v2360_v26  ;;  %vm2112_vm1 = vcmp.gt.f32.partialorder %v1294_v35, 0.0  ;;  %v2368_v9 = vmul.f32 0.2, %v1294_v35  ;;  %5014 = vmatmul.mubr.bf16.gmra.mrb[112].mxu0 %v12411_v19  ;;  %v1614_v23 = vadd.f32 %v12201_v1, %v11892_v40  ;;  %v1297_v32 = vpop.f32.mrb[56].mxu1  ;;  %v12453_v21 = vpop.f32.mrb[49].mxu0 }
 0x2d6   : > { %v2623_v53 = vsel %vm2111_vm0, %v1292_v4, %v2367_v63  ;;  %v12446_v20 = vsel %vm1996_vm13, %v12381_v2, %v2252_v28  ;;  %vm2003_vm2 = vcmp.gt.f32.partialorder %v12416_v48, 0.0  ;;  %v2259_v13 = vmul.f32 0.2, %v12416_v48  ;;  %v1299_v4 = vpop.f32.mrb[57].mxu1  ;;  %v12457_v7 = vpop.f32.mrb[50].mxu0 }
 0x2d7   : > { %14705 = vst [vmem:[#allocation87_spill] sm:$0xff] %v12446_v20  ;;  %v2624_v34 = vsel %vm2112_vm1, %v1294_v35, %v2368_v9  ;;  %v3127_v26 = vmul.f32 %v2871_v50, %v2615_v57  ;;  %v3135_v19 = vmul.f32 %v2879_v45, %v2623_v53  ;;  %vm2004_vm3 = vcmp.gt.f32.partialorder %v12426_v12, 0.0  ;;  %v1301_v29 = vpop.f32.mrb[58].mxu1  ;;  %v12466_v45 = vpop.f32.mrb[51].mxu0 }
 0x2d8   : > { %v1298_v1 = vadd.f32 %v1297_v32, %v11864_v46  ;;  %v3128_v63 = vmul.f32 %v2872_v22, %v2616_v5  ;;  %v3136_v2 = vmul.f32 %v2880_v55, %v2624_v34  ;;  %v2260_v28 = vmul.f32 0.2, %v12426_v12  ;;  %v1303_v22 = vpop.f32.mrb[59].mxu1  ;;  %v2887_v32 = vld [vmem:[%s11651_s22 + $0x700] sm:$0xff] }
 0x2d9   : > { %v1300_v20 = vadd.f32 %v1299_v4, %v11868_v47  ;;  %v12460_v35 = vpack.c.bf16 %v3135_v19, %v3127_v26  ;;  %v2267_v57 = vmul.f32 0.2, %v1614_v23  ;;  %v12464_v50 = vadd.f32 %v12204_v41, %v11903_v3  ;;  %v2895_v26 = vld [vmem:[%s11651_s22 + $0x740] sm:$0xff] }
 0x2da   : > { %vm2119_vm4 = vcmp.gt.f32.partialorder %v1298_v1, 0.0  ;;  %v2375_v5 = vmul.f32 0.2, %v1298_v1  ;;  %v1302_v9 = vadd.f32 %v1301_v29, %v11864_v46  ;;  %v12469_v55 = vpack.c.bf16 %v3136_v2, %v3128_v63  ;;  %v2888_v2 = vld [vmem:[%s11651_s22 + $0x708] sm:$0xff] }
 0x2db   : > { %14706 = vst [vmem:[#allocation88_spill] sm:$0xff] %v12460_v35  ;;  %vm2120_vm5 = vcmp.gt.f32.partialorder %v1300_v20, 0.0  ;;  %v2376_v53 = vmul.f32 0.2, %v1300_v20  ;;  %v1304_v19 = vadd.f32 %v1303_v22, %v11868_v47  ;;  %vm2011_vm6 = vcmp.gt.f32.partialorder %v1614_v23, 0.0  ;;  %1825 = vmatmul.mubr.bf16.gmra.mrb[164].mxu1 %v11771_v30 }
 0x2dc   : > { %14707 = vst [vmem:[#allocation89_spill] sm:$0xff] %v12469_v55  ;;  %v2631_v41 = vsel %vm2119_vm4, %v1298_v1, %v2375_v5  ;;  %vm2127_vm7 = vcmp.gt.f32.partialorder %v1302_v9, 0.0  ;;  %v2383_v34 = vmul.f32 0.2, %v1302_v9  ;;  %5023 = vmatprep.mubr.bf16.mxu0 %v12469_v55  ;;  %v1618_v29 = vadd.f32 %v12208_v8, %v11892_v40  ;;  %1834 = vmatprep.mubr.bf16.mxu1 %v14666_v17  ;;  %v2896_v1 = vld [vmem:[%s11651_s22 + $0x748] sm:$0xff] }
 0x2dd   : > { %v2632_v4 = vsel %vm2120_vm5, %v1300_v20, %v2376_v53  ;;  %vm2128_vm8 = vcmp.gt.f32.partialorder %v1304_v19, 0.0  ;;  %v2384_v63 = vmul.f32 0.2, %v1304_v19  ;;  %5024 = vmatmul.mubr.bf16.gmra.mrb[116].mxu0 %v12460_v35  ;;  %v12485_v30 = vsel %vm2003_vm2, %v12416_v48, %v2259_v13  ;;  %v12496_v20 = vpop.f32.mrb[52].mxu0  ;;  %v1307_v35 = vpop.f32.mrb[60].mxu1 }
 0x2de   : > { %14708 = vst [vmem:[#allocation90_spill] sm:$0xff] %v12485_v30  ;;  %v2639_v5 = vsel %vm2127_vm7, %v1302_v9, %v2383_v34  ;;  %v12490_v22 = vsel %vm2004_vm3, %v12426_v12, %v2260_v28  ;;  %v12493_v8 = vsel %vm2011_vm6, %v1614_v23, %v2267_v57  ;;  %vm2012_vm9 = vcmp.gt.f32.partialorder %v12464_v50, 0.0  ;;  %v12499_v13 = vpop.f32.mrb[53].mxu0  ;;  %v1309_v34 = vpop.f32.mrb[61].mxu1 }
 0x2df   : > { %14709 = vst [vmem:[#allocation91_spill] sm:$0xff] %v12490_v22  ;;  %14710 = vst [vmem:[#allocation92_spill] sm:$0xff] %v12493_v8  ;;  %v2640_v53 = vsel %vm2128_vm8, %v1304_v19, %v2384_v63  ;;  %v3143_v55 = vmul.f32 %v2887_v32, %v2631_v41  ;;  %v3151_v27 = vmul.f32 %v2895_v26, %v2639_v5  ;;  %v2268_v48 = vmul.f32 0.2, %v12464_v50  ;;  %v12502_v23 = vpop.f32.mrb[54].mxu0  ;;  %v1311_v8 = vpop.f32.mrb[62].mxu1 }
 0x2e0   : > { %v1308_v9 = vadd.f32 %v1307_v35, %v11864_v46  ;;  %v3144_v12 = vmul.f32 %v2888_v2, %v2632_v4  ;;  %v3152_v28 = vmul.f32 %v2896_v1, %v2640_v53  ;;  %vm2019_vm10 = vcmp.gt.f32.partialorder %v1618_v29, 0.0  ;;  %v12511_v32 = vpop.f32.mrb[55].mxu0  ;;  %v1313_v4 = vpop.f32.mrb[63].mxu1  ;;  %v2911_v5 = vld [vmem:[%s11651_s22 + $0x7c0] sm:$0xff] }
 0x2e1   : > { %v1310_v57 = vadd.f32 %v1309_v34, %v11868_v47  ;;  %v12505_v30 = vpack.c.bf16 %v3151_v27, %v3143_v55  ;;  %v2275_v19 = vmul.f32 0.2, %v1618_v29  ;;  %v12509_v41 = vadd.f32 %v12221_v42, %v11903_v3 }
 0x2e2   : > { %vm2135_vm11 = vcmp.gt.f32.partialorder %v1308_v9, 0.0  ;;  %v2391_v35 = vmul.f32 0.2, %v1308_v9  ;;  %v1312_v26 = vadd.f32 %v1311_v8, %v11864_v46  ;;  %v12514_v63 = vpack.c.bf16 %v3152_v28, %v3144_v12  ;;  %v2903_v46 = vld [vmem:[%s11651_s22 + $0x780] sm:$0xff] }
 0x2e3   : > { %14711 = vst [vmem:[#allocation93_spill] sm:$0xff] %v12505_v30  ;;  %vm2136_vm12 = vcmp.gt.f32.partialorder %v1310_v57, 0.0  ;;  %v2392_v2 = vmul.f32 0.2, %v1310_v57  ;;  %v1314_v27 = vadd.f32 %v1313_v4, %v11868_v47  ;;  %v12519_v42 = vadd.f32 %v12255_v60, %v11892_v40  ;;  %1835 = vmatmul.mubr.bf16.gmra.mrb[168].mxu1 %v11779_v38  ;;  %v2904_v60 = vld [vmem:[%s11651_s22 + $0x788] sm:$0xff] }
 0x2e4   : > { %14712 = vst [vmem:[#allocation94_spill] sm:$0xff] %v12514_v63  ;;  %v2647_v55 = vsel %vm2135_vm11, %v1308_v9, %v2391_v35  ;;  %vm2143_vm13 = vcmp.gt.f32.partialorder %v1312_v26, 0.0  ;;  %v2399_v1 = vmul.f32 0.2, %v1312_v26  ;;  %5033 = vmatprep.mubr.bf16.mxu0 %v12514_v63  ;;  %v12528_v8 = vsel %vm2012_vm9, %v12464_v50, %v2268_v48  ;;  %1844 = vmatprep.mubr.bf16.mxu1 %v14666_v17  ;;  %v2912_v9 = vld [vmem:[%s11651_s22 + $0x7c8] sm:$0xff]  ;;  %v12541_v48 = vpop.f32.mrb[56].mxu0 }
 0x2e5   : > { %14713 = vst [vmem:[#allocation95_spill] sm:$0xff] %v12528_v8  ;;  %v2648_v47 = vsel %vm2136_vm12, %v1310_v57, %v2392_v2  ;;  %vm2144_vm14 = vcmp.gt.f32.partialorder %v1314_v27, 0.0  ;;  %v2400_v53 = vmul.f32 0.2, %v1314_v27  ;;  %5034 = vmatmul.mubr.bf16.gmra.mrb[120].mxu0 %v12505_v30  ;;  %v1626_v38 = vadd.f32 %v12259_v43, %v11903_v3  ;;  %v1350_v57 = vpop.f32.mrb[64].mxu1  ;;  %v12544_v2 = vpop.f32.mrb[57].mxu0 }
 0x2e6   : > { %v2655_v34 = vsel %vm2143_vm13, %v1312_v26, %v2399_v1  ;;  %v12537_v12 = vsel %vm2019_vm10, %v1618_v29, %v2275_v19  ;;  %vm2020_vm15 = vcmp.gt.f32.partialorder %v12509_v41, 0.0  ;;  %v2276_v50 = vmul.f32 0.2, %v12509_v41  ;;  %v1352_v26 = vpop.f32.mrb[65].mxu1  ;;  %v12548_v30 = vpop.f32.mrb[58].mxu0 }
 0x2e7   : > { %14714 = vst [vmem:[#allocation96_spill] sm:$0xff] %v12537_v12  ;;  %v2656_v28 = vsel %vm2144_vm14, %v1314_v27, %v2400_v53  ;;  %v3159_v35 = vmul.f32 %v2903_v46, %v2647_v55  ;;  %v3167_v4 = vmul.f32 %v2911_v5, %v2655_v34  ;;  %vm2027_vm0 = vcmp.gt.f32.partialorder %v12519_v42, 0.0  ;;  %v1354_v27 = vpop.f32.mrb[66].mxu1  ;;  %v12557_v5 = vpop.f32.mrb[59].mxu0 }
 0x2e8   : > { %v1351_v43 = vadd.f32 %v1350_v57, %v11928_v6  ;;  %v3160_v1 = vmul.f32 %v2904_v60, %v2648_v47  ;;  %v3168_v29 = vmul.f32 %v2912_v9, %v2656_v28  ;;  %v2283_v19 = vmul.f32 0.2, %v12519_v42  ;;  %v1356_v9 = vpop.f32.mrb[67].mxu1 }
 0x2e9   : > { %v1353_v63 = vadd.f32 %v1352_v26, %v11936_v14  ;;  %v12551_v53 = vpack.c.bf16 %v3167_v4, %v3159_v35  ;;  %v2284_v55 = vmul.f32 0.2, %v1626_v38  ;;  %v12555_v46 = vadd.f32 %v12263_v49, %v11892_v40  ;;  %v2665_v4 = vld [vmem:[%s11651_s22 + $0x10] sm:$0xff] }
 0x2ea   : > { %vm1897_vm1 = vcmp.gt.f32.partialorder %v1351_v43, 0.0  ;;  %v2153_v47 = vmul.f32 0.2, %v1351_v43  ;;  %v1355_v60 = vadd.f32 %v1354_v27, %v11928_v6  ;;  %v12560_v34 = vpack.c.bf16 %v3168_v29, %v3160_v1  ;;  %v2673_v26 = vld [vmem:[%s11651_s22 + $0x50] sm:$0xff] }
 0x2eb   : > { %14715 = vst [vmem:[#allocation97_spill] sm:$0xff] %v12551_v53  ;;  %vm1898_vm2 = vcmp.gt.f32.partialorder %v1353_v63, 0.0  ;;  %v2154_v28 = vmul.f32 0.2, %v1353_v63  ;;  %v1357_v57 = vadd.f32 %v1356_v9, %v11936_v14  ;;  %vm2028_vm3 = vcmp.gt.f32.partialorder %v1626_v38, 0.0  ;;  %1845 = vmatmul.mubr.bf16.gmra.mrb[172].mxu1 %v11787_v44 }
 0x2ec   : > { %14716 = vst [vmem:[#allocation98_spill] sm:$0xff] %v12560_v34  ;;  %v2409_v35 = vsel %vm1897_vm1, %v1351_v43, %v2153_v47  ;;  %vm1905_vm4 = vcmp.gt.f32.partialorder %v1355_v60, 0.0  ;;  %v2161_v49 = vmul.f32 0.2, %v1355_v60  ;;  %5043 = vmatprep.mubr.bf16.mxu0 %v12560_v34  ;;  %v12569_v1 = vadd.f32 %v12276_v58, %v11903_v3  ;;  %1854 = vmatprep.mubr.bf16.mxu1 %v14666_v17  ;;  %v2666_v43 = vld [vmem:[%s11651_s22 + $0x18] sm:$0xff] }
 0x2ed   : > { %v2410_v29 = vsel %vm1898_vm2, %v1353_v63, %v2154_v28  ;;  %vm1906_vm5 = vcmp.gt.f32.partialorder %v1357_v57, 0.0  ;;  %v2162_v27 = vmul.f32 0.2, %v1357_v57  ;;  %5044 = vmatmul.mubr.bf16.gmra.mrb[124].mxu0 %v12551_v53  ;;  %v2674_v47 = vld [vmem:[%s11651_s22 + $0x58] sm:$0xff]  ;;  %v12578_v9 = vsel %vm2020_vm15, %v12509_v41, %v2276_v50  ;;  %v12589_v28 = vpop.f32.mrb[60].mxu0  ;;  %v1360_v8 = vpop.f32.mrb[68].mxu1 }
 0x2ee   : > { %14717 = vst [vmem:[#allocation99_spill] sm:$0xff] %v12578_v9  ;;  %v2417_v44 = vsel %vm1905_vm4, %v1355_v60, %v2161_v49  ;;  %v12583_v58 = vsel %vm2027_vm0, %v12519_v42, %v2283_v19  ;;  %v12586_v63 = vsel %vm2028_vm3, %v1626_v38, %v2284_v55  ;;  %vm2035_vm6 = vcmp.gt.f32.partialorder %v12555_v46, 0.0  ;;  %v12592_v50 = vpop.f32.mrb[61].mxu0  ;;  %v1362_v49 = vpop.f32.mrb[69].mxu1  ;;  %v10271_v9 = vld [vmem:[#allocation11 + $0x444] ss:$16 sps:$4 sm:$0xff]  }
 0x2ef   : > { %14718 = vst [vmem:[#allocation100_spill] sm:$0xff] %v12583_v58  ;;  %14719 = vst [vmem:[#allocation101_spill] sm:$0xff] %v12586_v63  ;;  %v2921_v53 = vmul.f32 %v2665_v4, %v2409_v35  ;;  %v2929_v34 = vmul.f32 %v2673_v26, %v2417_v44  ;;  %v2418_v12 = vsel %vm1906_vm5, %v1357_v57, %v2162_v27  ;;  %v2291_v41 = vmul.f32 0.2, %v12555_v46  ;;  %v12596_v38 = vpop.f32.mrb[62].mxu0  ;;  %v1364_v4 = vpop.f32.mrb[70].mxu1 }
 0x2f0   : > { %v1361_v60 = vadd.f32 %v1360_v8, %v11928_v6  ;;  %v2922_v42 = vmul.f32 %v2666_v43, %v2410_v29  ;;  %v2930_v19 = vmul.f32 %v2674_v47, %v2418_v12  ;;  %vm2036_vm7 = vcmp.gt.f32.partialorder %v12569_v1, 0.0  ;;  %v12606_v27 = vpop.f32.mrb[63].mxu0  ;;  %v1366_v29 = vpop.f32.mrb[71].mxu1  ;;  %v10265_v44 = vld [vmem:[#allocation11 + $0x424] ss:$16 sps:$4 sm:$0xff]  }
 0x2f1   : > { %v12598_v55 = vpack.c.bf16 %v2929_v34, %v2921_v53  ;;  %v1363_v35 = vadd.f32 %v1362_v49, %v11936_v14  ;;  %v2292_v57 = vmul.f32 0.2, %v12569_v1  ;;  %v12604_v26 = vadd.f32 %v12302_v37, %v11892_v40  ;;  %v10257_v34 = vld [vmem:[#allocation11 + $0x400] ss:$16 sps:$4 sm:$0xff]  }
 0x2f2   : > { %vm1913_vm8 = vcmp.gt.f32.partialorder %v1361_v60, 0.0  ;;  %v2169_v8 = vmul.f32 0.2, %v1361_v60  ;;  %v1365_v12 = vadd.f32 %v1364_v4, %v11928_v6  ;;  %v12609_v53 = vpack.c.bf16 %v2930_v19, %v2922_v42  ;;  %v2681_v42 = vld [vmem:[%s11651_s22 + $0x90] sm:$0xff] }
 0x2f3   : > { %14720 = vst [vmem:[#allocation102_spill] sm:$0xff] %v12598_v55  ;;  %vm1914_vm9 = vcmp.gt.f32.partialorder %v1363_v35, 0.0  ;;  %v2170_v43 = vmul.f32 0.2, %v1363_v35  ;;  %v1367_v47 = vadd.f32 %v1366_v29, %v11936_v14  ;;  %v12614_v37 = vadd.f32 %v12307_v10, %v11903_v3  ;;  %1855 = vmatmul.mubr.bf16.gmra.mrb[176].mxu1 %v11795_v52  ;;  %v2689_v19 = vld [vmem:[%s11651_s22 + $0xd0] sm:$0xff]  ;;  %v2682_v10 = vld [vmem:[%s11651_s22 + $0x98] sm:$0xff] }
 0x2f4   : > { %14721 = vst [vmem:[#allocation103_spill] sm:$0xff] %v12609_v53  ;;  %v2425_v49 = vsel %vm1913_vm8, %v1361_v60, %v2169_v8  ;;  %vm1921_vm10 = vcmp.gt.f32.partialorder %v1365_v12, 0.0  ;;  %v2177_v58 = vmul.f32 0.2, %v1365_v12  ;;  %5086 = vmatprep.mubr.bf16.mxu0 %v12609_v53  ;;  %v12623_v4 = vsel %vm2035_vm6, %v12555_v46, %v2291_v41  ;;  %1864 = vmatprep.mubr.bf16.mxu1 %v14666_v17  ;;  %v2690_v60 = vld [vmem:[%s11651_s22 + $0xd8] sm:$0xff] }
 0x2f5   : > { %14722 = vst [vmem:[#allocation104_spill] sm:$0xff] %v12623_v4  ;;  %v2426_v29 = vsel %vm1914_vm9, %v1363_v35, %v2170_v43  ;;  %vm1922_vm11 = vcmp.gt.f32.partialorder %v1367_v47, 0.0  ;;  %v2178_v63 = vmul.f32 0.2, %v1367_v47  ;;  %5087 = vmatmul.mubr.bf16.vlgmr.msra.gmra.mrb[64].mxu0 %v12598_v55  ;;  %v1638_v52 = vadd.f32 %v12311_v15, %v11892_v40  ;;  %v10263_v53 = vld [vmem:[#allocation11 + $0x420] ss:$16 sps:$4 sm:$0xff]  }
 0x2f6   : > { %v2433_v8 = vsel %vm1921_vm10, %v1365_v12, %v2177_v58  ;;  %5248 = vmatpush1.bf16.msra.mxu0 %v10257_v34  ;;  %v12634_v46 = vsel %vm2036_vm7, %v12569_v1, %v2292_v57  ;;  %vm2043_vm12 = vcmp.gt.f32.partialorder %v12604_v26, 0.0  ;;  %v2299_v41 = vmul.f32 0.2, %v12604_v26  ;;  %v1370_v43 = vpop.f32.mrb[72].mxu1 }
 0x2f7   : > { %14723 = vst [vmem:[#allocation105_spill] sm:$0xff] %v12634_v46  ;;  %v2434_v35 = vsel %vm1922_vm11, %v1367_v47, %v2178_v63  ;;  %v2937_v55 = vmul.f32 %v2681_v42, %v2425_v49  ;;  %v2945_v4 = vmul.f32 %v2689_v19, %v2433_v8  ;;  %5249 = vmatprep.subr.bf16.mxu0 %v10265_v44  ;;  %vm2044_vm13 = vcmp.gt.f32.partialorder %v12614_v37, 0.0  ;;  %v1372_v58 = vpop.f32.mrb[73].mxu1  ;;  %v2697_v8 = vld [vmem:[%s11651_s22 + $0x110] sm:$0xff] }
 0x2f8   : > { %v1371_v15 = vadd.f32 %v1370_v43, %v11928_v6  ;;  %v2938_v12 = vmul.f32 %v2682_v10, %v2426_v29  ;;  %v2946_v34 = vmul.f32 %v2690_v60, %v2434_v35  ;;  %v2300_v1 = vmul.f32 0.2, %v12614_v37  ;;  %v1374_v46 = vpop.f32.mrb[74].mxu1  ;;  %v10269_v29 = vld [vmem:[#allocation11 + $0x440] ss:$16 sps:$4 sm:$0xff]   ;;  %v2698_v43 = vld [vmem:[%s11651_s22 + $0x118] sm:$0xff] }
 0x2f9   : > { %v1373_v57 = vadd.f32 %v1372_v58, %v11936_v14  ;;  %v12642_v22 = vpack.c.bf16 %v2945_v4, %v2937_v55  ;;  %v2307_v63 = vmul.f32 0.2, %v1638_v52  ;;  %v12646_v47 = vadd.f32 %v12321_v62, %v11903_v3  ;;  %v1376_v42 = vpop.f32.mrb[75].mxu1  ;;  %v10277_v4 = vld [vmem:[#allocation11 + $0x464] ss:$16 sps:$4 sm:$0xff]  }
 0x2fa   : > { %vm1929_vm14 = vcmp.gt.f32.partialorder %v1371_v15, 0.0  ;;  %v2185_v44 = vmul.f32 0.2, %v1371_v15  ;;  %v1375_v49 = vadd.f32 %v1374_v46, %v11928_v6  ;;  %v12649_v19 = vpack.c.bf16 %v2946_v34, %v2938_v12  ;;  %5250 = vmatpush1.bf16.msra.mxu0 %v10263_v53  ;;  %v2705_v46 = vld [vmem:[%s11651_s22 + $0x150] sm:$0xff] }
 0x2fb   : > { %14724 = vst [vmem:[#allocation106_spill] sm:$0xff] %v12642_v22  ;;  %vm1930_vm15 = vcmp.gt.f32.partialorder %v1373_v57, 0.0  ;;  %v2186_v10 = vmul.f32 0.2, %v1373_v57  ;;  %v1377_v55 = vadd.f32 %v1376_v42, %v11936_v14  ;;  %5251 = vmatprep.subr.bf16.mxu0 %v10271_v9  ;;  %vm2051_vm0 = vcmp.gt.f32.partialorder %v1638_v52, 0.0  ;;  %1865 = vmatmul.mubr.bf16.gmra.mrb[180].mxu1 %v11803_v56 }
 0x2fc   : > { %14725 = vst [vmem:[#allocation107_spill] sm:$0xff] %v12649_v19  ;;  %v2441_v62 = vsel %vm1929_vm14, %v1371_v15, %v2185_v44  ;;  %vm1937_vm1 = vcmp.gt.f32.partialorder %v1375_v49, 0.0  ;;  %v2193_v60 = vmul.f32 0.2, %v1375_v49  ;;  %5096 = vmatprep.mubr.bf16.mxu0 %v12649_v19  ;;  %v12658_v53 = vadd.f32 %v12353_v54, %v11892_v40  ;;  %1874 = vmatprep.mubr.bf16.mxu1 %v14666_v17  ;;  %v2706_v15 = vld [vmem:[%s11651_s22 + $0x158] sm:$0xff] }
 0x2fd   : > { %v2442_v35 = vsel %vm1930_vm15, %v1373_v57, %v2186_v10  ;;  %vm1938_vm2 = vcmp.gt.f32.partialorder %v1377_v55, 0.0  ;;  %v2194_v9 = vmul.f32 0.2, %v1377_v55  ;;  %5097 = vmatmul.mubr.bf16.gmra.mrb[68].mxu0 %v12642_v22  ;;  %v12667_v56 = vsel %vm2043_vm12, %v12604_v26, %v2299_v41  ;;  %v10275_v12 = vld [vmem:[#allocation11 + $0x460] ss:$16 sps:$4 sm:$0xff]   ;;  %v1380_v44 = vpop.f32.mrb[76].mxu1 }
 0x2fe   : > { %v2449_v58 = vsel %vm1937_vm1, %v1375_v49, %v2193_v60  ;;  %5252 = vmatpush1.bf16.msra.mxu0 %v10269_v29  ;;  %v12672_v54 = vsel %vm2044_vm13, %v12614_v37, %v2300_v1  ;;  %v12675_v34 = vsel %vm2051_vm0, %v1638_v52, %v2307_v63  ;;  %vm2052_vm3 = vcmp.gt.f32.partialorder %v12646_v47, 0.0  ;;  %v10283_v41 = vld [vmem:[#allocation11 + $0x484] ss:$16 sps:$4 sm:$0xff]   ;;  %v1382_v29 = vpop.f32.mrb[77].mxu1  ;;  %v14770_v22 = vld [vmem:[#allocation49_spill] sm:$0xff] }
 0x2ff   : > { %v2450_v57 = vsel %vm1938_vm2, %v1377_v55, %v2194_v9  ;;  %v2953_v42 = vmul.f32 %v2697_v8, %v2441_v62  ;;  %v2961_v10 = vmul.f32 %v2705_v46, %v2449_v58  ;;  %5253 = vmatprep.subr.bf16.mxu0 %v10277_v4  ;;  %v2308_v26 = vmul.f32 0.2, %v12646_v47  ;;  %v1384_v1 = vpop.f32.mrb[78].mxu1  ;;  %v10281_v9 = vld [vmem:[#allocation11 + $0x480] ss:$16 sps:$4 sm:$0xff]  }
 0x300   : > { %v1381_v49 = vadd.f32 %v1380_v44, %v11928_v6  ;;  %v2954_v60 = vmul.f32 %v2698_v43, %v2442_v35  ;;  %v2962_v37 = vmul.f32 %v2706_v15, %v2450_v57  ;;  %vm2059_vm4 = vcmp.gt.f32.partialorder %v12658_v53, 0.0  ;;  %v1386_v46 = vpop.f32.mrb[79].mxu1  ;;  %v10289_v58 = vld [vmem:[#allocation11 + $0x4a4] ss:$16 sps:$4 sm:$0xff]  }
 0x301   : > { %v1383_v52 = vadd.f32 %v1382_v29, %v11936_v14  ;;  %v12682_v63 = vpack.c.bf16 %v2961_v10, %v2953_v42  ;;  %v2315_v55 = vmul.f32 0.2, %v12658_v53  ;;  %v12687_v4 = vadd.f32 %v12356_v51, %v11903_v3  ;;  %v2721_v42 = vld [vmem:[%s11651_s22 + $0x1d0] sm:$0xff]  ;;  %v2722_v29 = vld [vmem:[%s11651_s22 + $0x1d8] sm:$0xff] }
 0x302   : > { %vm1945_vm5 = vcmp.gt.f32.partialorder %v1381_v49, 0.0  ;;  %v2201_v62 = vmul.f32 0.2, %v1381_v49  ;;  %v1385_v8 = vadd.f32 %v1384_v1, %v11928_v6  ;;  %v12690_v35 = vpack.c.bf16 %v2962_v37, %v2954_v60  ;;  %5254 = vmatpush1.bf16.msra.mxu0 %v10275_v12  ;;  %v2713_v12 = vld [vmem:[%s11651_s22 + $0x190] sm:$0xff] }
 0x303   : > { %14726 = vst [vmem:[#allocation108_spill] sm:$0xff] %v12682_v63  ;;  %vm1946_vm6 = vcmp.gt.f32.partialorder %v1383_v52, 0.0  ;;  %v2202_v43 = vmul.f32 0.2, %v1383_v52  ;;  %v1387_v15 = vadd.f32 %v1386_v46, %v11936_v14  ;;  %5255 = vmatprep.subr.bf16.mxu0 %v10283_v41  ;;  %v12695_v51 = vadd.f32 %v12360_v39, %v11892_v40  ;;  %1875 = vmatmul.mubr.bf16.gmra.mrb[184].mxu1 %v11811_v59 }
 0x304   : > { %14727 = vst [vmem:[#allocation109_spill] sm:$0xff] %v12690_v35  ;;  %v2457_v57 = vsel %vm1945_vm5, %v1381_v49, %v2201_v62  ;;  %vm1953_vm7 = vcmp.gt.f32.partialorder %v1385_v8, 0.0  ;;  %v2209_v44 = vmul.f32 0.2, %v1385_v8  ;;  %5106 = vmatprep.mubr.bf16.mxu0 %v12690_v35  ;;  %v12704_v10 = vsel %vm2052_vm3, %v12646_v47, %v2308_v26  ;;  %1884 = vmatprep.mubr.bf16.mxu1 %v14666_v17  ;;  %v2714_v49 = vld [vmem:[%s11651_s22 + $0x198] sm:$0xff] }
 0x305   : > { %v2458_v41 = vsel %vm1946_vm6, %v1383_v52, %v2202_v43  ;;  %vm1954_vm8 = vcmp.gt.f32.partialorder %v1387_v15, 0.0  ;;  %v2210_v39 = vmul.f32 0.2, %v1387_v15  ;;  %5107 = vmatmul.mubr.bf16.gmra.mrb[72].mxu0 %v12682_v63  ;;  %v1650_v59 = vadd.f32 %v12369_v61, %v11903_v3  ;;  %v10287_v26 = vld [vmem:[#allocation11 + $0x4a0] ss:$16 sps:$4 sm:$0xff]   ;;  %v1390_v1 = vpop.f32.mrb[80].mxu1 }
 0x306   : > { %v2465_v60 = vsel %vm1953_vm7, %v1385_v8, %v2209_v44  ;;  %v12715_v37 = vsel %vm2059_vm4, %v12658_v53, %v2315_v55  ;;  %vm2060_vm9 = vcmp.gt.f32.partialorder %v12687_v4, 0.0  ;;  %v2316_v47 = vmul.f32 0.2, %v12687_v4  ;;  %5256 = vmatpush1.bf16.msra.mxu0 %v10281_v9  ;;  %v10295_v61 = vld [vmem:[#allocation11 + $0x4c4] ss:$16 sps:$4 sm:$0xff]   ;;  %v1392_v46 = vpop.f32.mrb[81].mxu1 }
 0x307   : > { %v2466_v52 = vsel %vm1954_vm8, %v1387_v15, %v2210_v39  ;;  %v2969_v17 = vmul.f32 %v2713_v12, %v2457_v57  ;;  %v2977_v62 = vmul.f32 %v2721_v42, %v2465_v60  ;;  %vm2067_vm10 = vcmp.gt.f32.partialorder %v12695_v51, 0.0  ;;  %5257 = vmatprep.subr.bf16.mxu0 %v10289_v58  ;;  %v1394_v63 = vpop.f32.mrb[82].mxu1  ;;  %v10293_v39 = vld [vmem:[#allocation11 + $0x4c0] ss:$16 sps:$4 sm:$0xff]   ;;  %v10284_v35 = vld [vmem:[#allocation11 + $0x288] ss:$16 sps:$4 sm:$0xff]  }
 0x308   : > { %v1391_v8 = vadd.f32 %v1390_v1, %v11928_v6  ;;  %v2970_v43 = vmul.f32 %v2714_v49, %v2458_v41  ;;  %v2978_v53 = vmul.f32 %v2722_v29, %v2466_v52  ;;  %v2323_v55 = vmul.f32 0.2, %v12695_v51  ;;  %v1396_v42 = vpop.f32.mrb[83].mxu1  ;;  %v2737_v1 = vld [vmem:[%s11651_s22 + $0x250] sm:$0xff] }
 0x309   : > { %v1393_v44 = vadd.f32 %v1392_v46, %v11936_v14  ;;  %v12723_v9 = vpack.c.bf16 %v2977_v62, %v2969_v17  ;;  %v2324_v15 = vmul.f32 0.2, %v1650_v59  ;;  %v12727_v57 = vadd.f32 %v12401_v24, %v11892_v40  ;;  %v10301_v24 = vld [vmem:[#allocation11 + $0x4e4] ss:$16 sps:$4 sm:$0xff]  }
 0x30a   : > { %vm1961_vm11 = vcmp.gt.f32.partialorder %v1391_v8, 0.0  ;;  %v2217_v58 = vmul.f32 0.2, %v1391_v8  ;;  %v1395_v12 = vadd.f32 %v1394_v63, %v11928_v6  ;;  %v12730_v41 = vpack.c.bf16 %v2978_v53, %v2970_v43  ;;  %5258 = vmatpush1.bf16.msra.mxu0 %v10287_v26  ;;  %v2729_v63 = vld [vmem:[%s11651_s22 + $0x210] sm:$0xff] }
 0x30b   : > { %14728 = vst [vmem:[#allocation110_spill] sm:$0xff] %v12723_v9  ;;  %vm1962_vm12 = vcmp.gt.f32.partialorder %v1393_v44, 0.0  ;;  %v2218_v49 = vmul.f32 0.2, %v1393_v44  ;;  %v1397_v29 = vadd.f32 %v1396_v42, %v11936_v14  ;;  %vm2068_vm13 = vcmp.gt.f32.partialorder %v1650_v59, 0.0  ;;  %5259 = vmatprep.subr.bf16.mxu0 %v10295_v61  ;;  %1885 = vmatmul.mubr.bf16.gmra.mrb[188].mxu1 %v11819_v0  ;;  %v2730_v61 = vld [vmem:[%s11651_s22 + $0x218] sm:$0xff] }
 0x30c   : > { %14729 = vst [vmem:[#allocation111_spill] sm:$0xff] %v12730_v41  ;;  %v2473_v60 = vsel %vm1961_vm11, %v1391_v8, %v2217_v58  ;;  %vm1969_vm14 = vcmp.gt.f32.partialorder %v1395_v12, 0.0  ;;  %v2225_v52 = vmul.f32 0.2, %v1395_v12  ;;  %5116 = vmatprep.mubr.bf16.mxu0 %v12730_v41  ;;  %v12739_v26 = vadd.f32 %v12404_v36, %v11903_v3  ;;  %5665 = vmatprep.mubr.bf16.mxu1 %v11888_v33  ;;  %v2738_v8 = vld [vmem:[%s11651_s22 + $0x258] sm:$0xff] }
 0x30d   : > { %v2474_v17 = vsel %vm1962_vm12, %v1393_v44, %v2218_v49  ;;  %vm1970_vm15 = vcmp.gt.f32.partialorder %v1397_v29, 0.0  ;;  %v2226_v62 = vmul.f32 0.2, %v1397_v29  ;;  %5117 = vmatmul.mubr.bf16.gmra.mrb[76].mxu0 %v12723_v9  ;;  %v12748_v0 = vsel %vm2060_vm9, %v12687_v4, %v2316_v47  ;;  %v10299_v33 = vld [vmem:[#allocation11 + $0x4e0] ss:$16 sps:$4 sm:$0xff]   ;;  %v1400_v44 = vpop.f32.mrb[84].mxu1 }
 0x30e   : > { %v2481_v46 = vsel %vm1969_vm14, %v1395_v12, %v2225_v52  ;;  %v12753_v36 = vsel %vm2067_vm10, %v12695_v51, %v2323_v55  ;;  %v12756_v43 = vsel %vm2068_vm13, %v1650_v59, %v2324_v15  ;;  %vm2075_vm0 = vcmp.gt.f32.partialorder %v12727_v57, 0.0  ;;  %5260 = vmatpush1.bf16.msra.mxu0 %v10293_v39  ;;  %v10307_v47 = vld [vmem:[#allocation11 + $0x504] ss:$16 sps:$4 sm:$0xff]   ;;  %v1402_v49 = vpop.f32.mrb[85].mxu1  ;;  %v10260_v52 = vld [vmem:[#allocation11 + $0x208] ss:$16 sps:$4 sm:$0xff]  }
 0x30f   : > { %v2482_v53 = vsel %vm1970_vm15, %v1397_v29, %v2226_v62  ;;  %v2985_v58 = vmul.f32 %v2729_v63, %v2473_v60  ;;  %v2993_v42 = vmul.f32 %v2737_v1, %v2481_v46  ;;  %v2331_v4 = vmul.f32 0.2, %v12727_v57  ;;  %5261 = vmatprep.subr.bf16.mxu0 %v10301_v24  ;;  %v1404_v15 = vpop.f32.mrb[86].mxu1  ;;  %v10268_v29 = vld [vmem:[#allocation11 + $0x22c] ss:$16 sps:$4 sm:$0xff]  }
 0x310   : > { %v1401_v12 = vadd.f32 %v1400_v44, %v11928_v6  ;;  %v2986_v51 = vmul.f32 %v2730_v61, %v2474_v17  ;;  %v2994_v55 = vmul.f32 %v2738_v8, %v2482_v53  ;;  %vm2076_vm1 = vcmp.gt.f32.partialorder %v12739_v26, 0.0  ;;  %v1406_v17 = vpop.f32.mrb[87].mxu1  ;;  %v10305_v61 = vld [vmem:[#allocation11 + $0x500] ss:$16 sps:$4 sm:$0xff]   ;;  %v10313_v53 = vld [vmem:[#allocation11 + $0x524] ss:$16 sps:$4 sm:$0xff]  }
 0x311   : > { %v1403_v59 = vadd.f32 %v1402_v49, %v11936_v14  ;;  %v12763_v39 = vpack.c.bf16 %v2993_v42, %v2985_v58  ;;  %v2332_v60 = vmul.f32 0.2, %v12739_v26  ;;  %v12768_v24 = vadd.f32 %v12408_v18, %v11892_v40  ;;  %v14732_v42 = vld [vmem:[#allocation40_spill] sm:$0xff]  ;;  %v2745_v49 = vld [vmem:[%s11651_s22 + $0x290] sm:$0xff] }
 0x312   : > { %vm1977_vm2 = vcmp.gt.f32.partialorder %v1401_v12, 0.0  ;;  %v2233_v63 = vmul.f32 0.2, %v1401_v12  ;;  %v1405_v1 = vadd.f32 %v1404_v15, %v11928_v6  ;;  %v12771_v62 = vpack.c.bf16 %v2994_v55, %v2986_v51  ;;  %5262 = vmatpush1.bf16.msra.mxu0 %v10299_v33  ;;  %v2746_v33 = vld [vmem:[%s11651_s22 + $0x298] sm:$0xff]  ;;  %v2753_v51 = vld [vmem:[%s11651_s22 + $0x2d0] sm:$0xff] }
 0x313   : > { %14730 = vst [vmem:[#allocation112_spill] sm:$0xff] %v12763_v39  ;;  %vm1978_vm3 = vcmp.gt.f32.partialorder %v1403_v59, 0.0  ;;  %v2234_v8 = vmul.f32 0.2, %v1403_v59  ;;  %v1407_v46 = vadd.f32 %v1406_v17, %v11936_v14  ;;  %v12776_v18 = vadd.f32 %v12418_v11, %v11903_v3  ;;  %5263 = vmatprep.subr.bf16.mxu0 %v10307_v47  ;;  %5666 = vmatmul.mubr.bf16.vlgmr.msra.gmra.mrb[192].mxu1 %v14732_v42  ;;  %v2754_v15 = vld [vmem:[%s11651_s22 + $0x2d8] sm:$0xff] }
 0x314   : > { %14731 = vst [vmem:[#allocation113_spill] sm:$0xff] %v12771_v62  ;;  %v2489_v44 = vsel %vm1977_vm2, %v1401_v12, %v2233_v63  ;;  %vm1985_vm4 = vcmp.gt.f32.partialorder %v1405_v1, 0.0  ;;  %v2241_v58 = vmul.f32 0.2, %v1405_v1  ;;  %5126 = vmatprep.mubr.bf16.mxu0 %v12771_v62  ;;  %v12786_v55 = vsel %vm2075_vm0, %v12727_v57, %v2331_v4  ;;  %v14733_v12 = vld [vmem:[#allocation42_spill] sm:$0xff]  ;;  %5827 = vmatpush1.bf16.msra.mxu1 %v10260_v52 }
 0x315   : > { %v2490_v11 = vsel %vm1978_vm3, %v1403_v59, %v2234_v8  ;;  %vm1986_vm5 = vcmp.gt.f32.partialorder %v1407_v46, 0.0  ;;  %v2242_v47 = vmul.f32 0.2, %v1407_v46  ;;  %5127 = vmatmul.mubr.bf16.gmra.mrb[80].mxu0 %v12763_v39  ;;  %5675 = vmatprep.mubr.bf16.mxu1 %v14733_v12  ;;  %v10266_v63 = vld [vmem:[#allocation11 + $0x228] ss:$16 sps:$4 sm:$0xff]   ;;  %v12793_v17 = vadd.f32 %v12450_v25, %v11892_v40  ;;  %v1410_v12 = vpop.f32.mrb[88].mxu1 }
 0x316   : > { %v2497_v42 = vsel %vm1985_vm4, %v1405_v1, %v2241_v58  ;;  %v12799_v57 = vsel %vm2076_vm1, %v12739_v26, %v2332_v60  ;;  %vm2083_vm6 = vcmp.gt.f32.partialorder %v12768_v24, 0.0  ;;  %v2339_v4 = vmul.f32 0.2, %v12768_v24  ;;  %5264 = vmatpush1.bf16.msra.mxu0 %v10305_v61  ;;  %v10311_v59 = vld [vmem:[#allocation11 + $0x520] ss:$16 sps:$4 sm:$0xff]   ;;  %5828 = vmatprep.subr.bf16.mxu1 %v10268_v29  ;;  %v1412_v26 = vpop.f32.mrb[89].mxu1 }
 0x317   : > { %v2498_v8 = vsel %vm1986_vm5, %v1407_v46, %v2242_v47  ;;  %v3001_v39 = vmul.f32 %v2745_v49, %v2489_v44  ;;  %v3009_v25 = vmul.f32 %v2753_v51, %v2497_v42  ;;  %v10274_v62 = vld [vmem:[#allocation11 + $0x24c] ss:$16 sps:$4 sm:$0xff]   ;;  %vm2084_vm7 = vcmp.gt.f32.partialorder %v12776_v18, 0.0  ;;  %5265 = vmatprep.subr.bf16.mxu0 %v10313_v53  ;;  %v10319_v52 = vld [vmem:[#allocation11 + $0x544] ss:$16 sps:$4 sm:$0xff]   ;;  %v1414_v46 = vpop.f32.mrb[90].mxu1 }
 0x318   : > { %v1411_v1 = vadd.f32 %v1410_v12, %v11928_v6  ;;  %v3002_v60 = vmul.f32 %v2746_v33, %v2490_v11  ;;  %v3010_v58 = vmul.f32 %v2754_v15, %v2498_v8  ;;  %v2340_v9 = vmul.f32 0.2, %v12776_v18  ;;  %v10272_v29 = vld [vmem:[#allocation11 + $0x248] ss:$16 sps:$4 sm:$0xff]   ;;  %v1416_v51 = vpop.f32.mrb[91].mxu1  ;;  %5829 = vmatpush1.bf16.msra.mxu1 %v10266_v63  ;;  %v2761_v15 = vld [vmem:[%s11651_s22 + $0x310] sm:$0xff] }
 0x319   : > { %v1413_v61 = vadd.f32 %v1412_v26, %v11936_v14  ;;  %v12807_v47 = vpack.c.bf16 %v3009_v25, %v3001_v39  ;;  %v2347_v44 = vmul.f32 0.2, %v12793_v17  ;;  %v12812_v53 = vadd.f32 %v12453_v21, %v11903_v3  ;;  %v10317_v39 = vld [vmem:[#allocation11 + $0x540] ss:$16 sps:$4 sm:$0xff]   ;;  %v2762_v12 = vld [vmem:[%s11651_s22 + $0x318] sm:$0xff]  ;;  %5830 = vmatprep.subr.bf16.mxu1 %v10274_v62  ;;  %v14736_v63 = vld [vmem:[#allocation41_spill] sm:$0xff] }
 0x31a   : > { %vm1993_vm8 = vcmp.gt.f32.partialorder %v1411_v1, 0.0  ;;  %v2249_v49 = vmul.f32 0.2, %v1411_v1  ;;  %v1415_v33 = vadd.f32 %v1414_v46, %v11928_v6  ;;  %v12815_v11 = vpack.c.bf16 %v3010_v58, %v3002_v60  ;;  %5266 = vmatpush1.bf16.msra.mxu0 %v10311_v59  ;;  %v10280_v21 = vld [vmem:[#allocation11 + $0x26c] ss:$16 sps:$4 sm:$0xff]   ;;  %v2769_v59 = vld [vmem:[%s11651_s22 + $0x350] sm:$0xff] }
 0x31b   : > { %14734 = vst [vmem:[#allocation40_spill] sm:$0xff] %v12807_v47  ;;  %vm1994_vm9 = vcmp.gt.f32.partialorder %v1413_v61, 0.0  ;;  %v2250_v42 = vmul.f32 0.2, %v1413_v61  ;;  %v1417_v8 = vadd.f32 %v1416_v51, %v11936_v14  ;;  %vm2091_vm10 = vcmp.gt.f32.partialorder %v12793_v17, 0.0  ;;  %5267 = vmatprep.subr.bf16.mxu0 %v10319_v52  ;;  %5676 = vmatmul.mubr.bf16.gmra.mrb[196].mxu1 %v14736_v63  ;;  %v14737_v52 = vld [vmem:[#allocation44_spill] sm:$0xff] }
 0x31c   : > { %14735 = vst [vmem:[#allocation42_spill] sm:$0xff] %v12815_v11  ;;  %v2505_v25 = vsel %vm1993_vm8, %v1411_v1, %v2249_v49  ;;  %vm2001_vm11 = vcmp.gt.f32.partialorder %v1415_v33, 0.0  ;;  %v2257_v26 = vmul.f32 0.2, %v1415_v33  ;;  %5136 = vmatprep.mubr.bf16.mxu0 %v12815_v11  ;;  %v12827_v60 = vadd.f32 %v12457_v7, %v11892_v40  ;;  %v10322_v58 = vld [vmem:[#allocation11 + $0x564] ss:$16 sps:$4 sm:$0xff]   ;;  %5685 = vmatprep.mubr.bf16.mxu1 %v14737_v52 }
 0x31d   : > { %v2506_v62 = vsel %vm1994_vm9, %v1413_v61, %v2250_v42  ;;  %vm2002_vm12 = vcmp.gt.f32.partialorder %v1417_v8, 0.0  ;;  %v2258_v46 = vmul.f32 0.2, %v1417_v8  ;;  %5137 = vmatmul.mubr.bf16.gmra.mrb[84].mxu0 %v12807_v47  ;;  %v2770_v1 = vld [vmem:[%s11651_s22 + $0x358] sm:$0xff]  ;;  %v12836_v51 = vsel %vm2083_vm6, %v12768_v24, %v2339_v4  ;;  %5831 = vmatpush1.bf16.msra.mxu1 %v10272_v29  ;;  %v10320_v52 = vld [vmem:[#allocation11 + $0x560] ss:$16 sps:$4 sm:$0xff]  }
 0x31e   : > { %v10278_v49 = vld [vmem:[#allocation11 + $0x268] ss:$16 sps:$4 sm:$0xff]   ;;  %v2513_v63 = vsel %vm2001_vm11, %v1415_v33, %v2257_v26  ;;  %v10286_v7 = vld [vmem:[#allocation11 + $0x28c] ss:$16 sps:$4 sm:$0xff]   ;;  %v12841_v61 = vsel %vm2084_vm7, %v12776_v18, %v2340_v9  ;;  %v12846_v42 = vsel %vm2091_vm10, %v12793_v17, %v2347_v44  ;;  %vm2092_vm13 = vcmp.gt.f32.partialorder %v12812_v53, 0.0  ;;  %5268 = vmatpush1.bf16.msra.mxu0 %v10317_v39  ;;  %v1420_v24 = vpop.f32.mrb[92].mxu1  ;;  %5832 = vmatprep.subr.bf16.mxu1 %v10280_v21 }
 0x31f   : > { %v2514_v47 = vsel %vm2002_vm12, %v1417_v8, %v2258_v46  ;;  %v3017_v4 = vmul.f32 %v2761_v15, %v2505_v25  ;;  %v3025_v33 = vmul.f32 %v2769_v59, %v2513_v63  ;;  %v2348_v29 = vmul.f32 0.2, %v12812_v53  ;;  %v10328_v26 = vld [vmem:[#allocation11 + $0x584] ss:$16 sps:$4 sm:$0xff]   ;;  %v1422_v18 = vpop.f32.mrb[93].mxu1  ;;  %5269 = vmatprep.subr.bf16.mxu0 %v10322_v58  ;;  %v2778_v63 = vld [vmem:[%s11651_s22 + $0x398] sm:$0xff] }
 0x320   : > { %v1421_v9 = vadd.f32 %v1420_v24, %v11928_v6  ;;  %v3018_v11 = vmul.f32 %v2762_v12, %v2506_v62  ;;  %v3026_v41 = vmul.f32 %v2770_v1, %v2514_v47  ;;  %vm2099_vm14 = vcmp.gt.f32.partialorder %v12827_v60, 0.0  ;;  %v1424_v44 = vpop.f32.mrb[94].mxu1  ;;  %v10292_v15 = vld [vmem:[#allocation11 + $0x2ac] ss:$16 sps:$4 sm:$0xff]   ;;  %v10326_v58 = vld [vmem:[#allocation11 + $0x580] ss:$16 sps:$4 sm:$0xff]  }
 0x321   : > { %v1423_v17 = vadd.f32 %v1422_v18, %v11936_v14  ;;  %v12853_v39 = vpack.c.bf16 %v3025_v33, %v3017_v4  ;;  %v2355_v8 = vmul.f32 0.2, %v12827_v60  ;;  %v12858_v21 = vadd.f32 %v12466_v45, %v11903_v3  ;;  %v1426_v12 = vpop.f32.mrb[95].mxu1  ;;  %5833 = vmatpush1.bf16.msra.mxu1 %v10278_v49  ;;  %v10331_v1 = vld [vmem:[#allocation11 + $0x5a4] ss:$16 sps:$4 sm:$0xff]   ;;  %v14740_v49 = vld [vmem:[#allocation43_spill] sm:$0xff] }
 0x322   : > { %vm2009_vm15 = vcmp.gt.f32.partialorder %v1421_v9, 0.0  ;;  %v2265_v25 = vmul.f32 0.2, %v1421_v9  ;;  %v1425_v47 = vadd.f32 %v1424_v44, %v11928_v6  ;;  %v12861_v59 = vpack.c.bf16 %v3026_v41, %v3018_v11  ;;  %5270 = vmatpush1.bf16.msra.mxu0 %v10320_v52  ;;  %5834 = vmatprep.subr.bf16.mxu1 %v10286_v7  ;;  %v2777_v52 = vld [vmem:[%s11651_s22 + $0x390] sm:$0xff]  ;;  %v14741_v33 = vld [vmem:[#allocation47_spill] sm:$0xff] }
 0x323   : > { %14738 = vst [vmem:[#allocation41_spill] sm:$0xff] %v12853_v39  ;;  %vm2010_vm0 = vcmp.gt.f32.partialorder %v1423_v17, 0.0  ;;  %v2266_v62 = vmul.f32 0.2, %v1423_v17  ;;  %v1427_v46 = vadd.f32 %v1426_v12, %v11936_v14  ;;  %v12866_v45 = vadd.f32 %v12496_v20, %v11892_v40  ;;  %5271 = vmatprep.subr.bf16.mxu0 %v10328_v26  ;;  %5686 = vmatmul.mubr.bf16.gmra.mrb[200].mxu1 %v14740_v49  ;;  %v2785_v24 = vld [vmem:[%s11651_s22 + $0x3d0] sm:$0xff]  ;;  %v2786_v26 = vld [vmem:[%s11651_s22 + $0x3d8] sm:$0xff] }
 0x324   : > { %14739 = vst [vmem:[#allocation44_spill] sm:$0xff] %v12861_v59  ;;  %v2521_v41 = vsel %vm2009_vm15, %v1421_v9, %v2265_v25  ;;  %vm2017_vm1 = vcmp.gt.f32.partialorder %v1425_v47, 0.0  ;;  %v2273_v11 = vmul.f32 0.2, %v1425_v47  ;;  %5146 = vmatprep.mubr.bf16.mxu0 %v12861_v59  ;;  %v12876_v7 = vsel %vm2092_vm13, %v12812_v53, %v2348_v29  ;;  %5695 = vmatprep.mubr.bf16.mxu1 %v14741_v33  ;;  %v10290_v9 = vld [vmem:[#allocation11 + $0x2a8] ss:$16 sps:$4 sm:$0xff]  }
 0x325   : > { %v2522_v20 = vsel %vm2010_vm0, %v1423_v17, %v2266_v62  ;;  %vm2018_vm2 = vcmp.gt.f32.partialorder %v1427_v46, 0.0  ;;  %v2274_v4 = vmul.f32 0.2, %v1427_v46  ;;  %5147 = vmatmul.mubr.bf16.gmra.mrb[88].mxu0 %v12853_v39  ;;  %v12884_v18 = vadd.f32 %v12499_v13, %v11903_v3  ;;  %5835 = vmatpush1.bf16.msra.mxu1 %v10284_v35  ;;  %v10329_v17 = vld [vmem:[#allocation11 + $0x5a0] ss:$16 sps:$4 sm:$0xff]   ;;  %v1430_v12 = vpop.f32.mrb[96].mxu1 }
 0x326   : > { %v2529_v44 = vsel %vm2017_vm1, %v1425_v47, %v2273_v11  ;;  %v12890_v53 = vsel %vm2099_vm14, %v12827_v60, %v2355_v8  ;;  %vm2100_vm3 = vcmp.gt.f32.partialorder %v12858_v21, 0.0  ;;  %v2356_v29 = vmul.f32 0.2, %v12858_v21  ;;  %5272 = vmatpush1.bf16.msra.mxu0 %v10326_v58  ;;  %5836 = vmatprep.subr.bf16.mxu1 %v10292_v15  ;;  %v10298_v13 = vld [vmem:[#allocation11 + $0x2cc] ss:$16 sps:$4 sm:$0xff]   ;;  %v1432_v60 = vpop.f32.mrb[97].mxu1 }
 0x327   : > { %v2530_v25 = vsel %vm2018_vm2, %v1427_v46, %v2274_v4  ;;  %v3033_v62 = vmul.f32 %v2777_v52, %v2521_v41  ;;  %v3041_v49 = vmul.f32 %v2785_v24, %v2529_v44  ;;  %vm2107_vm4 = vcmp.gt.f32.partialorder %v12866_v45, 0.0  ;;  %5273 = vmatprep.subr.bf16.mxu0 %v10331_v1  ;;  %v10337_v35 = vld [vmem:[#allocation11 + $0x5c4] ss:$16 sps:$4 sm:$0xff]   ;;  %v1434_v39 = vpop.f32.mrb[98].mxu1  ;;  %v10296_v41 = vld [vmem:[#allocation11 + $0x2c8] ss:$16 sps:$4 sm:$0xff]  }
 0x328   : > { %v1431_v47 = vadd.f32 %v1430_v12, %v11928_v6  ;;  %v3034_v8 = vmul.f32 %v2778_v63, %v2522_v20  ;;  %v3042_v11 = vmul.f32 %v2786_v26, %v2530_v25  ;;  %v2363_v33 = vmul.f32 0.2, %v12866_v45  ;;  %v1436_v24 = vpop.f32.mrb[99].mxu1  ;;  %v10335_v20 = vld [vmem:[#allocation11 + $0x5c0] ss:$16 sps:$4 sm:$0xff]   ;;  %v2692_v59 = vld [vmem:[%s11651_s22 + $0xe8] sm:$0xff] }
 0x329   : > { %v1433_v58 = vadd.f32 %v1432_v60, %v11936_v14  ;;  %v12898_v46 = vpack.c.bf16 %v3041_v49, %v3033_v62  ;;  %vm2108_vm5 = vcmp.gt.f32.partialorder %v12884_v18, 0.0  ;;  %v2364_v15 = vmul.f32 0.2, %v12884_v18  ;;  %5837 = vmatpush1.bf16.msra.mxu1 %v10290_v9  ;;  %v2793_v44 = vld [vmem:[%s11651_s22 + $0x410] sm:$0xff]  ;;  %v10304_v25 = vld [vmem:[#allocation11 + $0x2ec] ss:$16 sps:$4 sm:$0xff]  }
 0x32a   : > { %vm2025_vm6 = vcmp.gt.f32.partialorder %v1431_v47, 0.0  ;;  %v2281_v1 = vmul.f32 0.2, %v1431_v47  ;;  %v1435_v52 = vadd.f32 %v1434_v39, %v11928_v6  ;;  %v12903_v63 = vpack.c.bf16 %v3042_v11, %v3034_v8  ;;  %5274 = vmatpush1.bf16.msra.mxu0 %v10329_v17  ;;  %5838 = vmatprep.subr.bf16.mxu1 %v10298_v13  ;;  %v14744_v17 = vld [vmem:[#allocation46_spill] sm:$0xff]  ;;  %v2802_v8 = vld [vmem:[%s11651_s22 + $0x458] sm:$0xff] }
 0x32b   : > { %14742 = vst [vmem:[#allocation43_spill] sm:$0xff] %v12898_v46  ;;  %vm2026_vm7 = vcmp.gt.f32.partialorder %v1433_v58, 0.0  ;;  %v2282_v4 = vmul.f32 0.2, %v1433_v58  ;;  %v1437_v26 = vadd.f32 %v1436_v24, %v11936_v14  ;;  %v12909_v12 = vadd.f32 %v12502_v23, %v11892_v40  ;;  %5275 = vmatprep.subr.bf16.mxu0 %v10337_v35  ;;  %5696 = vmatmul.mubr.bf16.gmra.mrb[204].mxu1 %v14744_v17  ;;  %v2801_v62 = vld [vmem:[%s11651_s22 + $0x450] sm:$0xff]  ;;  %v14745_v35 = vld [vmem:[#allocation52_spill] sm:$0xff] }
 0x32c   : > { %14743 = vst [vmem:[#allocation47_spill] sm:$0xff] %v12903_v63  ;;  %v2537_v39 = vsel %vm2025_vm6, %v1431_v47, %v2281_v1  ;;  %vm2033_vm8 = vcmp.gt.f32.partialorder %v1435_v52, 0.0  ;;  %v2289_v9 = vmul.f32 0.2, %v1435_v52  ;;  %5156 = vmatprep.mubr.bf16.mxu0 %v12903_v63  ;;  %v12918_v49 = vsel %vm2100_vm3, %v12858_v21, %v2356_v29  ;;  %v10340_v13 = vld [vmem:[#allocation11 + $0x5e4] ss:$16 sps:$4 sm:$0xff]   ;;  %5705 = vmatprep.mubr.bf16.mxu1 %v14745_v35 }
 0x32d   : > { %v2538_v23 = vsel %vm2026_vm7, %v1433_v58, %v2282_v4  ;;  %vm2034_vm9 = vcmp.gt.f32.partialorder %v1437_v26, 0.0  ;;  %v2290_v60 = vmul.f32 0.2, %v1437_v26  ;;  %5157 = vmatmul.mubr.bf16.gmra.mrb[92].mxu0 %v12898_v46  ;;  %v2794_v47 = vld [vmem:[%s11651_s22 + $0x418] sm:$0xff]  ;;  %v12927_v11 = vadd.f32 %v12511_v32, %v11903_v3  ;;  %5839 = vmatpush1.bf16.msra.mxu1 %v10296_v41  ;;  %v10338_v24 = vld [vmem:[#allocation11 + $0x5e0] ss:$16 sps:$4 sm:$0xff]  }
 0x32e   : > { %v2545_v1 = vsel %vm2033_vm8, %v1435_v52, %v2289_v9  ;;  %v12932_v21 = vsel %vm2107_vm4, %v12866_v45, %v2363_v33  ;;  %v12937_v29 = vsel %vm2108_vm5, %v12884_v18, %v2364_v15  ;;  %v10302_v58 = vld [vmem:[#allocation11 + $0x2e8] ss:$16 sps:$4 sm:$0xff]   ;;  %5276 = vmatpush1.bf16.msra.mxu0 %v10335_v20  ;;  %v1440_v17 = vpop.f32.mrb[100].mxu1  ;;  %v3049_v35 = vmul.f32 %v2793_v44, %v2537_v39  ;;  %v10310_v41 = vld [vmem:[#allocation11 + $0x30c] ss:$16 sps:$4 sm:$0xff]  }
 0x32f   : > { %14746 = vst [vmem:[#allocation46_spill] sm:$0xff] %v12932_v21  ;;  %v2546_v4 = vsel %vm2034_vm9, %v1437_v26, %v2290_v60  ;;  %v3057_v32 = vmul.f32 %v2801_v62, %v2545_v1  ;;  %5840 = vmatprep.subr.bf16.mxu1 %v10304_v25  ;;  %vm2115_vm10 = vcmp.gt.f32.partialorder %v12909_v12, 0.0  ;;  %v10355_v52 = vld [vmem:[#allocation11 + $0x604] ss:$16 sps:$4 sm:$0xff]   ;;  %v1441_v45 = vadd.f32 %v1440_v17, %v11928_v6  ;;  %v1442_v33 = vpop.f32.mrb[101].mxu1 }
 0x330   : > { %v3050_v9 = vmul.f32 %v2794_v47, %v2538_v23  ;;  %v3058_v46 = vmul.f32 %v2802_v8, %v2546_v4  ;;  %v2371_v18 = vmul.f32 0.2, %v12909_v12  ;;  %5277 = vmatprep.subr.bf16.mxu0 %v10340_v13  ;;  %v1443_v15 = vadd.f32 %v1442_v33, %v11936_v14  ;;  %v1444_v20 = vpop.f32.mrb[102].mxu1  ;;  %v10308_v13 = vld [vmem:[#allocation11 + $0x308] ss:$16 sps:$4 sm:$0xff]   ;;  %v2809_v4 = vld [vmem:[%s11651_s22 + $0x490] sm:$0xff] }
 0x331   : > { %v12943_v26 = vpack.c.bf16 %v3057_v32, %v3049_v35  ;;  %vm2116_vm11 = vcmp.gt.f32.partialorder %v12927_v11, 0.0  ;;  %v12948_v44 = vadd.f32 %v12541_v48, %v11892_v40  ;;  %vm2041_vm12 = vcmp.gt.f32.partialorder %v1441_v45, 0.0  ;;  %v1446_v62 = vpop.f32.mrb[103].mxu1  ;;  %5841 = vmatpush1.bf16.msra.mxu1 %v10302_v58  ;;  %v10316_v8 = vld [vmem:[#allocation11 + $0x32c] ss:$16 sps:$4 sm:$0xff]   ;;  %v2817_v17 = vld [vmem:[%s11651_s22 + $0x4d0] sm:$0xff] }
 0x332   : > { %v2297_v25 = vmul.f32 0.2, %v1441_v45  ;;  %v1445_v39 = vadd.f32 %v1444_v20, %v11928_v6  ;;  %v12951_v23 = vpack.c.bf16 %v3058_v46, %v3050_v9  ;;  %5278 = vmatpush1.bf16.msra.mxu0 %v10338_v24  ;;  %vm2042_vm13 = vcmp.gt.f32.partialorder %v1443_v15, 0.0  ;;  %5842 = vmatprep.subr.bf16.mxu1 %v10310_v41  ;;  %v14749_v58 = vld [vmem:[#allocation51_spill] sm:$0xff]  ;;  %v14751_v41 = vld [vmem:[#allocation57_spill] sm:$0xff]  ;;  %v14788_v21 = vld [vmem:[#allocation70_spill] sm:$0xff] }
 0x333   : > { %14747 = vst [vmem:[#allocation52_spill] sm:$0xff] %v12943_v26  ;;  %v2298_v60 = vmul.f32 0.2, %v1443_v15  ;;  %v1447_v47 = vadd.f32 %v1446_v62, %v11936_v14  ;;  %v12956_v48 = vadd.f32 %v12544_v2, %v11903_v3  ;;  %5440 = vmatprep.subr.bf16.mxu0 %v10355_v52  ;;  %5706 = vmatmul.mubr.bf16.gmra.mrb[208].mxu1 %v14749_v58  ;;  %v2810_v24 = vld [vmem:[%s11651_s22 + $0x498] sm:$0xff]  ;;  %v2372_v20 = vmul.f32 0.2, %v12927_v11 }
 0x334   : > { %14748 = vst [vmem:[#allocation114_spill] sm:$0xff] %v12951_v23  ;;  %v2553_v46 = vsel %vm2041_vm12, %v1441_v45, %v2297_v25  ;;  %vm2049_vm14 = vcmp.gt.f32.partialorder %v1445_v39, 0.0  ;;  %v2305_v1 = vmul.f32 0.2, %v1445_v39  ;;  %5166 = vmatprep.mubr.bf16.mxu0 %v12951_v23  ;;  %v12966_v35 = vsel %vm2115_vm10, %v12909_v12, %v2371_v18  ;;  %5715 = vmatprep.mubr.bf16.mxu1 %v14751_v41  ;;  %v2818_v52 = vld [vmem:[%s11651_s22 + $0x4d8] sm:$0xff] }
 0x335   : > { %14750 = vst [vmem:[#allocation51_spill] sm:$0xff] %v12966_v35  ;;  %v2554_v2 = vsel %vm2042_vm13, %v1443_v15, %v2298_v60  ;;  %vm2050_vm15 = vcmp.gt.f32.partialorder %v1447_v47, 0.0  ;;  %v2306_v32 = vmul.f32 0.2, %v1447_v47  ;;  %5167 = vmatmul.mubr.bf16.gmra.mrb[96].mxu0 %v12943_v26  ;;  %v1688_v45 = vadd.f32 %v12548_v30, %v11892_v40  ;;  %v10314_v33 = vld [vmem:[#allocation11 + $0x328] ss:$16 sps:$4 sm:$0xff]   ;;  %5843 = vmatpush1.bf16.msra.mxu1 %v10308_v13 }
 0x336   : > { %v2561_v9 = vsel %vm2049_vm14, %v1445_v39, %v2305_v1  ;;  %vm2123_vm0 = vcmp.gt.f32.partialorder %v12948_v44, 0.0  ;;  %v2379_v12 = vmul.f32 0.2, %v12948_v44  ;;  %v1450_v15 = vpop.f32.mrb[104].mxu1  ;;  %v3065_v25 = vmul.f32 %v2809_v4, %v2553_v46  ;;  %5844 = vmatprep.subr.bf16.mxu1 %v10316_v8  ;;  %v10325_v60 = vld [vmem:[#allocation11 + $0x34c] ss:$16 sps:$4 sm:$0xff]  }
 0x337   : > { %v2562_v18 = vsel %vm2050_vm15, %v1447_v47, %v2306_v32  ;;  %v3073_v62 = vmul.f32 %v2817_v17, %v2561_v9  ;;  %vm2124_vm1 = vcmp.gt.f32.partialorder %v12956_v48, 0.0  ;;  %v1451_v30 = vadd.f32 %v1450_v15, %v11928_v6  ;;  %v1452_v58 = vpop.f32.mrb[105].mxu1  ;;  %v2833_v15 = vld [vmem:[%s11651_s22 + $0x550] sm:$0xff] }
 0x338   : > { %v3066_v41 = vmul.f32 %v2810_v24, %v2554_v2  ;;  %v3074_v39 = vmul.f32 %v2818_v52, %v2562_v18  ;;  %v2380_v1 = vmul.f32 0.2, %v12956_v48  ;;  %v1453_v26 = vadd.f32 %v1452_v58, %v11936_v14  ;;  %v1454_v23 = vpop.f32.mrb[106].mxu1  ;;  %v10323_v24 = vld [vmem:[#allocation11 + $0x348] ss:$16 sps:$4 sm:$0xff]   ;;  %v14754_v18 = vld [vmem:[#allocation56_spill] sm:$0xff] }
 0x339   : > { %v12982_v63 = vpack.c.bf16 %v3073_v62, %v3065_v25  ;;  %vm2131_vm2 = vcmp.gt.f32.partialorder %v1688_v45, 0.0  ;;  %v2387_v13 = vmul.f32 0.2, %v1688_v45  ;;  %vm2057_vm3 = vcmp.gt.f32.partialorder %v1451_v30, 0.0  ;;  %v1456_v8 = vpop.f32.mrb[107].mxu1  ;;  %5845 = vmatpush1.bf16.msra.mxu1 %v10314_v33  ;;  %v2825_v33 = vld [vmem:[%s11651_s22 + $0x510] sm:$0xff] }
 0x33a   : > { %v2313_v47 = vmul.f32 0.2, %v1451_v30  ;;  %v1455_v46 = vadd.f32 %v1454_v23, %v11928_v6  ;;  %v12985_v4 = vpack.c.bf16 %v3074_v39, %v3066_v41  ;;  %vm2058_vm4 = vcmp.gt.f32.partialorder %v1453_v26, 0.0  ;;  %5846 = vmatprep.subr.bf16.mxu1 %v10325_v60  ;;  %v10334_v52 = vld [vmem:[#allocation11 + $0x36c] ss:$16 sps:$4 sm:$0xff]  }
 0x33b   : > { %14752 = vst [vmem:[#allocation57_spill] sm:$0xff] %v12982_v63  ;;  %v2314_v17 = vmul.f32 0.2, %v1453_v26  ;;  %v1457_v2 = vadd.f32 %v1456_v8, %v11936_v14  ;;  %v12990_v32 = vadd.f32 %v12557_v5, %v11903_v3  ;;  %5716 = vmatmul.mubr.bf16.gmra.mrb[212].mxu1 %v14754_v18  ;;  %v12999_v25 = vsel %vm2116_vm11, %v12927_v11, %v2372_v20  ;;  %v14755_v60 = vld [vmem:[#allocation61_spill] sm:$0xff]  ;;  %v2834_v58 = vld [vmem:[%s11651_s22 + $0x558] sm:$0xff] }
 0x33c   : > { %14753 = vst [vmem:[#allocation115_spill] sm:$0xff] %v12985_v4  ;;  %v2569_v23 = vsel %vm2057_vm3, %v1451_v30, %v2313_v47  ;;  %vm2065_vm5 = vcmp.gt.f32.partialorder %v1455_v46, 0.0  ;;  %v2321_v9 = vmul.f32 0.2, %v1455_v46  ;;  %5176 = vmatprep.mubr.bf16.mxu0 %v12985_v4  ;;  %5725 = vmatprep.mubr.bf16.mxu1 %v14755_v60  ;;  %v2826_v30 = vld [vmem:[%s11651_s22 + $0x518] sm:$0xff]  ;;  %v1694_v41 = vadd.f32 %v12589_v28, %v11892_v40 }
 0x33d   : > { %v2570_v5 = vsel %vm2058_vm4, %v1453_v26, %v2314_v17  ;;  %vm2066_vm6 = vcmp.gt.f32.partialorder %v1457_v2, 0.0  ;;  %v2322_v62 = vmul.f32 0.2, %v1457_v2  ;;  %5177 = vmatmul.mubr.bf16.gmra.mrb[100].mxu0 %v12982_v63  ;;  %v13010_v47 = vsel %vm2123_vm0, %v12948_v44, %v2379_v12  ;;  %5847 = vmatpush1.bf16.msra.mxu1 %v10323_v24  ;;  %v10332_v20 = vld [vmem:[#allocation11 + $0x368] ss:$16 sps:$4 sm:$0xff]   ;;  %v1460_v17 = vpop.f32.mrb[108].mxu1 }
 0x33e   : > { %v2577_v39 = vsel %vm2065_vm5, %v1455_v46, %v2321_v9  ;;  %14756 = vst [vmem:[#allocation56_spill] sm:$0xff] %v13010_v47  ;;  %v13015_v11 = vsel %vm2124_vm1, %v12956_v48, %v2380_v1  ;;  %v13018_v26 = vsel %vm2131_vm2, %v1688_v45, %v2387_v13  ;;  %v3081_v18 = vmul.f32 %v2825_v33, %v2569_v23  ;;  %v10343_v46 = vld [vmem:[#allocation11 + $0x38c] ss:$16 sps:$4 sm:$0xff]   ;;  %v1462_v12 = vpop.f32.mrb[109].mxu1 }
 0x33f   : > { %14757 = vst [vmem:[#allocation61_spill] sm:$0xff] %v13015_v11  ;;  %14758 = vst [vmem:[#allocation116_spill] sm:$0xff] %v13018_v26  ;;  %v2578_v8 = vsel %vm2066_vm6, %v1457_v2, %v2322_v62  ;;  %v3089_v28 = vmul.f32 %v2833_v15, %v2577_v39  ;;  %vm2132_vm7 = vcmp.gt.f32.partialorder %v12990_v32, 0.0  ;;  %5848 = vmatprep.subr.bf16.mxu1 %v10334_v52  ;;  %v2388_v48 = vmul.f32 0.2, %v12990_v32  ;;  %v1464_v1 = vpop.f32.mrb[110].mxu1 }
 0x340   : > { %v1461_v44 = vadd.f32 %v1460_v17, %v11928_v6  ;;  %v3082_v9 = vmul.f32 %v2826_v30, %v2570_v5  ;;  %v3090_v60 = vmul.f32 %v2834_v58, %v2578_v8  ;;  %v1463_v45 = vadd.f32 %v1462_v12, %v11936_v14  ;;  %v1466_v33 = vpop.f32.mrb[111].mxu1  ;;  %v10341_v5 = vld [vmem:[#allocation11 + $0x388] ss:$16 sps:$4 sm:$0xff]   ;;  %v14761_v8 = vld [vmem:[#allocation60_spill] sm:$0xff]  ;;  %v2841_v17 = vld [vmem:[%s11651_s22 + $0x590] sm:$0xff] }
 0x341   : > { %v13024_v13 = vpack.c.bf16 %v3089_v28, %v3081_v18  ;;  %v2395_v24 = vmul.f32 0.2, %v1694_v41  ;;  %v13028_v2 = vadd.f32 %v12592_v50, %v11903_v3  ;;  %v1465_v23 = vadd.f32 %v1464_v1, %v11928_v6  ;;  %5849 = vmatpush1.bf16.msra.mxu1 %v10332_v20  ;;  %v10346_v50 = vld [vmem:[#allocation11 + $0x3ac] ss:$16 sps:$4 sm:$0xff]   ;;  %v2849_v18 = vld [vmem:[%s11651_s22 + $0x5d0] sm:$0xff] }
 0x342   : > { %vm2073_vm8 = vcmp.gt.f32.partialorder %v1461_v44, 0.0  ;;  %v2329_v52 = vmul.f32 0.2, %v1461_v44  ;;  %v13031_v15 = vpack.c.bf16 %v3090_v60, %v3082_v9  ;;  %vm2074_vm9 = vcmp.gt.f32.partialorder %v1463_v45, 0.0  ;;  %5850 = vmatprep.subr.bf16.mxu1 %v10343_v46  ;;  %v14763_v46 = vld [vmem:[#allocation65_spill] sm:$0xff]  ;;  %v2850_v9 = vld [vmem:[%s11651_s22 + $0x5d8] sm:$0xff] }
 0x343   : > { %14759 = vst [vmem:[#allocation117_spill] sm:$0xff] %v13024_v13  ;;  %v2330_v62 = vmul.f32 0.2, %v1463_v45  ;;  %v1467_v30 = vadd.f32 %v1466_v33, %v11936_v14  ;;  %vm2139_vm10 = vcmp.gt.f32.partialorder %v1694_v41, 0.0  ;;  %vm2081_vm11 = vcmp.gt.f32.partialorder %v1465_v23, 0.0  ;;  %5726 = vmatmul.mubr.bf16.gmra.mrb[216].mxu1 %v14761_v8 }
 0x344   : > { %14760 = vst [vmem:[#allocation118_spill] sm:$0xff] %v13031_v15  ;;  %v2585_v58 = vsel %vm2073_vm8, %v1461_v44, %v2329_v52  ;;  %v2337_v39 = vmul.f32 0.2, %v1465_v23  ;;  %5186 = vmatprep.mubr.bf16.mxu0 %v13031_v15  ;;  %v13041_v20 = vsel %vm2132_vm7, %v12990_v32, %v2388_v48  ;;  %5735 = vmatprep.mubr.bf16.mxu1 %v14763_v46  ;;  %v2842_v44 = vld [vmem:[%s11651_s22 + $0x598] sm:$0xff]  ;;  %v13055_v32 = vmul.f32 0.2, %v13028_v2 }
 0x345   : > { %14762 = vst [vmem:[#allocation60_spill] sm:$0xff] %v13041_v20  ;;  %v2586_v28 = vsel %vm2074_vm9, %v1463_v45, %v2330_v62  ;;  %vm2082_vm12 = vcmp.gt.f32.partialorder %v1467_v30, 0.0  ;;  %v2338_v12 = vmul.f32 0.2, %v1467_v30  ;;  %5187 = vmatmul.mubr.bf16.gmra.mrb[104].mxu0 %v13024_v13  ;;  %v13049_v60 = vadd.f32 %v12596_v38, %v11892_v40  ;;  %5851 = vmatpush1.bf16.msra.mxu1 %v10341_v5  ;;  %v10344_v45 = vld [vmem:[#allocation11 + $0x3a8] ss:$16 sps:$4 sm:$0xff]  }
 0x346   : > { %v2593_v1 = vsel %vm2081_vm11, %v1465_v23, %v2337_v39  ;;  %v13052_v52 = vsel %vm2139_vm10, %v1694_v41, %v2395_v24  ;;  %v13059_v48 = vadd.f32 %v12606_v27, %v11903_v3  ;;  %v1470_v62 = vpop.f32.mrb[112].mxu1  ;;  %v3097_v40 = vmul.f32 %v2841_v17, %v2585_v58  ;;  %v14765_v23 = vld [vmem:[#allocation37_spill] sm:$0xff]  ;;  %5852 = vmatprep.subr.bf16.mxu1 %v10346_v50  ;;  %v2858_v58 = vld [vmem:[%s11651_s22 + $0x618] sm:$0xff]  ;;  %v2857_v17 = vld [vmem:[%s11651_s22 + $0x610] sm:$0xff] }
 0x347   : > { %14764 = vst [vmem:[#allocation65_spill] sm:$0xff] %v13052_v52  ;;  %v2594_v33 = vsel %vm2082_vm12, %v1467_v30, %v2338_v12  ;;  %v3105_v38 = vmul.f32 %v2849_v18, %v2593_v1  ;;  %v789_v39 = vsub.s32 6, %v14765_v23  ;;  %v10349_v41 = vld [vmem:[#allocation11 + $0x3cc] ss:$16 sps:$4 sm:$0xff]   ;;  %v1471_v24 = vadd.f32 %v1470_v62, %v11928_v6  ;;  %v1472_v8 = vpop.f32.mrb[113].mxu1 }
 0x348   : > { %v3098_v46 = vmul.f32 %v2842_v44, %v2586_v28  ;;  %v3106_v13 = vmul.f32 %v2850_v9, %v2594_v33  ;;  %v793_v3 = vsub.s32 7, %v14765_v23  ;;  %v2668_v27 = vld [vmem:[%s11651_s22 + $0x28] sm:$0xff]  ;;  %v1473_v5 = vadd.f32 %v1472_v8, %v11936_v14  ;;  %v1474_v30 = vpop.f32.mrb[114].mxu1  ;;  %v10721_v18 = vld [vmem:[#allocation8] sm:$0xff] }
 0x349   : > { %v13066_v12 = vpack.c.bf16 %v3105_v38, %v3097_v40  ;;  %v13071_v50 = vmul.f32 0.2, %v13049_v60  ;;  %v13073_v1 = vrot.slane %v10721_v18, %v789_v39  ;;  %v2676_v62 = vld [vmem:[%s11651_s22 + $0x68] sm:$0xff]  ;;  %vm2089_vm13 = vcmp.gt.f32.partialorder %v1471_v24, 0.0  ;;  %v1476_v9 = vpop.f32.mrb[115].mxu1  ;;  %5853 = vmatpush1.bf16.msra.mxu1 %v10344_v45  ;;  %v2865_v45 = vld [vmem:[%s11651_s22 + $0x650] sm:$0xff] }
 0x34a   : > { %v2345_v28 = vmul.f32 0.2, %v1471_v24  ;;  %v1475_v44 = vadd.f32 %v1474_v30, %v11928_v6  ;;  %v13077_v33 = vpack.c.bf16 %v3106_v13, %v3098_v46  ;;  %v10347_v40 = vld [vmem:[#allocation11 + $0x3c8] ss:$16 sps:$4 sm:$0xff]   ;;  %vm2090_vm14 = vcmp.gt.f32.partialorder %v1473_v5, 0.0  ;;  %5854 = vmatprep.subr.bf16.mxu1 %v10349_v41  ;;  %v14768_v13 = vld [vmem:[#allocation64_spill] sm:$0xff] }
 0x34b   : > { %14766 = vst [vmem:[#allocation119_spill] sm:$0xff] %v13066_v12  ;;  %v2346_v38 = vmul.f32 0.2, %v1473_v5  ;;  %v1477_v8 = vadd.f32 %v1476_v9, %v11936_v14  ;;  %v13080_v23 = vrot.slane %v10721_v18, %v793_v3  ;;  %v2684_v39 = vld [vmem:[%s11651_s22 + $0xa8] sm:$0xff]  ;;  %5736 = vmatmul.mubr.bf16.gmra.mrb[220].mxu1 %v14768_v13  ;;  %v14769_v46 = vld [vmem:[#allocation48_spill] sm:$0xff]  ;;  %v2932_v19 = vmul.f32 %v2676_v62, %v14770_v22 }
 0x34c   : > { %14767 = vst [vmem:[#allocation120_spill] sm:$0xff] %v13077_v33  ;;  %v10352_v15 = vld [vmem:[#allocation11 + $0x3ec] ss:$16 sps:$4 sm:$0xff]   ;;  %v2601_v63 = vsel %vm2089_vm13, %v1471_v24, %v2345_v28  ;;  %vm2097_vm15 = vcmp.gt.f32.partialorder %v1475_v44, 0.0  ;;  %v2353_v30 = vmul.f32 0.2, %v1475_v44  ;;  %5196 = vmatprep.mubr.bf16.mxu0 %v13077_v33  ;;  %v2924_v4 = vmul.f32 %v2668_v27, %v14769_v46  ;;  %5745 = vmatprep.mubr.bf16.mxu1 %v12224_v31 }
 0x34d   : > { %v2683_v9 = vld [vmem:[%s11651_s22 + $0xa0] sm:$0xff]  ;;  %v2602_v3 = vsel %vm2090_vm14, %v1473_v5, %v2346_v38  ;;  %vm2098_vm0 = vcmp.gt.f32.partialorder %v1477_v8, 0.0  ;;  %v2354_v41 = vmul.f32 0.2, %v1477_v8  ;;  %5197 = vmatmul.mubr.bf16.gmra.mrb[108].mxu0 %v13066_v12  ;;  %v2866_v24 = vld [vmem:[%s11651_s22 + $0x658] sm:$0xff]  ;;  %v3113_v18 = vmul.f32 %v2857_v17, %v2601_v63  ;;  %v14771_v52 = vld [vmem:[#allocation53_spill] sm:$0xff]  ;;  %5855 = vmatpush1.bf16.msra.mxu1 %v10347_v40 }
 0x34e   : > { %v2691_v28 = vld [vmem:[%s11651_s22 + $0xe0] sm:$0xff]  ;;  %v2609_v33 = vsel %vm2097_vm15, %v1475_v44, %v2353_v30  ;;  %v3114_v13 = vmul.f32 %v2858_v58, %v2602_v3  ;;  %v2940_v27 = vmul.f32 %v2684_v39, %v14771_v52  ;;  %v2700_v46 = vld [vmem:[%s11651_s22 + $0x128] sm:$0xff]  ;;  %v1480_v38 = vpop.f32.mrb[116].mxu1  ;;  %v14772_v12 = vld [vmem:[#allocation55_spill] sm:$0xff]  ;;  %5856 = vmatprep.subr.bf16.mxu1 %v10352_v15  ;;  %v13101_v62 = vpack.c.bf16 %v2932_v19, %v2924_v4 }
 0x34f   : > { %v10350_v26 = vld [vmem:[#allocation11 + $0x3e8] ss:$16 sps:$4 sm:$0xff]   ;;  %v2610_v5 = vsel %vm2098_vm0, %v1477_v8, %v2354_v41  ;;  %v3121_v47 = vmul.f32 %v2865_v45, %v2609_v33  ;;  %v2948_v20 = vmul.f32 %v2692_v59, %v14772_v12  ;;  %v14773_v31 = vld [vmem:[#allocation50_spill] sm:$0xff]  ;;  %v10358_v63 = vld [vmem:[#allocation11 + $0x40c] ss:$16 sps:$4 sm:$0xff]   ;;  %v1481_v17 = vadd.f32 %v1480_v38, %v11928_v6  ;;  %v1482_v58 = vpop.f32.mrb[117].mxu1 }
 0x350   : > { %v2939_v11 = vmul.f32 %v2683_v9, %v14773_v31  ;;  %v3122_v22 = vmul.f32 %v2866_v24, %v2610_v5  ;;  %14774 = vst [vmem:[#allocation64_spill] sm:$0xff] %v13101_v62  ;;  %v14775_v52 = vld [vmem:[#allocation54_spill] sm:$0xff]  ;;  %v1483_v40 = vadd.f32 %v1482_v58, %v11936_v14  ;;  %v1484_v8 = vpop.f32.mrb[118].mxu1  ;;  %v2708_v15 = vld [vmem:[%s11651_s22 + $0x168] sm:$0xff]  ;;  %v14778_v12 = vld [vmem:[#allocation59_spill] sm:$0xff]  ;;  %vm2140_vm13 = vcmp.gt.f32.partialorder %v13028_v2, 0.0 }
 0x351   : > { %v2947_v44 = vmul.f32 %v2691_v28, %v14775_v52  ;;  %v13105_v33 = vpack.c.bf16 %v3121_v47, %v3113_v18  ;;  %v13107_v59 = vpack.c.bf16 %v2948_v20, %v2940_v27  ;;  %v2956_v39 = vmul.f32 %v2700_v46, %v14778_v12  ;;  %v1486_v19 = vpop.f32.mrb[119].mxu1  ;;  %v2873_v9 = vld [vmem:[%s11651_s22 + $0x690] sm:$0xff]  ;;  %5857 = vmatpush1.bf16.msra.mxu1 %v10350_v26  ;;  %v2874_v3 = vld [vmem:[%s11651_s22 + $0x698] sm:$0xff]  ;;  %v2699_v24 = vld [vmem:[%s11651_s22 + $0x120] sm:$0xff] }
 0x352   : > { %vm2105_vm1 = vcmp.gt.f32.partialorder %v1481_v17, 0.0  ;;  %v2361_v30 = vmul.f32 0.2, %v1481_v17  ;;  %v1485_v45 = vadd.f32 %v1484_v8, %v11928_v6  ;;  %v13112_v4 = vpack.c.bf16 %v3122_v22, %v3114_v13  ;;  %6019 = vmatprep.subr.bf16.mxu1 %v10358_v63  ;;  %v14781_v13 = vld [vmem:[#allocation67_spill] sm:$0xff]  ;;  %v2881_v26 = vld [vmem:[%s11651_s22 + $0x6d0] sm:$0xff]  ;;  %v2707_v5 = vld [vmem:[%s11651_s22 + $0x160] sm:$0xff] }
 0x353   : > { %14776 = vst [vmem:[#allocation48_spill] sm:$0xff] %v13105_v33  ;;  %14777 = vst [vmem:[#allocation49_spill] sm:$0xff] %v13107_v59  ;;  %vm2106_vm2 = vcmp.gt.f32.partialorder %v1483_v40, 0.0  ;;  %v2362_v47 = vmul.f32 0.2, %v1483_v40  ;;  %v1487_v20 = vadd.f32 %v1486_v19, %v11936_v14  ;;  %v13117_v41 = vpack.c.bf16 %v2947_v44, %v2939_v11  ;;  %5746 = vmatmul.mubr.bf16.gmra.mrb[224].mxu1 %v14781_v13  ;;  %v14782_v27 = vld [vmem:[#allocation63_spill] sm:$0xff] }
 0x354   : > { %14779 = vst [vmem:[#allocation53_spill] sm:$0xff] %v13112_v4  ;;  %v2617_v18 = vsel %vm2105_vm1, %v1481_v17, %v2361_v30  ;;  %vm2113_vm3 = vcmp.gt.f32.partialorder %v1485_v45, 0.0  ;;  %v2369_v28 = vmul.f32 0.2, %v1485_v45  ;;  %5206 = vmatprep.mubr.bf16.mxu0 %v13112_v4  ;;  %v2964_v46 = vmul.f32 %v2708_v15, %v14782_v27  ;;  %v2716_v38 = vld [vmem:[%s11651_s22 + $0x1a8] sm:$0xff]  ;;  %v14783_v63 = vld [vmem:[#allocation72_spill] sm:$0xff] }
 0x355   : > { %14780 = vst [vmem:[#allocation55_spill] sm:$0xff] %v13117_v41  ;;  %v2618_v11 = vsel %vm2106_vm2, %v1483_v40, %v2362_v47  ;;  %vm2114_vm4 = vcmp.gt.f32.partialorder %v1487_v20, 0.0  ;;  %v2370_v31 = vmul.f32 0.2, %v1487_v20  ;;  %5207 = vmatmul.mubr.bf16.gmra.mrb[112].mxu0 %v13105_v33  ;;  %5755 = vmatprep.mubr.bf16.mxu1 %v14783_v63  ;;  %v2882_v17 = vld [vmem:[%s11651_s22 + $0x6d8] sm:$0xff]  ;;  %v3129_v58 = vmul.f32 %v2873_v9, %v2617_v18  ;;  %v2724_v22 = vld [vmem:[%s11651_s22 + $0x1e8] sm:$0xff] }
 0x356   : > { %v2715_v52 = vld [vmem:[%s11651_s22 + $0x1a0] sm:$0xff]  ;;  %v2625_v44 = vsel %vm2113_vm3, %v1485_v45, %v2369_v28  ;;  %v3130_v8 = vmul.f32 %v2874_v3, %v2618_v11  ;;  %v13133_v12 = vpack.c.bf16 %v2964_v46, %v2956_v39  ;;  %v14785_v15 = vld [vmem:[#allocation58_spill] sm:$0xff]  ;;  %v1490_v40 = vpop.f32.mrb[120].mxu1  ;;  %v2980_v45 = vmul.f32 %v2724_v22, %v14788_v21  ;;  %v2890_v22 = vld [vmem:[%s11651_s22 + $0x718] sm:$0xff] }
 0x357   : > { %v2955_v30 = vmul.f32 %v2699_v24, %v14785_v15  ;;  %v2723_v19 = vld [vmem:[%s11651_s22 + $0x1e0] sm:$0xff]  ;;  %v2626_v13 = vsel %vm2114_vm4, %v1487_v20, %v2370_v31  ;;  %v3137_v47 = vmul.f32 %v2881_v26, %v2625_v44  ;;  %v14786_v27 = vld [vmem:[#allocation62_spill] sm:$0xff]  ;;  %v1491_v9 = vadd.f32 %v1490_v40, %v11928_v6  ;;  %v1492_v18 = vpop.f32.mrb[121].mxu1  ;;  %v2740_v44 = vld [vmem:[%s11651_s22 + $0x268] sm:$0xff] }
 0x358   : > { %14784 = vst [vmem:[#allocation50_spill] sm:$0xff] %v13133_v12  ;;  %v2963_v4 = vmul.f32 %v2707_v5, %v14786_v27  ;;  %v14787_v33 = vld [vmem:[#allocation68_spill] sm:$0xff]  ;;  %v3138_v63 = vmul.f32 %v2882_v17, %v2626_v13  ;;  %v14789_v3 = vld [vmem:[#allocation66_spill] sm:$0xff]  ;;  %v1493_v24 = vadd.f32 %v1492_v18, %v11936_v14  ;;  %v1494_v20 = vpop.f32.mrb[122].mxu1  ;;  %v2898_v18 = vld [vmem:[%s11651_s22 + $0x758] sm:$0xff]  ;;  %vm2147_vm14 = vcmp.gt.f32.partialorder %v13049_v60, 0.0 }
 0x359   : > { %v2972_v35 = vmul.f32 %v2716_v38, %v14787_v33  ;;  %v2971_v39 = vmul.f32 %v2715_v52, %v14789_v3  ;;  %v13143_v28 = vpack.c.bf16 %v3137_v47, %v3129_v58  ;;  %v14792_v33 = vld [vmem:[#allocation69_spill] sm:$0xff]  ;;  %vm2121_vm5 = vcmp.gt.f32.partialorder %v1491_v9, 0.0  ;;  %v1496_v21 = vpop.f32.mrb[123].mxu1  ;;  %v2889_v31 = vld [vmem:[%s11651_s22 + $0x710] sm:$0xff]  ;;  %v2731_v40 = vld [vmem:[%s11651_s22 + $0x220] sm:$0xff] }
 0x35a   : > { %v13145_v26 = vpack.c.bf16 %v2963_v4, %v2955_v30  ;;  %v2979_v46 = vmul.f32 %v2723_v19, %v14792_v33  ;;  %v2377_v5 = vmul.f32 0.2, %v1491_v9  ;;  %v1495_v38 = vadd.f32 %v1494_v20, %v11928_v6  ;;  %v2732_v52 = vld [vmem:[%s11651_s22 + $0x228] sm:$0xff]  ;;  %v2897_v19 = vld [vmem:[%s11651_s22 + $0x750] sm:$0xff]  ;;  %v2739_v47 = vld [vmem:[%s11651_s22 + $0x260] sm:$0xff] }
 0x35b   : > { %14790 = vst [vmem:[#allocation54_spill] sm:$0xff] %v13143_v28  ;;  %v13149_v11 = vpack.c.bf16 %v3138_v63, %v3130_v8  ;;  %vm2122_vm6 = vcmp.gt.f32.partialorder %v1493_v24, 0.0  ;;  %v2378_v17 = vmul.f32 0.2, %v1493_v24  ;;  %v1497_v58 = vadd.f32 %v1496_v21, %v11936_v14  ;;  %v14795_v8 = vld [vmem:[#allocation71_spill] sm:$0xff]  ;;  %v14798_v33 = vld [vmem:[#allocation74_spill] sm:$0xff] }
 0x35c   : > { %14791 = vst [vmem:[#allocation59_spill] sm:$0xff] %v13145_v26  ;;  %v13154_v4 = vpack.c.bf16 %v2980_v45, %v2972_v35  ;;  %v2633_v15 = vsel %vm2121_vm5, %v1491_v9, %v2377_v5  ;;  %vm2129_vm7 = vcmp.gt.f32.partialorder %v1495_v38, 0.0  ;;  %v2385_v30 = vmul.f32 0.2, %v1495_v38  ;;  %5756 = vmatmul.mubr.bf16.gmra.mrb[228].mxu1 %v14795_v8  ;;  %v14797_v9 = vld [vmem:[#allocation77_spill] sm:$0xff] }
 0x35d   : > { %14793 = vst [vmem:[#allocation67_spill] sm:$0xff] %v13149_v11  ;;  %5216 = vmatprep.mubr.bf16.mxu0 %v13149_v11  ;;  %v13161_v13 = vpack.c.bf16 %v2979_v46, %v2971_v39  ;;  %v2634_v35 = vsel %vm2122_vm6, %v1493_v24, %v2378_v17  ;;  %vm2130_vm8 = vcmp.gt.f32.partialorder %v1497_v58, 0.0  ;;  %v2386_v27 = vmul.f32 0.2, %v1497_v58  ;;  %5765 = vmatprep.mubr.bf16.mxu1 %v14797_v9  ;;  %v2748_v45 = vld [vmem:[%s11651_s22 + $0x2a8] sm:$0xff]  ;;  %v14799_v39 = vld [vmem:[#allocation78_spill] sm:$0xff] }
 0x35e   : > { %14794 = vst [vmem:[#allocation63_spill] sm:$0xff] %v13154_v4  ;;  %5217 = vmatmul.mubr.bf16.gmra.mrb[116].mxu0 %v13143_v28  ;;  %v3145_v63 = vmul.f32 %v2889_v31, %v2633_v15  ;;  %v2641_v3 = vsel %vm2129_vm7, %v1495_v38, %v2385_v30  ;;  %v3146_v20 = vmul.f32 %v2890_v22, %v2634_v35  ;;  %v2756_v21 = vld [vmem:[%s11651_s22 + $0x2e8] sm:$0xff]  ;;  %v1500_v24 = vpop.f32.mrb[124].mxu1  ;;  %v14801_v28 = vld [vmem:[#allocation75_spill] sm:$0xff]  ;;  %vm2148_vm0 = vcmp.gt.f32.partialorder %v13059_v48, 0.0 }
 0x35f   : > { %14796 = vst [vmem:[#allocation72_spill] sm:$0xff] %v13161_v13  ;;  %v2988_v5 = vmul.f32 %v2732_v52, %v14798_v33  ;;  %v2996_v46 = vmul.f32 %v2740_v44, %v14799_v39  ;;  %v2642_v8 = vsel %vm2130_vm8, %v1497_v58, %v2386_v27  ;;  %v3153_v17 = vmul.f32 %v2897_v19, %v2641_v3  ;;  %v14800_v11 = vld [vmem:[#allocation73_spill] sm:$0xff]  ;;  %v1502_v31 = vpop.f32.mrb[125].mxu1  ;;  %v2747_v19 = vld [vmem:[%s11651_s22 + $0x2a0] sm:$0xff]  ;;  %v2905_v27 = vld [vmem:[%s11651_s22 + $0x790] sm:$0xff] }
 0x360   : > { %v2987_v13 = vmul.f32 %v2731_v40, %v14800_v11  ;;  %v2995_v4 = vmul.f32 %v2739_v47, %v14801_v28  ;;  %v1501_v9 = vadd.f32 %v1500_v24, %v11928_v6  ;;  %v3154_v15 = vmul.f32 %v2898_v18, %v2642_v8  ;;  %v1504_v44 = vpop.f32.mrb[126].mxu1  ;;  %v14804_v28 = vld [vmem:[#allocation83_spill] sm:$0xff]  ;;  %v2764_v3 = vld [vmem:[%s11651_s22 + $0x328] sm:$0xff] }
 0x361   : > { %v13177_v38 = vpack.c.bf16 %v2996_v46, %v2988_v5  ;;  %v3004_v22 = vmul.f32 %v2748_v45, %v12390_v16  ;;  %v1503_v52 = vadd.f32 %v1502_v31, %v11936_v14  ;;  %v13181_v58 = vpack.c.bf16 %v3153_v17, %v3145_v63  ;;  %v1506_v35 = vpop.f32.mrb[127].mxu1  ;;  %v2755_v45 = vld [vmem:[%s11651_s22 + $0x2e0] sm:$0xff]  ;;  %v2913_v5 = vld [vmem:[%s11651_s22 + $0x7d0] sm:$0xff]  ;;  %v14808_v39 = vld [vmem:[#allocation79_spill] sm:$0xff] }
 0x362   : > { %v13183_v11 = vpack.c.bf16 %v2995_v4, %v2987_v13  ;;  %v3012_v30 = vmul.f32 %v2756_v21, %v14804_v28  ;;  %vm2137_vm9 = vcmp.gt.f32.partialorder %v1501_v9, 0.0  ;;  %v2393_v40 = vmul.f32 0.2, %v1501_v9  ;;  %v2906_v4 = vld [vmem:[%s11651_s22 + $0x798] sm:$0xff]  ;;  %v2772_v21 = vld [vmem:[%s11651_s22 + $0x368] sm:$0xff]  ;;  %v14810_v28 = vld [vmem:[#allocation82_spill] sm:$0xff] }
 0x363   : > { %14802 = vst [vmem:[#allocation58_spill] sm:$0xff] %v13177_v38  ;;  %14803 = vst [vmem:[#allocation62_spill] sm:$0xff] %v13181_v58  ;;  %v1505_v47 = vadd.f32 %v1504_v44, %v11928_v6  ;;  %v13188_v16 = vpack.c.bf16 %v3154_v15, %v3146_v20  ;;  %vm2138_vm10 = vcmp.gt.f32.partialorder %v1503_v52, 0.0  ;;  %v2394_v18 = vmul.f32 0.2, %v1503_v52  ;;  %v14807_v20 = vld [vmem:[#allocation76_spill] sm:$0xff] }
 0x364   : > { %v1507_v63 = vadd.f32 %v1506_v35, %v11936_v14  ;;  %v13193_v13 = vpack.c.bf16 %v3012_v30, %v3004_v22  ;;  %v2649_v33 = vsel %vm2137_vm9, %v1501_v9, %v2393_v40  ;;  %5766 = vmatmul.mubr.bf16.gmra.mrb[232].mxu1 %v14807_v20  ;;  %v3003_v46 = vmul.f32 %v2747_v19, %v14808_v39  ;;  %v2763_v14 = vld [vmem:[%s11651_s22 + $0x320] sm:$0xff]  ;;  %v14809_v17 = vld [vmem:[#allocation81_spill] sm:$0xff]  ;;  %v2914_v9 = vld [vmem:[%s11651_s22 + $0x7d8] sm:$0xff] }
 0x365   : > { %14805 = vst [vmem:[#allocation68_spill] sm:$0xff] %v13188_v16  ;;  %vm2145_vm11 = vcmp.gt.f32.partialorder %v1505_v47, 0.0  ;;  %v2401_v6 = vmul.f32 0.2, %v1505_v47  ;;  %5226 = vmatprep.mubr.bf16.mxu0 %v13188_v16  ;;  %v2650_v8 = vsel %vm2138_vm10, %v1503_v52, %v2394_v18  ;;  %5775 = vmatprep.mubr.bf16.mxu1 %v14809_v17  ;;  %v3161_v31 = vmul.f32 %v2905_v27, %v2649_v33  ;;  %v2771_v15 = vld [vmem:[%s11651_s22 + $0x360] sm:$0xff]  ;;  %v14811_v40 = vld [vmem:[#allocation87_spill] sm:$0xff] }
 0x366   : > { %14806 = vst [vmem:[#allocation70_spill] sm:$0xff] %v13193_v13  ;;  %vm2146_vm12 = vcmp.gt.f32.partialorder %v1507_v63, 0.0  ;;  %v2402_v24 = vmul.f32 0.2, %v1507_v63  ;;  %5227 = vmatmul.mubr.bf16.gmra.mrb[120].mxu0 %v13181_v58  ;;  %v3162_v44 = vmul.f32 %v2906_v4, %v2650_v8  ;;  %v3011_v30 = vmul.f32 %v2755_v45, %v14810_v28  ;;  %v2780_v35 = vld [vmem:[%s11651_s22 + $0x3a8] sm:$0xff]  ;;  %v1736_v18 = vpop.f32.mrb[128].mxu1 }
 0x367   : > { %v2657_v22 = vsel %vm2145_vm11, %v1505_v47, %v2401_v6  ;;  %v3020_v19 = vmul.f32 %v2764_v3, %v14811_v40  ;;  %v14812_v39 = vld [vmem:[#allocation91_spill] sm:$0xff]  ;;  %v14813_v33 = vld [vmem:[#allocation86_spill] sm:$0xff]  ;;  %v1737_v47 = vadd.f32 %v1736_v18, %v13073_v1  ;;  %v1738_v4 = vpop.f32.mrb[129].mxu1  ;;  %v2787_v18 = vld [vmem:[%s11651_s22 + $0x3e0] sm:$0xff] }
 0x368   : > { %v2658_v52 = vsel %vm2146_vm12, %v1507_v63, %v2402_v24  ;;  %v3169_v20 = vmul.f32 %v2913_v5, %v2657_v22  ;;  %v3028_v27 = vmul.f32 %v2772_v21, %v14812_v39  ;;  %v3019_v17 = vmul.f32 %v2763_v14, %v14813_v33  ;;  %v14814_v3 = vld [vmem:[#allocation90_spill] sm:$0xff]  ;;  %v1740_v63 = vpop.f32.mrb[130].mxu1  ;;  %v2788_v21 = vld [vmem:[%s11651_s22 + $0x3e8] sm:$0xff]  ;;  %v14817_v14 = vld [vmem:[#allocation95_spill] sm:$0xff] }
 0x369   : > { %v3170_v45 = vmul.f32 %v2914_v9, %v2658_v52  ;;  %v13217_v6 = vpack.c.bf16 %v3011_v30, %v3003_v46  ;;  %v3027_v8 = vmul.f32 %v2771_v15, %v14814_v3  ;;  %v13221_v28 = vadd.f32 %v1738_v4, %v13080_v23  ;;  %v2669_v46 = vld [vmem:[%s11651_s22 + $0x30] sm:$0xff]  ;;  %v1742_v15 = vpop.f32.mrb[131].mxu1  ;;  %v14821_v33 = vld [vmem:[#allocation99_spill] sm:$0xff]  ;;  %v2804_v3 = vld [vmem:[%s11651_s22 + $0x468] sm:$0xff] }
 0x36a   : > { %v13223_v5 = vpack.c.bf16 %v3169_v20, %v3161_v31  ;;  %v13225_v24 = vpack.c.bf16 %v3028_v27, %v3020_v19  ;;  %v3036_v22 = vmul.f32 %v2780_v35, %v14817_v14  ;;  %vm1901_vm15 = vcmp.gt.f32.partialorder %v1737_v47, 0.0  ;;  %v2779_v35 = vld [vmem:[%s11651_s22 + $0x3a0] sm:$0xff]  ;;  %v2677_v27 = vld [vmem:[%s11651_s22 + $0x70] sm:$0xff]  ;;  %v14826_v16 = vld [vmem:[#allocation101_spill] sm:$0xff] }
 0x36b   : > { %v2157_v9 = vmul.f32 0.2, %v1737_v47  ;;  %v1741_v30 = vadd.f32 %v1740_v63, %v13073_v1  ;;  %v13231_v40 = vpack.c.bf16 %v3170_v45, %v3162_v44  ;;  %v2404_v31 = vmul.f32 0.2, %v13059_v48  ;;  %v14820_v44 = vld [vmem:[#allocation80_spill] sm:$0xff]  ;;  %v2796_v45 = vld [vmem:[%s11651_s22 + $0x428] sm:$0xff] }
 0x36c   : > { %14815 = vst [vmem:[#allocation66_spill] sm:$0xff] %v13223_v5  ;;  %14816 = vst [vmem:[#allocation69_spill] sm:$0xff] %v13225_v24  ;;  %v1743_v19 = vadd.f32 %v1742_v15, %v13080_v23  ;;  %v13236_v52 = vpack.c.bf16 %v3027_v8, %v3019_v17  ;;  %5776 = vmatmul.mubr.bf16.gmra.mrb[236].mxu1 %v14820_v44  ;;  %v3044_v4 = vmul.f32 %v2788_v21, %v14821_v33  ;;  %v2795_v8 = vld [vmem:[%s11651_s22 + $0x420] sm:$0xff]  ;;  %v2812_v33 = vld [vmem:[%s11651_s22 + $0x4a8] sm:$0xff] }
 0x36d   : > { %14818 = vst [vmem:[#allocation71_spill] sm:$0xff] %v13231_v40  ;;  %v2413_v20 = vsel %vm1901_vm15, %v1737_v47, %v2157_v9  ;;  %vm1909_vm1 = vcmp.gt.f32.partialorder %v1741_v30, 0.0  ;;  %v2165_v39 = vmul.f32 0.2, %v1741_v30  ;;  %5236 = vmatprep.mubr.bf16.mxu0 %v13231_v40  ;;  %vm1902_vm2 = vcmp.gt.f32.partialorder %v13221_v28, 0.0  ;;  %v14822_v47 = vld [vmem:[#allocation85_spill] sm:$0xff] }
 0x36e   : > { %14819 = vst [vmem:[#allocation77_spill] sm:$0xff] %v13236_v52  ;;  %v2925_v63 = vmul.f32 %v2669_v46, %v2413_v20  ;;  %v2158_v17 = vmul.f32 0.2, %v13221_v28  ;;  %vm1910_vm3 = vcmp.gt.f32.partialorder %v1743_v19, 0.0  ;;  %5237 = vmatmul.mubr.bf16.gmra.mrb[124].mxu0 %v13223_v5  ;;  %5785 = vmatprep.mubr.bf16.mxu1 %v14822_v47  ;;  %v2803_v14 = vld [vmem:[%s11651_s22 + $0x460] sm:$0xff]  ;;  %v13254_v21 = vpack.c.bf16 %v3044_v4, %v3036_v22  ;;  %v1746_v5 = vpop.f32.mrb[132].mxu1 }
 0x36f   : > { %v2421_v9 = vsel %vm1909_vm1, %v1741_v30, %v2165_v39  ;;  %5279 = vmatprep.mubr.bf16.mxu0 %v13101_v62  ;;  %v14824_v15 = vld [vmem:[#allocation92_spill] sm:$0xff]  ;;  %v2166_v58 = vmul.f32 0.2, %v1743_v19  ;;  %v3052_v47 = vmul.f32 %v2796_v45, %v14826_v16  ;;  %v14827_v52 = vld [vmem:[#allocation105_spill] sm:$0xff]  ;;  %v13262_v30 = vadd.f32 %v1746_v5, %v13073_v1  ;;  %v1748_v39 = vpop.f32.mrb[133].mxu1 }
 0x370   : > { %14823 = vst [vmem:[#allocation74_spill] sm:$0xff] %v13254_v21  ;;  %v3035_v46 = vmul.f32 %v2779_v35, %v14824_v15  ;;  %v14825_v20 = vld [vmem:[#allocation96_spill] sm:$0xff]  ;;  %v2933_v40 = vmul.f32 %v2677_v27, %v2421_v9  ;;  %v3060_v24 = vmul.f32 %v2804_v3, %v14827_v52  ;;  %v13272_v27 = vadd.f32 %v1748_v39, %v13080_v23  ;;  %v1750_v16 = vpop.f32.mrb[134].mxu1 }
 0x371   : > { %v3043_v44 = vmul.f32 %v2787_v18, %v14825_v20  ;;  %v14828_v22 = vld [vmem:[#allocation100_spill] sm:$0xff]  ;;  %v2820_v18 = vld [vmem:[%s11651_s22 + $0x4e8] sm:$0xff]  ;;  %v3068_v5 = vmul.f32 %v2812_v33, %v12672_v54  ;;  %v13282_v3 = vsel %vm2140_vm13, %v13028_v2, %v13055_v32  ;;  %v13298_v2 = vsel %vm2148_vm0, %v13059_v48, %v2404_v31 }
 0x372   : > { %v3051_v4 = vmul.f32 %v2795_v8, %v14828_v22  ;;  %v14829_v35 = vld [vmem:[#allocation104_spill] sm:$0xff]  ;;  %v13269_v20 = vpack.c.bf16 %v2933_v40, %v2925_v63  ;;  %v13274_v52 = vpack.c.bf16 %v3060_v24, %v3052_v47  ;;  %v13288_v40 = vsel %vm2147_vm14, %v13049_v60, %v13071_v50  ;;  %v1752_v24 = vpop.f32.mrb[135].mxu1  ;;  %v2844_v22 = vld [vmem:[%s11651_s22 + $0x5a8] sm:$0xff] }
 0x373   : > { %v13264_v62 = vpack.c.bf16 %v3043_v44, %v3035_v46  ;;  %v3059_v15 = vmul.f32 %v2803_v14, %v14829_v35  ;;  %v2811_v45 = vld [vmem:[%s11651_s22 + $0x4a0] sm:$0xff]  ;;  %v13291_v63 = vadd.f32 %v1750_v16, %v13073_v1  ;;  %v13303_v60 = vsel %vm1902_vm2, %v13221_v28, %v2158_v17  ;;  %v2828_v46 = vld [vmem:[%s11651_s22 + $0x528] sm:$0xff] }
 0x374   : > { %14830 = vst [vmem:[#allocation78_spill] sm:$0xff] %v13269_v20  ;;  %14831 = vst [vmem:[#allocation73_spill] sm:$0xff] %v13274_v52  ;;  %v10353_v54 = vld [vmem:[#allocation11 + $0x600] ss:$16 sps:$4 sm:$0xff]   ;;  %v13306_v32 = vadd.f32 %v1752_v24, %v13080_v23  ;;  %v10361_v50 = vld [vmem:[#allocation11 + $0x624] ss:$16 sps:$4 sm:$0xff]   ;;  %v3076_v14 = vmul.f32 %v2820_v18, %v12704_v10  ;;  %v13312_v44 = vsel %vm1910_vm3, %v1743_v19, %v2166_v58 }
 0x375   : > { %v13293_v8 = vpack.c.bf16 %v3059_v15, %v3051_v4  ;;  %v2819_v9 = vld [vmem:[%s11651_s22 + $0x4e0] sm:$0xff]  ;;  %vm1917_vm4 = vcmp.gt.f32.partialorder %v13262_v30, 0.0  ;;  %v2173_v48 = vmul.f32 0.2, %v13262_v30  ;;  %v3067_v28 = vmul.f32 %v2811_v45, %v12667_v56  ;;  %v2836_v17 = vld [vmem:[%s11651_s22 + $0x568] sm:$0xff] }
 0x376   : > { %v14833_v31 = vld [vmem:[#allocation84_spill] sm:$0xff]  ;;  %vm1918_vm5 = vcmp.gt.f32.partialorder %v13272_v27, 0.0  ;;  %v2174_v10 = vmul.f32 0.2, %v13272_v27  ;;  %vm1925_vm6 = vcmp.gt.f32.partialorder %v13291_v63, 0.0  ;;  %v14834_v58 = vld [vmem:[#allocation45_spill] sm:$0xff]  ;;  %v13326_v39 = vpack.c.bf16 %v3076_v14, %v3068_v5 }
 0x377   : > { %14832 = vst [vmem:[#allocation75_spill] sm:$0xff] %v13293_v8  ;;  %5786 = vmatmul.mubr.bf16.gmra.mrb[240].mxu1 %v14833_v31  ;;  %v2827_v33 = vld [vmem:[%s11651_s22 + $0x520] sm:$0xff]  ;;  %5280 = vmatmul.mubr.bf16.vlgmr.msra.gmra.mrb[64].mxu0 %v14834_v58  ;;  %v14835_v19 = vld [vmem:[#allocation89_spill] sm:$0xff]  ;;  %v2181_v56 = vmul.f32 0.2, %v13291_v63  ;;  %vm1926_vm7 = vcmp.gt.f32.partialorder %v13306_v32, 0.0  ;;  %v3075_v15 = vmul.f32 %v2819_v9, %v12675_v34  ;;  %v3084_v18 = vmul.f32 %v2828_v46, %v12748_v0 }
 0x378   : > { %v2835_v47 = vld [vmem:[%s11651_s22 + $0x560] sm:$0xff]  ;;  %5795 = vmatprep.mubr.bf16.mxu1 %v14835_v19  ;;  %14836 = vst [vmem:[#allocation83_spill] sm:$0xff] %v13326_v39  ;;  %v2852_v4 = vld [vmem:[%s11651_s22 + $0x5e8] sm:$0xff]  ;;  %5289 = vmatprep.mubr.bf16.mxu0 %v13107_v59  ;;  %v2182_v45 = vmul.f32 0.2, %v13306_v32  ;;  %v1756_v5 = vpop.f32.mrb[136].mxu1  ;;  %v3092_v14 = vmul.f32 %v2836_v17, %v12756_v43  ;;  %v3083_v31 = vmul.f32 %v2827_v33, %v12715_v37 }
 0x379   : > { %5441 = vmatpush1.bf16.msra.mxu0 %v10353_v54  ;;  %v10359_v35 = vld [vmem:[#allocation11 + $0x620] ss:$16 sps:$4 sm:$0xff]   ;;  %v10367_v24 = vld [vmem:[#allocation11 + $0x644] ss:$16 sps:$4 sm:$0xff]   ;;  %v3091_v19 = vmul.f32 %v2835_v47, %v12753_v36  ;;  %v1757_v54 = vadd.f32 %v1756_v5, %v13073_v1  ;;  %v1758_v59 = vpop.f32.mrb[137].mxu1  ;;  %v13341_v58 = vpack.c.bf16 %v3075_v15, %v3067_v28  ;;  %v3100_v34 = vmul.f32 %v2844_v22, %v12799_v57  ;;  %v2860_v36 = vld [vmem:[%s11651_s22 + $0x628] sm:$0xff] }
 0x37a   : > { %v2843_v16 = vld [vmem:[%s11651_s22 + $0x5a0] sm:$0xff]  ;;  %5442 = vmatprep.subr.bf16.mxu0 %v10361_v50  ;;  %v3108_v0 = vmul.f32 %v2852_v4, %v12841_v61  ;;  %v13347_v50 = vadd.f32 %v1758_v59, %v13080_v23  ;;  %v1760_v46 = vpop.f32.mrb[138].mxu1  ;;  %v13349_v20 = vpack.c.bf16 %v3092_v14, %v3084_v18  ;;  %v13363_v33 = vsel %vm1917_vm4, %v13262_v30, %v2173_v48  ;;  %v2876_v18 = vld [vmem:[%s11651_s22 + $0x6a8] sm:$0xff] }
 0x37b   : > { %14837 = vst [vmem:[#allocation76_spill] sm:$0xff] %v13341_v58  ;;  %v2851_v9 = vld [vmem:[%s11651_s22 + $0x5e0] sm:$0xff]  ;;  %v13351_v43 = vpack.c.bf16 %v3091_v19, %v3083_v31  ;;  %v3099_v37 = vmul.f32 %v2843_v16, %v12786_v55  ;;  %vm1933_vm8 = vcmp.gt.f32.partialorder %v1757_v54, 0.0  ;;  %v2189_v28 = vmul.f32 0.2, %v1757_v54  ;;  %v1762_v61 = vpop.f32.mrb[139].mxu1 }
 0x37c   : > { %14838 = vst [vmem:[#allocation79_spill] sm:$0xff] %v13349_v20  ;;  %v13356_v57 = vadd.f32 %v1760_v46, %v13073_v1  ;;  %v10365_v59 = vld [vmem:[#allocation11 + $0x640] ss:$16 sps:$4 sm:$0xff]   ;;  %v13358_v17 = vpack.c.bf16 %v3108_v0, %v3100_v34  ;;  %v13368_v55 = vsel %vm1918_vm5, %v13272_v27, %v2174_v10  ;;  %v13371_v47 = vadd.f32 %v1762_v61, %v13080_v23  ;;  %v10373_v22 = vld [vmem:[#allocation11 + $0x664] ss:$16 sps:$4 sm:$0xff]   ;;  %v2884_v16 = vld [vmem:[%s11651_s22 + $0x6e8] sm:$0xff] }
 0x37d   : > { %14839 = vst [vmem:[#allocation81_spill] sm:$0xff] %v13351_v43  ;;  %5443 = vmatpush1.bf16.msra.mxu0 %v10359_v35  ;;  %v3107_v4 = vmul.f32 %v2851_v9, %v12836_v51  ;;  %v2868_v35 = vld [vmem:[%s11651_s22 + $0x668] sm:$0xff]  ;;  %v2859_v15 = vld [vmem:[%s11651_s22 + $0x620] sm:$0xff]  ;;  %v13379_v30 = vsel %vm1925_vm6, %v13291_v63, %v2181_v56  ;;  %v13384_v27 = vsel %vm1926_vm7, %v13306_v32, %v2182_v45  ;;  %vm1934_vm9 = vcmp.gt.f32.partialorder %v13347_v50, 0.0  ;;  %v14841_v32 = vld [vmem:[#allocation94_spill] sm:$0xff]  ;;  %v1766_v0 = vpop.f32.mrb[140].mxu1 }
 0x37e   : > { %5444 = vmatprep.subr.bf16.mxu0 %v10367_v24  ;;  %v14840_v48 = vld [vmem:[#allocation88_spill] sm:$0xff]  ;;  %v3116_v51 = vmul.f32 %v2860_v36, %v12876_v7  ;;  %v13393_v5 = vsel %vm1933_vm8, %v1757_v54, %v2189_v28  ;;  %v2190_v63 = vmul.f32 0.2, %v13347_v50  ;;  %vm1941_vm10 = vcmp.gt.f32.partialorder %v13356_v57, 0.0  ;;  %v2892_v54 = vld [vmem:[%s11651_s22 + $0x728] sm:$0xff]  ;;  %v1768_v61 = vpop.f32.mrb[141].mxu1 }
 0x37f   : > { %5796 = vmatmul.mubr.bf16.gmra.mrb[244].mxu1 %v14840_v48  ;;  %v2867_v10 = vld [vmem:[%s11651_s22 + $0x660] sm:$0xff]  ;;  %5290 = vmatmul.mubr.bf16.gmra.mrb[68].mxu0 %v13117_v41  ;;  %v13399_v56 = vpack.c.bf16 %v3107_v4, %v3099_v37  ;;  %v2197_v7 = vmul.f32 0.2, %v13356_v57  ;;  %vm1942_vm11 = vcmp.gt.f32.partialorder %v13371_v47, 0.0  ;;  %v3124_v31 = vmul.f32 %v2868_v35, %v12918_v49  ;;  %v14843_v49 = vld [vmem:[#allocation46_spill] sm:$0xff]  ;;  %v14844_v4 = vld [vmem:[#allocation51_spill] sm:$0xff] }
 0x380   : > { %5805 = vmatprep.mubr.bf16.mxu1 %v14841_v32  ;;  %v2875_v45 = vld [vmem:[%s11651_s22 + $0x6a0] sm:$0xff]  ;;  %5299 = vmatprep.mubr.bf16.mxu0 %v13133_v12  ;;  %v3115_v19 = vmul.f32 %v2859_v15, %v12846_v42  ;;  %v2198_v34 = vmul.f32 0.2, %v13371_v47  ;;  %v3123_v46 = vmul.f32 %v2867_v10, %v12890_v53  ;;  %v3132_v37 = vmul.f32 %v2876_v18, %v12937_v29  ;;  %v2900_v15 = vld [vmem:[%s11651_s22 + $0x768] sm:$0xff]  ;;  %v1770_v48 = vpop.f32.mrb[142].mxu1 }
 0x381   : > { %14842 = vst [vmem:[#allocation82_spill] sm:$0xff] %v13399_v56  ;;  %v2883_v24 = vld [vmem:[%s11651_s22 + $0x6e0] sm:$0xff]  ;;  %5445 = vmatpush1.bf16.msra.mxu0 %v10365_v59  ;;  %v3140_v36 = vmul.f32 %v2884_v16, %v12999_v25  ;;  %v1767_v28 = vadd.f32 %v1766_v0, %v13073_v1  ;;  %v13414_v59 = vpack.c.bf16 %v3124_v31, %v3116_v51  ;;  %v14845_v25 = vld [vmem:[#allocation61_spill] sm:$0xff] }
 0x382   : > { %v10371_v14 = vld [vmem:[#allocation11 + $0x660] ss:$16 sps:$4 sm:$0xff]   ;;  %5446 = vmatprep.subr.bf16.mxu0 %v10373_v22  ;;  %v10379_v9 = vld [vmem:[#allocation11 + $0x684] ss:$16 sps:$4 sm:$0xff]   ;;  %v3131_v42 = vmul.f32 %v2875_v45, %v14843_v49  ;;  %v3139_v35 = vmul.f32 %v2883_v24, %v14844_v4  ;;  %v1769_v22 = vadd.f32 %v1768_v61, %v13080_v23  ;;  %v13420_v53 = vpack.c.bf16 %v3123_v46, %v3115_v19  ;;  %v1772_v45 = vpop.f32.mrb[143].mxu1  ;;  %v14848_v49 = vld [vmem:[#allocation93_spill] sm:$0xff] }
 0x383   : > { %v10377_v32 = vld [vmem:[#allocation11 + $0x680] ss:$16 sps:$4 sm:$0xff]   ;;  %v13422_v29 = vpack.c.bf16 %v3140_v36, %v3132_v37  ;;  %v3148_v10 = vmul.f32 %v2892_v54, %v14845_v25  ;;  %vm1949_vm12 = vcmp.gt.f32.partialorder %v1767_v28, 0.0  ;;  %v2205_v51 = vmul.f32 0.2, %v1767_v28  ;;  %v2908_v36 = vld [vmem:[%s11651_s22 + $0x7a8] sm:$0xff] }
 0x384   : > { %v2891_v18 = vld [vmem:[%s11651_s22 + $0x720] sm:$0xff]  ;;  %v13427_v16 = vadd.f32 %v1770_v48, %v13073_v1  ;;  %v13429_v24 = vpack.c.bf16 %v3139_v35, %v3131_v42  ;;  %vm1950_vm13 = vcmp.gt.f32.partialorder %v1769_v22, 0.0  ;;  %v2206_v19 = vmul.f32 0.2, %v1769_v22  ;;  %v2916_v35 = vld [vmem:[%s11651_s22 + $0x7e8] sm:$0xff] }
 0x385   : > { %5447 = vmatpush1.bf16.msra.mxu0 %v10371_v14  ;;  %v2899_v31 = vld [vmem:[%s11651_s22 + $0x760] sm:$0xff]  ;;  %v13433_v0 = vadd.f32 %v1772_v45, %v13080_v23  ;;  %v13440_v14 = vsel %vm1934_vm9, %v13347_v50, %v2190_v63  ;;  %v13445_v61 = vsel %vm1941_vm10, %v13356_v57, %v2197_v7  ;;  %v13458_v50 = vsel %vm1949_vm12, %v1767_v28, %v2205_v51  ;;  %v14850_v63 = vld [vmem:[#allocation98_spill] sm:$0xff]  ;;  %v2670_v7 = vld [vmem:[%s11651_s22 + $0x38] sm:$0xff] }
 0x386   : > { %14846 = vst [vmem:[#allocation87_spill] sm:$0xff] %v13429_v24  ;;  %5448 = vmatprep.subr.bf16.mxu0 %v10379_v9  ;;  %v10385_v54 = vld [vmem:[#allocation11 + $0x6a4] ss:$16 sps:$4 sm:$0xff]   ;;  %v13450_v9 = vsel %vm1942_vm11, %v13371_v47, %v2198_v34  ;;  %vm1957_vm14 = vcmp.gt.f32.partialorder %v13427_v16, 0.0  ;;  %v2213_v57 = vmul.f32 0.2, %v13427_v16  ;;  %v13469_v25 = vsel %vm1950_vm13, %v1769_v22, %v2206_v19 }
 0x387   : > { %v14847_v46 = vld [vmem:[#allocation60_spill] sm:$0xff]  ;;  %5806 = vmatmul.mubr.bf16.gmra.mrb[248].mxu1 %v14848_v49  ;;  %5300 = vmatmul.mubr.bf16.gmra.mrb[72].mxu0 %v13145_v26  ;;  %v2678_v34 = vld [vmem:[%s11651_s22 + $0x78] sm:$0xff]  ;;  %vm1958_vm15 = vcmp.gt.f32.partialorder %v13433_v0, 0.0  ;;  %v3172_v22 = vmul.f32 %v2916_v35, %v13298_v2  ;;  %v14853_v19 = vld [vmem:[#allocation65_spill] sm:$0xff] }
 0x388   : > { %v3156_v37 = vmul.f32 %v2900_v15, %v14847_v46  ;;  %v14849_v42 = vld [vmem:[#allocation56_spill] sm:$0xff]  ;;  %5815 = vmatprep.mubr.bf16.mxu1 %v14850_v63  ;;  %v3164_v46 = vmul.f32 %v2908_v36, %v13282_v3  ;;  %v2686_v49 = vld [vmem:[%s11651_s22 + $0xb8] sm:$0xff]  ;;  %v2934_v3 = vmul.f32 %v2678_v34, %v13312_v44 }
 0x389   : > { %v3147_v4 = vmul.f32 %v2891_v18, %v14849_v42  ;;  %v2907_v15 = vld [vmem:[%s11651_s22 + $0x7a0] sm:$0xff]  ;;  %v14851_v18 = vld [vmem:[#allocation63_spill] sm:$0xff]  ;;  %5449 = vmatpush1.bf16.msra.mxu0 %v10377_v32 }
 0x38a   : > { %v2915_v48 = vld [vmem:[%s11651_s22 + $0x7e0] sm:$0xff]  ;;  %v13464_v47 = vpack.c.bf16 %v3156_v37, %v3148_v10  ;;  %5309 = vmatprep.mubr.bf16.mxu0 %v14851_v18  ;;  %v2214_v10 = vmul.f32 0.2, %v13433_v0  ;;  %v1776_v37 = vpop.f32.mrb[144].mxu1  ;;  %5450 = vmatprep.subr.bf16.mxu0 %v10385_v54  ;;  %v3163_v63 = vmul.f32 %v2907_v15, %v14853_v19  ;;  %v2694_v36 = vld [vmem:[%s11651_s22 + $0xf8] sm:$0xff]  ;;  %v13487_v35 = vpack.c.bf16 %v3172_v22, %v3164_v46  ;;  %v2709_v22 = vld [vmem:[%s11651_s22 + $0x170] sm:$0xff] }
 0x38b   : > { %v10383_v28 = vld [vmem:[#allocation11 + $0x6a0] ss:$16 sps:$4 sm:$0xff]   ;;  %v10391_v42 = vld [vmem:[#allocation11 + $0x6c4] ss:$16 sps:$4 sm:$0xff]   ;;  %v3171_v26 = vmul.f32 %v2915_v48, %v13288_v40  ;;  %v1777_v32 = vadd.f32 %v1776_v37, %v13073_v1  ;;  %v1778_v18 = vpop.f32.mrb[145].mxu1  ;;  %v14854_v37 = vld [vmem:[#allocation97_spill] sm:$0xff] }
 0x38c   : > { %v14852_v51 = vld [vmem:[#allocation116_spill] sm:$0xff]  ;;  %v1779_v54 = vadd.f32 %v1778_v18, %v13080_v23  ;;  %v2693_v18 = vld [vmem:[%s11651_s22 + $0xf0] sm:$0xff]  ;;  %v2470_v46 = vsel %vm1958_vm15, %v13433_v0, %v2214_v10  ;;  %v2718_v10 = vld [vmem:[%s11651_s22 + $0x1b8] sm:$0xff] }
 0x38d   : > { %v3155_v45 = vmul.f32 %v2899_v31, %v14852_v51  ;;  %v2926_v31 = vmul.f32 %v2670_v7, %v13303_v60  ;;  %v1780_v51 = vpop.f32.mrb[146].mxu1  ;;  %v10389_v41 = vld [vmem:[#allocation11 + $0x6c0] ss:$16 sps:$4 sm:$0xff]   ;;  %v10397_v2 = vld [vmem:[#allocation11 + $0x6e4] ss:$16 sps:$4 sm:$0xff]   ;;  %v13489_v40 = vpack.c.bf16 %v3171_v26, %v3163_v63  ;;  %vm1965_vm0 = vcmp.gt.f32.partialorder %v1777_v32, 0.0  ;;  %5451 = vmatpush1.bf16.msra.mxu0 %v10383_v28 }
 0x38e   : > { %v2221_v15 = vmul.f32 0.2, %v1777_v32  ;;  %v13493_v60 = vadd.f32 %v1780_v51, %v13073_v1  ;;  %v1782_v44 = vpop.f32.mrb[147].mxu1  ;;  %v2685_v7 = vld [vmem:[%s11651_s22 + $0xb0] sm:$0xff]  ;;  %vm1966_vm1 = vcmp.gt.f32.partialorder %v1779_v54, 0.0  ;;  %5452 = vmatprep.subr.bf16.mxu0 %v10391_v42  ;;  %v2469_v28 = vsel %vm1957_vm14, %v13427_v16, %v2213_v57  ;;  %v14855_v63 = vld [vmem:[#allocation72_spill] sm:$0xff] }
 0x38f   : > { %v13481_v12 = vpack.c.bf16 %v3155_v45, %v3147_v4  ;;  %v2942_v4 = vmul.f32 %v2686_v49, %v13368_v55  ;;  %v13495_v48 = vpack.c.bf16 %v2934_v3, %v2926_v31  ;;  %v2222_v34 = vmul.f32 0.2, %v1779_v54  ;;  %v2702_v45 = vld [vmem:[%s11651_s22 + $0x138] sm:$0xff]  ;;  %5816 = vmatmul.mubr.bf16.gmra.mrb[252].mxu1 %v14854_v37  ;;  %v2701_v42 = vld [vmem:[%s11651_s22 + $0x130] sm:$0xff]  ;;  %5310 = vmatmul.mubr.bf16.gmra.mrb[76].mxu0 %v14855_v63 }
 0x390   : > { %v1783_v26 = vadd.f32 %v1782_v44, %v13080_v23  ;;  %v2950_v55 = vmul.f32 %v2694_v36, %v13384_v27  ;;  %v13509_v49 = vsel %vm1965_vm0, %v1777_v32, %v2221_v15  ;;  %vm1973_vm2 = vcmp.gt.f32.partialorder %v13493_v60, 0.0  ;;  %v2710_v27 = vld [vmem:[%s11651_s22 + $0x178] sm:$0xff]  ;;  %5319 = vmatprep.mubr.bf16.mxu0 %v13177_v38  ;;  %v10395_v36 = vld [vmem:[#allocation11 + $0x6e0] ss:$16 sps:$4 sm:$0xff]  }
 0x391   : > { %v14856_v16 = vld [vmem:[#allocation103_spill] sm:$0xff]  ;;  %v2941_v0 = vmul.f32 %v2685_v7, %v13363_v33  ;;  %v2478_v31 = vsel %vm1966_vm1, %v1779_v54, %v2222_v34  ;;  %v2229_v3 = vmul.f32 0.2, %v13493_v60  ;;  %5453 = vmatpush1.bf16.msra.mxu0 %v10389_v41  ;;  %v2949_v51 = vmul.f32 %v2693_v18, %v13379_v30  ;;  %v2717_v44 = vld [vmem:[%s11651_s22 + $0x1b0] sm:$0xff] }
 0x392   : > { %vm1974_vm3 = vcmp.gt.f32.partialorder %v1783_v26, 0.0  ;;  %v2230_v19 = vmul.f32 0.2, %v1783_v26  ;;  %5858 = vmatprep.mubr.bf16.mxu1 %v14856_v16  ;;  %v13518_v57 = vpack.c.bf16 %v2950_v55, %v2942_v4  ;;  %v2726_v32 = vld [vmem:[%s11651_s22 + $0x1f8] sm:$0xff]  ;;  %v2958_v15 = vmul.f32 %v2702_v45, %v13440_v14  ;;  %v1786_v55 = vpop.f32.mrb[148].mxu1  ;;  %5454 = vmatprep.subr.bf16.mxu0 %v10397_v2  ;;  %v2725_v45 = vld [vmem:[%s11651_s22 + $0x1f0] sm:$0xff] }
 0x393   : > { %v10403_v33 = vld [vmem:[#allocation11 + $0x704] ss:$16 sps:$4 sm:$0xff]   ;;  %v2966_v7 = vmul.f32 %v2710_v27, %v13450_v9  ;;  %v2957_v54 = vmul.f32 %v2701_v42, %v13393_v5  ;;  %v2965_v34 = vmul.f32 %v2709_v22, %v13445_v61  ;;  %v1787_v41 = vadd.f32 %v1786_v55, %v13073_v1  ;;  %v1788_v37 = vpop.f32.mrb[149].mxu1  ;;  %v10356_v16 = vld [vmem:[#allocation11 + $0x408] ss:$16 sps:$4 sm:$0xff]  }
 0x394   : > { %v2486_v4 = vsel %vm1974_vm3, %v1783_v26, %v2230_v19  ;;  %v13534_v30 = vpack.c.bf16 %v2949_v51, %v2941_v0  ;;  %v2974_v14 = vmul.f32 %v2718_v10, %v13469_v25  ;;  %v2982_v18 = vmul.f32 %v2726_v32, %v2470_v46  ;;  %v1790_v2 = vpop.f32.mrb[150].mxu1  ;;  %v10364_v19 = vld [vmem:[#allocation11 + $0x42c] ss:$16 sps:$4 sm:$0xff]   ;;  %v10401_v38 = vld [vmem:[#allocation11 + $0x700] ss:$16 sps:$4 sm:$0xff]  }
 0x395   : > { %v1789_v26 = vadd.f32 %v1788_v37, %v13080_v23  ;;  %v13539_v9 = vpack.c.bf16 %v2966_v7, %v2958_v15  ;;  %v13541_v5 = vpack.c.bf16 %v2965_v34, %v2957_v54  ;;  %v2973_v61 = vmul.f32 %v2717_v44, %v13458_v50  ;;  %v1792_v25 = vpop.f32.mrb[151].mxu1  ;;  %5455 = vmatpush1.bf16.msra.mxu0 %v10395_v36  ;;  %v10409_v46 = vld [vmem:[#allocation11 + $0x724] ss:$16 sps:$4 sm:$0xff]   ;;  %v2734_v51 = vld [vmem:[%s11651_s22 + $0x238] sm:$0xff] }
 0x396   : > { %vm1981_vm4 = vcmp.gt.f32.partialorder %v1787_v41, 0.0  ;;  %v2237_v27 = vmul.f32 0.2, %v1787_v41  ;;  %v1791_v42 = vadd.f32 %v1790_v2, %v13073_v1  ;;  %v13545_v22 = vpack.c.bf16 %v2982_v18, %v2974_v14  ;;  %5456 = vmatprep.subr.bf16.mxu0 %v10403_v33  ;;  %v2742_v50 = vld [vmem:[%s11651_s22 + $0x278] sm:$0xff]  ;;  %v14857_v55 = vld [vmem:[#allocation102_spill] sm:$0xff] }
 0x397   : > { %vm1982_vm5 = vcmp.gt.f32.partialorder %v1789_v26, 0.0  ;;  %v2238_v0 = vmul.f32 0.2, %v1789_v26  ;;  %v1793_v10 = vadd.f32 %v1792_v25, %v13080_v23  ;;  %v2981_v32 = vmul.f32 %v2725_v45, %v2469_v28  ;;  %5859 = vmatmul.mubr.bf16.vlgmr.msra.gmra.mrb[192].mxu1 %v14857_v55  ;;  %v2733_v7 = vld [vmem:[%s11651_s22 + $0x230] sm:$0xff]  ;;  %5320 = vmatmul.mubr.bf16.gmra.mrb[80].mxu0 %v13183_v11  ;;  %v14858_v33 = vld [vmem:[#allocation107_spill] sm:$0xff]  ;;  %v1796_v25 = vpop.f32.mrb[152].mxu1 }
 0x398   : > { %v2485_v15 = vsel %vm1973_vm2, %v13493_v60, %v2229_v3  ;;  %v2493_v44 = vsel %vm1981_vm4, %v1787_v41, %v2237_v27  ;;  %vm1989_vm6 = vcmp.gt.f32.partialorder %v1791_v42, 0.0  ;;  %v2245_v36 = vmul.f32 0.2, %v1791_v42  ;;  %v2741_v54 = vld [vmem:[%s11651_s22 + $0x270] sm:$0xff]  ;;  %5868 = vmatprep.mubr.bf16.mxu1 %v14858_v33  ;;  %v2750_v14 = vld [vmem:[%s11651_s22 + $0x2b8] sm:$0xff]  ;;  %6020 = vmatpush1.bf16.msra.mxu1 %v10356_v16 }
 0x399   : > { %v2494_v34 = vsel %vm1982_vm5, %v1789_v26, %v2238_v0  ;;  %vm1990_vm7 = vcmp.gt.f32.partialorder %v1793_v10, 0.0  ;;  %v2246_v28 = vmul.f32 0.2, %v1793_v10  ;;  %v13558_v37 = vpack.c.bf16 %v2981_v32, %v2973_v61  ;;  %v2758_v60 = vld [vmem:[%s11651_s22 + $0x2f8] sm:$0xff]  ;;  %5329 = vmatprep.mubr.bf16.mxu0 %v13193_v13  ;;  %v2749_v2 = vld [vmem:[%s11651_s22 + $0x2b0] sm:$0xff]  ;;  %6021 = vmatprep.subr.bf16.mxu1 %v10364_v19 }
 0x39a   : > { %v2501_v3 = vsel %vm1989_vm6, %v1791_v42, %v2245_v36  ;;  %v10362_v41 = vld [vmem:[#allocation11 + $0x428] ss:$16 sps:$4 sm:$0xff]   ;;  %v2990_v18 = vmul.f32 %v2734_v51, %v2478_v31  ;;  %v2998_v45 = vmul.f32 %v2742_v50, %v2486_v4  ;;  %v2757_v27 = vld [vmem:[%s11651_s22 + $0x2f0] sm:$0xff]  ;;  %v10370_v0 = vld [vmem:[#allocation11 + $0x44c] ss:$16 sps:$4 sm:$0xff]   ;;  %5457 = vmatpush1.bf16.msra.mxu0 %v10401_v38  ;;  %v2989_v61 = vmul.f32 %v2733_v7, %v13509_v49  ;;  %v1798_v42 = vpop.f32.mrb[153].mxu1 }
 0x39b   : > { %v2502_v26 = vsel %vm1990_vm7, %v1793_v10, %v2246_v28  ;;  %v10407_v55 = vld [vmem:[#allocation11 + $0x720] ss:$16 sps:$4 sm:$0xff]   ;;  %v2997_v32 = vmul.f32 %v2741_v54, %v2485_v15  ;;  %v1797_v33 = vadd.f32 %v1796_v25, %v13073_v1  ;;  %5458 = vmatprep.subr.bf16.mxu0 %v10409_v46  ;;  %v10415_v16 = vld [vmem:[#allocation11 + $0x744] ss:$16 sps:$4 sm:$0xff]   ;;  %v3006_v31 = vmul.f32 %v2750_v14, %v2494_v34  ;;  %v1800_v10 = vpop.f32.mrb[154].mxu1  ;;  %v14860_v25 = vld [vmem:[#allocation109_spill] sm:$0xff] }
 0x39c   : > { %v13567_v36 = vpack.c.bf16 %v2998_v45, %v2990_v18  ;;  %v3014_v4 = vmul.f32 %v2758_v60, %v2502_v26  ;;  %v1799_v51 = vadd.f32 %v1798_v42, %v13080_v23  ;;  %v10368_v50 = vld [vmem:[#allocation11 + $0x448] ss:$16 sps:$4 sm:$0xff]   ;;  %v10376_v19 = vld [vmem:[#allocation11 + $0x46c] ss:$16 sps:$4 sm:$0xff]   ;;  %v3005_v38 = vmul.f32 %v2749_v2, %v2493_v44  ;;  %v1802_v7 = vpop.f32.mrb[155].mxu1  ;;  %6022 = vmatpush1.bf16.msra.mxu1 %v10362_v41  ;;  %v14859_v45 = vld [vmem:[#allocation106_spill] sm:$0xff] }
 0x39d   : > { %v13570_v28 = vpack.c.bf16 %v2997_v32, %v2989_v61  ;;  %v3013_v13 = vmul.f32 %v2757_v27, %v2501_v3  ;;  %vm1997_vm8 = vcmp.gt.f32.partialorder %v1797_v33, 0.0  ;;  %v2253_v49 = vmul.f32 0.2, %v1797_v33  ;;  %v10413_v46 = vld [vmem:[#allocation11 + $0x740] ss:$16 sps:$4 sm:$0xff]   ;;  %6023 = vmatprep.subr.bf16.mxu1 %v10370_v0  ;;  %v2766_v0 = vld [vmem:[%s11651_s22 + $0x338] sm:$0xff] }
 0x39e   : > { %v1801_v15 = vadd.f32 %v1800_v10, %v13073_v1  ;;  %v13573_v54 = vpack.c.bf16 %v3014_v4, %v3006_v31  ;;  %vm1998_vm9 = vcmp.gt.f32.partialorder %v1799_v51, 0.0  ;;  %v2254_v34 = vmul.f32 0.2, %v1799_v51  ;;  %5459 = vmatpush1.bf16.msra.mxu0 %v10407_v55  ;;  %v10418_v44 = vld [vmem:[#allocation11 + $0x764] ss:$16 sps:$4 sm:$0xff]   ;;  %v2774_v55 = vld [vmem:[%s11651_s22 + $0x378] sm:$0xff] }
 0x39f   : > { %v1803_v14 = vadd.f32 %v1802_v7, %v13080_v23  ;;  %v13576_v60 = vpack.c.bf16 %v3013_v13, %v3005_v38  ;;  %v2509_v3 = vsel %vm1997_vm8, %v1797_v33, %v2253_v49  ;;  %5869 = vmatmul.mubr.bf16.gmra.mrb[196].mxu1 %v14859_v45  ;;  %5460 = vmatprep.subr.bf16.mxu0 %v10415_v16  ;;  %v2765_v41 = vld [vmem:[%s11651_s22 + $0x330] sm:$0xff]  ;;  %v14861_v13 = vld [vmem:[#allocation69_spill] sm:$0xff]  ;;  %v1806_v42 = vpop.f32.mrb[156].mxu1 }
 0x3a0   : > { %vm2005_vm10 = vcmp.gt.f32.partialorder %v1801_v15, 0.0  ;;  %v2261_v18 = vmul.f32 0.2, %v1801_v15  ;;  %v2773_v2 = vld [vmem:[%s11651_s22 + $0x370] sm:$0xff]  ;;  %v2510_v27 = vsel %vm1998_vm9, %v1799_v51, %v2254_v34  ;;  %5330 = vmatmul.mubr.bf16.gmra.mrb[84].mxu0 %v13217_v6  ;;  %5878 = vmatprep.mubr.bf16.mxu1 %v14860_v25  ;;  %v10374_v32 = vld [vmem:[#allocation11 + $0x468] ss:$16 sps:$4 sm:$0xff]   ;;  %v3021_v4 = vmul.f32 %v2765_v41, %v2509_v3 }
 0x3a1   : > { %vm2006_vm11 = vcmp.gt.f32.partialorder %v1803_v14, 0.0  ;;  %v2262_v26 = vmul.f32 0.2, %v1803_v14  ;;  %5339 = vmatprep.mubr.bf16.mxu0 %v14861_v13  ;;  %6024 = vmatpush1.bf16.msra.mxu1 %v10368_v50  ;;  %v10382_v16 = vld [vmem:[#allocation11 + $0x48c] ss:$16 sps:$4 sm:$0xff]   ;;  %v1807_v10 = vadd.f32 %v1806_v42, %v13073_v1  ;;  %v1808_v38 = vpop.f32.mrb[157].mxu1  ;;  %v3022_v7 = vmul.f32 %v2766_v0, %v2510_v27 }
 0x3a2   : > { %v2517_v61 = vsel %vm2005_vm10, %v1801_v15, %v2261_v18  ;;  %6025 = vmatprep.subr.bf16.mxu1 %v10376_v19  ;;  %5461 = vmatpush1.bf16.msra.mxu0 %v10413_v46  ;;  %v10416_v31 = vld [vmem:[#allocation11 + $0x760] ss:$16 sps:$4 sm:$0xff]   ;;  %v10424_v49 = vld [vmem:[#allocation11 + $0x784] ss:$16 sps:$4 sm:$0xff]   ;;  %v1809_v15 = vadd.f32 %v1808_v38, %v13080_v23  ;;  %v1810_v18 = vpop.f32.mrb[158].mxu1  ;;  %v2782_v38 = vld [vmem:[%s11651_s22 + $0x3b8] sm:$0xff] }
 0x3a3   : > { %v2518_v33 = vsel %vm2006_vm11, %v1803_v14, %v2262_v26  ;;  %v3029_v51 = vmul.f32 %v2773_v2, %v2517_v61  ;;  %5462 = vmatprep.subr.bf16.mxu0 %v10418_v44  ;;  %v10380_v50 = vld [vmem:[#allocation11 + $0x488] ss:$16 sps:$4 sm:$0xff]   ;;  %v10388_v45 = vld [vmem:[#allocation11 + $0x4ac] ss:$16 sps:$4 sm:$0xff]   ;;  %vm2013_vm12 = vcmp.gt.f32.partialorder %v1807_v10, 0.0  ;;  %v1811_v46 = vadd.f32 %v1810_v18, %v13073_v1  ;;  %v1812_v3 = vpop.f32.mrb[159].mxu1 }
 0x3a4   : > { %v3030_v34 = vmul.f32 %v2774_v55, %v2518_v33  ;;  %v2269_v19 = vmul.f32 0.2, %v1807_v10  ;;  %v10422_v41 = vld [vmem:[#allocation11 + $0x780] ss:$16 sps:$4 sm:$0xff]   ;;  %vm2014_vm13 = vcmp.gt.f32.partialorder %v1809_v15, 0.0  ;;  %v1813_v27 = vadd.f32 %v1812_v3, %v13080_v23 }
 0x3a5   : > { %v13588_v14 = vpack.c.bf16 %v3029_v51, %v3021_v4  ;;  %6026 = vmatpush1.bf16.msra.mxu1 %v10374_v32  ;;  %v2270_v2 = vmul.f32 0.2, %v1809_v15  ;;  %v10427_v26 = vld [vmem:[#allocation11 + $0x7a4] ss:$16 sps:$4 sm:$0xff]   ;;  %vm2021_vm14 = vcmp.gt.f32.partialorder %v1811_v46, 0.0  ;;  %v14863_v4 = vld [vmem:[#allocation77_spill] sm:$0xff] }
 0x3a6   : > { %v13591_v44 = vpack.c.bf16 %v3030_v34, %v3022_v7  ;;  %6027 = vmatprep.subr.bf16.mxu1 %v10382_v16  ;;  %5463 = vmatpush1.bf16.msra.mxu0 %v10416_v31  ;;  %v2525_v25 = vsel %vm2013_vm12, %v1807_v10, %v2269_v19  ;;  %v2277_v0 = vmul.f32 0.2, %v1811_v46  ;;  %v14862_v55 = vld [vmem:[#allocation108_spill] sm:$0xff]  ;;  %v2781_v61 = vld [vmem:[%s11651_s22 + $0x3b0] sm:$0xff]  ;;  %vm2022_vm15 = vcmp.gt.f32.partialorder %v1813_v27, 0.0  ;;  %v14864_v51 = vld [vmem:[#allocation111_spill] sm:$0xff] }
 0x3a7   : > { %5879 = vmatmul.mubr.bf16.gmra.mrb[200].mxu1 %v14862_v55  ;;  %5464 = vmatprep.subr.bf16.mxu0 %v10424_v49  ;;  %v2789_v32 = vld [vmem:[%s11651_s22 + $0x3f0] sm:$0xff]  ;;  %v2526_v33 = vsel %vm2014_vm13, %v1809_v15, %v2270_v2  ;;  %v2278_v42 = vmul.f32 0.2, %v1813_v27  ;;  %v2790_v16 = vld [vmem:[%s11651_s22 + $0x3f8] sm:$0xff]  ;;  %v1816_v34 = vpop.f32.mrb[160].mxu1  ;;  %v3037_v15 = vmul.f32 %v2781_v61, %v2525_v25 }
 0x3a8   : > { %5340 = vmatmul.mubr.bf16.gmra.mrb[88].mxu0 %v14863_v4  ;;  %5888 = vmatprep.mubr.bf16.mxu1 %v14864_v51  ;;  %v2533_v7 = vsel %vm2021_vm14, %v1811_v46, %v2277_v0  ;;  %v10386_v31 = vld [vmem:[#allocation11 + $0x4a8] ss:$16 sps:$4 sm:$0xff]   ;;  %v10394_v49 = vld [vmem:[#allocation11 + $0x4cc] ss:$16 sps:$4 sm:$0xff]   ;;  %v10425_v18 = vld [vmem:[#allocation11 + $0x7a0] ss:$16 sps:$4 sm:$0xff]   ;;  %v1817_v3 = vadd.f32 %v1816_v34, %v13073_v1  ;;  %v3038_v51 = vmul.f32 %v2782_v38, %v2526_v33 }
 0x3a9   : > { %5349 = vmatprep.mubr.bf16.mxu0 %v13254_v21  ;;  %6028 = vmatpush1.bf16.msra.mxu1 %v10380_v50  ;;  %v2534_v10 = vsel %vm2022_vm15, %v1813_v27, %v2278_v42  ;;  %v3045_v19 = vmul.f32 %v2789_v32, %v2533_v7  ;;  %v1818_v2 = vpop.f32.mrb[161].mxu1  ;;  %v10433_v55 = vld [vmem:[#allocation11 + $0x7c4] ss:$16 sps:$4 sm:$0xff]   ;;  %v10392_v50 = vld [vmem:[#allocation11 + $0x4c8] ss:$16 sps:$4 sm:$0xff]  }
 0x3aa   : > { %6029 = vmatprep.subr.bf16.mxu1 %v10388_v45  ;;  %5465 = vmatpush1.bf16.msra.mxu0 %v10422_v41  ;;  %v3046_v4 = vmul.f32 %v2790_v16, %v2534_v10  ;;  %v1819_v46 = vadd.f32 %v1818_v2, %v13080_v23  ;;  %v1820_v0 = vpop.f32.mrb[162].mxu1  ;;  %v10400_v21 = vld [vmem:[#allocation11 + $0x4ec] ss:$16 sps:$4 sm:$0xff]   ;;  %vm2029_vm0 = vcmp.gt.f32.partialorder %v1817_v3, 0.0  ;;  %v2285_v45 = vmul.f32 0.2, %v1817_v3 }
 0x3ab   : > { %5466 = vmatprep.subr.bf16.mxu0 %v10427_v26  ;;  %v13604_v27 = vpack.c.bf16 %v3045_v19, %v3037_v15  ;;  %v1821_v41 = vadd.f32 %v1820_v0, %v13073_v1  ;;  %v1822_v25 = vpop.f32.mrb[163].mxu1  ;;  %v10431_v61 = vld [vmem:[#allocation11 + $0x7c0] ss:$16 sps:$4 sm:$0xff]   ;;  %v10436_v42 = vld [vmem:[#allocation11 + $0x7e4] ss:$16 sps:$4 sm:$0xff]   ;;  %v14866_v15 = vld [vmem:[#allocation113_spill] sm:$0xff] }
 0x3ac   : > { %v13607_v26 = vpack.c.bf16 %v3046_v4, %v3038_v51  ;;  %vm2030_vm1 = vcmp.gt.f32.partialorder %v1819_v46, 0.0  ;;  %v2286_v32 = vmul.f32 0.2, %v1819_v46  ;;  %v1823_v33 = vadd.f32 %v1822_v25, %v13080_v23  ;;  %v14865_v7 = vld [vmem:[#allocation110_spill] sm:$0xff]  ;;  %v2798_v19 = vld [vmem:[%s11651_s22 + $0x438] sm:$0xff] }
 0x3ad   : > { %6030 = vmatpush1.bf16.msra.mxu1 %v10386_v31  ;;  %v2541_v38 = vsel %vm2029_vm0, %v1817_v3, %v2285_v45  ;;  %vm2037_vm2 = vcmp.gt.f32.partialorder %v1821_v41, 0.0  ;;  %v2293_v16 = vmul.f32 0.2, %v1821_v41  ;;  %v2797_v10 = vld [vmem:[%s11651_s22 + $0x430] sm:$0xff] }
 0x3ae   : > { %6031 = vmatprep.subr.bf16.mxu1 %v10394_v49  ;;  %5467 = vmatpush1.bf16.msra.mxu0 %v10425_v18  ;;  %v2805_v31 = vld [vmem:[%s11651_s22 + $0x470] sm:$0xff]  ;;  %v2542_v34 = vsel %vm2030_vm1, %v1819_v46, %v2286_v32  ;;  %vm2038_vm3 = vcmp.gt.f32.partialorder %v1823_v33, 0.0  ;;  %v2294_v4 = vmul.f32 0.2, %v1823_v33  ;;  %v2806_v49 = vld [vmem:[%s11651_s22 + $0x478] sm:$0xff]  ;;  %v1826_v51 = vpop.f32.mrb[164].mxu1  ;;  %v3053_v46 = vmul.f32 %v2797_v10, %v2541_v38 }
 0x3af   : > { %5889 = vmatmul.mubr.bf16.gmra.mrb[204].mxu1 %v14865_v7  ;;  %5468 = vmatprep.subr.bf16.mxu0 %v10433_v55  ;;  %v2549_v2 = vsel %vm2037_vm2, %v1821_v41, %v2293_v16  ;;  %v10398_v18 = vld [vmem:[#allocation11 + $0x4e8] ss:$16 sps:$4 sm:$0xff]   ;;  %v10406_v55 = vld [vmem:[#allocation11 + $0x50c] ss:$16 sps:$4 sm:$0xff]   ;;  %v10434_v0 = vld [vmem:[#allocation11 + $0x7e0] ss:$16 sps:$4 sm:$0xff]   ;;  %v1827_v25 = vadd.f32 %v1826_v51, %v13073_v1  ;;  %v3054_v7 = vmul.f32 %v2798_v19, %v2542_v34 }
 0x3b0   : > { %5350 = vmatmul.mubr.bf16.gmra.mrb[92].mxu0 %v13264_v62  ;;  %5898 = vmatprep.mubr.bf16.mxu1 %v14866_v15  ;;  %v2550_v3 = vsel %vm2038_vm3, %v1823_v33, %v2294_v4  ;;  %v3061_v45 = vmul.f32 %v2805_v31, %v2549_v2  ;;  %v1828_v32 = vpop.f32.mrb[165].mxu1  ;;  %v10404_v33 = vld [vmem:[#allocation11 + $0x508] ss:$16 sps:$4 sm:$0xff]   ;;  %v10412_v31 = vld [vmem:[#allocation11 + $0x52c] ss:$16 sps:$4 sm:$0xff]   ;;  %v14867_v19 = vld [vmem:[#allocation112_spill] sm:$0xff] }
 0x3b1   : > { %5359 = vmatprep.mubr.bf16.mxu0 %v13274_v52  ;;  %6032 = vmatpush1.bf16.msra.mxu1 %v10392_v50  ;;  %v3062_v15 = vmul.f32 %v2806_v49, %v2550_v3  ;;  %v1829_v41 = vadd.f32 %v1828_v32, %v13080_v23  ;;  %v1830_v16 = vpop.f32.mrb[166].mxu1  ;;  %vm2045_vm4 = vcmp.gt.f32.partialorder %v1827_v25, 0.0  ;;  %v2301_v50 = vmul.f32 0.2, %v1827_v25  ;;  %v2813_v49 = vld [vmem:[%s11651_s22 + $0x4b0] sm:$0xff] }
 0x3b2   : > { %6033 = vmatprep.subr.bf16.mxu1 %v10400_v21  ;;  %5469 = vmatpush1.bf16.msra.mxu0 %v10431_v61  ;;  %v13620_v52 = vpack.c.bf16 %v3061_v45, %v3053_v46  ;;  %v1831_v21 = vadd.f32 %v1830_v16, %v13073_v1  ;;  %v1832_v61 = vpop.f32.mrb[167].mxu1  ;;  %v2821_v2 = vld [vmem:[%s11651_s22 + $0x4f0] sm:$0xff]  ;;  %v2814_v46 = vld [vmem:[%s11651_s22 + $0x4b8] sm:$0xff] }
 0x3b3   : > { %5470 = vmatprep.subr.bf16.mxu0 %v10436_v42  ;;  %v13623_v38 = vpack.c.bf16 %v3062_v15, %v3054_v7  ;;  %vm2046_vm5 = vcmp.gt.f32.partialorder %v1829_v41, 0.0  ;;  %v2302_v42 = vmul.f32 0.2, %v1829_v41  ;;  %v1833_v10 = vadd.f32 %v1832_v61, %v13080_v23  ;;  %v14868_v51 = vld [vmem:[#allocation42_spill] sm:$0xff]  ;;  %v2822_v45 = vld [vmem:[%s11651_s22 + $0x4f8] sm:$0xff] }
 0x3b4   : > { %v2557_v34 = vsel %vm2045_vm4, %v1827_v25, %v2301_v50  ;;  %vm2053_vm6 = vcmp.gt.f32.partialorder %v1831_v21, 0.0  ;;  %v2309_v4 = vmul.f32 0.2, %v1831_v21  ;;  %v10421_v7 = vld [vmem:[#allocation11 + $0x54c] ss:$16 sps:$4 sm:$0xff]  }
 0x3b5   : > { %6034 = vmatpush1.bf16.msra.mxu1 %v10398_v18  ;;  %v2558_v18 = vsel %vm2046_vm5, %v1829_v41, %v2302_v42  ;;  %vm2054_vm7 = vcmp.gt.f32.partialorder %v1833_v10, 0.0  ;;  %v2310_v3 = vmul.f32 0.2, %v1833_v10  ;;  %v3069_v15 = vmul.f32 %v2813_v49, %v2557_v34 }
 0x3b6   : > { %6035 = vmatprep.subr.bf16.mxu1 %v10406_v55  ;;  %5471 = vmatpush1.bf16.msra.mxu0 %v10434_v0  ;;  %v2565_v32 = vsel %vm2053_vm6, %v1831_v21, %v2309_v4  ;;  %v10410_v55 = vld [vmem:[#allocation11 + $0x528] ss:$16 sps:$4 sm:$0xff]   ;;  %v1836_v25 = vpop.f32.mrb[168].mxu1  ;;  %v3070_v61 = vmul.f32 %v2814_v46, %v2558_v18  ;;  %v14869_v46 = vld [vmem:[#allocation40_spill] sm:$0xff] }
 0x3b7   : > { %5899 = vmatmul.mubr.bf16.gmra.mrb[208].mxu1 %v14867_v19  ;;  %v2566_v0 = vsel %vm2054_vm7, %v1833_v10, %v2310_v3  ;;  %v3077_v16 = vmul.f32 %v2821_v2, %v2565_v32  ;;  %v1837_v41 = vadd.f32 %v1836_v25, %v13073_v1  ;;  %v1838_v50 = vpop.f32.mrb[169].mxu1  ;;  %v10430_v2 = vld [vmem:[#allocation11 + $0x56c] ss:$16 sps:$4 sm:$0xff]   ;;  %v2837_v32 = vld [vmem:[%s11651_s22 + $0x570] sm:$0xff]  ;;  %v14870_v25 = vld [vmem:[#allocation44_spill] sm:$0xff] }
 0x3b8   : > { %5360 = vmatmul.mubr.bf16.gmra.mrb[96].mxu0 %v13293_v8  ;;  %5908 = vmatprep.mubr.bf16.mxu1 %v14868_v51  ;;  %v3078_v42 = vmul.f32 %v2822_v45, %v2566_v0  ;;  %v1839_v19 = vadd.f32 %v1838_v50, %v13080_v23  ;;  %v1840_v51 = vpop.f32.mrb[170].mxu1  ;;  %v2829_v45 = vld [vmem:[%s11651_s22 + $0x530] sm:$0xff] }
 0x3b9   : > { %5369 = vmatprep.mubr.bf16.mxu0 %v13326_v39  ;;  %6036 = vmatpush1.bf16.msra.mxu1 %v10404_v33  ;;  %v13636_v8 = vpack.c.bf16 %v3077_v16, %v3069_v15  ;;  %vm2061_vm8 = vcmp.gt.f32.partialorder %v1837_v41, 0.0  ;;  %v2317_v21 = vmul.f32 0.2, %v1837_v41  ;;  %v1841_v33 = vadd.f32 %v1840_v51, %v13073_v1  ;;  %v1842_v10 = vpop.f32.mrb[171].mxu1  ;;  %v2830_v15 = vld [vmem:[%s11651_s22 + $0x538] sm:$0xff] }
 0x3ba   : > { %6037 = vmatprep.subr.bf16.mxu1 %v10412_v31  ;;  %v10419_v31 = vld [vmem:[#allocation11 + $0x548] ss:$16 sps:$4 sm:$0xff]   ;;  %v13639_v34 = vpack.c.bf16 %v3078_v42, %v3070_v61  ;;  %vm2062_vm9 = vcmp.gt.f32.partialorder %v1839_v19, 0.0  ;;  %v2318_v4 = vmul.f32 0.2, %v1839_v19  ;;  %v1843_v49 = vadd.f32 %v1842_v10, %v13080_v23 }
 0x3bb   : > { %v2573_v18 = vsel %vm2061_vm8, %v1837_v41, %v2317_v21  ;;  %vm2069_vm10 = vcmp.gt.f32.partialorder %v1841_v33, 0.0  ;;  %v2325_v3 = vmul.f32 0.2, %v1841_v33  ;;  %v2838_v16 = vld [vmem:[%s11651_s22 + $0x578] sm:$0xff] }
 0x3bc   : > { %v2574_v0 = vsel %vm2062_vm9, %v1839_v19, %v2318_v4  ;;  %vm2070_vm11 = vcmp.gt.f32.partialorder %v1843_v49, 0.0  ;;  %v10439_v42 = vld [vmem:[#allocation11 + $0x58c] ss:$16 sps:$4 sm:$0xff]   ;;  %v3085_v51 = vmul.f32 %v2829_v45, %v2573_v18 }
 0x3bd   : > { %6038 = vmatpush1.bf16.msra.mxu1 %v10410_v55  ;;  %v2326_v55 = vmul.f32 0.2, %v1843_v49  ;;  %v2581_v50 = vsel %vm2069_vm10, %v1841_v33, %v2325_v3  ;;  %v3086_v4 = vmul.f32 %v2830_v15, %v2574_v0  ;;  %v14871_v15 = vld [vmem:[#allocation41_spill] sm:$0xff] }
 0x3be   : > { %6039 = vmatprep.subr.bf16.mxu1 %v10421_v7  ;;  %v10428_v7 = vld [vmem:[#allocation11 + $0x568] ss:$16 sps:$4 sm:$0xff]   ;;  %v1846_v61 = vpop.f32.mrb[172].mxu1  ;;  %v3093_v21 = vmul.f32 %v2837_v32, %v2581_v50  ;;  %v10442_v32 = vld [vmem:[#allocation11 + $0x5ac] ss:$16 sps:$4 sm:$0xff]  }
 0x3bf   : > { %5909 = vmatmul.mubr.bf16.gmra.mrb[212].mxu1 %v14869_v46  ;;  %v2582_v41 = vsel %vm2070_vm11, %v1843_v49, %v2326_v55  ;;  %v1847_v19 = vadd.f32 %v1846_v61, %v13073_v1  ;;  %v1848_v10 = vpop.f32.mrb[173].mxu1  ;;  %v2846_v61 = vld [vmem:[%s11651_s22 + $0x5b8] sm:$0xff] }
 0x3c0   : > { %5370 = vmatmul.mubr.bf16.gmra.mrb[100].mxu0 %v13341_v58  ;;  %5918 = vmatprep.mubr.bf16.mxu1 %v14870_v25  ;;  %v3094_v46 = vmul.f32 %v2838_v16, %v2582_v41  ;;  %v1849_v25 = vadd.f32 %v1848_v10, %v13080_v23  ;;  %v1850_v58 = vpop.f32.mrb[174].mxu1  ;;  %v13652_v39 = vpack.c.bf16 %v3093_v21, %v3085_v51  ;;  %v2845_v16 = vld [vmem:[%s11651_s22 + $0x5b0] sm:$0xff]  ;;  %v14872_v41 = vld [vmem:[#allocation47_spill] sm:$0xff] }
 0x3c1   : > { %5379 = vmatprep.mubr.bf16.mxu0 %v13349_v20  ;;  %6040 = vmatpush1.bf16.msra.mxu1 %v10419_v31  ;;  %vm2077_vm12 = vcmp.gt.f32.partialorder %v1847_v19, 0.0  ;;  %v2333_v33 = vmul.f32 0.2, %v1847_v19  ;;  %v1851_v31 = vadd.f32 %v1850_v58, %v13073_v1  ;;  %v1852_v49 = vpop.f32.mrb[175].mxu1  ;;  %v2853_v58 = vld [vmem:[%s11651_s22 + $0x5f0] sm:$0xff]  ;;  %v2854_v51 = vld [vmem:[%s11651_s22 + $0x5f8] sm:$0xff] }
 0x3c2   : > { %6041 = vmatprep.subr.bf16.mxu1 %v10430_v2  ;;  %v10437_v2 = vld [vmem:[#allocation11 + $0x588] ss:$16 sps:$4 sm:$0xff]   ;;  %v13655_v18 = vpack.c.bf16 %v3094_v46, %v3086_v4  ;;  %vm2078_vm13 = vcmp.gt.f32.partialorder %v1849_v25, 0.0  ;;  %v2334_v3 = vmul.f32 0.2, %v1849_v25  ;;  %v1853_v45 = vadd.f32 %v1852_v49, %v13080_v23 }
 0x3c3   : > { %v2589_v0 = vsel %vm2077_vm12, %v1847_v19, %v2333_v33  ;;  %vm2085_vm14 = vcmp.gt.f32.partialorder %v1851_v31, 0.0  ;;  %v2341_v55 = vmul.f32 0.2, %v1851_v31  ;;  %v10445_v4 = vld [vmem:[#allocation11 + $0x5cc] ss:$16 sps:$4 sm:$0xff]  }
 0x3c4   : > { %v2590_v50 = vsel %vm2078_vm13, %v1849_v25, %v2334_v3  ;;  %vm2086_vm15 = vcmp.gt.f32.partialorder %v1853_v45, 0.0  ;;  %v3101_v46 = vmul.f32 %v2845_v16, %v2589_v0 }
 0x3c5   : > { %6042 = vmatpush1.bf16.msra.mxu1 %v10428_v7  ;;  %v2342_v7 = vmul.f32 0.2, %v1853_v45  ;;  %v2597_v21 = vsel %vm2085_vm14, %v1851_v31, %v2341_v55  ;;  %v3102_v3 = vmul.f32 %v2846_v61, %v2590_v50  ;;  %v14873_v61 = vld [vmem:[#allocation43_spill] sm:$0xff] }
 0x3c6   : > { %6043 = vmatprep.subr.bf16.mxu1 %v10439_v42  ;;  %v10440_v42 = vld [vmem:[#allocation11 + $0x5a8] ss:$16 sps:$4 sm:$0xff]   ;;  %v1856_v10 = vpop.f32.mrb[176].mxu1  ;;  %v3109_v33 = vmul.f32 %v2853_v58, %v2597_v21  ;;  %v10448_v58 = vld [vmem:[#allocation11 + $0x5ec] ss:$16 sps:$4 sm:$0xff]  }
 0x3c7   : > { %5919 = vmatmul.mubr.bf16.gmra.mrb[216].mxu1 %v14871_v15  ;;  %v2598_v19 = vsel %vm2086_vm15, %v1853_v45, %v2342_v7  ;;  %v1857_v25 = vadd.f32 %v1856_v10, %v13073_v1  ;;  %v1858_v49 = vpop.f32.mrb[177].mxu1  ;;  %v2862_v10 = vld [vmem:[%s11651_s22 + $0x638] sm:$0xff] }
 0x3c8   : > { %5380 = vmatmul.mubr.bf16.gmra.mrb[104].mxu0 %v13351_v43  ;;  %5928 = vmatprep.mubr.bf16.mxu1 %v14872_v41  ;;  %v3110_v15 = vmul.f32 %v2854_v51, %v2598_v19  ;;  %v1859_v41 = vadd.f32 %v1858_v49, %v13080_v23  ;;  %v1860_v43 = vpop.f32.mrb[178].mxu1  ;;  %v13668_v20 = vpack.c.bf16 %v3109_v33, %v3101_v46  ;;  %v2861_v51 = vld [vmem:[%s11651_s22 + $0x630] sm:$0xff]  ;;  %v2870_v46 = vld [vmem:[%s11651_s22 + $0x678] sm:$0xff] }
 0x3c9   : > { %5389 = vmatprep.mubr.bf16.mxu0 %v13358_v17  ;;  %6044 = vmatpush1.bf16.msra.mxu1 %v10437_v2  ;;  %vm2093_vm0 = vcmp.gt.f32.partialorder %v1857_v25, 0.0  ;;  %v2349_v31 = vmul.f32 0.2, %v1857_v25  ;;  %v1861_v2 = vadd.f32 %v1860_v43, %v13073_v1  ;;  %v1862_v45 = vpop.f32.mrb[179].mxu1  ;;  %v2869_v43 = vld [vmem:[%s11651_s22 + $0x670] sm:$0xff] }
 0x3ca   : > { %6045 = vmatprep.subr.bf16.mxu1 %v10442_v32  ;;  %v10443_v32 = vld [vmem:[#allocation11 + $0x5c8] ss:$16 sps:$4 sm:$0xff]   ;;  %v13671_v0 = vpack.c.bf16 %v3110_v15, %v3102_v3  ;;  %vm2094_vm1 = vcmp.gt.f32.partialorder %v1859_v41, 0.0  ;;  %v2350_v55 = vmul.f32 0.2, %v1859_v41  ;;  %v1863_v16 = vadd.f32 %v1862_v45, %v13080_v23  ;;  %v14874_v19 = vld [vmem:[#allocation114_spill] sm:$0xff] }
 0x3cb   : > { %v2605_v50 = vsel %vm2093_vm0, %v1857_v25, %v2349_v31  ;;  %vm2101_vm2 = vcmp.gt.f32.partialorder %v1861_v2, 0.0  ;;  %v2357_v7 = vmul.f32 0.2, %v1861_v2  ;;  %v10451_v3 = vld [vmem:[#allocation11 + $0x60c] ss:$16 sps:$4 sm:$0xff]  }
 0x3cc   : > { %v2606_v21 = vsel %vm2094_vm1, %v1859_v41, %v2350_v55  ;;  %vm2102_vm3 = vcmp.gt.f32.partialorder %v1863_v16, 0.0  ;;  %v3117_v15 = vmul.f32 %v2861_v51, %v2605_v50 }
 0x3cd   : > { %6046 = vmatpush1.bf16.msra.mxu1 %v10440_v42  ;;  %v2358_v42 = vmul.f32 0.2, %v1863_v16  ;;  %v2613_v33 = vsel %vm2101_vm2, %v1861_v2, %v2357_v7  ;;  %v3118_v55 = vmul.f32 %v2862_v10, %v2606_v21  ;;  %v2877_v10 = vld [vmem:[%s11651_s22 + $0x6b0] sm:$0xff] }
 0x3ce   : > { %6047 = vmatprep.subr.bf16.mxu1 %v10445_v4  ;;  %v10446_v4 = vld [vmem:[#allocation11 + $0x5e8] ss:$16 sps:$4 sm:$0xff]   ;;  %v1866_v49 = vpop.f32.mrb[180].mxu1  ;;  %v3125_v31 = vmul.f32 %v2869_v43, %v2613_v33 }
 0x3cf   : > { %5929 = vmatmul.mubr.bf16.gmra.mrb[220].mxu1 %v14873_v61  ;;  %v2614_v25 = vsel %vm2102_vm3, %v1863_v16, %v2358_v42  ;;  %v1867_v41 = vadd.f32 %v1866_v49, %v13073_v1  ;;  %v1868_v45 = vpop.f32.mrb[181].mxu1  ;;  %v14875_v42 = vld [vmem:[#allocation52_spill] sm:$0xff]  ;;  %v2886_v49 = vld [vmem:[%s11651_s22 + $0x6f8] sm:$0xff] }
 0x3d0   : > { %5390 = vmatmul.mubr.bf16.gmra.mrb[108].mxu0 %v13399_v56  ;;  %5938 = vmatprep.mubr.bf16.mxu1 %v14874_v19  ;;  %v3126_v61 = vmul.f32 %v2870_v46, %v2614_v25  ;;  %v1869_v19 = vadd.f32 %v1868_v45, %v13080_v23  ;;  %v1870_v56 = vpop.f32.mrb[182].mxu1  ;;  %v13684_v2 = vpack.c.bf16 %v3125_v31, %v3117_v15  ;;  %v2885_v46 = vld [vmem:[%s11651_s22 + $0x6f0] sm:$0xff]  ;;  %v2878_v25 = vld [vmem:[%s11651_s22 + $0x6b8] sm:$0xff] }
 0x3d1   : > { %5399 = vmatprep.mubr.bf16.mxu0 %v13414_v59  ;;  %6048 = vmatpush1.bf16.msra.mxu1 %v10443_v32  ;;  %vm2109_vm4 = vcmp.gt.f32.partialorder %v1867_v41, 0.0  ;;  %v2365_v32 = vmul.f32 0.2, %v1867_v41  ;;  %v1871_v16 = vadd.f32 %v1870_v56, %v13073_v1 }
 0x3d2   : > { %6049 = vmatprep.subr.bf16.mxu1 %v10448_v58  ;;  %v1872_v58 = vpop.f32.mrb[183].mxu1  ;;  %v13687_v50 = vpack.c.bf16 %v3126_v61, %v3118_v55  ;;  %vm2110_vm5 = vcmp.gt.f32.partialorder %v1869_v19, 0.0  ;;  %v2366_v7 = vmul.f32 0.2, %v1869_v19 }
 0x3d3   : > { %v1873_v51 = vadd.f32 %v1872_v58, %v13080_v23  ;;  %v2621_v43 = vsel %vm2109_vm4, %v1867_v41, %v2365_v32  ;;  %vm2117_vm6 = vcmp.gt.f32.partialorder %v1871_v16, 0.0  ;;  %v2373_v21 = vmul.f32 0.2, %v1871_v16 }
 0x3d4   : > { %v2622_v33 = vsel %vm2110_vm5, %v1869_v19, %v2366_v7  ;;  %v3133_v41 = vmul.f32 %v2877_v10, %v2621_v43 }
 0x3d5   : > { %6050 = vmatpush1.bf16.msra.mxu1 %v10446_v4  ;;  %vm2118_vm7 = vcmp.gt.f32.partialorder %v1873_v51, 0.0  ;;  %v2374_v56 = vmul.f32 0.2, %v1873_v51  ;;  %v14876_v4 = vld [vmem:[#allocation115_spill] sm:$0xff]  ;;  %v2629_v15 = vsel %vm2117_vm6, %v1871_v16, %v2373_v21  ;;  %v3134_v32 = vmul.f32 %v2878_v25, %v2622_v33  ;;  %v2893_v25 = vld [vmem:[%s11651_s22 + $0x730] sm:$0xff] }
 0x3d6   : > { %6212 = vmatprep.subr.bf16.mxu1 %v10451_v3  ;;  %v1876_v31 = vpop.f32.mrb[184].mxu1  ;;  %v3141_v45 = vmul.f32 %v2885_v46, %v2629_v15 }
 0x3d7   : > { %5939 = vmatmul.mubr.bf16.gmra.mrb[224].mxu1 %v14875_v42  ;;  %v2630_v3 = vsel %vm2118_vm7, %v1873_v51, %v2374_v56  ;;  %v1877_v55 = vadd.f32 %v1876_v31, %v13073_v1  ;;  %v1878_v61 = vpop.f32.mrb[185].mxu1  ;;  %v14878_v31 = vld [vmem:[#allocation118_spill] sm:$0xff] }
 0x3d8   : > { %5400 = vmatmul.mubr.bf16.gmra.mrb[112].mxu0 %v13420_v53  ;;  %5948 = vmatprep.mubr.bf16.mxu1 %v14876_v4  ;;  %v3142_v19 = vmul.f32 %v2886_v49, %v2630_v3  ;;  %v1879_v58 = vadd.f32 %v1878_v61, %v13080_v23  ;;  %v1880_v7 = vpop.f32.mrb[186].mxu1  ;;  %v13700_v42 = vpack.c.bf16 %v3141_v45, %v3133_v41  ;;  %v14877_v4 = vld [vmem:[#allocation57_spill] sm:$0xff]  ;;  %v2901_v49 = vld [vmem:[%s11651_s22 + $0x770] sm:$0xff]  ;;  %v2894_v41 = vld [vmem:[%s11651_s22 + $0x738] sm:$0xff] }
 0x3d9   : > { %5409 = vmatprep.mubr.bf16.mxu0 %v13422_v29  ;;  %vm2125_vm8 = vcmp.gt.f32.partialorder %v1877_v55, 0.0  ;;  %v2381_v16 = vmul.f32 0.2, %v1877_v55  ;;  %v1881_v21 = vadd.f32 %v1880_v7, %v13073_v1  ;;  %v1882_v51 = vpop.f32.mrb[187].mxu1  ;;  %v2902_v45 = vld [vmem:[%s11651_s22 + $0x778] sm:$0xff] }
 0x3da   : > { %v13703_v43 = vpack.c.bf16 %v3142_v19, %v3134_v32  ;;  %vm2126_vm9 = vcmp.gt.f32.partialorder %v1879_v58, 0.0  ;;  %v2382_v10 = vmul.f32 0.2, %v1879_v58  ;;  %v1883_v46 = vadd.f32 %v1882_v51, %v13080_v23 }
 0x3db   : > { %v2637_v33 = vsel %vm2125_vm8, %v1877_v55, %v2381_v16  ;;  %vm2133_vm10 = vcmp.gt.f32.partialorder %v1881_v21, 0.0  ;;  %v2389_v56 = vmul.f32 0.2, %v1881_v21 }
 0x3dc   : > { %v2638_v15 = vsel %vm2126_vm9, %v1879_v58, %v2382_v10  ;;  %vm2134_vm11 = vcmp.gt.f32.partialorder %v1883_v46, 0.0  ;;  %v2390_v3 = vmul.f32 0.2, %v1883_v46  ;;  %v3149_v19 = vmul.f32 %v2893_v25, %v2637_v33 }
 0x3dd   : > { %v2645_v61 = vsel %vm2133_vm10, %v1881_v21, %v2389_v56 }
 0x3de   : > { %v2646_v32 = vsel %vm2134_vm11, %v1883_v46, %v2390_v3  ;;  %v1886_v55 = vpop.f32.mrb[188].mxu1  ;;  %v3157_v7 = vmul.f32 %v2901_v49, %v2645_v61  ;;  %v2917_v61 = vld [vmem:[%s11651_s22 + $0x7f0] sm:$0xff] }
 0x3df   : > { %5949 = vmatmul.mubr.bf16.gmra.mrb[228].mxu1 %v14877_v4  ;;  %v1887_v16 = vadd.f32 %v1886_v55, %v13073_v1  ;;  %v1888_v51 = vpop.f32.mrb[189].mxu1  ;;  %v3150_v4 = vmul.f32 %v2894_v41, %v2638_v15  ;;  %v3158_v58 = vmul.f32 %v2902_v45, %v2646_v32  ;;  %v14879_v41 = vld [vmem:[#allocation117_spill] sm:$0xff]  ;;  %v2909_v45 = vld [vmem:[%s11651_s22 + $0x7b0] sm:$0xff] }
 0x3e0   : > { %5410 = vmatmul.mubr.bf16.gmra.mrb[116].mxu0 %v13429_v24  ;;  %5958 = vmatprep.mubr.bf16.mxu1 %v14878_v31  ;;  %v1889_v10 = vadd.f32 %v1888_v51, %v13080_v23  ;;  %v1890_v24 = vpop.f32.mrb[190].mxu1  ;;  %v13716_v31 = vpack.c.bf16 %v3157_v7, %v3149_v19  ;;  %v2918_v19 = vld [vmem:[%s11651_s22 + $0x7f8] sm:$0xff] }
 0x3e1   : > { %5419 = vmatprep.mubr.bf16.mxu0 %v13464_v47  ;;  %vm2141_vm12 = vcmp.gt.f32.partialorder %v1887_v16, 0.0  ;;  %v2397_v21 = vmul.f32 0.2, %v1887_v16  ;;  %v1891_v56 = vadd.f32 %v1890_v24, %v13073_v1  ;;  %v1892_v46 = vpop.f32.mrb[191].mxu1  ;;  %v13719_v33 = vpack.c.bf16 %v3158_v58, %v3150_v4  ;;  %v14880_v1 = vld [vmem:[#allocation120_spill] sm:$0xff]  ;;  %v2910_v24 = vld [vmem:[%s11651_s22 + $0x7b8] sm:$0xff] }
 0x3e2   : > { %vm2142_vm13 = vcmp.gt.f32.partialorder %v1889_v10, 0.0  ;;  %v2398_v25 = vmul.f32 0.2, %v1889_v10  ;;  %v1893_v49 = vadd.f32 %v1892_v46, %v13080_v23 }
 0x3e3   : > { %v2653_v15 = vsel %vm2141_vm12, %v1887_v16, %v2397_v21  ;;  %vm2149_vm14 = vcmp.gt.f32.partialorder %v1891_v56, 0.0  ;;  %v2405_v3 = vmul.f32 0.2, %v1891_v56 }
 0x3e4   : > { %v2654_v32 = vsel %vm2142_vm13, %v1889_v10, %v2398_v25  ;;  %vm2150_vm15 = vcmp.gt.f32.partialorder %v1893_v49, 0.0  ;;  %v2406_v55 = vmul.f32 0.2, %v1893_v49  ;;  %v3165_v16 = vmul.f32 %v2909_v45, %v2653_v15  ;;  %v14881_v10 = vld [vmem:[#allocation119_spill] sm:$0xff]  ;;  %v14882_v25 = vld [vmem:[#allocation53_spill] sm:$0xff]  ;;  %v14886_v45 = vld [vmem:[#allocation54_spill] sm:$0xff] }
 0x3e5   : > { %v2661_v7 = vsel %vm2149_vm14, %v1891_v56, %v2405_v3  ;;  %v3166_v4 = vmul.f32 %v2910_v24, %v2654_v32  ;;  %v14883_v56 = vld [vmem:[#allocation48_spill] sm:$0xff]  ;;  %v14884_v3 = vld [vmem:[#allocation78_spill] sm:$0xff]  ;;  %v14889_v24 = vld [vmem:[#allocation71_spill] sm:$0xff] }
 0x3e6   : > { %v2662_v23 = vsel %vm2150_vm15, %v1893_v49, %v2406_v55  ;;  %v3173_v51 = vmul.f32 %v2917_v61, %v2661_v7  ;;  %v14885_v49 = vld [vmem:[#allocation67_spill] sm:$0xff]  ;;  %v10488_v15 = vld [vmem:[#allocation15] ss:$8 sps:$4 sm:$0xff]   ;;  %v10502_v7 = vld [vmem:[#allocation15 + $0x24] ss:$8 sps:$4 sm:$0xff]  }
 0x3e7   : > { %5959 = vmatmul.mubr.bf16.gmra.mrb[232].mxu1 %v14879_v41  ;;  %v3174_v58 = vmul.f32 %v2918_v19, %v2662_v23  ;;  %v10490_v41 = vld [vmem:[#allocation15 + $0x4] ss:$8 sps:$4 sm:$0xff]   ;;  %v14887_v61 = vld [vmem:[#allocation68_spill] sm:$0xff]  ;;  %v10494_v32 = vld [vmem:[#allocation15 + $0x10] ss:$8 sps:$4 sm:$0xff]  }
 0x3e8   : > { %5420 = vmatmul.mubr.bf16.gmra.mrb[120].mxu0 %v13481_v12  ;;  %5968 = vmatprep.mubr.bf16.mxu1 %v14880_v1  ;;  %v13730_v21 = vpack.c.bf16 %v3173_v51, %v3165_v16  ;;  %v10496_v55 = vld [vmem:[#allocation15 + $0x14] ss:$8 sps:$4 sm:$0xff]   ;;  %v14888_v1 = vld [vmem:[#allocation62_spill] sm:$0xff]  ;;  %v10500_v19 = vld [vmem:[#allocation15 + $0x20] ss:$8 sps:$4 sm:$0xff]  }
 0x3e9   : > { %5429 = vmatprep.mubr.bf16.mxu0 %v13487_v35  ;;  %v13732_v46 = vpack.c.bf16 %v3174_v58, %v3166_v4  ;;  %7505 = vmatprep.subr.bf16.mxu0 %v10490_v41  ;;  %v14890_v23 = vld [vmem:[#allocation66_spill] sm:$0xff]  ;;  %v14891_v16 = vld [vmem:[#allocation64_spill] sm:$0xff]  ;;  %v10449_v58 = vld [vmem:[#allocation11 + $0x608] ss:$16 sps:$4 sm:$0xff]  }
 0x3ea   : > { %v10506_v51 = vld [vmem:[#allocation15 + $0x30] ss:$8 sps:$4 sm:$0xff]   ;;  %v10508_v4 = vld [vmem:[#allocation15 + $0x34] ss:$8 sps:$4 sm:$0xff]  }
 0x3eb   : > { %v10452_v41 = vld [vmem:[#allocation11 + $0x628] ss:$16 sps:$4 sm:$0xff]  }
 0x3ef   : > { %5969 = vmatmul.mubr.bf16.gmra.mrb[236].mxu1 %v14881_v10  ;;  %v10454_v10 = vld [vmem:[#allocation11 + $0x62c] ss:$16 sps:$4 sm:$0xff]  }
 0x3f0   : > { %5430 = vmatmul.mubr.bf16.gmra.mrb[124].mxu0 %v13489_v40  ;;  %5978 = vmatprep.mubr.bf16.mxu1 %v14882_v25  ;;  %v14892_v25 = vld [vmem:[#allocation45_spill] sm:$0xff] }
 0x3f1   : > { %5472 = vmatprep.mubr.bf16.mxu0 %v13495_v48 }
 0x3f7   : > { %5979 = vmatmul.mubr.bf16.gmra.mrb[240].mxu1 %v14883_v56  ;;  %v14893_v56 = vld [vmem:[#allocation49_spill] sm:$0xff] }
 0x3f8   : > { %5473 = vmatmul.mubr.bf16.vlgmr.msra.gmra.mrb[64].mxu0 %v14884_v3  ;;  %5988 = vmatprep.mubr.bf16.mxu1 %v14885_v49  ;;  %v10509_v49 = vld [vmem:[#allocation15 + $0x40] ss:$8 sps:$4 sm:$0xff]  }
 0x3f9   : > { %5482 = vmatprep.mubr.bf16.mxu0 %v13518_v57  ;;  %7506 = vmatpush1.bf16.msra.mxu0 %v10488_v15  ;;  %v10511_v15 = vld [vmem:[#allocation15 + $0x44] ss:$8 sps:$4 sm:$0xff]  }
 0x3fa   : > { %7507 = vmatprep.subr.bf16.mxu0 %v10496_v55  ;;  %v14894_v55 = vld [vmem:[#allocation55_spill] sm:$0xff] }
 0x3fd   : > { %7508 = vmatpush1.bf16.msra.mxu0 %v10494_v32  ;;  %v10460_v32 = vld [vmem:[#allocation11 + $0x66c] ss:$16 sps:$4 sm:$0xff]  }
 0x3fe   : > { %7509 = vmatprep.subr.bf16.mxu0 %v10502_v7  ;;  %v10458_v7 = vld [vmem:[#allocation11 + $0x668] ss:$16 sps:$4 sm:$0xff]  }
 0x3ff   : > { %5989 = vmatmul.mubr.bf16.gmra.mrb[244].mxu1 %v14886_v45  ;;  %v10457_v45 = vld [vmem:[#allocation11 + $0x64c] ss:$16 sps:$4 sm:$0xff]  }
 0x400   : > { %5483 = vmatmul.mubr.bf16.gmra.mrb[68].mxu0 %v13534_v30  ;;  %5998 = vmatprep.mubr.bf16.mxu1 %v14887_v61  ;;  %v10455_v61 = vld [vmem:[#allocation11 + $0x648] ss:$16 sps:$4 sm:$0xff]  }
 0x401   : > { %5492 = vmatprep.mubr.bf16.mxu0 %v13539_v9  ;;  %7510 = vmatpush1.bf16.msra.mxu0 %v10500_v19  ;;  %v10514_v19 = vld [vmem:[#allocation15 + $0x54] ss:$8 sps:$4 sm:$0xff]  }
 0x402   : > { %7511 = vmatprep.subr.bf16.mxu0 %v10508_v4  ;;  %v14896_v4 = vld [vmem:[#allocation59_spill] sm:$0xff] }
 0x405   : > { %7512 = vmatpush1.bf16.msra.mxu0 %v10506_v51  ;;  %v10466_v51 = vld [vmem:[#allocation11 + $0x6ac] ss:$16 sps:$4 sm:$0xff]  }
 0x406   : > { %7513 = vmatprep.subr.bf16.mxu0 %v10511_v15  ;;  %v10467_v15 = vld [vmem:[#allocation11 + $0x6c8] ss:$16 sps:$4 sm:$0xff]  }
 0x407   : > { %5999 = vmatmul.mubr.bf16.gmra.mrb[248].mxu1 %v14888_v1  ;;  %v14895_v1 = vld [vmem:[#allocation50_spill] sm:$0xff] }
 0x408   : > { %5493 = vmatmul.mubr.bf16.gmra.mrb[72].mxu0 %v13541_v5  ;;  %6008 = vmatprep.mubr.bf16.mxu1 %v14889_v24  ;;  %v10512_v24 = vld [vmem:[#allocation15 + $0x50] ss:$8 sps:$4 sm:$0xff]  }
 0x409   : > { %5502 = vmatprep.mubr.bf16.mxu0 %v13545_v22  ;;  %7514 = vmatpush1.bf16.msra.mxu0 %v10509_v49  ;;  %v10469_v49 = vld [vmem:[#allocation11 + $0x6cc] ss:$16 sps:$4 sm:$0xff]  }
 0x40a   : > { %7515 = vmatprep.subr.bf16.mxu0 %v10514_v19  ;;  %v10478_v19 = vld [vmem:[#allocation11 + $0x72c] ss:$16 sps:$4 sm:$0xff]  }
 0x40d   : > { %7516 = vmatpush1.bf16.msra.mxu0 %v10512_v24  ;;  %v10473_v24 = vld [vmem:[#allocation11 + $0x708] ss:$16 sps:$4 sm:$0xff]  }
 0x40f   : > { %6009 = vmatmul.mubr.bf16.gmra.mrb[252].mxu1 %v14890_v23  ;;  %v10463_v23 = vld [vmem:[#allocation11 + $0x68c] ss:$16 sps:$4 sm:$0xff]  }
 0x410   : > { %5503 = vmatmul.mubr.bf16.gmra.mrb[76].mxu0 %v13558_v37  ;;  %6051 = vmatprep.mubr.bf16.mxu1 %v14891_v16  ;;  %v10461_v16 = vld [vmem:[#allocation11 + $0x688] ss:$16 sps:$4 sm:$0xff]  }
 0x411   : > { %5512 = vmatprep.mubr.bf16.mxu0 %v13567_v36 }
 0x417   : > { %6052 = vmatmul.mubr.bf16.vlgmr.msra.gmra.mrb[192].mxu1 %v14892_v25  ;;  %v10517_v25 = vld [vmem:[#allocation15 + $0x64] ss:$8 sps:$4 sm:$0xff]  }
 0x418   : > { %5513 = vmatmul.mubr.bf16.gmra.mrb[80].mxu0 %v13570_v28  ;;  %6061 = vmatprep.mubr.bf16.mxu1 %v14893_v56  ;;  %v10464_v56 = vld [vmem:[#allocation11 + $0x6a8] ss:$16 sps:$4 sm:$0xff]  }
 0x419   : > { %6213 = vmatpush1.bf16.msra.mxu1 %v10449_v58  ;;  %5522 = vmatprep.mubr.bf16.mxu0 %v13573_v54  ;;  %v14897_v58 = vld [vmem:[#allocation63_spill] sm:$0xff] }
 0x41a   : > { %6214 = vmatprep.subr.bf16.mxu1 %v10454_v10  ;;  %v10515_v10 = vld [vmem:[#allocation15 + $0x60] ss:$8 sps:$4 sm:$0xff]   ;;  %7517 = vmatprep.subr.bf16.mxu0 %v10517_v25 }
 0x41b   : > { %7518 = vmatpush1.bf16.msra.mxu0 %v10515_v10  ;;  %v10479_v10 = vld [vmem:[#allocation11 + $0x748] ss:$16 sps:$4 sm:$0xff]   ;;  %v10527_v25 = vld [vmem:[#allocation15 + $0xa0] ss:$8 sps:$4 sm:$0xff]  }
 0x41d   : > { %6215 = vmatpush1.bf16.msra.mxu1 %v10452_v41  ;;  %v10472_v41 = vld [vmem:[#allocation11 + $0x6ec] ss:$16 sps:$4 sm:$0xff]  }
 0x41e   : > { %6216 = vmatprep.subr.bf16.mxu1 %v10457_v45  ;;  %v14898_v45 = vld [vmem:[#allocation58_spill] sm:$0xff] }
 0x41f   : > { %6062 = vmatmul.mubr.bf16.gmra.mrb[196].mxu1 %v14894_v55  ;;  %v10470_v55 = vld [vmem:[#allocation11 + $0x6e8] ss:$16 sps:$4 sm:$0xff]  }
 0x420   : > { %5523 = vmatmul.mubr.bf16.gmra.mrb[84].mxu0 %v13576_v60  ;;  %6071 = vmatprep.mubr.bf16.mxu1 %v14895_v1  ;;  %v10475_v1 = vld [vmem:[#allocation11 + $0x70c] ss:$16 sps:$4 sm:$0xff]  }
 0x421   : > { %5532 = vmatprep.mubr.bf16.mxu0 %v13591_v44  ;;  %6217 = vmatpush1.bf16.msra.mxu1 %v10455_v61  ;;  %v10518_v61 = vld [vmem:[#allocation15 + $0x70] ss:$8 sps:$4 sm:$0xff]  }
 0x422   : > { %6218 = vmatprep.subr.bf16.mxu1 %v10460_v32  ;;  %v10520_v32 = vld [vmem:[#allocation15 + $0x74] ss:$8 sps:$4 sm:$0xff]  }
 0x423   : > { %7519 = vmatprep.subr.bf16.mxu0 %v10520_v32  ;;  %v14900_v32 = vld [vmem:[#allocation77_spill] sm:$0xff] }
 0x424   : > { %7520 = vmatpush1.bf16.msra.mxu0 %v10518_v61  ;;  %v10493_v61 = vld [vmem:[#allocation11 + $0x7ac] ss:$16 sps:$4 sm:$0xff]  }
 0x425   : > { %6219 = vmatpush1.bf16.msra.mxu1 %v10458_v7  ;;  %v10521_v7 = vld [vmem:[#allocation15 + $0x80] ss:$8 sps:$4 sm:$0xff]  }
 0x426   : > { %6220 = vmatprep.subr.bf16.mxu1 %v10463_v23  ;;  %v10523_v23 = vld [vmem:[#allocation15 + $0x84] ss:$8 sps:$4 sm:$0xff]  }
 0x427   : > { %6072 = vmatmul.mubr.bf16.gmra.mrb[200].mxu1 %v14896_v4  ;;  %v10481_v4 = vld [vmem:[#allocation11 + $0x74c] ss:$16 sps:$4 sm:$0xff]   ;;  %7521 = vmatprep.subr.bf16.mxu0 %v10523_v23 }
 0x428   : > { %5533 = vmatmul.mubr.bf16.gmra.mrb[88].mxu0 %v13588_v14  ;;  %6081 = vmatprep.mubr.bf16.mxu1 %v14897_v58  ;;  %v10524_v58 = vld [vmem:[#allocation15 + $0x90] ss:$8 sps:$4 sm:$0xff]   ;;  %v14902_v23 = vld [vmem:[#allocation73_spill] sm:$0xff] }
 0x429   : > { %5542 = vmatprep.mubr.bf16.mxu0 %v13607_v26  ;;  %6221 = vmatpush1.bf16.msra.mxu1 %v10461_v16  ;;  %v10476_v16 = vld [vmem:[#allocation11 + $0x728] ss:$16 sps:$4 sm:$0xff]  }
 0x42a   : > { %6222 = vmatprep.subr.bf16.mxu1 %v10466_v51  ;;  %v10526_v51 = vld [vmem:[#allocation15 + $0x94] ss:$8 sps:$4 sm:$0xff]   ;;  %7522 = vmatpush1.bf16.msra.mxu0 %v10521_v7  ;;  %v10505_v7 = vld [vmem:[#allocation11 + $0x7ec] ss:$16 sps:$4 sm:$0xff]  }
 0x42b   : > { %7523 = vmatprep.subr.bf16.mxu0 %v10526_v51  ;;  %v10536_v51 = vld [vmem:[#allocation15 + $0xd0] ss:$8 sps:$4 sm:$0xff]  }
 0x42d   : > { %6223 = vmatpush1.bf16.msra.mxu1 %v10464_v56  ;;  %v10529_v56 = vld [vmem:[#allocation15 + $0xa4] ss:$8 sps:$4 sm:$0xff]  }
 0x42e   : > { %6224 = vmatprep.subr.bf16.mxu1 %v10469_v49  ;;  %7524 = vmatpush1.bf16.msra.mxu0 %v10524_v58  ;;  %v10482_v49 = vld [vmem:[#allocation11 + $0x768] ss:$16 sps:$4 sm:$0xff]  }
 0x42f   : > { %6082 = vmatmul.mubr.bf16.gmra.mrb[204].mxu1 %v14855_v63  ;;  %v14899_v63 = vld [vmem:[#allocation70_spill] sm:$0xff]  ;;  %7525 = vmatprep.subr.bf16.mxu0 %v10529_v56 }
 0x430   : > { %5543 = vmatmul.mubr.bf16.gmra.mrb[92].mxu0 %v13604_v27  ;;  %6091 = vmatprep.mubr.bf16.mxu1 %v14898_v45  ;;  %v10530_v45 = vld [vmem:[#allocation15 + $0xb0] ss:$8 sps:$4 sm:$0xff]   ;;  %v10541_v58 = vld [vmem:[#allocation15 + $0xe4] ss:$8 sps:$4 sm:$0xff]  }
 0x431   : > { %5552 = vmatprep.mubr.bf16.mxu0 %v13623_v38  ;;  %6225 = vmatpush1.bf16.msra.mxu1 %v10467_v15  ;;  %v10532_v15 = vld [vmem:[#allocation15 + $0xb4] ss:$8 sps:$4 sm:$0xff]   ;;  %v10542_v56 = vld [vmem:[#allocation15 + $0xf0] ss:$8 sps:$4 sm:$0xff]  }
 0x432   : > { %6226 = vmatprep.subr.bf16.mxu1 %v10472_v41  ;;  %v10487_v41 = vld [vmem:[#allocation11 + $0x78c] ss:$16 sps:$4 sm:$0xff]   ;;  %7526 = vmatpush1.bf16.msra.mxu0 %v10527_v25  ;;  %v10544_v25 = vld [vmem:[#allocation15 + $0xf4] ss:$8 sps:$4 sm:$0xff]  }
 0x433   : > { %7527 = vmatprep.subr.bf16.mxu0 %v10532_v15  ;;  %v14906_v15 = vld [vmem:[#allocation79_spill] sm:$0xff] }
 0x435   : > { %6227 = vmatpush1.bf16.msra.mxu1 %v10470_v55  ;;  %v10533_v55 = vld [vmem:[#allocation15 + $0xc0] ss:$8 sps:$4 sm:$0xff]  }
 0x436   : > { %6228 = vmatprep.subr.bf16.mxu1 %v10475_v1  ;;  %7528 = vmatpush1.bf16.msra.mxu0 %v10530_v45  ;;  %v10535_v1 = vld [vmem:[#allocation15 + $0xc4] ss:$8 sps:$4 sm:$0xff]  }
 0x437   : > { %6092 = vmatmul.mubr.bf16.gmra.mrb[208].mxu1 %v13183_v11  ;;  %v10484_v11 = vld [vmem:[#allocation11 + $0x76c] ss:$16 sps:$4 sm:$0xff]   ;;  %7529 = vmatprep.subr.bf16.mxu0 %v10535_v1  ;;  %v14908_v45 = vld [vmem:[#allocation82_spill] sm:$0xff] }
 0x438   : > { %5553 = vmatmul.mubr.bf16.gmra.mrb[96].mxu0 %v13620_v52  ;;  %6101 = vmatprep.mubr.bf16.mxu1 %v14899_v63  ;;  %v10497_v63 = vld [vmem:[#allocation11 + $0x7c8] ss:$16 sps:$4 sm:$0xff]  }
 0x439   : > { %5562 = vmatprep.mubr.bf16.mxu0 %v13639_v34  ;;  %6229 = vmatpush1.bf16.msra.mxu1 %v10473_v24  ;;  %v10491_v24 = vld [vmem:[#allocation11 + $0x7a8] ss:$16 sps:$4 sm:$0xff]  }
 0x43a   : > { %6230 = vmatprep.subr.bf16.mxu1 %v10478_v19  ;;  %v10499_v19 = vld [vmem:[#allocation11 + $0x7cc] ss:$16 sps:$4 sm:$0xff]   ;;  %7530 = vmatpush1.bf16.msra.mxu0 %v10533_v55 }
 0x43d   : > { %6231 = vmatpush1.bf16.msra.mxu1 %v10476_v16  ;;  %v10503_v16 = vld [vmem:[#allocation11 + $0x7e8] ss:$16 sps:$4 sm:$0xff]  }
 0x43e   : > { %6232 = vmatprep.subr.bf16.mxu1 %v10481_v4  ;;  %v10538_v4 = vld [vmem:[#allocation15 + $0xd4] ss:$8 sps:$4 sm:$0xff]  }
 0x43f   : > { %6102 = vmatmul.mubr.bf16.gmra.mrb[212].mxu1 %v13217_v6  ;;  %v10485_v6 = vld [vmem:[#allocation11 + $0x788] ss:$16 sps:$4 sm:$0xff]   ;;  %7531 = vmatprep.subr.bf16.mxu0 %v10538_v4 }
 0x440   : > { %5563 = vmatmul.mubr.bf16.gmra.mrb[100].mxu0 %v13636_v8  ;;  %6111 = vmatprep.mubr.bf16.mxu1 %v14861_v13  ;;  %v14901_v13 = vld [vmem:[#allocation74_spill] sm:$0xff] }
 0x441   : > { %5572 = vmatprep.mubr.bf16.mxu0 %v13655_v18  ;;  %6233 = vmatpush1.bf16.msra.mxu1 %v10479_v10  ;;  %v14903_v10 = vld [vmem:[#allocation75_spill] sm:$0xff] }
 0x442   : > { %6234 = vmatprep.subr.bf16.mxu1 %v10484_v11  ;;  %v14904_v11 = vld [vmem:[#allocation83_spill] sm:$0xff]  ;;  %7532 = vmatpush1.bf16.msra.mxu0 %v10536_v51 }
 0x443   : > { %7533 = vmatprep.subr.bf16.mxu0 %v10541_v58 }
 0x445   : > { %6235 = vmatpush1.bf16.msra.mxu1 %v10482_v49  ;;  %v14905_v49 = vld [vmem:[#allocation76_spill] sm:$0xff] }
 0x446   : > { %6236 = vmatprep.subr.bf16.mxu1 %v10487_v41  ;;  %v14907_v41 = vld [vmem:[#allocation81_spill] sm:$0xff] }
 0x447   : > { %6112 = vmatmul.mubr.bf16.gmra.mrb[216].mxu1 %v14900_v32 }
 0x448   : > { %5573 = vmatmul.mubr.bf16.gmra.mrb[104].mxu0 %v13652_v39  ;;  %6121 = vmatprep.mubr.bf16.mxu1 %v14901_v13 }
 0x449   : > { %5582 = vmatprep.mubr.bf16.mxu0 %v13671_v0  ;;  %6237 = vmatpush1.bf16.msra.mxu1 %v10485_v6  ;;  %v10547_v6 = vld [vmem:[#allocation15 + $0x104] ss:$8 sps:$4 sm:$0xff]  }
 0x44a   : > { %6238 = vmatprep.subr.bf16.mxu1 %v10493_v61  ;;  %v14909_v61 = vld [vmem:[#allocation87_spill] sm:$0xff] }
 0x44d   : > { %6239 = vmatpush1.bf16.msra.mxu1 %v10491_v24 }
 0x44e   : > { %6240 = vmatprep.subr.bf16.mxu1 %v10499_v19 }
 0x44f   : > { %6122 = vmatmul.mubr.bf16.gmra.mrb[220].mxu1 %v13264_v62  ;;  %v10539_v62 = vld [vmem:[#allocation15 + $0xe0] ss:$8 sps:$4 sm:$0xff]  }
 0x450   : > { %5583 = vmatmul.mubr.bf16.gmra.mrb[108].mxu0 %v13668_v20  ;;  %6131 = vmatprep.mubr.bf16.mxu1 %v14902_v23 }
 0x451   : > { %5592 = vmatprep.mubr.bf16.mxu0 %v13687_v50  ;;  %6241 = vmatpush1.bf16.msra.mxu1 %v10497_v63 }
 0x452   : > { %6242 = vmatprep.subr.bf16.mxu1 %v10505_v7  ;;  %7534 = vmatpush1.bf16.msra.mxu0 %v10539_v62 }
 0x453   : > { %7535 = vmatprep.subr.bf16.mxu0 %v10544_v25 }
 0x455   : > { %6243 = vmatpush1.bf16.msra.mxu1 %v10503_v16 }
 0x456   : > { %7536 = vmatpush1.bf16.msra.mxu0 %v10542_v56  ;;  %v10550_v56 = vld [vmem:[#allocation15 + $0x114] ss:$8 sps:$4 sm:$0xff]  }
 0x457   : > { %6132 = vmatmul.mubr.bf16.gmra.mrb[224].mxu1 %v14903_v10  ;;  %7698 = vmatprep.subr.bf16.mxu0 %v10547_v6 }
 0x458   : > { %5593 = vmatmul.mubr.bf16.gmra.mrb[112].mxu0 %v13684_v2  ;;  %6141 = vmatprep.mubr.bf16.mxu1 %v14904_v11  ;;  %v10545_v11 = vld [vmem:[#allocation15 + $0x100] ss:$8 sps:$4 sm:$0xff]  }
 0x459   : > { %5602 = vmatprep.mubr.bf16.mxu0 %v13703_v43 }
 0x45f   : > { %6142 = vmatmul.mubr.bf16.gmra.mrb[228].mxu1 %v14905_v49 }
 0x460   : > { %5603 = vmatmul.mubr.bf16.gmra.mrb[116].mxu0 %v13700_v42  ;;  %6151 = vmatprep.mubr.bf16.mxu1 %v14906_v15 }
 0x461   : > { %5612 = vmatprep.mubr.bf16.mxu0 %v13719_v33 }
 0x467   : > { %6152 = vmatmul.mubr.bf16.gmra.mrb[232].mxu1 %v14907_v41  ;;  %v6797_v41 = vld [vmem:[%s11666_s25 + $0x40] sm:$0xff] }
 0x468   : > { %5613 = vmatmul.mubr.bf16.gmra.mrb[120].mxu0 %v13716_v31  ;;  %6161 = vmatprep.mubr.bf16.mxu1 %v13358_v17  ;;  %v14910_v17 = vld [vmem:[#allocation38_spill] sm:$0xff] }
 0x469   : > { %5622 = vmatprep.mubr.bf16.mxu0 %v13732_v46 }
 0x46f   : > { %6162 = vmatmul.mubr.bf16.gmra.mrb[236].mxu1 %v14908_v45  ;;  %v6801_v45 = vld [vmem:[%s11666_s25 + $0x60] sm:$0xff] }
 0x470   : > { %5623 = vmatmul.mubr.bf16.gmra.mrb[124].mxu0 %v13730_v21  ;;  %6171 = vmatprep.mubr.bf16.mxu1 %v13414_v59 }
 0x477   : > { %6172 = vmatmul.mubr.bf16.gmra.mrb[240].mxu1 %v13420_v53  ;;  %v14911_v53 = vld [vmem:[#allocation39_spill] sm:$0xff] }
 0x478   : > { %6181 = vmatprep.mubr.bf16.mxu1 %v13422_v29 }
 0x47f   : > { %6182 = vmatmul.mubr.bf16.gmra.mrb[244].mxu1 %v14909_v61 }
 0x480   : > { %6191 = vmatprep.mubr.bf16.mxu1 %v13464_v47 }
 0x487   : > { %6192 = vmatmul.mubr.bf16.gmra.mrb[248].mxu1 %v13481_v12  ;;  %v3559_v12 = vld [vmem:[#allocation12] sm:$0xf] }
 0x488   : > { %6201 = vmatprep.mubr.bf16.mxu1 %v13487_v35  ;;  %v13824_v59 = vrot.slane %v3559_v12, %v14910_v17  ;;  %v13827_v29 = vrot.slane %v3559_v12, %v14911_v53  ;;  %v6798_v12 = vld [vmem:[%s11666_s25 + $0x48] sm:$0xff] }
 0x48f   : > { %6202 = vmatmul.mubr.bf16.gmra.mrb[252].mxu1 %v13489_v40 }
 0x490   : > { %6244 = vmatprep.mubr.bf16.mxu1 %v13495_v48 }
 0x497   : > { %6245 = vmatmul.mubr.bf16.vlgmr.msra.gmra.mrb[192].mxu1 %v14884_v3  ;;  %v6794_v3 = vld [vmem:[%s11666_s25 + $0x28] sm:$0xff] }
 0x498   : > { %6254 = vmatprep.mubr.bf16.mxu1 %v13518_v57 }
 0x49f   : > { %6255 = vmatmul.mubr.bf16.gmra.mrb[196].mxu1 %v13534_v30 }
 0x4a0   : > { %6264 = vmatprep.mubr.bf16.mxu1 %v13539_v9 }
 0x4a7   : > { %6265 = vmatmul.mubr.bf16.gmra.mrb[200].mxu1 %v13541_v5 }
 0x4a8   : > { %6274 = vmatprep.mubr.bf16.mxu1 %v13545_v22 }
 0x4af   : > { %6275 = vmatmul.mubr.bf16.gmra.mrb[204].mxu1 %v13558_v37 }
 0x4b0   : > { %6284 = vmatprep.mubr.bf16.mxu1 %v13567_v36 }
 0x4b7   : > { %6285 = vmatmul.mubr.bf16.gmra.mrb[208].mxu1 %v13570_v28  ;;  %v6789_v28 = vld [vmem:[%s11666_s25] sm:$0xff] }
 0x4b8   : > { %6294 = vmatprep.mubr.bf16.mxu1 %v13573_v54 }
 0x4bf   : > { %6295 = vmatmul.mubr.bf16.gmra.mrb[212].mxu1 %v13576_v60  ;;  %v6793_v60 = vld [vmem:[%s11666_s25 + $0x20] sm:$0xff] }
 0x4c0   : > { %6304 = vmatprep.mubr.bf16.mxu1 %v13591_v44 }
 0x4c7   : > { %6305 = vmatmul.mubr.bf16.gmra.mrb[216].mxu1 %v13588_v14 }
 0x4c8   : > { %6314 = vmatprep.mubr.bf16.mxu1 %v13607_v26  ;;  %v6790_v26 = vld [vmem:[%s11666_s25 + $0x8] sm:$0xff] }
 0x4cb   : > { %v5474_v47 = vpop.f32.mrb[64].mxu0 }
 0x4cc   : > { %v9330_v35 = vadd.f32 %v5474_v47, %v13824_v59  ;;  %v5476_v40 = vpop.f32.mrb[65].mxu0  ;;  %v6802_v47 = vld [vmem:[%s11666_s25 + $0x68] sm:$0xff] }
 0x4cd   : > { %v9331_v48 = vadd.f32 %v5476_v40, %v13827_v29  ;;  %v5478_v57 = vpop.f32.mrb[66].mxu0  ;;  %v10548_v40 = vld [vmem:[#allocation15 + $0x110] ss:$8 sps:$4 sm:$0xff]  }
 0x4ce   : > { %vm6405_vm0 = vcmp.gt.f32.partialorder %v9330_v35, 0.0  ;;  %v6533_v30 = vmul.f32 0.2, %v9330_v35  ;;  %v9332_v9 = vadd.f32 %v5478_v57, %v13824_v59  ;;  %v5480_v5 = vpop.f32.mrb[67].mxu0 }
 0x4cf   : > { %vm6406_vm1 = vcmp.gt.f32.partialorder %v9331_v48, 0.0  ;;  %v6534_v22 = vmul.f32 0.2, %v9331_v48  ;;  %v9333_v37 = vadd.f32 %v5480_v5, %v13827_v29  ;;  %6315 = vmatmul.mubr.bf16.gmra.mrb[220].mxu1 %v13604_v27 }
 0x4d0   : > { %v6661_v36 = vsel %vm6405_vm0, %v9330_v35, %v6533_v30  ;;  %vm6409_vm2 = vcmp.gt.f32.partialorder %v9332_v9, 0.0  ;;  %v6537_v54 = vmul.f32 0.2, %v9332_v9  ;;  %6324 = vmatprep.mubr.bf16.mxu1 %v13623_v38 }
 0x4d1   : > { %v6662_v14 = vsel %vm6406_vm1, %v9331_v48, %v6534_v22  ;;  %vm6410_vm3 = vcmp.gt.f32.partialorder %v9333_v37, 0.0  ;;  %v6538_v44 = vmul.f32 0.2, %v9333_v37  ;;  %v6917_v13 = vmul.f32 %v6789_v28, %v6661_v36 }
 0x4d2   : > { %v6665_v32 = vsel %vm6409_vm2, %v9332_v9, %v6537_v54  ;;  %v6918_v63 = vmul.f32 %v6790_v26, %v6662_v14  ;;  %v10553_v9 = vld [vmem:[#allocation15 + $0x124] ss:$8 sps:$4 sm:$0xff]  }
 0x4d3   : > { %v6921_v55 = vmul.f32 %v6793_v60, %v6665_v32  ;;  %v6666_v1 = vsel %vm6410_vm3, %v9333_v37, %v6538_v44  ;;  %v5484_v24 = vpop.f32.mrb[68].mxu0 }
 0x4d4   : > { %v9334_v19 = vadd.f32 %v5484_v24, %v13824_v59  ;;  %v5486_v27 = vpop.f32.mrb[69].mxu0  ;;  %v6922_v7 = vmul.f32 %v6794_v3, %v6666_v1  ;;  %v10551_v3 = vld [vmem:[#allocation15 + $0x120] ss:$8 sps:$4 sm:$0xff]  }
 0x4d5   : > { %v7045_v23 = vpack.c.bf16 %v6921_v55, %v6917_v13  ;;  %v9335_v16 = vadd.f32 %v5486_v27, %v13827_v29  ;;  %v5488_v51 = vpop.f32.mrb[70].mxu0  ;;  %v10556_v55 = vld [vmem:[#allocation15 + $0x134] ss:$8 sps:$4 sm:$0xff]   ;;  %v6809_v27 = vld [vmem:[%s11666_s25 + $0xa0] sm:$0xff] }
 0x4d6   : > { %vm6413_vm4 = vcmp.gt.f32.partialorder %v9334_v19, 0.0  ;;  %v6541_v38 = vmul.f32 0.2, %v9334_v19  ;;  %v9336_v4 = vadd.f32 %v5488_v51, %v13824_v59  ;;  %v5490_v58 = vpop.f32.mrb[71].mxu0  ;;  %v7046_v10 = vpack.c.bf16 %v6922_v7, %v6918_v63 }
 0x4d7   : > { %vm6414_vm5 = vcmp.gt.f32.partialorder %v9335_v16, 0.0  ;;  %v6542_v62 = vmul.f32 0.2, %v9335_v16  ;;  %v9337_v25 = vadd.f32 %v5490_v58, %v13827_v29  ;;  %6325 = vmatmul.mubr.bf16.gmra.mrb[224].mxu1 %v13620_v52 }
 0x4d8   : > { %v6669_v49 = vsel %vm6413_vm4, %v9334_v19, %v6541_v38  ;;  %vm6417_vm6 = vcmp.gt.f32.partialorder %v9336_v4, 0.0  ;;  %v6545_v15 = vmul.f32 0.2, %v9336_v4  ;;  %6334 = vmatprep.mubr.bf16.mxu1 %v13639_v34  ;;  %7537 = vmatprep.mubr.bf16.mxu0 %v7046_v10  ;;  %v6805_v19 = vld [vmem:[%s11666_s25 + $0x80] sm:$0xff]  ;;  %v10554_v38 = vld [vmem:[#allocation15 + $0x130] ss:$8 sps:$4 sm:$0xff]  }
 0x4d9   : > { %v6670_v6 = vsel %vm6414_vm5, %v9335_v16, %v6542_v62  ;;  %vm6418_vm7 = vcmp.gt.f32.partialorder %v9337_v25, 0.0  ;;  %v6546_v61 = vmul.f32 0.2, %v9337_v25  ;;  %7538 = vmatmul.mubr.bf16.vlgmr.msra.gmra.mrb[128].mxu0 %v7045_v23  ;;  %v6925_v57 = vmul.f32 %v6797_v41, %v6669_v49  ;;  %v6806_v23 = vld [vmem:[%s11666_s25 + $0x88] sm:$0xff] }
 0x4da   : > { %v6673_v35 = vsel %vm6417_vm6, %v9336_v4, %v6545_v15  ;;  %7699 = vmatpush1.bf16.msra.mxu0 %v10545_v11  ;;  %v6926_v22 = vmul.f32 %v6798_v12, %v6670_v6  ;;  %v6810_v16 = vld [vmem:[%s11666_s25 + $0xa8] sm:$0xff] }
 0x4db   : > { %v6674_v48 = vsel %vm6418_vm7, %v9337_v25, %v6546_v61  ;;  %v5494_v52 = vpop.f32.mrb[72].mxu0  ;;  %v6929_v30 = vmul.f32 %v6801_v45, %v6673_v35  ;;  %7700 = vmatprep.subr.bf16.mxu0 %v10550_v56  ;;  %v10559_v11 = vld [vmem:[#allocation15 + $0x144] ss:$8 sps:$4 sm:$0xff]  }
 0x4dc   : > { %v9338_v34 = vadd.f32 %v5494_v52, %v13824_v59  ;;  %v5496_v5 = vpop.f32.mrb[73].mxu0  ;;  %v6930_v37 = vmul.f32 %v6802_v47, %v6674_v48  ;;  %v10557_v47 = vld [vmem:[#allocation15 + $0x140] ss:$8 sps:$4 sm:$0xff]   ;;  %v10562_v48 = vld [vmem:[#allocation15 + $0x154] ss:$8 sps:$4 sm:$0xff]  }
 0x4dd   : > { %v9339_v36 = vadd.f32 %v5496_v5, %v13827_v29  ;;  %v5498_v28 = vpop.f32.mrb[74].mxu0  ;;  %v7049_v54 = vpack.c.bf16 %v6929_v30, %v6925_v57  ;;  %v6813_v30 = vld [vmem:[%s11666_s25 + $0xc0] sm:$0xff] }
 0x4de   : > { %vm6421_vm8 = vcmp.gt.f32.partialorder %v9338_v34, 0.0  ;;  %v6549_v60 = vmul.f32 0.2, %v9338_v34  ;;  %v9340_v14 = vadd.f32 %v5498_v28, %v13824_v59  ;;  %v5500_v44 = vpop.f32.mrb[75].mxu0  ;;  %v7050_v26 = vpack.c.bf16 %v6930_v37, %v6926_v22  ;;  %7701 = vmatpush1.bf16.msra.mxu0 %v10548_v40  ;;  %v6814_v22 = vld [vmem:[%s11666_s25 + $0xc8] sm:$0xff] }
 0x4df   : > { %vm6422_vm9 = vcmp.gt.f32.partialorder %v9339_v36, 0.0  ;;  %v6550_v32 = vmul.f32 0.2, %v9339_v36  ;;  %v9341_v13 = vadd.f32 %v5500_v44, %v13827_v29  ;;  %6335 = vmatmul.mubr.bf16.gmra.mrb[228].mxu1 %v13636_v8  ;;  %7702 = vmatprep.subr.bf16.mxu0 %v10553_v9  ;;  %v6817_v9 = vld [vmem:[%s11666_s25 + $0xe0] sm:$0xff]  ;;  %v6818_v37 = vld [vmem:[%s11666_s25 + $0xe8] sm:$0xff] }
 0x4e0   : > { %v6677_v1 = vsel %vm6421_vm8, %v9338_v34, %v6549_v60  ;;  %vm6425_vm10 = vcmp.gt.f32.partialorder %v9340_v14, 0.0  ;;  %v6553_v24 = vmul.f32 0.2, %v9340_v14  ;;  %6344 = vmatprep.mubr.bf16.mxu1 %v13655_v18  ;;  %7547 = vmatprep.mubr.bf16.mxu0 %v7050_v26  ;;  %v10560_v28 = vld [vmem:[#allocation15 + $0x150] ss:$8 sps:$4 sm:$0xff]  }
 0x4e1   : > { %v6678_v63 = vsel %vm6422_vm9, %v9339_v36, %v6550_v32  ;;  %vm6426_vm11 = vcmp.gt.f32.partialorder %v9341_v13, 0.0  ;;  %v6554_v7 = vmul.f32 0.2, %v9341_v13  ;;  %7548 = vmatmul.mubr.bf16.gmra.mrb[132].mxu0 %v7049_v54  ;;  %v6933_v58 = vmul.f32 %v6805_v19, %v6677_v1  ;;  %v10565_v44 = vld [vmem:[#allocation15 + $0x164] ss:$8 sps:$4 sm:$0xff]  }
 0x4e2   : > { %v6681_v51 = vsel %vm6425_vm10, %v9340_v14, %v6553_v24  ;;  %7703 = vmatpush1.bf16.msra.mxu0 %v10551_v3  ;;  %v6934_v25 = vmul.f32 %v6806_v23, %v6678_v63 }
 0x4e3   : > { %v6682_v8 = vsel %vm6426_vm11, %v9341_v13, %v6554_v7  ;;  %v5504_v4 = vpop.f32.mrb[76].mxu0  ;;  %v6937_v10 = vmul.f32 %v6809_v27, %v6681_v51  ;;  %7704 = vmatprep.subr.bf16.mxu0 %v10556_v55  ;;  %v10563_v7 = vld [vmem:[#allocation15 + $0x160] ss:$8 sps:$4 sm:$0xff]   ;;  %v10568_v51 = vld [vmem:[#allocation15 + $0x174] ss:$8 sps:$4 sm:$0xff]  }
 0x4e4   : > { %v9342_v18 = vadd.f32 %v5504_v4, %v13824_v59  ;;  %v5506_v62 = vpop.f32.mrb[77].mxu0  ;;  %v6938_v56 = vmul.f32 %v6810_v16, %v6682_v8  ;;  %v6821_v4 = vld [vmem:[%s11666_s25 + $0x100] sm:$0xff] }
 0x4e5   : > { %v9343_v49 = vadd.f32 %v5506_v62, %v13827_v29  ;;  %v5508_v15 = vpop.f32.mrb[78].mxu0  ;;  %v7053_v41 = vpack.c.bf16 %v6937_v10, %v6933_v58  ;;  %v6825_v58 = vld [vmem:[%s11666_s25 + $0x120] sm:$0xff]  ;;  %v6826_v62 = vld [vmem:[%s11666_s25 + $0x128] sm:$0xff] }
 0x4e6   : > { %vm6429_vm12 = vcmp.gt.f32.partialorder %v9342_v18, 0.0  ;;  %v6557_v45 = vmul.f32 0.2, %v9342_v18  ;;  %v9344_v6 = vadd.f32 %v5508_v15, %v13824_v59  ;;  %v5510_v61 = vpop.f32.mrb[79].mxu0  ;;  %v7054_v12 = vpack.c.bf16 %v6938_v56, %v6934_v25  ;;  %7705 = vmatpush1.bf16.msra.mxu0 %v10554_v38  ;;  %v10566_v56 = vld [vmem:[#allocation15 + $0x170] ss:$8 sps:$4 sm:$0xff]  }
 0x4e7   : > { %vm6430_vm13 = vcmp.gt.f32.partialorder %v9343_v49, 0.0  ;;  %v6558_v35 = vmul.f32 0.2, %v9343_v49  ;;  %v9345_v40 = vadd.f32 %v5510_v61, %v13827_v29  ;;  %6345 = vmatmul.mubr.bf16.gmra.mrb[232].mxu1 %v13652_v39  ;;  %7706 = vmatprep.subr.bf16.mxu0 %v10559_v11 }
 0x4e8   : > { %v6685_v52 = vsel %vm6429_vm12, %v9342_v18, %v6557_v45  ;;  %vm6433_vm14 = vcmp.gt.f32.partialorder %v9344_v6, 0.0  ;;  %v6561_v57 = vmul.f32 0.2, %v9344_v6  ;;  %6354 = vmatprep.mubr.bf16.mxu1 %v13671_v0  ;;  %7557 = vmatprep.mubr.bf16.mxu0 %v7054_v12  ;;  %v6822_v18 = vld [vmem:[%s11666_s25 + $0x108] sm:$0xff] }
 0x4e9   : > { %v6686_v34 = vsel %vm6430_vm13, %v9343_v49, %v6558_v35  ;;  %vm6434_vm15 = vcmp.gt.f32.partialorder %v9345_v40, 0.0  ;;  %v6562_v5 = vmul.f32 0.2, %v9345_v40  ;;  %7558 = vmatmul.mubr.bf16.gmra.mrb[136].mxu0 %v7053_v41  ;;  %v6941_v60 = vmul.f32 %v6813_v30, %v6685_v52  ;;  %v10571_v45 = vld [vmem:[#allocation15 + $0x184] ss:$8 sps:$4 sm:$0xff]  }
 0x4ea   : > { %v6689_v36 = vsel %vm6433_vm14, %v9344_v6, %v6561_v57  ;;  %7707 = vmatpush1.bf16.msra.mxu0 %v10557_v47  ;;  %v6942_v3 = vmul.f32 %v6814_v22, %v6686_v34  ;;  %v10574_v22 = vld [vmem:[#allocation15 + $0x194] ss:$8 sps:$4 sm:$0xff]  }
 0x4eb   : > { %v6690_v39 = vsel %vm6434_vm15, %v9345_v40, %v6562_v5  ;;  %v5514_v54 = vpop.f32.mrb[80].mxu0  ;;  %v6945_v14 = vmul.f32 %v6817_v9, %v6689_v36  ;;  %7708 = vmatprep.subr.bf16.mxu0 %v10562_v48  ;;  %v10569_v9 = vld [vmem:[#allocation15 + $0x180] ss:$8 sps:$4 sm:$0xff]  }
 0x4ec   : > { %v9346_v0 = vadd.f32 %v5514_v54, %v13824_v59  ;;  %v5516_v26 = vpop.f32.mrb[81].mxu0  ;;  %v6946_v32 = vmul.f32 %v6818_v37, %v6690_v39  ;;  %v6833_v39 = vld [vmem:[%s11666_s25 + $0x160] sm:$0xff] }
 0x4ed   : > { %v9347_v13 = vadd.f32 %v5516_v26, %v13827_v29  ;;  %v5518_v55 = vpop.f32.mrb[82].mxu0  ;;  %v7057_v1 = vpack.c.bf16 %v6945_v14, %v6941_v60  ;;  %v6830_v14 = vld [vmem:[%s11666_s25 + $0x148] sm:$0xff]  ;;  %v10572_v26 = vld [vmem:[#allocation15 + $0x190] ss:$8 sps:$4 sm:$0xff]  }
 0x4ee   : > { %vm6437_vm0 = vcmp.gt.f32.partialorder %v9346_v0, 0.0  ;;  %v6565_v24 = vmul.f32 0.2, %v9346_v0  ;;  %v9348_v19 = vadd.f32 %v5518_v55, %v13824_v59  ;;  %v5520_v27 = vpop.f32.mrb[83].mxu0  ;;  %v7058_v63 = vpack.c.bf16 %v6946_v32, %v6942_v3  ;;  %7709 = vmatpush1.bf16.msra.mxu0 %v10560_v28  ;;  %v6829_v28 = vld [vmem:[%s11666_s25 + $0x140] sm:$0xff] }
 0x4ef   : > { %vm6438_vm1 = vcmp.gt.f32.partialorder %v9347_v13, 0.0  ;;  %v6566_v23 = vmul.f32 0.2, %v9347_v13  ;;  %v9349_v16 = vadd.f32 %v5520_v27, %v13827_v29  ;;  %6355 = vmatmul.mubr.bf16.gmra.mrb[236].mxu1 %v13668_v20  ;;  %7710 = vmatprep.subr.bf16.mxu0 %v10565_v44  ;;  %v6834_v44 = vld [vmem:[%s11666_s25 + $0x168] sm:$0xff] }
 0x4f0   : > { %v6693_v38 = vsel %vm6437_vm0, %v9346_v0, %v6565_v24  ;;  %vm6441_vm2 = vcmp.gt.f32.partialorder %v9348_v19, 0.0  ;;  %v6569_v8 = vmul.f32 0.2, %v9348_v19  ;;  %6364 = vmatprep.mubr.bf16.mxu1 %v13687_v50  ;;  %7567 = vmatprep.mubr.bf16.mxu0 %v7058_v63  ;;  %v10577_v55 = vld [vmem:[#allocation15 + $0x1a4] ss:$8 sps:$4 sm:$0xff]  }
 0x4f1   : > { %v6694_v10 = vsel %vm6438_vm1, %v9347_v13, %v6566_v23  ;;  %vm6442_vm3 = vcmp.gt.f32.partialorder %v9349_v16, 0.0  ;;  %v6570_v11 = vmul.f32 0.2, %v9349_v16  ;;  %7568 = vmatmul.mubr.bf16.gmra.mrb[140].mxu0 %v7057_v1  ;;  %v6949_v15 = vmul.f32 %v6821_v4, %v6693_v38 }
 0x4f2   : > { %v6697_v25 = vsel %vm6441_vm2, %v9348_v19, %v6569_v8  ;;  %7711 = vmatpush1.bf16.msra.mxu0 %v10563_v7  ;;  %v6950_v61 = vmul.f32 %v6822_v18, %v6694_v10  ;;  %v10575_v8 = vld [vmem:[#allocation15 + $0x1a0] ss:$8 sps:$4 sm:$0xff]   ;;  %v10580_v10 = vld [vmem:[#allocation15 + $0x1b4] ss:$8 sps:$4 sm:$0xff]  }
 0x4f3   : > { %v6698_v20 = vsel %vm6442_vm3, %v9349_v16, %v6570_v11  ;;  %v5524_v49 = vpop.f32.mrb[84].mxu0  ;;  %v6953_v41 = vmul.f32 %v6825_v58, %v6697_v25  ;;  %7712 = vmatprep.subr.bf16.mxu0 %v10568_v51  ;;  %v6841_v25 = vld [vmem:[%s11666_s25 + $0x1a0] sm:$0xff] }
 0x4f4   : > { %v9350_v50 = vadd.f32 %v5524_v49, %v13824_v59  ;;  %v5526_v6 = vpop.f32.mrb[85].mxu0  ;;  %v6954_v12 = vmul.f32 %v6826_v62, %v6698_v20  ;;  %v6837_v62 = vld [vmem:[%s11666_s25 + $0x180] sm:$0xff]  ;;  %v6838_v49 = vld [vmem:[%s11666_s25 + $0x188] sm:$0xff] }
 0x4f5   : > { %v9351_v47 = vadd.f32 %v5526_v6, %v13827_v29  ;;  %v5528_v35 = vpop.f32.mrb[86].mxu0  ;;  %v7061_v40 = vpack.c.bf16 %v6953_v41, %v6949_v15  ;;  %v6842_v15 = vld [vmem:[%s11666_s25 + $0x1a8] sm:$0xff] }
 0x4f6   : > { %vm6445_vm4 = vcmp.gt.f32.partialorder %v9350_v50, 0.0  ;;  %v6573_v48 = vmul.f32 0.2, %v9350_v50  ;;  %v9352_v52 = vadd.f32 %v5528_v35, %v13824_v59  ;;  %v5530_v57 = vpop.f32.mrb[87].mxu0  ;;  %v7062_v30 = vpack.c.bf16 %v6954_v12, %v6950_v61  ;;  %7713 = vmatpush1.bf16.msra.mxu0 %v10566_v56  ;;  %v10583_v12 = vld [vmem:[#allocation15 + $0x1c4] ss:$8 sps:$4 sm:$0xff]  }
 0x4f7   : > { %vm6446_vm5 = vcmp.gt.f32.partialorder %v9351_v47, 0.0  ;;  %v6574_v34 = vmul.f32 0.2, %v9351_v47  ;;  %v9353_v5 = vadd.f32 %v5530_v57, %v13827_v29  ;;  %6365 = vmatmul.mubr.bf16.gmra.mrb[240].mxu1 %v13684_v2  ;;  %7714 = vmatprep.subr.bf16.mxu0 %v10571_v45  ;;  %v10578_v45 = vld [vmem:[#allocation15 + $0x1b0] ss:$8 sps:$4 sm:$0xff]  }
 0x4f8   : > { %v6701_v37 = vsel %vm6445_vm4, %v9350_v50, %v6573_v48  ;;  %vm6449_vm6 = vcmp.gt.f32.partialorder %v9352_v52, 0.0  ;;  %v6577_v36 = vmul.f32 0.2, %v9352_v52  ;;  %6374 = vmatprep.mubr.bf16.mxu1 %v13703_v43  ;;  %7577 = vmatprep.mubr.bf16.mxu0 %v7062_v30 }
 0x4f9   : > { %v6702_v54 = vsel %vm6446_vm5, %v9351_v47, %v6574_v34  ;;  %vm6450_vm7 = vcmp.gt.f32.partialorder %v9353_v5, 0.0  ;;  %v6578_v60 = vmul.f32 0.2, %v9353_v5  ;;  %7578 = vmatmul.mubr.bf16.gmra.mrb[144].mxu0 %v7061_v40  ;;  %v6957_v32 = vmul.f32 %v6829_v28, %v6701_v37  ;;  %v10586_v28 = vld [vmem:[#allocation15 + $0x1d4] ss:$8 sps:$4 sm:$0xff]  }
 0x4fa   : > { %v6705_v0 = vsel %vm6449_vm6, %v9352_v52, %v6577_v36  ;;  %7715 = vmatpush1.bf16.msra.mxu0 %v10569_v9  ;;  %v6958_v24 = vmul.f32 %v6830_v14, %v6702_v54  ;;  %v6849_v14 = vld [vmem:[%s11666_s25 + $0x1e0] sm:$0xff] }
 0x4fb   : > { %v6706_v2 = vsel %vm6450_vm7, %v9353_v5, %v6578_v60  ;;  %v5534_v3 = vpop.f32.mrb[88].mxu0  ;;  %v6961_v13 = vmul.f32 %v6833_v39, %v6705_v0  ;;  %7716 = vmatprep.subr.bf16.mxu0 %v10574_v22  ;;  %v10581_v22 = vld [vmem:[#allocation15 + $0x1c0] ss:$8 sps:$4 sm:$0xff]  }
 0x4fc   : > { %v9354_v43 = vadd.f32 %v5534_v3, %v13824_v59  ;;  %v5536_v1 = vpop.f32.mrb[89].mxu0  ;;  %v6962_v19 = vmul.f32 %v6834_v44, %v6706_v2  ;;  %v6845_v60 = vld [vmem:[%s11666_s25 + $0x1c0] sm:$0xff]  ;;  %v6850_v2 = vld [vmem:[%s11666_s25 + $0x1e8] sm:$0xff] }
 0x4fd   : > { %v9355_v27 = vadd.f32 %v5536_v1, %v13827_v29  ;;  %v5538_v63 = vpop.f32.mrb[90].mxu0  ;;  %v7065_v7 = vpack.c.bf16 %v6961_v13, %v6957_v32  ;;  %v10584_v32 = vld [vmem:[#allocation15 + $0x1d0] ss:$8 sps:$4 sm:$0xff]   ;;  %v10589_v1 = vld [vmem:[#allocation15 + $0x1e4] ss:$8 sps:$4 sm:$0xff]  }
 0x4fe   : > { %vm6453_vm8 = vcmp.gt.f32.partialorder %v9354_v43, 0.0  ;;  %v6581_v23 = vmul.f32 0.2, %v9354_v43  ;;  %v9356_v16 = vadd.f32 %v5538_v63, %v13824_v59  ;;  %v5540_v51 = vpop.f32.mrb[91].mxu0  ;;  %v7066_v38 = vpack.c.bf16 %v6962_v19, %v6958_v24  ;;  %7717 = vmatpush1.bf16.msra.mxu0 %v10572_v26  ;;  %v6846_v26 = vld [vmem:[%s11666_s25 + $0x1c8] sm:$0xff] }
 0x4ff   : > { %vm6454_vm9 = vcmp.gt.f32.partialorder %v9355_v27, 0.0  ;;  %v6582_v4 = vmul.f32 0.2, %v9355_v27  ;;  %v9357_v58 = vadd.f32 %v5540_v51, %v13827_v29  ;;  %6375 = vmatmul.mubr.bf16.gmra.mrb[244].mxu1 %v13700_v42  ;;  %7718 = vmatprep.subr.bf16.mxu0 %v10577_v55 }
 0x500   : > { %v6709_v11 = vsel %vm6453_vm8, %v9354_v43, %v6581_v23  ;;  %vm6457_vm10 = vcmp.gt.f32.partialorder %v9356_v16, 0.0  ;;  %v6585_v18 = vmul.f32 0.2, %v9356_v16  ;;  %6384 = vmatprep.mubr.bf16.mxu1 %v13719_v33  ;;  %7587 = vmatprep.mubr.bf16.mxu0 %v7066_v38 }
 0x501   : > { %v6710_v56 = vsel %vm6454_vm9, %v9355_v27, %v6582_v4  ;;  %vm6458_vm11 = vcmp.gt.f32.partialorder %v9357_v58, 0.0  ;;  %v6586_v20 = vmul.f32 0.2, %v9357_v58  ;;  %7588 = vmatmul.mubr.bf16.gmra.mrb[148].mxu0 %v7065_v7  ;;  %v6965_v6 = vmul.f32 %v6837_v62, %v6709_v11  ;;  %v10587_v4 = vld [vmem:[#allocation15 + $0x1e0] ss:$8 sps:$4 sm:$0xff]  }
 0x502   : > { %v6713_v41 = vsel %vm6457_vm10, %v9356_v16, %v6585_v18  ;;  %7719 = vmatpush1.bf16.msra.mxu0 %v10575_v8  ;;  %v6966_v35 = vmul.f32 %v6838_v49, %v6710_v56  ;;  %v10592_v11 = vld [vmem:[#allocation15 + $0x1f4] ss:$8 sps:$4 sm:$0xff]   ;;  %v6857_v56 = vld [vmem:[%s11666_s25 + $0x220] sm:$0xff] }
 0x503   : > { %v6714_v42 = vsel %vm6458_vm11, %v9357_v58, %v6586_v20  ;;  %v5544_v50 = vpop.f32.mrb[92].mxu0  ;;  %v6969_v61 = vmul.f32 %v6841_v25, %v6713_v41  ;;  %7720 = vmatprep.subr.bf16.mxu0 %v10580_v10  ;;  %v6853_v25 = vld [vmem:[%s11666_s25 + $0x200] sm:$0xff]  ;;  %v6858_v41 = vld [vmem:[%s11666_s25 + $0x228] sm:$0xff] }
 0x504   : > { %v9358_v33 = vadd.f32 %v5544_v50, %v13824_v59  ;;  %v5546_v47 = vpop.f32.mrb[93].mxu0  ;;  %v6970_v40 = vmul.f32 %v6842_v15, %v6714_v42  ;;  %v6854_v15 = vld [vmem:[%s11666_s25 + $0x208] sm:$0xff]  ;;  %v10590_v42 = vld [vmem:[#allocation15 + $0x1f0] ss:$8 sps:$4 sm:$0xff]  }
 0x505   : > { %v9359_v48 = vadd.f32 %v5546_v47, %v13827_v29  ;;  %v5548_v52 = vpop.f32.mrb[94].mxu0  ;;  %v7069_v57 = vpack.c.bf16 %v6969_v61, %v6965_v6 }
 0x506   : > { %vm6461_vm12 = vcmp.gt.f32.partialorder %v9358_v33, 0.0  ;;  %v6589_v30 = vmul.f32 0.2, %v9358_v33  ;;  %v9360_v9 = vadd.f32 %v5548_v52, %v13824_v59  ;;  %v5550_v34 = vpop.f32.mrb[95].mxu0  ;;  %v7070_v5 = vpack.c.bf16 %v6970_v40, %v6966_v35  ;;  %7721 = vmatpush1.bf16.msra.mxu0 %v10578_v45 }
 0x507   : > { %vm6462_vm13 = vcmp.gt.f32.partialorder %v9359_v48, 0.0  ;;  %v6590_v37 = vmul.f32 0.2, %v9359_v48  ;;  %v9361_v36 = vadd.f32 %v5550_v34, %v13827_v29  ;;  %6385 = vmatmul.mubr.bf16.gmra.mrb[248].mxu1 %v13716_v31  ;;  %7722 = vmatprep.subr.bf16.mxu0 %v10583_v12 }
 0x508   : > { %v6717_v39 = vsel %vm6461_vm12, %v9358_v33, %v6589_v30  ;;  %vm6465_vm14 = vcmp.gt.f32.partialorder %v9360_v9, 0.0  ;;  %v6593_v54 = vmul.f32 0.2, %v9360_v9  ;;  %6394 = vmatprep.mubr.bf16.mxu1 %v13732_v46  ;;  %7597 = vmatprep.mubr.bf16.mxu0 %v7070_v5 }
 0x509   : > { %v6718_v44 = vsel %vm6462_vm13, %v9359_v48, %v6590_v37  ;;  %vm6466_vm15 = vcmp.gt.f32.partialorder %v9361_v36, 0.0  ;;  %v6594_v0 = vmul.f32 0.2, %v9361_v36  ;;  %7598 = vmatmul.mubr.bf16.gmra.mrb[152].mxu0 %v7069_v57  ;;  %v6973_v55 = vmul.f32 %v6845_v60, %v6717_v39  ;;  %v6865_v39 = vld [vmem:[%s11666_s25 + $0x260] sm:$0xff] }
 0x50a   : > { %v6721_v3 = vsel %vm6465_vm14, %v9360_v9, %v6593_v54  ;;  %7723 = vmatpush1.bf16.msra.mxu0 %v10581_v22  ;;  %v6974_v19 = vmul.f32 %v6846_v26, %v6718_v44  ;;  %v6866_v44 = vld [vmem:[%s11666_s25 + $0x268] sm:$0xff] }
 0x50b   : > { %v6722_v31 = vsel %vm6466_vm15, %v9361_v36, %v6594_v0  ;;  %v5554_v13 = vpop.f32.mrb[96].mxu0  ;;  %v6977_v43 = vmul.f32 %v6849_v14, %v6721_v3  ;;  %7724 = vmatprep.subr.bf16.mxu0 %v10586_v28  ;;  %v6861_v28 = vld [vmem:[%s11666_s25 + $0x240] sm:$0xff]  ;;  %v6862_v14 = vld [vmem:[%s11666_s25 + $0x248] sm:$0xff] }
 0x50c   : > { %v9362_v46 = vadd.f32 %v5554_v13, %v13824_v59  ;;  %v5556_v24 = vpop.f32.mrb[97].mxu0  ;;  %v6978_v27 = vmul.f32 %v6850_v2, %v6722_v31 }
 0x50d   : > { %v9363_v63 = vadd.f32 %v5556_v24, %v13827_v29  ;;  %v5558_v7 = vpop.f32.mrb[98].mxu0  ;;  %v7073_v23 = vpack.c.bf16 %v6977_v43, %v6973_v55 }
 0x50e   : > { %vm6469_vm0 = vcmp.gt.f32.partialorder %v9362_v46, 0.0  ;;  %v6597_v16 = vmul.f32 0.2, %v9362_v46  ;;  %v9364_v51 = vadd.f32 %v5558_v7, %v13824_v59  ;;  %v5560_v38 = vpop.f32.mrb[99].mxu0  ;;  %v7074_v8 = vpack.c.bf16 %v6978_v27, %v6974_v19  ;;  %7725 = vmatpush1.bf16.msra.mxu0 %v10584_v32 }
 0x50f   : > { %vm6470_vm1 = vcmp.gt.f32.partialorder %v9363_v63, 0.0  ;;  %v6598_v58 = vmul.f32 0.2, %v9363_v63  ;;  %v9365_v10 = vadd.f32 %v5560_v38, %v13827_v29  ;;  %6395 = vmatmul.mubr.bf16.gmra.mrb[252].mxu1 %v13730_v21  ;;  %7726 = vmatprep.subr.bf16.mxu0 %v10589_v1 }
 0x510   : > { %v6725_v18 = vsel %vm6469_vm0, %v9362_v46, %v6597_v16  ;;  %vm6473_vm2 = vcmp.gt.f32.partialorder %v9364_v51, 0.0  ;;  %v6601_v62 = vmul.f32 0.2, %v9364_v51  ;;  %7607 = vmatprep.mubr.bf16.mxu0 %v7074_v8  ;;  %v6869_v8 = vld [vmem:[%s11666_s25 + $0x280] sm:$0xff] }
 0x511   : > { %v6726_v20 = vsel %vm6470_vm1, %v9363_v63, %v6598_v58  ;;  %vm6474_vm3 = vcmp.gt.f32.partialorder %v9365_v10, 0.0  ;;  %v6602_v49 = vmul.f32 0.2, %v9365_v10  ;;  %7608 = vmatmul.mubr.bf16.gmra.mrb[156].mxu0 %v7073_v23  ;;  %v6981_v21 = vmul.f32 %v6853_v25, %v6725_v18  ;;  %v6874_v18 = vld [vmem:[%s11666_s25 + $0x2a8] sm:$0xff] }
 0x512   : > { %v6729_v45 = vsel %vm6473_vm2, %v9364_v51, %v6601_v62  ;;  %7727 = vmatpush1.bf16.msra.mxu0 %v10587_v4  ;;  %v6982_v47 = vmul.f32 %v6854_v15, %v6726_v20  ;;  %v6873_v4 = vld [vmem:[%s11666_s25 + $0x2a0] sm:$0xff] }
 0x513   : > { %v6730_v50 = vsel %vm6474_vm3, %v9365_v10, %v6602_v49  ;;  %v5564_v6 = vpop.f32.mrb[100].mxu0  ;;  %v6985_v61 = vmul.f32 %v6857_v56, %v6729_v45  ;;  %7728 = vmatprep.subr.bf16.mxu0 %v10592_v11  ;;  %v6870_v11 = vld [vmem:[%s11666_s25 + $0x288] sm:$0xff] }
 0x514   : > { %v9366_v12 = vadd.f32 %v5564_v6, %v13824_v59  ;;  %v5566_v33 = vpop.f32.mrb[101].mxu0  ;;  %v6986_v35 = vmul.f32 %v6858_v41, %v6730_v50 }
 0x515   : > { %v9367_v40 = vadd.f32 %v5566_v33, %v13827_v29  ;;  %v5568_v48 = vpop.f32.mrb[102].mxu0  ;;  %v7077_v52 = vpack.c.bf16 %v6985_v61, %v6981_v21 }
 0x516   : > { %vm6477_vm4 = vcmp.gt.f32.partialorder %v9366_v12, 0.0  ;;  %v6605_v57 = vmul.f32 0.2, %v9366_v12  ;;  %v9368_v30 = vadd.f32 %v5568_v48, %v13824_v59  ;;  %v5570_v9 = vpop.f32.mrb[103].mxu0  ;;  %v7078_v34 = vpack.c.bf16 %v6986_v35, %v6982_v47  ;;  %7729 = vmatpush1.bf16.msra.mxu0 %v10590_v42 }
 0x517   : > { %vm6478_vm5 = vcmp.gt.f32.partialorder %v9367_v40, 0.0  ;;  %v6606_v5 = vmul.f32 0.2, %v9367_v40  ;;  %v9369_v22 = vadd.f32 %v5570_v9, %v13827_v29 }
 0x518   : > { %v6733_v37 = vsel %vm6477_vm4, %v9366_v12, %v6605_v57  ;;  %vm6481_vm6 = vcmp.gt.f32.partialorder %v9368_v30, 0.0  ;;  %v6609_v36 = vmul.f32 0.2, %v9368_v30  ;;  %7617 = vmatprep.mubr.bf16.mxu0 %v7078_v34  ;;  %v6877_v57 = vld [vmem:[%s11666_s25 + $0x2c0] sm:$0xff] }
 0x519   : > { %v6734_v54 = vsel %vm6478_vm5, %v9367_v40, %v6606_v5  ;;  %vm6482_vm7 = vcmp.gt.f32.partialorder %v9369_v22, 0.0  ;;  %v6610_v60 = vmul.f32 0.2, %v9369_v22  ;;  %7618 = vmatmul.mubr.bf16.gmra.mrb[160].mxu0 %v7077_v52  ;;  %v6989_v3 = vmul.f32 %v6861_v28, %v6733_v37  ;;  %v6878_v5 = vld [vmem:[%s11666_s25 + $0x2c8] sm:$0xff] }
 0x51a   : > { %v6737_v0 = vsel %vm6481_vm6, %v9368_v30, %v6609_v36  ;;  %v6990_v55 = vmul.f32 %v6862_v14, %v6734_v54  ;;  %v6881_v30 = vld [vmem:[%s11666_s25 + $0x2e0] sm:$0xff] }
 0x51b   : > { %v6738_v26 = vsel %vm6482_vm7, %v9369_v22, %v6610_v60  ;;  %v5574_v2 = vpop.f32.mrb[104].mxu0  ;;  %v6993_v32 = vmul.f32 %v6865_v39, %v6737_v0  ;;  %v6882_v22 = vld [vmem:[%s11666_s25 + $0x2e8] sm:$0xff] }
 0x51c   : > { %v9370_v31 = vadd.f32 %v5574_v2, %v13824_v59  ;;  %v5576_v13 = vpop.f32.mrb[105].mxu0  ;;  %v6994_v43 = vmul.f32 %v6866_v44, %v6738_v26 }
 0x51d   : > { %v9371_v1 = vadd.f32 %v5576_v13, %v13827_v29  ;;  %v5578_v46 = vpop.f32.mrb[106].mxu0  ;;  %v7081_v24 = vpack.c.bf16 %v6993_v32, %v6989_v3 }
 0x51e   : > { %vm6485_vm8 = vcmp.gt.f32.partialorder %v9370_v31, 0.0  ;;  %v6613_v19 = vmul.f32 0.2, %v9370_v31  ;;  %v9372_v27 = vadd.f32 %v5578_v46, %v13824_v59  ;;  %v5580_v63 = vpop.f32.mrb[107].mxu0  ;;  %v7082_v7 = vpack.c.bf16 %v6994_v43, %v6990_v55 }
 0x51f   : > { %vm6486_vm9 = vcmp.gt.f32.partialorder %v9371_v1, 0.0  ;;  %v6614_v23 = vmul.f32 0.2, %v9371_v1  ;;  %v9373_v16 = vadd.f32 %v5580_v63, %v13827_v29 }
 0x520   : > { %v6741_v51 = vsel %vm6485_vm8, %v9370_v31, %v6613_v19  ;;  %vm6489_vm10 = vcmp.gt.f32.partialorder %v9372_v27, 0.0  ;;  %v6617_v38 = vmul.f32 0.2, %v9372_v27  ;;  %7627 = vmatprep.mubr.bf16.mxu0 %v7082_v7  ;;  %v6885_v19 = vld [vmem:[%s11666_s25 + $0x300] sm:$0xff] }
 0x521   : > { %v6742_v58 = vsel %vm6486_vm9, %v9371_v1, %v6614_v23  ;;  %vm6490_vm11 = vcmp.gt.f32.partialorder %v9373_v16, 0.0  ;;  %v6618_v10 = vmul.f32 0.2, %v9373_v16  ;;  %7628 = vmatmul.mubr.bf16.gmra.mrb[164].mxu0 %v7081_v24  ;;  %v6997_v20 = vmul.f32 %v6869_v8, %v6741_v51  ;;  %v6886_v23 = vld [vmem:[%s11666_s25 + $0x308] sm:$0xff] }
 0x522   : > { %v6745_v62 = vsel %vm6489_vm10, %v9372_v27, %v6617_v38  ;;  %v6998_v45 = vmul.f32 %v6870_v11, %v6742_v58  ;;  %v6889_v27 = vld [vmem:[%s11666_s25 + $0x320] sm:$0xff] }
 0x523   : > { %v6746_v25 = vsel %vm6490_vm11, %v9373_v16, %v6618_v10  ;;  %v5584_v56 = vpop.f32.mrb[108].mxu0  ;;  %v7001_v49 = vmul.f32 %v6873_v4, %v6745_v62  ;;  %v6890_v16 = vld [vmem:[%s11666_s25 + $0x328] sm:$0xff] }
 0x524   : > { %v9374_v15 = vadd.f32 %v5584_v56, %v13824_v59  ;;  %v5586_v41 = vpop.f32.mrb[109].mxu0  ;;  %v7002_v42 = vmul.f32 %v6874_v18, %v6746_v25 }
 0x525   : > { %v9375_v50 = vadd.f32 %v5586_v41, %v13827_v29  ;;  %v5588_v6 = vpop.f32.mrb[110].mxu0  ;;  %v7085_v21 = vpack.c.bf16 %v7001_v49, %v6997_v20 }
 0x526   : > { %vm6493_vm12 = vcmp.gt.f32.partialorder %v9374_v15, 0.0  ;;  %v6621_v61 = vmul.f32 0.2, %v9374_v15  ;;  %v9376_v12 = vadd.f32 %v5588_v6, %v13824_v59  ;;  %v5590_v33 = vpop.f32.mrb[111].mxu0  ;;  %v7086_v47 = vpack.c.bf16 %v7002_v42, %v6998_v45 }
 0x527   : > { %vm6494_vm13 = vcmp.gt.f32.partialorder %v9375_v50, 0.0  ;;  %v6622_v35 = vmul.f32 0.2, %v9375_v50  ;;  %v9377_v40 = vadd.f32 %v5590_v33, %v13827_v29 }
 0x528   : > { %v6749_v48 = vsel %vm6493_vm12, %v9374_v15, %v6621_v61  ;;  %vm6497_vm14 = vcmp.gt.f32.partialorder %v9376_v12, 0.0  ;;  %v6625_v52 = vmul.f32 0.2, %v9376_v12  ;;  %7637 = vmatprep.mubr.bf16.mxu0 %v7086_v47  ;;  %v6893_v61 = vld [vmem:[%s11666_s25 + $0x340] sm:$0xff] }
 0x529   : > { %v6750_v9 = vsel %vm6494_vm13, %v9375_v50, %v6622_v35  ;;  %vm6498_vm15 = vcmp.gt.f32.partialorder %v9377_v40, 0.0  ;;  %v6626_v34 = vmul.f32 0.2, %v9377_v40  ;;  %7638 = vmatmul.mubr.bf16.gmra.mrb[168].mxu0 %v7085_v21  ;;  %v7005_v39 = vmul.f32 %v6877_v57, %v6749_v48  ;;  %v6894_v35 = vld [vmem:[%s11666_s25 + $0x348] sm:$0xff] }
 0x52a   : > { %v6753_v37 = vsel %vm6497_vm14, %v9376_v12, %v6625_v52  ;;  %v7006_v44 = vmul.f32 %v6878_v5, %v6750_v9  ;;  %v6897_v12 = vld [vmem:[%s11666_s25 + $0x360] sm:$0xff] }
 0x52b   : > { %v6754_v36 = vsel %vm6498_vm15, %v9377_v40, %v6626_v34  ;;  %v5594_v28 = vpop.f32.mrb[112].mxu0  ;;  %v7009_v54 = vmul.f32 %v6881_v30, %v6753_v37  ;;  %v6898_v40 = vld [vmem:[%s11666_s25 + $0x368] sm:$0xff] }
 0x52c   : > { %v9378_v60 = vadd.f32 %v5594_v28, %v13824_v59  ;;  %v5596_v14 = vpop.f32.mrb[113].mxu0  ;;  %v7010_v0 = vmul.f32 %v6882_v22, %v6754_v36 }
 0x52d   : > { %v9379_v26 = vadd.f32 %v5596_v14, %v13827_v29  ;;  %v5598_v2 = vpop.f32.mrb[114].mxu0  ;;  %v7089_v3 = vpack.c.bf16 %v7009_v54, %v7005_v39 }
 0x52e   : > { %vm6501_vm0 = vcmp.gt.f32.partialorder %v9378_v60, 0.0  ;;  %v6629_v32 = vmul.f32 0.2, %v9378_v60  ;;  %v9380_v31 = vadd.f32 %v5598_v2, %v13824_v59  ;;  %v5600_v13 = vpop.f32.mrb[115].mxu0  ;;  %v7090_v55 = vpack.c.bf16 %v7010_v0, %v7006_v44 }
 0x52f   : > { %vm6502_vm1 = vcmp.gt.f32.partialorder %v9379_v26, 0.0  ;;  %v6630_v43 = vmul.f32 0.2, %v9379_v26  ;;  %v9381_v1 = vadd.f32 %v5600_v13, %v13827_v29 }
 0x530   : > { %v6757_v46 = vsel %vm6501_vm0, %v9378_v60, %v6629_v32  ;;  %vm6505_vm2 = vcmp.gt.f32.partialorder %v9380_v31, 0.0  ;;  %v6633_v24 = vmul.f32 0.2, %v9380_v31  ;;  %7647 = vmatprep.mubr.bf16.mxu0 %v7090_v55  ;;  %v6901_v32 = vld [vmem:[%s11666_s25 + $0x380] sm:$0xff] }
 0x531   : > { %v6758_v63 = vsel %vm6502_vm1, %v9379_v26, %v6630_v43  ;;  %vm6506_vm3 = vcmp.gt.f32.partialorder %v9381_v1, 0.0  ;;  %v6634_v7 = vmul.f32 0.2, %v9381_v1  ;;  %7648 = vmatmul.mubr.bf16.gmra.mrb[172].mxu0 %v7089_v3  ;;  %v7013_v4 = vmul.f32 %v6885_v19, %v6757_v46  ;;  %v6902_v43 = vld [vmem:[%s11666_s25 + $0x388] sm:$0xff] }
 0x532   : > { %v6761_v51 = vsel %vm6505_vm2, %v9380_v31, %v6633_v24  ;;  %v7014_v18 = vmul.f32 %v6886_v23, %v6758_v63  ;;  %v6905_v31 = vld [vmem:[%s11666_s25 + $0x3a0] sm:$0xff] }
 0x533   : > { %v6762_v38 = vsel %vm6506_vm3, %v9381_v1, %v6634_v7  ;;  %v5604_v8 = vpop.f32.mrb[116].mxu0  ;;  %v7017_v58 = vmul.f32 %v6889_v27, %v6761_v51  ;;  %v6906_v1 = vld [vmem:[%s11666_s25 + $0x3a8] sm:$0xff] }
 0x534   : > { %v9382_v10 = vadd.f32 %v5604_v8, %v13824_v59  ;;  %v5606_v11 = vpop.f32.mrb[117].mxu0  ;;  %v7018_v62 = vmul.f32 %v6890_v16, %v6762_v38 }
 0x535   : > { %v9383_v25 = vadd.f32 %v5606_v11, %v13827_v29  ;;  %v5608_v56 = vpop.f32.mrb[118].mxu0  ;;  %v7093_v20 = vpack.c.bf16 %v7017_v58, %v7013_v4 }
 0x536   : > { %vm6509_vm4 = vcmp.gt.f32.partialorder %v9382_v10, 0.0  ;;  %v6637_v49 = vmul.f32 0.2, %v9382_v10  ;;  %v9384_v15 = vadd.f32 %v5608_v56, %v13824_v59  ;;  %v5610_v41 = vpop.f32.mrb[119].mxu0  ;;  %v7094_v45 = vpack.c.bf16 %v7018_v62, %v7014_v18 }
 0x537   : > { %vm6510_vm5 = vcmp.gt.f32.partialorder %v9383_v25, 0.0  ;;  %v6638_v42 = vmul.f32 0.2, %v9383_v25  ;;  %v9385_v50 = vadd.f32 %v5610_v41, %v13827_v29 }
 0x538   : > { %v6765_v6 = vsel %vm6509_vm4, %v9382_v10, %v6637_v49  ;;  %vm6513_vm6 = vcmp.gt.f32.partialorder %v9384_v15, 0.0  ;;  %v6641_v21 = vmul.f32 0.2, %v9384_v15  ;;  %7657 = vmatprep.mubr.bf16.mxu0 %v7094_v45  ;;  %v6909_v49 = vld [vmem:[%s11666_s25 + $0x3c0] sm:$0xff] }
 0x539   : > { %v6766_v33 = vsel %vm6510_vm5, %v9383_v25, %v6638_v42  ;;  %vm6514_vm7 = vcmp.gt.f32.partialorder %v9385_v50, 0.0  ;;  %v6642_v47 = vmul.f32 0.2, %v9385_v50  ;;  %7658 = vmatmul.mubr.bf16.gmra.mrb[176].mxu0 %v7093_v20  ;;  %v7021_v30 = vmul.f32 %v6893_v61, %v6765_v6  ;;  %v6910_v42 = vld [vmem:[%s11666_s25 + $0x3c8] sm:$0xff] }
 0x53a   : > { %v6769_v48 = vsel %vm6513_vm6, %v9384_v15, %v6641_v21  ;;  %v7022_v22 = vmul.f32 %v6894_v35, %v6766_v33  ;;  %v6913_v15 = vld [vmem:[%s11666_s25 + $0x3e0] sm:$0xff]  ;;  %v10722_v35 = vld [vmem:[#allocation12] sm:$0xf] }
 0x53b   : > { %v6770_v52 = vsel %vm6514_vm7, %v9385_v50, %v6642_v47  ;;  %v5614_v57 = vpop.f32.mrb[120].mxu0  ;;  %v7025_v9 = vmul.f32 %v6897_v12, %v6769_v48 }
 0x53c   : > { %v9386_v34 = vadd.f32 %v5614_v57, %v13824_v59  ;;  %v5616_v5 = vpop.f32.mrb[121].mxu0  ;;  %v7026_v37 = vmul.f32 %v6898_v40, %v6770_v52  ;;  %v14912_v40 = vld [vmem:[#allocation37_spill] sm:$0xff] }
 0x53d   : > { %v9387_v36 = vadd.f32 %v5616_v5, %v13827_v29  ;;  %v5618_v28 = vpop.f32.mrb[122].mxu0  ;;  %v7097_v39 = vpack.c.bf16 %v7025_v9, %v7021_v30  ;;  %v14913_v48 = vsub.s32 2, %v14912_v40  ;;  %v14914_v57 = vsub.s32 3, %v14912_v40 }
 0x53e   : > { %vm6517_vm8 = vcmp.gt.f32.partialorder %v9386_v34, 0.0  ;;  %v6645_v54 = vmul.f32 0.2, %v9386_v34  ;;  %v9388_v60 = vadd.f32 %v5618_v28, %v13824_v59  ;;  %v5620_v14 = vpop.f32.mrb[123].mxu0  ;;  %v7098_v44 = vpack.c.bf16 %v7026_v37, %v7022_v22 }
 0x53f   : > { %vm6518_vm9 = vcmp.gt.f32.partialorder %v9387_v36, 0.0  ;;  %v6646_v0 = vmul.f32 0.2, %v9387_v36  ;;  %v9389_v26 = vadd.f32 %v5620_v14, %v13827_v29  ;;  %v13976_v52 = vrot.slane %v10722_v35, %v14913_v48 }
 0x540   : > { %v6773_v2 = vsel %vm6517_vm8, %v9386_v34, %v6645_v54  ;;  %vm6521_vm10 = vcmp.gt.f32.partialorder %v9388_v60, 0.0  ;;  %v6649_v3 = vmul.f32 0.2, %v9388_v60  ;;  %7667 = vmatprep.mubr.bf16.mxu0 %v7098_v44  ;;  %v13980_v30 = vrot.slane %v10722_v35, %v14914_v57  ;;  %v6791_v44 = vld [vmem:[%s11666_s25 + $0x10] sm:$0xff] }
 0x541   : > { %v6774_v13 = vsel %vm6518_vm9, %v9387_v36, %v6646_v0  ;;  %vm6522_vm11 = vcmp.gt.f32.partialorder %v9389_v26, 0.0  ;;  %v6650_v55 = vmul.f32 0.2, %v9389_v26  ;;  %7668 = vmatmul.mubr.bf16.gmra.mrb[180].mxu0 %v7097_v39  ;;  %v7029_v27 = vmul.f32 %v6901_v32, %v6773_v2  ;;  %v6792_v32 = vld [vmem:[%s11666_s25 + $0x18] sm:$0xff] }
 0x542   : > { %v6777_v46 = vsel %vm6521_vm10, %v9388_v60, %v6649_v3  ;;  %v7030_v16 = vmul.f32 %v6902_v43, %v6774_v13 }
 0x543   : > { %v6778_v24 = vsel %vm6522_vm11, %v9389_v26, %v6650_v55  ;;  %v5624_v19 = vpop.f32.mrb[124].mxu0  ;;  %v7033_v63 = vmul.f32 %v6905_v31, %v6777_v46  ;;  %v6795_v26 = vld [vmem:[%s11666_s25 + $0x30] sm:$0xff]  ;;  %v6796_v31 = vld [vmem:[%s11666_s25 + $0x38] sm:$0xff] }
 0x544   : > { %v9390_v7 = vadd.f32 %v5624_v19, %v13824_v59  ;;  %v5626_v23 = vpop.f32.mrb[125].mxu0  ;;  %v7034_v51 = vmul.f32 %v6906_v1, %v6778_v24 }
 0x545   : > { %v9391_v38 = vadd.f32 %v5626_v23, %v13827_v29  ;;  %v5628_v8 = vpop.f32.mrb[126].mxu0  ;;  %v7101_v4 = vpack.c.bf16 %v7033_v63, %v7029_v27 }
 0x546   : > { %vm6525_vm12 = vcmp.gt.f32.partialorder %v9390_v7, 0.0  ;;  %v6653_v58 = vmul.f32 0.2, %v9390_v7  ;;  %v9392_v10 = vadd.f32 %v5628_v8, %v13824_v59  ;;  %v5630_v11 = vpop.f32.mrb[127].mxu0  ;;  %v7102_v18 = vpack.c.bf16 %v7034_v51, %v7030_v16  ;;  %v6914_v59 = vld [vmem:[%s11666_s25 + $0x3e8] sm:$0xff] }
 0x547   : > { %vm6526_vm13 = vcmp.gt.f32.partialorder %v9391_v38, 0.0  ;;  %v6654_v62 = vmul.f32 0.2, %v9391_v38  ;;  %v9393_v25 = vadd.f32 %v5630_v11, %v13827_v29 }
 0x548   : > { %v6781_v56 = vsel %vm6525_vm12, %v9390_v7, %v6653_v58  ;;  %vm6529_vm14 = vcmp.gt.f32.partialorder %v9392_v10, 0.0  ;;  %v6657_v20 = vmul.f32 0.2, %v9392_v10  ;;  %7677 = vmatprep.mubr.bf16.mxu0 %v7102_v18 }
 0x549   : > { %v6782_v41 = vsel %vm6526_vm13, %v9391_v38, %v6654_v62  ;;  %vm6530_vm15 = vcmp.gt.f32.partialorder %v9393_v25, 0.0  ;;  %v6658_v45 = vmul.f32 0.2, %v9393_v25  ;;  %7678 = vmatmul.mubr.bf16.gmra.mrb[184].mxu0 %v7101_v4  ;;  %v7037_v21 = vmul.f32 %v6909_v49, %v6781_v56  ;;  %v6799_v62 = vld [vmem:[%s11666_s25 + $0x50] sm:$0xff]  ;;  %v6800_v49 = vld [vmem:[%s11666_s25 + $0x58] sm:$0xff] }
 0x54a   : > { %v6785_v50 = vsel %vm6529_vm14, %v9392_v10, %v6657_v20  ;;  %v7038_v12 = vmul.f32 %v6910_v42, %v6782_v41 }
 0x54b   : > { %v6786_v6 = vsel %vm6530_vm15, %v9393_v25, %v6658_v45  ;;  %v7041_v61 = vmul.f32 %v6913_v15, %v6785_v50  ;;  %v6803_v25 = vld [vmem:[%s11666_s25 + $0x70] sm:$0xff]  ;;  %v6804_v15 = vld [vmem:[%s11666_s25 + $0x78] sm:$0xff] }
 0x54c   : > { %v7042_v33 = vmul.f32 %v6914_v59, %v6786_v6 }
 0x54d   : > { %v7105_v47 = vpack.c.bf16 %v7041_v61, %v7037_v21 }
 0x54e   : > { %v7106_v29 = vpack.c.bf16 %v7042_v33, %v7038_v12 }
 0x550   : > { %7687 = vmatprep.mubr.bf16.mxu0 %v7106_v29 }
 0x551   : > { %7688 = vmatmul.mubr.bf16.gmra.mrb[188].mxu0 %v7105_v47 }
 0x56a   : > { %v6246_v9 = vpop.f32.mrb[192].mxu1 }
 0x56b   : > { %v9394_v34 = vadd.f32 %v6246_v9, %v13976_v52  ;;  %v6248_v5 = vpop.f32.mrb[193].mxu1 }
 0x56c   : > { %v9395_v22 = vadd.f32 %v6248_v5, %v13980_v30  ;;  %v6250_v37 = vpop.f32.mrb[194].mxu1 }
 0x56d   : > { %vm6407_vm0 = vcmp.gt.f32.partialorder %v9394_v34, 0.0  ;;  %v6535_v36 = vmul.f32 0.2, %v9394_v34  ;;  %v9396_v28 = vadd.f32 %v6250_v37, %v13976_v52  ;;  %v6252_v39 = vpop.f32.mrb[195].mxu1  ;;  %v6807_v37 = vld [vmem:[%s11666_s25 + $0x90] sm:$0xff] }
 0x56e   : > { %vm6408_vm1 = vcmp.gt.f32.partialorder %v9395_v22, 0.0  ;;  %v6536_v54 = vmul.f32 0.2, %v9395_v22  ;;  %v9397_v60 = vadd.f32 %v6252_v39, %v13980_v30 }
 0x56f   : > { %v6663_v14 = vsel %vm6407_vm0, %v9394_v34, %v6535_v36  ;;  %vm6411_vm2 = vcmp.gt.f32.partialorder %v9396_v28, 0.0  ;;  %v6539_v0 = vmul.f32 0.2, %v9396_v28  ;;  %v6811_v36 = vld [vmem:[%s11666_s25 + $0xb0] sm:$0xff] }
 0x570   : > { %v6664_v2 = vsel %vm6408_vm1, %v9395_v22, %v6536_v54  ;;  %vm6412_vm3 = vcmp.gt.f32.partialorder %v9397_v60, 0.0  ;;  %v6540_v3 = vmul.f32 0.2, %v9397_v60  ;;  %v6919_v55 = vmul.f32 %v6791_v44, %v6663_v14  ;;  %v6808_v54 = vld [vmem:[%s11666_s25 + $0x98] sm:$0xff] }
 0x571   : > { %v6667_v13 = vsel %vm6411_vm2, %v9396_v28, %v6539_v0  ;;  %v6920_v27 = vmul.f32 %v6792_v32, %v6664_v2 }
 0x572   : > { %v6923_v43 = vmul.f32 %v6795_v26, %v6667_v13  ;;  %v6668_v1 = vsel %vm6412_vm3, %v9397_v60, %v6540_v3  ;;  %v6256_v46 = vpop.f32.mrb[196].mxu1  ;;  %v6812_v60 = vld [vmem:[%s11666_s25 + $0xb8] sm:$0xff] }
 0x573   : > { %v9398_v24 = vadd.f32 %v6256_v46, %v13976_v52  ;;  %v6258_v19 = vpop.f32.mrb[197].mxu1  ;;  %v6924_v63 = vmul.f32 %v6796_v31, %v6668_v1 }
 0x574   : > { %v7047_v7 = vpack.c.bf16 %v6923_v43, %v6919_v55  ;;  %v9399_v23 = vadd.f32 %v6258_v19, %v13980_v30  ;;  %v6260_v16 = vpop.f32.mrb[198].mxu1 }
 0x575   : > { %vm6415_vm4 = vcmp.gt.f32.partialorder %v9398_v24, 0.0  ;;  %v6543_v51 = vmul.f32 0.2, %v9398_v24  ;;  %v9400_v38 = vadd.f32 %v6260_v16, %v13976_v52  ;;  %v6262_v8 = vpop.f32.mrb[199].mxu1  ;;  %v7048_v4 = vpack.c.bf16 %v6924_v63, %v6920_v27 }
 0x576   : > { %vm6416_vm5 = vcmp.gt.f32.partialorder %v9399_v23, 0.0  ;;  %v6544_v58 = vmul.f32 0.2, %v9399_v23  ;;  %v9401_v10 = vadd.f32 %v6262_v8, %v13980_v30 }
 0x577   : > { %v6671_v11 = vsel %vm6415_vm4, %v9398_v24, %v6543_v51  ;;  %vm6419_vm6 = vcmp.gt.f32.partialorder %v9400_v38, 0.0  ;;  %v6547_v18 = vmul.f32 0.2, %v9400_v38  ;;  %7730 = vmatprep.mubr.bf16.mxu0 %v7048_v4  ;;  %v6815_v51 = vld [vmem:[%s11666_s25 + $0xd0] sm:$0xff] }
 0x578   : > { %v6672_v56 = vsel %vm6416_vm5, %v9399_v23, %v6544_v58  ;;  %vm6420_vm7 = vcmp.gt.f32.partialorder %v9401_v10, 0.0  ;;  %v6548_v20 = vmul.f32 0.2, %v9401_v10  ;;  %7731 = vmatmul.mubr.bf16.vlgmr.msra.gmra.mrb[128].mxu0 %v7047_v7  ;;  %v6927_v59 = vmul.f32 %v6799_v62, %v6671_v11  ;;  %v6816_v58 = vld [vmem:[%s11666_s25 + $0xd8] sm:$0xff] }
 0x579   : > { %v6675_v41 = vsel %vm6419_vm6, %v9400_v38, %v6547_v18  ;;  %v6928_v61 = vmul.f32 %v6800_v49, %v6672_v56  ;;  %v6819_v38 = vld [vmem:[%s11666_s25 + $0xf0] sm:$0xff] }
 0x57a   : > { %v6676_v45 = vsel %vm6420_vm7, %v9401_v10, %v6548_v20  ;;  %v6266_v42 = vpop.f32.mrb[200].mxu1  ;;  %v6931_v50 = vmul.f32 %v6803_v25, %v6675_v41  ;;  %v6820_v10 = vld [vmem:[%s11666_s25 + $0xf8] sm:$0xff] }
 0x57b   : > { %v9402_v6 = vadd.f32 %v6266_v42, %v13976_v52  ;;  %v6268_v21 = vpop.f32.mrb[201].mxu1  ;;  %v6932_v12 = vmul.f32 %v6804_v15, %v6676_v45 }
 0x57c   : > { %v9403_v33 = vadd.f32 %v6268_v21, %v13980_v30  ;;  %v6270_v47 = vpop.f32.mrb[202].mxu1  ;;  %v7051_v29 = vpack.c.bf16 %v6931_v50, %v6927_v59 }
 0x57d   : > { %vm6423_vm8 = vcmp.gt.f32.partialorder %v9402_v6, 0.0  ;;  %v6551_v35 = vmul.f32 0.2, %v9402_v6  ;;  %v9404_v40 = vadd.f32 %v6270_v47, %v13976_v52  ;;  %v6272_v48 = vpop.f32.mrb[203].mxu1  ;;  %v7052_v57 = vpack.c.bf16 %v6932_v12, %v6928_v61 }
 0x57e   : > { %vm6424_vm9 = vcmp.gt.f32.partialorder %v9403_v33, 0.0  ;;  %v6552_v9 = vmul.f32 0.2, %v9403_v33  ;;  %v9405_v34 = vadd.f32 %v6272_v48, %v13980_v30 }
 0x57f   : > { %v6679_v5 = vsel %vm6423_vm8, %v9402_v6, %v6551_v35  ;;  %vm6427_vm10 = vcmp.gt.f32.partialorder %v9404_v40, 0.0  ;;  %v6555_v22 = vmul.f32 0.2, %v9404_v40  ;;  %7740 = vmatprep.mubr.bf16.mxu0 %v7052_v57  ;;  %v6823_v35 = vld [vmem:[%s11666_s25 + $0x110] sm:$0xff] }
 0x580   : > { %v6680_v28 = vsel %vm6424_vm9, %v9403_v33, %v6552_v9  ;;  %vm6428_vm11 = vcmp.gt.f32.partialorder %v9405_v34, 0.0  ;;  %v6556_v39 = vmul.f32 0.2, %v9405_v34  ;;  %7741 = vmatmul.mubr.bf16.gmra.mrb[132].mxu0 %v7051_v29  ;;  %v6935_v26 = vmul.f32 %v6807_v37, %v6679_v5  ;;  %v6824_v9 = vld [vmem:[%s11666_s25 + $0x118] sm:$0xff] }
 0x581   : > { %v6683_v14 = vsel %vm6427_vm10, %v9404_v40, %v6555_v22  ;;  %v6936_v31 = vmul.f32 %v6808_v54, %v6680_v28  ;;  %v6827_v40 = vld [vmem:[%s11666_s25 + $0x130] sm:$0xff] }
 0x582   : > { %v6684_v44 = vsel %vm6428_vm11, %v9405_v34, %v6556_v39  ;;  %v6276_v0 = vpop.f32.mrb[204].mxu1  ;;  %v6939_v2 = vmul.f32 %v6811_v36, %v6683_v14  ;;  %v6828_v34 = vld [vmem:[%s11666_s25 + $0x138] sm:$0xff] }
 0x583   : > { %v9406_v3 = vadd.f32 %v6276_v0, %v13976_v52  ;;  %v6278_v32 = vpop.f32.mrb[205].mxu1  ;;  %v6940_v13 = vmul.f32 %v6812_v60, %v6684_v44 }
 0x584   : > { %v9407_v55 = vadd.f32 %v6278_v32, %v13980_v30  ;;  %v6280_v43 = vpop.f32.mrb[206].mxu1  ;;  %v7055_v1 = vpack.c.bf16 %v6939_v2, %v6935_v26 }
 0x585   : > { %vm6431_vm12 = vcmp.gt.f32.partialorder %v9406_v3, 0.0  ;;  %v6559_v46 = vmul.f32 0.2, %v9406_v3  ;;  %v9408_v24 = vadd.f32 %v6280_v43, %v13976_v52  ;;  %v6282_v19 = vpop.f32.mrb[207].mxu1  ;;  %v7056_v27 = vpack.c.bf16 %v6940_v13, %v6936_v31 }
 0x586   : > { %vm6432_vm13 = vcmp.gt.f32.partialorder %v9407_v55, 0.0  ;;  %v6560_v63 = vmul.f32 0.2, %v9407_v55  ;;  %v9409_v7 = vadd.f32 %v6282_v19, %v13980_v30 }
 0x587   : > { %v6687_v23 = vsel %vm6431_vm12, %v9406_v3, %v6559_v46  ;;  %vm6435_vm14 = vcmp.gt.f32.partialorder %v9408_v24, 0.0  ;;  %v6563_v16 = vmul.f32 0.2, %v9408_v24  ;;  %7750 = vmatprep.mubr.bf16.mxu0 %v7056_v27  ;;  %v6831_v46 = vld [vmem:[%s11666_s25 + $0x150] sm:$0xff] }
 0x588   : > { %v6688_v8 = vsel %vm6432_vm13, %v9407_v55, %v6560_v63  ;;  %vm6436_vm15 = vcmp.gt.f32.partialorder %v9409_v7, 0.0  ;;  %v6564_v4 = vmul.f32 0.2, %v9409_v7  ;;  %7751 = vmatmul.mubr.bf16.gmra.mrb[136].mxu0 %v7055_v1  ;;  %v6943_v25 = vmul.f32 %v6815_v51, %v6687_v23  ;;  %v6832_v63 = vld [vmem:[%s11666_s25 + $0x158] sm:$0xff] }
 0x589   : > { %v6691_v11 = vsel %vm6435_vm14, %v9408_v24, %v6563_v16  ;;  %v6944_v15 = vmul.f32 %v6816_v58, %v6688_v8  ;;  %v6835_v24 = vld [vmem:[%s11666_s25 + $0x170] sm:$0xff] }
 0x58a   : > { %v6692_v18 = vsel %vm6436_vm15, %v9409_v7, %v6564_v4  ;;  %v6286_v62 = vpop.f32.mrb[208].mxu1  ;;  %v6947_v56 = vmul.f32 %v6819_v38, %v6691_v11  ;;  %v6836_v7 = vld [vmem:[%s11666_s25 + $0x178] sm:$0xff] }
 0x58b   : > { %v9410_v20 = vadd.f32 %v6286_v62, %v13976_v52  ;;  %v6288_v49 = vpop.f32.mrb[209].mxu1  ;;  %v6948_v41 = vmul.f32 %v6820_v10, %v6692_v18 }
 0x58c   : > { %v9411_v45 = vadd.f32 %v6288_v49, %v13980_v30  ;;  %v6290_v42 = vpop.f32.mrb[210].mxu1  ;;  %v7059_v59 = vpack.c.bf16 %v6947_v56, %v6943_v25 }
 0x58d   : > { %vm6439_vm0 = vcmp.gt.f32.partialorder %v9410_v20, 0.0  ;;  %v6567_v50 = vmul.f32 0.2, %v9410_v20  ;;  %v9412_v6 = vadd.f32 %v6290_v42, %v13976_v52  ;;  %v6292_v21 = vpop.f32.mrb[211].mxu1  ;;  %v7060_v61 = vpack.c.bf16 %v6948_v41, %v6944_v15 }
 0x58e   : > { %vm6440_vm1 = vcmp.gt.f32.partialorder %v9411_v45, 0.0  ;;  %v6568_v12 = vmul.f32 0.2, %v9411_v45  ;;  %v9413_v33 = vadd.f32 %v6292_v21, %v13980_v30 }
 0x58f   : > { %v6695_v47 = vsel %vm6439_vm0, %v9410_v20, %v6567_v50  ;;  %vm6443_vm2 = vcmp.gt.f32.partialorder %v9412_v6, 0.0  ;;  %v6571_v29 = vmul.f32 0.2, %v9412_v6  ;;  %7760 = vmatprep.mubr.bf16.mxu0 %v7060_v61  ;;  %v6839_v50 = vld [vmem:[%s11666_s25 + $0x190] sm:$0xff] }
 0x590   : > { %v6696_v48 = vsel %vm6440_vm1, %v9411_v45, %v6568_v12  ;;  %vm6444_vm3 = vcmp.gt.f32.partialorder %v9413_v33, 0.0  ;;  %v6572_v57 = vmul.f32 0.2, %v9413_v33  ;;  %7761 = vmatmul.mubr.bf16.gmra.mrb[140].mxu0 %v7059_v59  ;;  %v6951_v36 = vmul.f32 %v6823_v35, %v6695_v47  ;;  %v6840_v12 = vld [vmem:[%s11666_s25 + $0x198] sm:$0xff] }
 0x591   : > { %v6699_v5 = vsel %vm6443_vm2, %v9412_v6, %v6571_v29  ;;  %v6952_v60 = vmul.f32 %v6824_v9, %v6696_v48  ;;  %v6843_v6 = vld [vmem:[%s11666_s25 + $0x1b0] sm:$0xff] }
 0x592   : > { %v6700_v22 = vsel %vm6444_vm3, %v9413_v33, %v6572_v57  ;;  %v6296_v37 = vpop.f32.mrb[212].mxu1  ;;  %v6955_v28 = vmul.f32 %v6827_v40, %v6699_v5  ;;  %v6844_v33 = vld [vmem:[%s11666_s25 + $0x1b8] sm:$0xff] }
 0x593   : > { %v9414_v39 = vadd.f32 %v6296_v37, %v13976_v52  ;;  %v6298_v54 = vpop.f32.mrb[213].mxu1  ;;  %v6956_v14 = vmul.f32 %v6828_v34, %v6700_v22 }
 0x594   : > { %v9415_v44 = vadd.f32 %v6298_v54, %v13980_v30  ;;  %v6300_v0 = vpop.f32.mrb[214].mxu1  ;;  %v7063_v26 = vpack.c.bf16 %v6955_v28, %v6951_v36 }
 0x595   : > { %vm6447_vm4 = vcmp.gt.f32.partialorder %v9414_v39, 0.0  ;;  %v6575_v2 = vmul.f32 0.2, %v9414_v39  ;;  %v9416_v3 = vadd.f32 %v6300_v0, %v13976_v52  ;;  %v6302_v32 = vpop.f32.mrb[215].mxu1  ;;  %v7064_v31 = vpack.c.bf16 %v6956_v14, %v6952_v60 }
 0x596   : > { %vm6448_vm5 = vcmp.gt.f32.partialorder %v9415_v44, 0.0  ;;  %v6576_v13 = vmul.f32 0.2, %v9415_v44  ;;  %v9417_v55 = vadd.f32 %v6302_v32, %v13980_v30 }
 0x597   : > { %v6703_v43 = vsel %vm6447_vm4, %v9414_v39, %v6575_v2  ;;  %vm6451_vm6 = vcmp.gt.f32.partialorder %v9416_v3, 0.0  ;;  %v6579_v1 = vmul.f32 0.2, %v9416_v3  ;;  %7770 = vmatprep.mubr.bf16.mxu0 %v7064_v31  ;;  %v6847_v2 = vld [vmem:[%s11666_s25 + $0x1d0] sm:$0xff] }
 0x598   : > { %v6704_v19 = vsel %vm6448_vm5, %v9415_v44, %v6576_v13  ;;  %vm6452_vm7 = vcmp.gt.f32.partialorder %v9417_v55, 0.0  ;;  %v6580_v27 = vmul.f32 0.2, %v9417_v55  ;;  %7771 = vmatmul.mubr.bf16.gmra.mrb[144].mxu0 %v7063_v26  ;;  %v6959_v38 = vmul.f32 %v6831_v46, %v6703_v43  ;;  %v6848_v13 = vld [vmem:[%s11666_s25 + $0x1d8] sm:$0xff] }
 0x599   : > { %v6707_v23 = vsel %vm6451_vm6, %v9416_v3, %v6579_v1  ;;  %v6960_v10 = vmul.f32 %v6832_v63, %v6704_v19  ;;  %v6851_v3 = vld [vmem:[%s11666_s25 + $0x1f0] sm:$0xff] }
 0x59a   : > { %v6708_v16 = vsel %vm6452_vm7, %v9417_v55, %v6580_v27  ;;  %v6306_v51 = vpop.f32.mrb[216].mxu1  ;;  %v6963_v8 = vmul.f32 %v6835_v24, %v6707_v23  ;;  %v6852_v55 = vld [vmem:[%s11666_s25 + $0x1f8] sm:$0xff] }
 0x59b   : > { %v9418_v4 = vadd.f32 %v6306_v51, %v13976_v52  ;;  %v6308_v58 = vpop.f32.mrb[217].mxu1  ;;  %v6964_v11 = vmul.f32 %v6836_v7, %v6708_v16 }
 0x59c   : > { %v9419_v18 = vadd.f32 %v6308_v58, %v13980_v30  ;;  %v6310_v62 = vpop.f32.mrb[218].mxu1  ;;  %v7067_v25 = vpack.c.bf16 %v6963_v8, %v6959_v38 }
 0x59d   : > { %vm6455_vm8 = vcmp.gt.f32.partialorder %v9418_v4, 0.0  ;;  %v6583_v56 = vmul.f32 0.2, %v9418_v4  ;;  %v9420_v20 = vadd.f32 %v6310_v62, %v13976_v52  ;;  %v6312_v49 = vpop.f32.mrb[219].mxu1  ;;  %v7068_v15 = vpack.c.bf16 %v6964_v11, %v6960_v10 }
 0x59e   : > { %vm6456_vm9 = vcmp.gt.f32.partialorder %v9419_v18, 0.0  ;;  %v6584_v41 = vmul.f32 0.2, %v9419_v18  ;;  %v9421_v45 = vadd.f32 %v6312_v49, %v13980_v30 }
 0x59f   : > { %v6711_v42 = vsel %vm6455_vm8, %v9418_v4, %v6583_v56  ;;  %vm6459_vm10 = vcmp.gt.f32.partialorder %v9420_v20, 0.0  ;;  %v6587_v59 = vmul.f32 0.2, %v9420_v20  ;;  %7780 = vmatprep.mubr.bf16.mxu0 %v7068_v15  ;;  %v6855_v56 = vld [vmem:[%s11666_s25 + $0x210] sm:$0xff] }
 0x5a0   : > { %v6712_v21 = vsel %vm6456_vm9, %v9419_v18, %v6584_v41  ;;  %vm6460_vm11 = vcmp.gt.f32.partialorder %v9421_v45, 0.0  ;;  %v6588_v61 = vmul.f32 0.2, %v9421_v45  ;;  %7781 = vmatmul.mubr.bf16.gmra.mrb[148].mxu0 %v7067_v25  ;;  %v6967_v40 = vmul.f32 %v6839_v50, %v6711_v42  ;;  %v6856_v41 = vld [vmem:[%s11666_s25 + $0x218] sm:$0xff] }
 0x5a1   : > { %v6715_v47 = vsel %vm6459_vm10, %v9420_v20, %v6587_v59  ;;  %v6968_v34 = vmul.f32 %v6840_v12, %v6712_v21  ;;  %v6859_v20 = vld [vmem:[%s11666_s25 + $0x230] sm:$0xff] }
 0x5a2   : > { %v6716_v29 = vsel %vm6460_vm11, %v9421_v45, %v6588_v61  ;;  %v6316_v35 = vpop.f32.mrb[220].mxu1  ;;  %v6971_v48 = vmul.f32 %v6843_v6, %v6715_v47  ;;  %v6860_v45 = vld [vmem:[%s11666_s25 + $0x238] sm:$0xff] }
 0x5a3   : > { %v9422_v57 = vadd.f32 %v6316_v35, %v13976_v52  ;;  %v6318_v9 = vpop.f32.mrb[221].mxu1  ;;  %v6972_v5 = vmul.f32 %v6844_v33, %v6716_v29 }
 0x5a4   : > { %v9423_v22 = vadd.f32 %v6318_v9, %v13980_v30  ;;  %v6320_v37 = vpop.f32.mrb[222].mxu1  ;;  %v7071_v36 = vpack.c.bf16 %v6971_v48, %v6967_v40 }
 0x5a5   : > { %vm6463_vm12 = vcmp.gt.f32.partialorder %v9422_v57, 0.0  ;;  %v6591_v28 = vmul.f32 0.2, %v9422_v57  ;;  %v9424_v39 = vadd.f32 %v6320_v37, %v13976_v52  ;;  %v6322_v54 = vpop.f32.mrb[223].mxu1  ;;  %v7072_v60 = vpack.c.bf16 %v6972_v5, %v6968_v34 }
 0x5a6   : > { %vm6464_vm13 = vcmp.gt.f32.partialorder %v9423_v22, 0.0  ;;  %v6592_v14 = vmul.f32 0.2, %v9423_v22  ;;  %v9425_v44 = vadd.f32 %v6322_v54, %v13980_v30 }
 0x5a7   : > { %v6719_v0 = vsel %vm6463_vm12, %v9422_v57, %v6591_v28  ;;  %vm6467_vm14 = vcmp.gt.f32.partialorder %v9424_v39, 0.0  ;;  %v6595_v26 = vmul.f32 0.2, %v9424_v39  ;;  %7790 = vmatprep.mubr.bf16.mxu0 %v7072_v60  ;;  %v6863_v28 = vld [vmem:[%s11666_s25 + $0x250] sm:$0xff] }
 0x5a8   : > { %v6720_v32 = vsel %vm6464_vm13, %v9423_v22, %v6592_v14  ;;  %vm6468_vm15 = vcmp.gt.f32.partialorder %v9425_v44, 0.0  ;;  %v6596_v31 = vmul.f32 0.2, %v9425_v44  ;;  %7791 = vmatmul.mubr.bf16.gmra.mrb[152].mxu0 %v7071_v36  ;;  %v6975_v24 = vmul.f32 %v6847_v2, %v6719_v0  ;;  %v6864_v14 = vld [vmem:[%s11666_s25 + $0x258] sm:$0xff] }
 0x5a9   : > { %v6723_v43 = vsel %vm6467_vm14, %v9424_v39, %v6595_v26  ;;  %v6976_v7 = vmul.f32 %v6848_v13, %v6720_v32  ;;  %v6867_v39 = vld [vmem:[%s11666_s25 + $0x270] sm:$0xff] }
 0x5aa   : > { %v6724_v1 = vsel %vm6468_vm15, %v9425_v44, %v6596_v31  ;;  %v6326_v46 = vpop.f32.mrb[224].mxu1  ;;  %v6979_v19 = vmul.f32 %v6851_v3, %v6723_v43  ;;  %v6868_v44 = vld [vmem:[%s11666_s25 + $0x278] sm:$0xff] }
 0x5ab   : > { %v9426_v27 = vadd.f32 %v6326_v46, %v13976_v52  ;;  %v6328_v63 = vpop.f32.mrb[225].mxu1  ;;  %v6980_v23 = vmul.f32 %v6852_v55, %v6724_v1 }
 0x5ac   : > { %v9427_v16 = vadd.f32 %v6328_v63, %v13980_v30  ;;  %v6330_v51 = vpop.f32.mrb[226].mxu1  ;;  %v7075_v38 = vpack.c.bf16 %v6979_v19, %v6975_v24 }
 0x5ad   : > { %vm6471_vm0 = vcmp.gt.f32.partialorder %v9426_v27, 0.0  ;;  %v6599_v8 = vmul.f32 0.2, %v9426_v27  ;;  %v9428_v4 = vadd.f32 %v6330_v51, %v13976_v52  ;;  %v6332_v58 = vpop.f32.mrb[227].mxu1  ;;  %v7076_v10 = vpack.c.bf16 %v6980_v23, %v6976_v7 }
 0x5ae   : > { %vm6472_vm1 = vcmp.gt.f32.partialorder %v9427_v16, 0.0  ;;  %v6600_v11 = vmul.f32 0.2, %v9427_v16  ;;  %v9429_v18 = vadd.f32 %v6332_v58, %v13980_v30 }
 0x5af   : > { %v6727_v62 = vsel %vm6471_vm0, %v9426_v27, %v6599_v8  ;;  %vm6475_vm2 = vcmp.gt.f32.partialorder %v9428_v4, 0.0  ;;  %v6603_v25 = vmul.f32 0.2, %v9428_v4  ;;  %7800 = vmatprep.mubr.bf16.mxu0 %v7076_v10  ;;  %v6871_v8 = vld [vmem:[%s11666_s25 + $0x290] sm:$0xff] }
 0x5b0   : > { %v6728_v49 = vsel %vm6472_vm1, %v9427_v16, %v6600_v11  ;;  %vm6476_vm3 = vcmp.gt.f32.partialorder %v9429_v18, 0.0  ;;  %v6604_v15 = vmul.f32 0.2, %v9429_v18  ;;  %7801 = vmatmul.mubr.bf16.gmra.mrb[156].mxu0 %v7075_v38  ;;  %v6983_v6 = vmul.f32 %v6855_v56, %v6727_v62  ;;  %v6872_v11 = vld [vmem:[%s11666_s25 + $0x298] sm:$0xff] }
 0x5b1   : > { %v6731_v42 = vsel %vm6475_vm2, %v9428_v4, %v6603_v25  ;;  %v6984_v33 = vmul.f32 %v6856_v41, %v6728_v49  ;;  %v6875_v4 = vld [vmem:[%s11666_s25 + $0x2b0] sm:$0xff] }
 0x5b2   : > { %v6732_v59 = vsel %vm6476_vm3, %v9429_v18, %v6604_v15  ;;  %v6336_v50 = vpop.f32.mrb[228].mxu1  ;;  %v6987_v21 = vmul.f32 %v6859_v20, %v6731_v42  ;;  %v6876_v18 = vld [vmem:[%s11666_s25 + $0x2b8] sm:$0xff] }
 0x5b3   : > { %v9430_v61 = vadd.f32 %v6336_v50, %v13976_v52  ;;  %v6338_v12 = vpop.f32.mrb[229].mxu1  ;;  %v6988_v47 = vmul.f32 %v6860_v45, %v6732_v59 }
 0x5b4   : > { %v9431_v29 = vadd.f32 %v6338_v12, %v13980_v30  ;;  %v6340_v35 = vpop.f32.mrb[230].mxu1  ;;  %v7079_v40 = vpack.c.bf16 %v6987_v21, %v6983_v6 }
 0x5b5   : > { %vm6479_vm4 = vcmp.gt.f32.partialorder %v9430_v61, 0.0  ;;  %v6607_v48 = vmul.f32 0.2, %v9430_v61  ;;  %v9432_v57 = vadd.f32 %v6340_v35, %v13976_v52  ;;  %v6342_v9 = vpop.f32.mrb[231].mxu1  ;;  %v7080_v34 = vpack.c.bf16 %v6988_v47, %v6984_v33 }
 0x5b6   : > { %vm6480_vm5 = vcmp.gt.f32.partialorder %v9431_v29, 0.0  ;;  %v6608_v5 = vmul.f32 0.2, %v9431_v29  ;;  %v9433_v22 = vadd.f32 %v6342_v9, %v13980_v30 }
 0x5b7   : > { %v6735_v37 = vsel %vm6479_vm4, %v9430_v61, %v6607_v48  ;;  %vm6483_vm6 = vcmp.gt.f32.partialorder %v9432_v57, 0.0  ;;  %v6611_v36 = vmul.f32 0.2, %v9432_v57  ;;  %7810 = vmatprep.mubr.bf16.mxu0 %v7080_v34  ;;  %v6879_v48 = vld [vmem:[%s11666_s25 + $0x2d0] sm:$0xff] }
 0x5b8   : > { %v6736_v54 = vsel %vm6480_vm5, %v9431_v29, %v6608_v5  ;;  %vm6484_vm7 = vcmp.gt.f32.partialorder %v9433_v22, 0.0  ;;  %v6612_v60 = vmul.f32 0.2, %v9433_v22  ;;  %7811 = vmatmul.mubr.bf16.gmra.mrb[160].mxu0 %v7079_v40  ;;  %v6991_v3 = vmul.f32 %v6863_v28, %v6735_v37  ;;  %v6880_v5 = vld [vmem:[%s11666_s25 + $0x2d8] sm:$0xff] }
 0x5b9   : > { %v6739_v0 = vsel %vm6483_vm6, %v9432_v57, %v6611_v36  ;;  %v6992_v55 = vmul.f32 %v6864_v14, %v6736_v54  ;;  %v6883_v57 = vld [vmem:[%s11666_s25 + $0x2f0] sm:$0xff] }
 0x5ba   : > { %v6740_v26 = vsel %vm6484_vm7, %v9433_v22, %v6612_v60  ;;  %v6346_v2 = vpop.f32.mrb[232].mxu1  ;;  %v6995_v32 = vmul.f32 %v6867_v39, %v6739_v0  ;;  %v6884_v22 = vld [vmem:[%s11666_s25 + $0x2f8] sm:$0xff] }
 0x5bb   : > { %v9434_v31 = vadd.f32 %v6346_v2, %v13976_v52  ;;  %v6348_v13 = vpop.f32.mrb[233].mxu1  ;;  %v6996_v43 = vmul.f32 %v6868_v44, %v6740_v26 }
 0x5bc   : > { %v9435_v1 = vadd.f32 %v6348_v13, %v13980_v30  ;;  %v6350_v46 = vpop.f32.mrb[234].mxu1  ;;  %v7083_v24 = vpack.c.bf16 %v6995_v32, %v6991_v3 }
 0x5bd   : > { %vm6487_vm8 = vcmp.gt.f32.partialorder %v9434_v31, 0.0  ;;  %v6615_v19 = vmul.f32 0.2, %v9434_v31  ;;  %v9436_v27 = vadd.f32 %v6350_v46, %v13976_v52  ;;  %v6352_v63 = vpop.f32.mrb[235].mxu1  ;;  %v7084_v7 = vpack.c.bf16 %v6996_v43, %v6992_v55 }
 0x5be   : > { %vm6488_vm9 = vcmp.gt.f32.partialorder %v9435_v1, 0.0  ;;  %v6616_v23 = vmul.f32 0.2, %v9435_v1  ;;  %v9437_v16 = vadd.f32 %v6352_v63, %v13980_v30 }
 0x5bf   : > { %v6743_v51 = vsel %vm6487_vm8, %v9434_v31, %v6615_v19  ;;  %vm6491_vm10 = vcmp.gt.f32.partialorder %v9436_v27, 0.0  ;;  %v6619_v38 = vmul.f32 0.2, %v9436_v27  ;;  %7820 = vmatprep.mubr.bf16.mxu0 %v7084_v7  ;;  %v6887_v19 = vld [vmem:[%s11666_s25 + $0x310] sm:$0xff] }
 0x5c0   : > { %v6744_v58 = vsel %vm6488_vm9, %v9435_v1, %v6616_v23  ;;  %vm6492_vm11 = vcmp.gt.f32.partialorder %v9437_v16, 0.0  ;;  %v6620_v10 = vmul.f32 0.2, %v9437_v16  ;;  %7821 = vmatmul.mubr.bf16.gmra.mrb[164].mxu0 %v7083_v24  ;;  %v6999_v20 = vmul.f32 %v6871_v8, %v6743_v51  ;;  %v6888_v23 = vld [vmem:[%s11666_s25 + $0x318] sm:$0xff] }
 0x5c1   : > { %v6747_v62 = vsel %vm6491_vm10, %v9436_v27, %v6619_v38  ;;  %v7000_v45 = vmul.f32 %v6872_v11, %v6744_v58  ;;  %v6891_v27 = vld [vmem:[%s11666_s25 + $0x330] sm:$0xff] }
 0x5c2   : > { %v6748_v25 = vsel %vm6492_vm11, %v9437_v16, %v6620_v10  ;;  %v6356_v56 = vpop.f32.mrb[236].mxu1  ;;  %v7003_v49 = vmul.f32 %v6875_v4, %v6747_v62  ;;  %v6892_v16 = vld [vmem:[%s11666_s25 + $0x338] sm:$0xff] }
 0x5c3   : > { %v9438_v15 = vadd.f32 %v6356_v56, %v13976_v52  ;;  %v6358_v41 = vpop.f32.mrb[237].mxu1  ;;  %v7004_v42 = vmul.f32 %v6876_v18, %v6748_v25 }
 0x5c4   : > { %v9439_v59 = vadd.f32 %v6358_v41, %v13980_v30  ;;  %v6360_v50 = vpop.f32.mrb[238].mxu1  ;;  %v7087_v6 = vpack.c.bf16 %v7003_v49, %v6999_v20 }
 0x5c5   : > { %vm6495_vm12 = vcmp.gt.f32.partialorder %v9438_v15, 0.0  ;;  %v6623_v21 = vmul.f32 0.2, %v9438_v15  ;;  %v9440_v61 = vadd.f32 %v6360_v50, %v13976_v52  ;;  %v6362_v12 = vpop.f32.mrb[239].mxu1  ;;  %v7088_v33 = vpack.c.bf16 %v7004_v42, %v7000_v45 }
 0x5c6   : > { %vm6496_vm13 = vcmp.gt.f32.partialorder %v9439_v59, 0.0  ;;  %v6624_v47 = vmul.f32 0.2, %v9439_v59  ;;  %v9441_v29 = vadd.f32 %v6362_v12, %v13980_v30 }
 0x5c7   : > { %v6751_v35 = vsel %vm6495_vm12, %v9438_v15, %v6623_v21  ;;  %vm6499_vm14 = vcmp.gt.f32.partialorder %v9440_v61, 0.0  ;;  %v6627_v40 = vmul.f32 0.2, %v9440_v61  ;;  %7830 = vmatprep.mubr.bf16.mxu0 %v7088_v33  ;;  %v6895_v21 = vld [vmem:[%s11666_s25 + $0x350] sm:$0xff] }
 0x5c8   : > { %v6752_v9 = vsel %vm6496_vm13, %v9439_v59, %v6624_v47  ;;  %vm6500_vm15 = vcmp.gt.f32.partialorder %v9441_v29, 0.0  ;;  %v6628_v34 = vmul.f32 0.2, %v9441_v29  ;;  %7831 = vmatmul.mubr.bf16.gmra.mrb[168].mxu0 %v7087_v6  ;;  %v7007_v39 = vmul.f32 %v6879_v48, %v6751_v35  ;;  %v6896_v47 = vld [vmem:[%s11666_s25 + $0x358] sm:$0xff] }
 0x5c9   : > { %v6755_v37 = vsel %vm6499_vm14, %v9440_v61, %v6627_v40  ;;  %v7008_v44 = vmul.f32 %v6880_v5, %v6752_v9  ;;  %v6899_v61 = vld [vmem:[%s11666_s25 + $0x370] sm:$0xff] }
 0x5ca   : > { %v6756_v36 = vsel %vm6500_vm15, %v9441_v29, %v6628_v34  ;;  %v6366_v28 = vpop.f32.mrb[240].mxu1  ;;  %v7011_v54 = vmul.f32 %v6883_v57, %v6755_v37  ;;  %v6900_v29 = vld [vmem:[%s11666_s25 + $0x378] sm:$0xff] }
 0x5cb   : > { %v9442_v60 = vadd.f32 %v6366_v28, %v13976_v52  ;;  %v6368_v14 = vpop.f32.mrb[241].mxu1  ;;  %v7012_v0 = vmul.f32 %v6884_v22, %v6756_v36 }
 0x5cc   : > { %v9443_v26 = vadd.f32 %v6368_v14, %v13980_v30  ;;  %v6370_v2 = vpop.f32.mrb[242].mxu1  ;;  %v7091_v3 = vpack.c.bf16 %v7011_v54, %v7007_v39 }
 0x5cd   : > { %vm6503_vm0 = vcmp.gt.f32.partialorder %v9442_v60, 0.0  ;;  %v6631_v32 = vmul.f32 0.2, %v9442_v60  ;;  %v9444_v31 = vadd.f32 %v6370_v2, %v13976_v52  ;;  %v6372_v13 = vpop.f32.mrb[243].mxu1  ;;  %v7092_v55 = vpack.c.bf16 %v7012_v0, %v7008_v44 }
 0x5ce   : > { %vm6504_vm1 = vcmp.gt.f32.partialorder %v9443_v26, 0.0  ;;  %v6632_v43 = vmul.f32 0.2, %v9443_v26  ;;  %v9445_v1 = vadd.f32 %v6372_v13, %v13980_v30 }
 0x5cf   : > { %v6759_v46 = vsel %vm6503_vm0, %v9442_v60, %v6631_v32  ;;  %vm6507_vm2 = vcmp.gt.f32.partialorder %v9444_v31, 0.0  ;;  %v6635_v24 = vmul.f32 0.2, %v9444_v31  ;;  %7840 = vmatprep.mubr.bf16.mxu0 %v7092_v55  ;;  %v6903_v32 = vld [vmem:[%s11666_s25 + $0x390] sm:$0xff] }
 0x5d0   : > { %v6760_v63 = vsel %vm6504_vm1, %v9443_v26, %v6632_v43  ;;  %vm6508_vm3 = vcmp.gt.f32.partialorder %v9445_v1, 0.0  ;;  %v6636_v7 = vmul.f32 0.2, %v9445_v1  ;;  %7841 = vmatmul.mubr.bf16.gmra.mrb[172].mxu0 %v7091_v3  ;;  %v7015_v4 = vmul.f32 %v6887_v19, %v6759_v46  ;;  %v6904_v43 = vld [vmem:[%s11666_s25 + $0x398] sm:$0xff] }
 0x5d1   : > { %v6763_v51 = vsel %vm6507_vm2, %v9444_v31, %v6635_v24  ;;  %v7016_v18 = vmul.f32 %v6888_v23, %v6760_v63  ;;  %v6907_v31 = vld [vmem:[%s11666_s25 + $0x3b0] sm:$0xff] }
 0x5d2   : > { %v6764_v38 = vsel %vm6508_vm3, %v9445_v1, %v6636_v7  ;;  %v6376_v8 = vpop.f32.mrb[244].mxu1  ;;  %v7019_v58 = vmul.f32 %v6891_v27, %v6763_v51  ;;  %v6908_v1 = vld [vmem:[%s11666_s25 + $0x3b8] sm:$0xff] }
 0x5d3   : > { %v9446_v10 = vadd.f32 %v6376_v8, %v13976_v52  ;;  %v6378_v11 = vpop.f32.mrb[245].mxu1  ;;  %v7020_v62 = vmul.f32 %v6892_v16, %v6764_v38 }
 0x5d4   : > { %v9447_v25 = vadd.f32 %v6378_v11, %v13980_v30  ;;  %v6380_v56 = vpop.f32.mrb[246].mxu1  ;;  %v7095_v20 = vpack.c.bf16 %v7019_v58, %v7015_v4 }
 0x5d5   : > { %vm6511_vm4 = vcmp.gt.f32.partialorder %v9446_v10, 0.0  ;;  %v6639_v49 = vmul.f32 0.2, %v9446_v10  ;;  %v9448_v15 = vadd.f32 %v6380_v56, %v13976_v52  ;;  %v6382_v41 = vpop.f32.mrb[247].mxu1  ;;  %v7096_v45 = vpack.c.bf16 %v7020_v62, %v7016_v18 }
 0x5d6   : > { %vm6512_vm5 = vcmp.gt.f32.partialorder %v9447_v25, 0.0  ;;  %v6640_v42 = vmul.f32 0.2, %v9447_v25  ;;  %v9449_v59 = vadd.f32 %v6382_v41, %v13980_v30 }
 0x5d7   : > { %v6767_v50 = vsel %vm6511_vm4, %v9446_v10, %v6639_v49  ;;  %vm6515_vm6 = vcmp.gt.f32.partialorder %v9448_v15, 0.0  ;;  %v6643_v6 = vmul.f32 0.2, %v9448_v15  ;;  %7850 = vmatprep.mubr.bf16.mxu0 %v7096_v45  ;;  %v6911_v49 = vld [vmem:[%s11666_s25 + $0x3d0] sm:$0xff] }
 0x5d8   : > { %v6768_v12 = vsel %vm6512_vm5, %v9447_v25, %v6640_v42  ;;  %vm6516_vm7 = vcmp.gt.f32.partialorder %v9449_v59, 0.0  ;;  %v6644_v33 = vmul.f32 0.2, %v9449_v59  ;;  %7851 = vmatmul.mubr.bf16.gmra.mrb[176].mxu0 %v7095_v20  ;;  %v7023_v57 = vmul.f32 %v6895_v21, %v6767_v50  ;;  %v6912_v42 = vld [vmem:[%s11666_s25 + $0x3d8] sm:$0xff] }
 0x5d9   : > { %v6771_v35 = vsel %vm6515_vm6, %v9448_v15, %v6643_v6  ;;  %v7024_v22 = vmul.f32 %v6896_v47, %v6768_v12  ;;  %v6915_v15 = vld [vmem:[%s11666_s25 + $0x3f0] sm:$0xff]  ;;  %v7173_v47 = vld [vmem:[#allocation16] sm:$0x3] }
 0x5da   : > { %v6772_v40 = vsel %vm6516_vm7, %v9449_v59, %v6644_v33  ;;  %v6386_v48 = vpop.f32.mrb[248].mxu1  ;;  %v7027_v9 = vmul.f32 %v6899_v61, %v6771_v35  ;;  %v14114_v35 = vrot.slane %v7173_v47, %v14911_v53 }
 0x5db   : > { %v9450_v34 = vadd.f32 %v6386_v48, %v13976_v52  ;;  %v6388_v5 = vpop.f32.mrb[249].mxu1  ;;  %v7028_v37 = vmul.f32 %v6900_v29, %v6772_v40  ;;  %v14111_v29 = vrot.slane %v7173_v47, %v14910_v17 }
 0x5dc   : > { %v9451_v36 = vadd.f32 %v6388_v5, %v13980_v30  ;;  %v6390_v28 = vpop.f32.mrb[250].mxu1  ;;  %v7099_v39 = vpack.c.bf16 %v7027_v9, %v7023_v57  ;;  %v8211_v9 = vld [vmem:[#allocation18] sm:$0x3] }
 0x5dd   : > { %vm6519_vm8 = vcmp.gt.f32.partialorder %v9450_v34, 0.0  ;;  %v6647_v54 = vmul.f32 0.2, %v9450_v34  ;;  %v9452_v60 = vadd.f32 %v6390_v28, %v13976_v52  ;;  %v6392_v14 = vpop.f32.mrb[251].mxu1  ;;  %v7100_v44 = vpack.c.bf16 %v7028_v37, %v7024_v22  ;;  %v8083_v28 = vld [vmem:[%s11681_s15] sm:$0xff] }
 0x5de   : > { %vm6520_vm9 = vcmp.gt.f32.partialorder %v9451_v36, 0.0  ;;  %v6648_v0 = vmul.f32 0.2, %v9451_v36  ;;  %v9453_v26 = vadd.f32 %v6392_v14, %v13980_v30  ;;  %v14123_v14 = vrot.slane %v8211_v9, %v14910_v17 }
 0x5df   : > { %v6775_v2 = vsel %vm6519_vm8, %v9450_v34, %v6647_v54  ;;  %vm6523_vm10 = vcmp.gt.f32.partialorder %v9452_v60, 0.0  ;;  %v6651_v3 = vmul.f32 0.2, %v9452_v60  ;;  %7860 = vmatprep.mubr.bf16.mxu0 %v7100_v44 }
 0x5e0   : > { %v6776_v13 = vsel %vm6520_vm9, %v9451_v36, %v6648_v0  ;;  %vm6524_vm11 = vcmp.gt.f32.partialorder %v9453_v26, 0.0  ;;  %v6652_v55 = vmul.f32 0.2, %v9453_v26  ;;  %7861 = vmatmul.mubr.bf16.gmra.mrb[180].mxu0 %v7099_v39  ;;  %v7031_v27 = vmul.f32 %v6903_v32, %v6775_v2  ;;  %v8085_v2 = vld [vmem:[%s11681_s15 + $0x10] sm:$0xff] }
 0x5e1   : > { %v6779_v46 = vsel %vm6523_vm10, %v9452_v60, %v6651_v3  ;;  %v7032_v16 = vmul.f32 %v6904_v43, %v6776_v13  ;;  %v8084_v60 = vld [vmem:[%s11681_s15 + $0x8] sm:$0xff]  ;;  %v8086_v13 = vld [vmem:[%s11681_s15 + $0x18] sm:$0xff] }
 0x5e2   : > { %v6780_v24 = vsel %vm6524_vm11, %v9453_v26, %v6652_v55  ;;  %v6396_v19 = vpop.f32.mrb[252].mxu1  ;;  %v7035_v63 = vmul.f32 %v6907_v31, %v6779_v46  ;;  %v14126_v26 = vrot.slane %v8211_v9, %v14911_v53 }
 0x5e3   : > { %v9454_v7 = vadd.f32 %v6396_v19, %v13976_v52  ;;  %v6398_v23 = vpop.f32.mrb[253].mxu1  ;;  %v7036_v51 = vmul.f32 %v6908_v1, %v6780_v24 }
 0x5e4   : > { %v9455_v38 = vadd.f32 %v6398_v23, %v13980_v30  ;;  %v6400_v8 = vpop.f32.mrb[254].mxu1  ;;  %v7103_v4 = vpack.c.bf16 %v7035_v63, %v7031_v27 }
 0x5e5   : > { %vm6527_vm12 = vcmp.gt.f32.partialorder %v9454_v7, 0.0  ;;  %v6655_v58 = vmul.f32 0.2, %v9454_v7  ;;  %v9456_v10 = vadd.f32 %v6400_v8, %v13976_v52  ;;  %v6402_v11 = vpop.f32.mrb[255].mxu1  ;;  %v7104_v18 = vpack.c.bf16 %v7036_v51, %v7032_v16  ;;  %v6916_v52 = vld [vmem:[%s11666_s25 + $0x3f8] sm:$0xff] }
 0x5e6   : > { %vm6528_vm13 = vcmp.gt.f32.partialorder %v9455_v38, 0.0  ;;  %v6656_v62 = vmul.f32 0.2, %v9455_v38  ;;  %v9457_v25 = vadd.f32 %v6402_v11, %v13980_v30 }
 0x5e7   : > { %v6783_v56 = vsel %vm6527_vm12, %v9454_v7, %v6655_v58  ;;  %vm6531_vm14 = vcmp.gt.f32.partialorder %v9456_v10, 0.0  ;;  %v6659_v20 = vmul.f32 0.2, %v9456_v10  ;;  %7870 = vmatprep.mubr.bf16.mxu0 %v7104_v18  ;;  %v8087_v18 = vld [vmem:[%s11681_s15 + $0x20] sm:$0xff] }
 0x5e8   : > { %v6784_v41 = vsel %vm6528_vm13, %v9455_v38, %v6656_v62  ;;  %vm6532_vm15 = vcmp.gt.f32.partialorder %v9457_v25, 0.0  ;;  %v6660_v45 = vmul.f32 0.2, %v9457_v25  ;;  %7871 = vmatmul.mubr.bf16.gmra.mrb[184].mxu0 %v7103_v4  ;;  %v7039_v6 = vmul.f32 %v6911_v49, %v6783_v56  ;;  %v8088_v62 = vld [vmem:[%s11681_s15 + $0x28] sm:$0xff] }
 0x5e9   : > { %v6787_v59 = vsel %vm6531_vm14, %v9456_v10, %v6659_v20  ;;  %v7040_v61 = vmul.f32 %v6912_v42, %v6784_v41  ;;  %v8089_v20 = vld [vmem:[%s11681_s15 + $0x30] sm:$0xff] }
 0x5ea   : > { %v6788_v50 = vsel %vm6532_vm15, %v9457_v25, %v6660_v45  ;;  %v7043_v21 = vmul.f32 %v6915_v15, %v6787_v59  ;;  %v8090_v45 = vld [vmem:[%s11681_s15 + $0x38] sm:$0xff] }
 0x5eb   : > { %v7044_v12 = vmul.f32 %v6916_v52, %v6788_v50 }
 0x5ec   : > { %v7107_v33 = vpack.c.bf16 %v7043_v21, %v7039_v6 }
 0x5ed   : > { %v7108_v30 = vpack.c.bf16 %v7044_v12, %v7040_v61 }
 0x5ef   : > { %7880 = vmatprep.mubr.bf16.mxu0 %v7108_v30 }
 0x5f0   : > { %7881 = vmatmul.mubr.bf16.gmra.mrb[188].mxu0 %v7107_v33 }
 0x64b   : > { %v7732_v40 = vpop.f32.mrb[128].mxu0 }
 0x64c   : > { %v9458_v48 = vadd.f32 %v7732_v40, %v14111_v29  ;;  %v7734_v57 = vpop.f32.mrb[129].mxu0 }
 0x64d   : > { %v9459_v34 = vadd.f32 %v7734_v57, %v14114_v35  ;;  %v7736_v5 = vpop.f32.mrb[130].mxu0 }
 0x64e   : > { %vm7891_vm0 = vcmp.gt.f32.partialorder %v9458_v48, 0.0  ;;  %v7955_v22 = vmul.f32 0.2, %v9458_v48  ;;  %v9460_v37 = vadd.f32 %v7736_v5, %v14111_v29  ;;  %v7738_v36 = vpop.f32.mrb[131].mxu0 }
 0x64f   : > { %vm7892_vm1 = vcmp.gt.f32.partialorder %v9459_v34, 0.0  ;;  %v7956_v39 = vmul.f32 0.2, %v9459_v34  ;;  %v9461_v54 = vadd.f32 %v7738_v36, %v14114_v35 }
 0x650   : > { %vm7893_vm2 = vcmp.gt.f32.partialorder %v9460_v37, 0.0  ;;  %v7957_v44 = vmul.f32 0.2, %v9460_v37  ;;  %v8019_v0 = vsel %vm7891_vm0, %v9458_v48, %v7955_v22 }
 0x651   : > { %vm7894_vm3 = vcmp.gt.f32.partialorder %v9461_v54, 0.0  ;;  %v7958_v3 = vmul.f32 0.2, %v9461_v54  ;;  %v8020_v32 = vsel %vm7892_vm1, %v9459_v34, %v7956_v39  ;;  %v8147_v31 = vmul.f32 %v8083_v28, %v8019_v0  ;;  %v8091_v39 = vld [vmem:[%s11681_s15 + $0x40] sm:$0xff]  ;;  %v8093_v0 = vld [vmem:[%s11681_s15 + $0x50] sm:$0xff] }
 0x652   : > { %v8021_v55 = vsel %vm7893_vm2, %v9460_v37, %v7957_v44  ;;  %v8148_v43 = vmul.f32 %v8084_v60, %v8020_v32 }
 0x653   : > { %v8022_v1 = vsel %vm7894_vm3, %v9461_v54, %v7958_v3  ;;  %v7742_v46 = vpop.f32.mrb[132].mxu0  ;;  %v8223_v24 = vmul.f32 %v14123_v14, %v8147_v31  ;;  %v8149_v17 = vmul.f32 %v8085_v2, %v8021_v55  ;;  %v8092_v54 = vld [vmem:[%s11681_s15 + $0x48] sm:$0xff]  ;;  %v8094_v31 = vld [vmem:[%s11681_s15 + $0x58] sm:$0xff] }
 0x654   : > { %v9462_v19 = vadd.f32 %v7742_v46, %v14111_v29  ;;  %v7744_v27 = vpop.f32.mrb[133].mxu0  ;;  %v8224_v53 = vmul.f32 %v14126_v26, %v8148_v43  ;;  %v8150_v63 = vmul.f32 %v8086_v13, %v8022_v1 }
 0x655   : > { %v9463_v7 = vadd.f32 %v7744_v27, %v14114_v35  ;;  %v7746_v23 = vpop.f32.mrb[134].mxu0  ;;  %v8225_v16 = vmul.f32 %v14123_v14, %v8149_v17 }
 0x656   : > { %vm7895_vm4 = vcmp.gt.f32.partialorder %v9462_v19, 0.0  ;;  %v7959_v51 = vmul.f32 0.2, %v9462_v19  ;;  %v9464_v38 = vadd.f32 %v7746_v23, %v14111_v29  ;;  %v7748_v8 = vpop.f32.mrb[135].mxu0  ;;  %v8287_v4 = vadd.f32 %v8224_v53, %v8223_v24 }
 0x657   : > { %vm7896_vm5 = vcmp.gt.f32.partialorder %v9463_v7, 0.0  ;;  %v7960_v58 = vmul.f32 0.2, %v9463_v7  ;;  %v9465_v10 = vadd.f32 %v7748_v8, %v14114_v35  ;;  %v8226_v11 = vmul.f32 %v14126_v26, %v8150_v63 }
 0x658   : > { %vm7897_vm6 = vcmp.gt.f32.partialorder %v9464_v38, 0.0  ;;  %v7961_v25 = vmul.f32 0.2, %v9464_v38  ;;  %8288 = vadd.xlane.f32.xlu0 %v8287_v4  ;;  %v8023_v56 = vsel %vm7895_vm4, %v9462_v19, %v7959_v51 }
 0x659   : > { %vm7898_vm7 = vcmp.gt.f32.partialorder %v9465_v10, 0.0  ;;  %v7962_v49 = vmul.f32 0.2, %v9465_v10  ;;  %v8290_v15 = vadd.f32 %v8226_v11, %v8225_v16  ;;  %v8024_v41 = vsel %vm7896_vm5, %v9463_v7, %v7960_v58 }
 0x65a   : > { %v8025_v42 = vsel %vm7897_vm6, %v9464_v38, %v7961_v25  ;;  %v8151_v52 = vmul.f32 %v8087_v18, %v8023_v56  ;;  %v8152_v59 = vmul.f32 %v8088_v62, %v8024_v41  ;;  %v8095_v18 = vld [vmem:[%s11681_s15 + $0x60] sm:$0xff]  ;;  %v8096_v62 = vld [vmem:[%s11681_s15 + $0x68] sm:$0xff] }
 0x65b   : > { %v8026_v50 = vsel %vm7898_vm7, %v9465_v10, %v7962_v49  ;;  %v7752_v6 = vpop.f32.mrb[136].mxu0  ;;  %v8153_v21 = vmul.f32 %v8089_v20, %v8025_v42  ;;  %v8097_v20 = vld [vmem:[%s11681_s15 + $0x70] sm:$0xff] }
 0x65c   : > { %v9466_v61 = vadd.f32 %v7752_v6, %v14111_v29  ;;  %v7754_v12 = vpop.f32.mrb[137].mxu0  ;;  %8291 = vadd.xlane.f32.xlu0 %v8290_v15  ;;  %v8227_v33 = vmul.f32 %v14123_v14, %v8151_v52  ;;  %v8228_v30 = vmul.f32 %v14126_v26, %v8152_v59  ;;  %v8154_v47 = vmul.f32 %v8090_v45, %v8026_v50  ;;  %v8098_v45 = vld [vmem:[%s11681_s15 + $0x78] sm:$0xff] }
 0x65d   : > { %v9467_v40 = vadd.f32 %v7754_v12, %v14114_v35  ;;  %v7756_v48 = vpop.f32.mrb[138].mxu0  ;;  %v8229_v57 = vmul.f32 %v14123_v14, %v8153_v21 }
 0x65e   : > { %vm7899_vm8 = vcmp.gt.f32.partialorder %v9466_v61, 0.0  ;;  %v7963_v9 = vmul.f32 0.2, %v9466_v61  ;;  %v9468_v34 = vadd.f32 %v7756_v48, %v14111_v29  ;;  %v7758_v5 = vpop.f32.mrb[139].mxu0  ;;  %v8293_v22 = vadd.f32 %v8228_v30, %v8227_v33 }
 0x65f   : > { %vm7900_vm9 = vcmp.gt.f32.partialorder %v9467_v40, 0.0  ;;  %v7964_v37 = vmul.f32 0.2, %v9467_v40  ;;  %v9469_v36 = vadd.f32 %v7758_v5, %v14114_v35  ;;  %v8230_v28 = vmul.f32 %v14126_v26, %v8154_v47 }
 0x660   : > { %v8027_v60 = vsel %vm7899_vm8, %v9466_v61, %v7963_v9  ;;  %vm7901_vm10 = vcmp.gt.f32.partialorder %v9468_v34, 0.0  ;;  %v7965_v44 = vmul.f32 0.2, %v9468_v34  ;;  %8294 = vadd.xlane.f32.xlu1 %v8293_v22 }
 0x661   : > { %v8028_v2 = vsel %vm7900_vm9, %v9467_v40, %v7964_v37  ;;  %vm7902_vm11 = vcmp.gt.f32.partialorder %v9469_v36, 0.0  ;;  %v7966_v3 = vmul.f32 0.2, %v9469_v36  ;;  %v8296_v32 = vadd.f32 %v8230_v28, %v8229_v57 }
 0x662   : > { %v8029_v13 = vsel %vm7901_vm10, %v9468_v34, %v7965_v44  ;;  %v8155_v55 = vmul.f32 %v8091_v39, %v8027_v60  ;;  %v8156_v43 = vmul.f32 %v8092_v54, %v8028_v2  ;;  %v8099_v39 = vld [vmem:[%s11681_s15 + $0x80] sm:$0xff]  ;;  %v8100_v54 = vld [vmem:[%s11681_s15 + $0x88] sm:$0xff] }
 0x663   : > { %v8030_v1 = vsel %vm7902_vm11, %v9469_v36, %v7966_v3  ;;  %v7762_v46 = vpop.f32.mrb[140].mxu0  ;;  %v8157_v24 = vmul.f32 %v8093_v0, %v8029_v13  ;;  %v8101_v0 = vld [vmem:[%s11681_s15 + $0x90] sm:$0xff] }
 0x664   : > { %v9470_v17 = vadd.f32 %v7762_v46, %v14111_v29  ;;  %v7764_v19 = vpop.f32.mrb[141].mxu0  ;;  %8297 = vadd.xlane.f32.xlu1 %v8296_v32  ;;  %v8231_v27 = vmul.f32 %v14123_v14, %v8155_v55  ;;  %v8232_v53 = vmul.f32 %v14126_v26, %v8156_v43  ;;  %v8158_v63 = vmul.f32 %v8094_v31, %v8030_v1  ;;  %v8102_v31 = vld [vmem:[%s11681_s15 + $0x98] sm:$0xff] }
 0x665   : > { %v9471_v7 = vadd.f32 %v7764_v19, %v14114_v35  ;;  %v7766_v23 = vpop.f32.mrb[142].mxu0  ;;  %v8233_v16 = vmul.f32 %v14123_v14, %v8157_v24 }
 0x666   : > { %vm7903_vm12 = vcmp.gt.f32.partialorder %v9470_v17, 0.0  ;;  %v7967_v51 = vmul.f32 0.2, %v9470_v17  ;;  %v9472_v38 = vadd.f32 %v7766_v23, %v14111_v29  ;;  %v7768_v8 = vpop.f32.mrb[143].mxu0  ;;  %v8299_v4 = vadd.f32 %v8232_v53, %v8231_v27 }
 0x667   : > { %vm7904_vm13 = vcmp.gt.f32.partialorder %v9471_v7, 0.0  ;;  %v7968_v58 = vmul.f32 0.2, %v9471_v7  ;;  %v9473_v10 = vadd.f32 %v7768_v8, %v14114_v35  ;;  %v8234_v11 = vmul.f32 %v14126_v26, %v8158_v63 }
 0x668   : > { %v8031_v25 = vsel %vm7903_vm12, %v9470_v17, %v7967_v51  ;;  %vm7905_vm14 = vcmp.gt.f32.partialorder %v9472_v38, 0.0  ;;  %v7969_v56 = vmul.f32 0.2, %v9472_v38  ;;  %8300 = vadd.xlane.f32.xlu0 %v8299_v4 }
 0x669   : > { %v8032_v49 = vsel %vm7904_vm13, %v9471_v7, %v7968_v58  ;;  %vm7906_vm15 = vcmp.gt.f32.partialorder %v9473_v10, 0.0  ;;  %v7970_v15 = vmul.f32 0.2, %v9473_v10  ;;  %v8302_v41 = vadd.f32 %v8234_v11, %v8233_v16 }
 0x66a   : > { %v8033_v42 = vsel %vm7905_vm14, %v9472_v38, %v7969_v56  ;;  %v8159_v52 = vmul.f32 %v8095_v18, %v8031_v25  ;;  %v8160_v59 = vmul.f32 %v8096_v62, %v8032_v49  ;;  %v8103_v18 = vld [vmem:[%s11681_s15 + $0xa0] sm:$0xff]  ;;  %v8104_v62 = vld [vmem:[%s11681_s15 + $0xa8] sm:$0xff] }
 0x66b   : > { %v8034_v50 = vsel %vm7906_vm15, %v9473_v10, %v7970_v15  ;;  %8303 = vadd.xlane.f32.xlu1 %v8302_v41  ;;  %v7772_v6 = vpop.f32.mrb[144].mxu0  ;;  %v8161_v21 = vmul.f32 %v8097_v20, %v8033_v42  ;;  %v8105_v20 = vld [vmem:[%s11681_s15 + $0xb0] sm:$0xff] }
 0x66c   : > { %v9474_v61 = vadd.f32 %v7772_v6, %v14111_v29  ;;  %v7774_v12 = vpop.f32.mrb[145].mxu0  ;;  %v8235_v33 = vmul.f32 %v14123_v14, %v8159_v52  ;;  %v8236_v30 = vmul.f32 %v14126_v26, %v8160_v59  ;;  %v8162_v47 = vmul.f32 %v8098_v45, %v8034_v50  ;;  %v8106_v45 = vld [vmem:[%s11681_s15 + $0xb8] sm:$0xff] }
 0x66d   : > { %v9475_v40 = vadd.f32 %v7774_v12, %v14114_v35  ;;  %v7776_v48 = vpop.f32.mrb[146].mxu0  ;;  %v8237_v57 = vmul.f32 %v14123_v14, %v8161_v21 }
 0x66e   : > { %vm7907_vm0 = vcmp.gt.f32.partialorder %v9474_v61, 0.0  ;;  %v7971_v9 = vmul.f32 0.2, %v9474_v61  ;;  %v9476_v34 = vadd.f32 %v7776_v48, %v14111_v29  ;;  %v7778_v5 = vpop.f32.mrb[147].mxu0  ;;  %v8305_v22 = vadd.f32 %v8236_v30, %v8235_v33 }
 0x66f   : > { %vm7908_vm1 = vcmp.gt.f32.partialorder %v9475_v40, 0.0  ;;  %v7972_v37 = vmul.f32 0.2, %v9475_v40  ;;  %v9477_v36 = vadd.f32 %v7778_v5, %v14114_v35  ;;  %v8238_v28 = vmul.f32 %v14126_v26, %v8162_v47 }
 0x670   : > { %v8035_v60 = vsel %vm7907_vm0, %v9474_v61, %v7971_v9  ;;  %vm7909_vm2 = vcmp.gt.f32.partialorder %v9476_v34, 0.0  ;;  %v7973_v44 = vmul.f32 0.2, %v9476_v34  ;;  %8306 = vadd.xlane.f32.xlu0 %v8305_v22 }
 0x671   : > { %v8036_v2 = vsel %vm7908_vm1, %v9475_v40, %v7972_v37  ;;  %vm7910_vm3 = vcmp.gt.f32.partialorder %v9477_v36, 0.0  ;;  %v7974_v3 = vmul.f32 0.2, %v9477_v36  ;;  %v8308_v32 = vadd.f32 %v8238_v28, %v8237_v57 }
 0x672   : > { %v8037_v13 = vsel %vm7909_vm2, %v9476_v34, %v7973_v44  ;;  %v8163_v55 = vmul.f32 %v8099_v39, %v8035_v60  ;;  %v8164_v43 = vmul.f32 %v8100_v54, %v8036_v2  ;;  %v8107_v39 = vld [vmem:[%s11681_s15 + $0xc0] sm:$0xff]  ;;  %v8108_v54 = vld [vmem:[%s11681_s15 + $0xc8] sm:$0xff] }
 0x673   : > { %v8038_v1 = vsel %vm7910_vm3, %v9477_v36, %v7974_v3  ;;  %8309 = vadd.xlane.f32.xlu1 %v8308_v32  ;;  %v7782_v46 = vpop.f32.mrb[148].mxu0  ;;  %v8165_v24 = vmul.f32 %v8101_v0, %v8037_v13  ;;  %v8109_v0 = vld [vmem:[%s11681_s15 + $0xd0] sm:$0xff] }
 0x674   : > { %v9478_v17 = vadd.f32 %v7782_v46, %v14111_v29  ;;  %v7784_v19 = vpop.f32.mrb[149].mxu0  ;;  %v8239_v27 = vmul.f32 %v14123_v14, %v8163_v55  ;;  %v8240_v53 = vmul.f32 %v14126_v26, %v8164_v43  ;;  %v8166_v63 = vmul.f32 %v8102_v31, %v8038_v1  ;;  %v8110_v31 = vld [vmem:[%s11681_s15 + $0xd8] sm:$0xff] }
 0x675   : > { %v9479_v7 = vadd.f32 %v7784_v19, %v14114_v35  ;;  %v7786_v23 = vpop.f32.mrb[150].mxu0  ;;  %v8241_v16 = vmul.f32 %v14123_v14, %v8165_v24 }
 0x676   : > { %vm7911_vm4 = vcmp.gt.f32.partialorder %v9478_v17, 0.0  ;;  %v7975_v51 = vmul.f32 0.2, %v9478_v17  ;;  %v9480_v38 = vadd.f32 %v7786_v23, %v14111_v29  ;;  %v7788_v8 = vpop.f32.mrb[151].mxu0  ;;  %v8311_v4 = vadd.f32 %v8240_v53, %v8239_v27 }
 0x677   : > { %vm7912_vm5 = vcmp.gt.f32.partialorder %v9479_v7, 0.0  ;;  %v7976_v58 = vmul.f32 0.2, %v9479_v7  ;;  %v9481_v10 = vadd.f32 %v7788_v8, %v14114_v35  ;;  %v8242_v11 = vmul.f32 %v14126_v26, %v8166_v63 }
 0x678   : > { %v8039_v25 = vsel %vm7911_vm4, %v9478_v17, %v7975_v51  ;;  %vm7913_vm6 = vcmp.gt.f32.partialorder %v9480_v38, 0.0  ;;  %v7977_v56 = vmul.f32 0.2, %v9480_v38  ;;  %8312 = vadd.xlane.f32.xlu0 %v8311_v4 }
 0x679   : > { %v8040_v49 = vsel %vm7912_vm5, %v9479_v7, %v7976_v58  ;;  %vm7914_vm7 = vcmp.gt.f32.partialorder %v9481_v10, 0.0  ;;  %v7978_v15 = vmul.f32 0.2, %v9481_v10  ;;  %v8314_v41 = vadd.f32 %v8242_v11, %v8241_v16 }
 0x67a   : > { %v8041_v42 = vsel %vm7913_vm6, %v9480_v38, %v7977_v56  ;;  %v8167_v52 = vmul.f32 %v8103_v18, %v8039_v25  ;;  %v8168_v59 = vmul.f32 %v8104_v62, %v8040_v49  ;;  %v8111_v18 = vld [vmem:[%s11681_s15 + $0xe0] sm:$0xff]  ;;  %v8112_v62 = vld [vmem:[%s11681_s15 + $0xe8] sm:$0xff] }
 0x67b   : > { %v8042_v50 = vsel %vm7914_vm7, %v9481_v10, %v7978_v15  ;;  %8315 = vadd.xlane.f32.xlu1 %v8314_v41  ;;  %v7792_v6 = vpop.f32.mrb[152].mxu0  ;;  %v8169_v21 = vmul.f32 %v8105_v20, %v8041_v42  ;;  %v8113_v20 = vld [vmem:[%s11681_s15 + $0xf0] sm:$0xff] }
 0x67c   : > { %v9482_v61 = vadd.f32 %v7792_v6, %v14111_v29  ;;  %v7794_v12 = vpop.f32.mrb[153].mxu0  ;;  %v8243_v33 = vmul.f32 %v14123_v14, %v8167_v52  ;;  %v8244_v30 = vmul.f32 %v14126_v26, %v8168_v59  ;;  %v8170_v47 = vmul.f32 %v8106_v45, %v8042_v50  ;;  %v8114_v45 = vld [vmem:[%s11681_s15 + $0xf8] sm:$0xff] }
 0x67d   : > { %v9483_v40 = vadd.f32 %v7794_v12, %v14114_v35  ;;  %v7796_v48 = vpop.f32.mrb[154].mxu0  ;;  %v8245_v57 = vmul.f32 %v14123_v14, %v8169_v21 }
 0x67e   : > { %vm7915_vm8 = vcmp.gt.f32.partialorder %v9482_v61, 0.0  ;;  %v7979_v9 = vmul.f32 0.2, %v9482_v61  ;;  %v9484_v34 = vadd.f32 %v7796_v48, %v14111_v29  ;;  %v7798_v5 = vpop.f32.mrb[155].mxu0  ;;  %v8317_v22 = vadd.f32 %v8244_v30, %v8243_v33 }
 0x67f   : > { %vm7916_vm9 = vcmp.gt.f32.partialorder %v9483_v40, 0.0  ;;  %v7980_v37 = vmul.f32 0.2, %v9483_v40  ;;  %v9485_v36 = vadd.f32 %v7798_v5, %v14114_v35  ;;  %v8246_v28 = vmul.f32 %v14126_v26, %v8170_v47 }
 0x680   : > { %v8043_v60 = vsel %vm7915_vm8, %v9482_v61, %v7979_v9  ;;  %vm7917_vm10 = vcmp.gt.f32.partialorder %v9484_v34, 0.0  ;;  %v7981_v44 = vmul.f32 0.2, %v9484_v34  ;;  %8318 = vadd.xlane.f32.xlu0 %v8317_v22 }
 0x681   : > { %v8044_v2 = vsel %vm7916_vm9, %v9483_v40, %v7980_v37  ;;  %vm7918_vm11 = vcmp.gt.f32.partialorder %v9485_v36, 0.0  ;;  %v7982_v3 = vmul.f32 0.2, %v9485_v36  ;;  %v8320_v32 = vadd.f32 %v8246_v28, %v8245_v57 }
 0x682   : > { %v8045_v13 = vsel %vm7917_vm10, %v9484_v34, %v7981_v44  ;;  %v8171_v55 = vmul.f32 %v8107_v39, %v8043_v60  ;;  %v8172_v43 = vmul.f32 %v8108_v54, %v8044_v2  ;;  %v8115_v39 = vld [vmem:[%s11681_s15 + $0x100] sm:$0xff]  ;;  %v8116_v54 = vld [vmem:[%s11681_s15 + $0x108] sm:$0xff] }
 0x683   : > { %v8046_v1 = vsel %vm7918_vm11, %v9485_v36, %v7982_v3  ;;  %8321 = vadd.xlane.f32.xlu1 %v8320_v32  ;;  %v7802_v46 = vpop.f32.mrb[156].mxu0  ;;  %v8173_v24 = vmul.f32 %v8109_v0, %v8045_v13  ;;  %v8117_v0 = vld [vmem:[%s11681_s15 + $0x110] sm:$0xff] }
 0x684   : > { %v9486_v17 = vadd.f32 %v7802_v46, %v14111_v29  ;;  %v7804_v19 = vpop.f32.mrb[157].mxu0  ;;  %v8247_v27 = vmul.f32 %v14123_v14, %v8171_v55  ;;  %v8248_v53 = vmul.f32 %v14126_v26, %v8172_v43  ;;  %v8174_v63 = vmul.f32 %v8110_v31, %v8046_v1  ;;  %v8118_v31 = vld [vmem:[%s11681_s15 + $0x118] sm:$0xff] }
 0x685   : > { %v9487_v7 = vadd.f32 %v7804_v19, %v14114_v35  ;;  %v7806_v23 = vpop.f32.mrb[158].mxu0  ;;  %v8249_v16 = vmul.f32 %v14123_v14, %v8173_v24 }
 0x686   : > { %vm7919_vm12 = vcmp.gt.f32.partialorder %v9486_v17, 0.0  ;;  %v7983_v51 = vmul.f32 0.2, %v9486_v17  ;;  %v9488_v38 = vadd.f32 %v7806_v23, %v14111_v29  ;;  %v7808_v8 = vpop.f32.mrb[159].mxu0  ;;  %v8323_v4 = vadd.f32 %v8248_v53, %v8247_v27 }
 0x687   : > { %vm7920_vm13 = vcmp.gt.f32.partialorder %v9487_v7, 0.0  ;;  %v7984_v58 = vmul.f32 0.2, %v9487_v7  ;;  %v9489_v10 = vadd.f32 %v7808_v8, %v14114_v35  ;;  %v8250_v11 = vmul.f32 %v14126_v26, %v8174_v63 }
 0x688   : > { %v8047_v25 = vsel %vm7919_vm12, %v9486_v17, %v7983_v51  ;;  %vm7921_vm14 = vcmp.gt.f32.partialorder %v9488_v38, 0.0  ;;  %v7985_v56 = vmul.f32 0.2, %v9488_v38  ;;  %8324 = vadd.xlane.f32.xlu0 %v8323_v4 }
 0x689   : > { %v8048_v49 = vsel %vm7920_vm13, %v9487_v7, %v7984_v58  ;;  %vm7922_vm15 = vcmp.gt.f32.partialorder %v9489_v10, 0.0  ;;  %v7986_v15 = vmul.f32 0.2, %v9489_v10  ;;  %v8326_v41 = vadd.f32 %v8250_v11, %v8249_v16 }
 0x68a   : > { %v8049_v42 = vsel %vm7921_vm14, %v9488_v38, %v7985_v56  ;;  %v8175_v52 = vmul.f32 %v8111_v18, %v8047_v25  ;;  %v8176_v59 = vmul.f32 %v8112_v62, %v8048_v49  ;;  %v8119_v18 = vld [vmem:[%s11681_s15 + $0x120] sm:$0xff]  ;;  %v8120_v62 = vld [vmem:[%s11681_s15 + $0x128] sm:$0xff] }
 0x68b   : > { %v8050_v50 = vsel %vm7922_vm15, %v9489_v10, %v7986_v15  ;;  %8327 = vadd.xlane.f32.xlu1 %v8326_v41  ;;  %v7812_v6 = vpop.f32.mrb[160].mxu0  ;;  %v8177_v21 = vmul.f32 %v8113_v20, %v8049_v42  ;;  %v8121_v20 = vld [vmem:[%s11681_s15 + $0x130] sm:$0xff] }
 0x68c   : > { %v9490_v61 = vadd.f32 %v7812_v6, %v14111_v29  ;;  %v7814_v12 = vpop.f32.mrb[161].mxu0  ;;  %v8251_v33 = vmul.f32 %v14123_v14, %v8175_v52  ;;  %v8252_v30 = vmul.f32 %v14126_v26, %v8176_v59  ;;  %v8178_v47 = vmul.f32 %v8114_v45, %v8050_v50  ;;  %v8122_v45 = vld [vmem:[%s11681_s15 + $0x138] sm:$0xff] }
 0x68d   : > { %v9491_v40 = vadd.f32 %v7814_v12, %v14114_v35  ;;  %v7816_v48 = vpop.f32.mrb[162].mxu0  ;;  %v8253_v57 = vmul.f32 %v14123_v14, %v8177_v21 }
 0x68e   : > { %vm7923_vm0 = vcmp.gt.f32.partialorder %v9490_v61, 0.0  ;;  %v7987_v9 = vmul.f32 0.2, %v9490_v61  ;;  %v9492_v34 = vadd.f32 %v7816_v48, %v14111_v29  ;;  %v7818_v5 = vpop.f32.mrb[163].mxu0  ;;  %v8329_v22 = vadd.f32 %v8252_v30, %v8251_v33 }
 0x68f   : > { %vm7924_vm1 = vcmp.gt.f32.partialorder %v9491_v40, 0.0  ;;  %v7988_v37 = vmul.f32 0.2, %v9491_v40  ;;  %v9493_v36 = vadd.f32 %v7818_v5, %v14114_v35  ;;  %v8254_v28 = vmul.f32 %v14126_v26, %v8178_v47 }
 0x690   : > { %v8051_v60 = vsel %vm7923_vm0, %v9490_v61, %v7987_v9  ;;  %vm7925_vm2 = vcmp.gt.f32.partialorder %v9492_v34, 0.0  ;;  %v7989_v44 = vmul.f32 0.2, %v9492_v34  ;;  %8330 = vadd.xlane.f32.xlu0 %v8329_v22 }
 0x691   : > { %v8052_v2 = vsel %vm7924_vm1, %v9491_v40, %v7988_v37  ;;  %vm7926_vm3 = vcmp.gt.f32.partialorder %v9493_v36, 0.0  ;;  %v7990_v3 = vmul.f32 0.2, %v9493_v36  ;;  %v8332_v32 = vadd.f32 %v8254_v28, %v8253_v57 }
 0x692   : > { %v8053_v13 = vsel %vm7925_vm2, %v9492_v34, %v7989_v44  ;;  %v8179_v55 = vmul.f32 %v8115_v39, %v8051_v60  ;;  %v8180_v43 = vmul.f32 %v8116_v54, %v8052_v2  ;;  %v8123_v39 = vld [vmem:[%s11681_s15 + $0x140] sm:$0xff]  ;;  %v8124_v54 = vld [vmem:[%s11681_s15 + $0x148] sm:$0xff] }
 0x693   : > { %v8054_v1 = vsel %vm7926_vm3, %v9493_v36, %v7990_v3  ;;  %8333 = vadd.xlane.f32.xlu1 %v8332_v32  ;;  %v7822_v46 = vpop.f32.mrb[164].mxu0  ;;  %v8181_v24 = vmul.f32 %v8117_v0, %v8053_v13  ;;  %v8125_v0 = vld [vmem:[%s11681_s15 + $0x150] sm:$0xff] }
 0x694   : > { %v9494_v17 = vadd.f32 %v7822_v46, %v14111_v29  ;;  %v7824_v19 = vpop.f32.mrb[165].mxu0  ;;  %v8255_v27 = vmul.f32 %v14123_v14, %v8179_v55  ;;  %v8256_v53 = vmul.f32 %v14126_v26, %v8180_v43  ;;  %v8182_v63 = vmul.f32 %v8118_v31, %v8054_v1  ;;  %v8126_v31 = vld [vmem:[%s11681_s15 + $0x158] sm:$0xff] }
 0x695   : > { %v9495_v7 = vadd.f32 %v7824_v19, %v14114_v35  ;;  %v7826_v23 = vpop.f32.mrb[166].mxu0  ;;  %v8257_v16 = vmul.f32 %v14123_v14, %v8181_v24 }
 0x696   : > { %vm7927_vm4 = vcmp.gt.f32.partialorder %v9494_v17, 0.0  ;;  %v7991_v51 = vmul.f32 0.2, %v9494_v17  ;;  %v9496_v38 = vadd.f32 %v7826_v23, %v14111_v29  ;;  %v7828_v8 = vpop.f32.mrb[167].mxu0  ;;  %v8335_v4 = vadd.f32 %v8256_v53, %v8255_v27 }
 0x697   : > { %vm7928_vm5 = vcmp.gt.f32.partialorder %v9495_v7, 0.0  ;;  %v7992_v58 = vmul.f32 0.2, %v9495_v7  ;;  %v9497_v10 = vadd.f32 %v7828_v8, %v14114_v35  ;;  %v8258_v11 = vmul.f32 %v14126_v26, %v8182_v63 }
 0x698   : > { %v8055_v25 = vsel %vm7927_vm4, %v9494_v17, %v7991_v51  ;;  %vm7929_vm6 = vcmp.gt.f32.partialorder %v9496_v38, 0.0  ;;  %v7993_v56 = vmul.f32 0.2, %v9496_v38  ;;  %8336 = vadd.xlane.f32.xlu0 %v8335_v4 }
 0x699   : > { %v8056_v49 = vsel %vm7928_vm5, %v9495_v7, %v7992_v58  ;;  %vm7930_vm7 = vcmp.gt.f32.partialorder %v9497_v10, 0.0  ;;  %v7994_v15 = vmul.f32 0.2, %v9497_v10  ;;  %v8338_v41 = vadd.f32 %v8258_v11, %v8257_v16 }
 0x69a   : > { %v8057_v42 = vsel %vm7929_vm6, %v9496_v38, %v7993_v56  ;;  %v8183_v52 = vmul.f32 %v8119_v18, %v8055_v25  ;;  %v8184_v59 = vmul.f32 %v8120_v62, %v8056_v49  ;;  %v8127_v18 = vld [vmem:[%s11681_s15 + $0x160] sm:$0xff]  ;;  %v8128_v62 = vld [vmem:[%s11681_s15 + $0x168] sm:$0xff] }
 0x69b   : > { %v8058_v50 = vsel %vm7930_vm7, %v9497_v10, %v7994_v15  ;;  %8339 = vadd.xlane.f32.xlu1 %v8338_v41  ;;  %v7832_v6 = vpop.f32.mrb[168].mxu0  ;;  %v8185_v21 = vmul.f32 %v8121_v20, %v8057_v42  ;;  %v8129_v20 = vld [vmem:[%s11681_s15 + $0x170] sm:$0xff] }
 0x69c   : > { %v9498_v61 = vadd.f32 %v7832_v6, %v14111_v29  ;;  %v7834_v12 = vpop.f32.mrb[169].mxu0  ;;  %v8259_v33 = vmul.f32 %v14123_v14, %v8183_v52  ;;  %v8260_v30 = vmul.f32 %v14126_v26, %v8184_v59  ;;  %v8186_v47 = vmul.f32 %v8122_v45, %v8058_v50  ;;  %v8130_v45 = vld [vmem:[%s11681_s15 + $0x178] sm:$0xff] }
 0x69d   : > { %v9499_v40 = vadd.f32 %v7834_v12, %v14114_v35  ;;  %v7836_v48 = vpop.f32.mrb[170].mxu0  ;;  %v8261_v57 = vmul.f32 %v14123_v14, %v8185_v21 }
 0x69e   : > { %vm7931_vm8 = vcmp.gt.f32.partialorder %v9498_v61, 0.0  ;;  %v7995_v9 = vmul.f32 0.2, %v9498_v61  ;;  %v9500_v34 = vadd.f32 %v7836_v48, %v14111_v29  ;;  %v7838_v5 = vpop.f32.mrb[171].mxu0  ;;  %v8341_v22 = vadd.f32 %v8260_v30, %v8259_v33 }
 0x69f   : > { %vm7932_vm9 = vcmp.gt.f32.partialorder %v9499_v40, 0.0  ;;  %v7996_v37 = vmul.f32 0.2, %v9499_v40  ;;  %v9501_v36 = vadd.f32 %v7838_v5, %v14114_v35  ;;  %v8262_v28 = vmul.f32 %v14126_v26, %v8186_v47 }
 0x6a0   : > { %v8059_v60 = vsel %vm7931_vm8, %v9498_v61, %v7995_v9  ;;  %vm7933_vm10 = vcmp.gt.f32.partialorder %v9500_v34, 0.0  ;;  %v7997_v44 = vmul.f32 0.2, %v9500_v34  ;;  %8342 = vadd.xlane.f32.xlu0 %v8341_v22 }
 0x6a1   : > { %v8060_v2 = vsel %vm7932_vm9, %v9499_v40, %v7996_v37  ;;  %vm7934_vm11 = vcmp.gt.f32.partialorder %v9501_v36, 0.0  ;;  %v7998_v3 = vmul.f32 0.2, %v9501_v36  ;;  %v8344_v32 = vadd.f32 %v8262_v28, %v8261_v57 }
 0x6a2   : > { %v8061_v13 = vsel %vm7933_vm10, %v9500_v34, %v7997_v44  ;;  %v8187_v55 = vmul.f32 %v8123_v39, %v8059_v60  ;;  %v8188_v43 = vmul.f32 %v8124_v54, %v8060_v2  ;;  %v8131_v39 = vld [vmem:[%s11681_s15 + $0x180] sm:$0xff]  ;;  %v8132_v54 = vld [vmem:[%s11681_s15 + $0x188] sm:$0xff] }
 0x6a3   : > { %v8062_v1 = vsel %vm7934_vm11, %v9501_v36, %v7998_v3  ;;  %8345 = vadd.xlane.f32.xlu1 %v8344_v32  ;;  %v7842_v46 = vpop.f32.mrb[172].mxu0  ;;  %v8189_v24 = vmul.f32 %v8125_v0, %v8061_v13  ;;  %v8133_v0 = vld [vmem:[%s11681_s15 + $0x190] sm:$0xff] }
 0x6a4   : > { %v9502_v17 = vadd.f32 %v7842_v46, %v14111_v29  ;;  %v7844_v19 = vpop.f32.mrb[173].mxu0  ;;  %v8263_v27 = vmul.f32 %v14123_v14, %v8187_v55  ;;  %v8264_v53 = vmul.f32 %v14126_v26, %v8188_v43  ;;  %v8190_v63 = vmul.f32 %v8126_v31, %v8062_v1  ;;  %v8134_v31 = vld [vmem:[%s11681_s15 + $0x198] sm:$0xff] }
 0x6a5   : > { %v9503_v7 = vadd.f32 %v7844_v19, %v14114_v35  ;;  %v7846_v23 = vpop.f32.mrb[174].mxu0  ;;  %v8265_v16 = vmul.f32 %v14123_v14, %v8189_v24 }
 0x6a6   : > { %vm7935_vm12 = vcmp.gt.f32.partialorder %v9502_v17, 0.0  ;;  %v7999_v51 = vmul.f32 0.2, %v9502_v17  ;;  %v9504_v38 = vadd.f32 %v7846_v23, %v14111_v29  ;;  %v7848_v8 = vpop.f32.mrb[175].mxu0  ;;  %v8347_v4 = vadd.f32 %v8264_v53, %v8263_v27 }
 0x6a7   : > { %vm7936_vm13 = vcmp.gt.f32.partialorder %v9503_v7, 0.0  ;;  %v8000_v58 = vmul.f32 0.2, %v9503_v7  ;;  %v9505_v10 = vadd.f32 %v7848_v8, %v14114_v35  ;;  %v8266_v11 = vmul.f32 %v14126_v26, %v8190_v63 }
 0x6a8   : > { %v8063_v25 = vsel %vm7935_vm12, %v9502_v17, %v7999_v51  ;;  %vm7937_vm14 = vcmp.gt.f32.partialorder %v9504_v38, 0.0  ;;  %v8001_v56 = vmul.f32 0.2, %v9504_v38  ;;  %8348 = vadd.xlane.f32.xlu0 %v8347_v4 }
 0x6a9   : > { %v8064_v49 = vsel %vm7936_vm13, %v9503_v7, %v8000_v58  ;;  %vm7938_vm15 = vcmp.gt.f32.partialorder %v9505_v10, 0.0  ;;  %v8002_v15 = vmul.f32 0.2, %v9505_v10  ;;  %v8350_v41 = vadd.f32 %v8266_v11, %v8265_v16 }
 0x6aa   : > { %v8065_v42 = vsel %vm7937_vm14, %v9504_v38, %v8001_v56  ;;  %v8191_v52 = vmul.f32 %v8127_v18, %v8063_v25  ;;  %v8192_v59 = vmul.f32 %v8128_v62, %v8064_v49  ;;  %v8135_v18 = vld [vmem:[%s11681_s15 + $0x1a0] sm:$0xff]  ;;  %v8136_v62 = vld [vmem:[%s11681_s15 + $0x1a8] sm:$0xff] }
 0x6ab   : > { %v8066_v50 = vsel %vm7938_vm15, %v9505_v10, %v8002_v15  ;;  %8351 = vadd.xlane.f32.xlu1 %v8350_v41  ;;  %v7852_v6 = vpop.f32.mrb[176].mxu0  ;;  %v8193_v21 = vmul.f32 %v8129_v20, %v8065_v42  ;;  %v8137_v20 = vld [vmem:[%s11681_s15 + $0x1b0] sm:$0xff] }
 0x6ac   : > { %v9506_v61 = vadd.f32 %v7852_v6, %v14111_v29  ;;  %v7854_v12 = vpop.f32.mrb[177].mxu0  ;;  %v8267_v33 = vmul.f32 %v14123_v14, %v8191_v52  ;;  %v8268_v30 = vmul.f32 %v14126_v26, %v8192_v59  ;;  %v8194_v47 = vmul.f32 %v8130_v45, %v8066_v50  ;;  %v8138_v45 = vld [vmem:[%s11681_s15 + $0x1b8] sm:$0xff] }
 0x6ad   : > { %v9507_v40 = vadd.f32 %v7854_v12, %v14114_v35  ;;  %v7856_v48 = vpop.f32.mrb[178].mxu0  ;;  %v8269_v57 = vmul.f32 %v14123_v14, %v8193_v21 }
 0x6ae   : > { %vm7939_vm0 = vcmp.gt.f32.partialorder %v9506_v61, 0.0  ;;  %v8003_v9 = vmul.f32 0.2, %v9506_v61  ;;  %v9508_v34 = vadd.f32 %v7856_v48, %v14111_v29  ;;  %v7858_v5 = vpop.f32.mrb[179].mxu0  ;;  %v8353_v22 = vadd.f32 %v8268_v30, %v8267_v33 }
 0x6af   : > { %vm7940_vm1 = vcmp.gt.f32.partialorder %v9507_v40, 0.0  ;;  %v8004_v37 = vmul.f32 0.2, %v9507_v40  ;;  %v9509_v36 = vadd.f32 %v7858_v5, %v14114_v35  ;;  %v8270_v28 = vmul.f32 %v14126_v26, %v8194_v47 }
 0x6b0   : > { %v8067_v60 = vsel %vm7939_vm0, %v9506_v61, %v8003_v9  ;;  %vm7941_vm2 = vcmp.gt.f32.partialorder %v9508_v34, 0.0  ;;  %v8005_v44 = vmul.f32 0.2, %v9508_v34  ;;  %8354 = vadd.xlane.f32.xlu0 %v8353_v22  ;;  %vm8614_vm0 = vcmask 7168  }
 0x6b1   : > { %v8068_v2 = vsel %vm7940_vm1, %v9507_v40, %v8004_v37  ;;  %vm7942_vm3 = vcmp.gt.f32.partialorder %v9509_v36, 0.0  ;;  %v8006_v3 = vmul.f32 0.2, %v9509_v36  ;;  %v8356_v32 = vadd.f32 %v8270_v28, %v8269_v57 }
 0x6b2   : > { %v8069_v13 = vsel %vm7941_vm2, %v9508_v34, %v8005_v44  ;;  %v8195_v55 = vmul.f32 %v8131_v39, %v8067_v60  ;;  %v8196_v43 = vmul.f32 %v8132_v54, %v8068_v2  ;;  %v8139_v39 = vld [vmem:[%s11681_s15 + $0x1c0] sm:$0xff]  ;;  %v8140_v54 = vld [vmem:[%s11681_s15 + $0x1c8] sm:$0xff] }
 0x6b3   : > { %v8070_v1 = vsel %vm7942_vm3, %v9509_v36, %v8006_v3  ;;  %8357 = vadd.xlane.f32.xlu1 %v8356_v32  ;;  %v7862_v46 = vpop.f32.mrb[180].mxu0  ;;  %v8197_v24 = vmul.f32 %v8133_v0, %v8069_v13  ;;  %v8141_v0 = vld [vmem:[%s11681_s15 + $0x1d0] sm:$0xff] }
 0x6b4   : > { %v9510_v17 = vadd.f32 %v7862_v46, %v14111_v29  ;;  %v7864_v19 = vpop.f32.mrb[181].mxu0  ;;  %v8271_v27 = vmul.f32 %v14123_v14, %v8195_v55  ;;  %v8272_v53 = vmul.f32 %v14126_v26, %v8196_v43  ;;  %v8198_v63 = vmul.f32 %v8134_v31, %v8070_v1  ;;  %v8142_v31 = vld [vmem:[%s11681_s15 + $0x1d8] sm:$0xff] }
 0x6b5   : > { %v9511_v7 = vadd.f32 %v7864_v19, %v14114_v35  ;;  %v7866_v23 = vpop.f32.mrb[182].mxu0  ;;  %v8273_v16 = vmul.f32 %v14123_v14, %v8197_v24 }
 0x6b6   : > { %vm7943_vm4 = vcmp.gt.f32.partialorder %v9510_v17, 0.0  ;;  %v8007_v51 = vmul.f32 0.2, %v9510_v17  ;;  %v9512_v38 = vadd.f32 %v7866_v23, %v14111_v29  ;;  %v7868_v8 = vpop.f32.mrb[183].mxu0  ;;  %v8359_v4 = vadd.f32 %v8272_v53, %v8271_v27 }
 0x6b7   : > { %vm7944_vm5 = vcmp.gt.f32.partialorder %v9511_v7, 0.0  ;;  %v8008_v58 = vmul.f32 0.2, %v9511_v7  ;;  %v9513_v10 = vadd.f32 %v7868_v8, %v14114_v35  ;;  %v8274_v11 = vmul.f32 %v14126_v26, %v8198_v63 }
 0x6b8   : > { %v8071_v25 = vsel %vm7943_vm4, %v9510_v17, %v8007_v51  ;;  %vm7945_vm6 = vcmp.gt.f32.partialorder %v9512_v38, 0.0  ;;  %v8009_v56 = vmul.f32 0.2, %v9512_v38  ;;  %8360 = vadd.xlane.f32.xlu0 %v8359_v4 }
 0x6b9   : > { %v8072_v49 = vsel %vm7944_vm5, %v9511_v7, %v8008_v58  ;;  %vm7946_vm7 = vcmp.gt.f32.partialorder %v9513_v10, 0.0  ;;  %v8010_v15 = vmul.f32 0.2, %v9513_v10  ;;  %v8362_v41 = vadd.f32 %v8274_v11, %v8273_v16 }
 0x6ba   : > { %v8073_v42 = vsel %vm7945_vm6, %v9512_v38, %v8009_v56  ;;  %v8199_v52 = vmul.f32 %v8135_v18, %v8071_v25  ;;  %v8200_v59 = vmul.f32 %v8136_v62, %v8072_v49  ;;  %v8143_v18 = vld [vmem:[%s11681_s15 + $0x1e0] sm:$0xff]  ;;  %v8144_v62 = vld [vmem:[%s11681_s15 + $0x1e8] sm:$0xff] }
 0x6bb   : > { %v8074_v50 = vsel %vm7946_vm7, %v9513_v10, %v8010_v15  ;;  %8363 = vadd.xlane.f32.xlu1 %v8362_v41  ;;  %v7872_v6 = vpop.f32.mrb[184].mxu0  ;;  %v8201_v21 = vmul.f32 %v8137_v20, %v8073_v42  ;;  %v8145_v20 = vld [vmem:[%s11681_s15 + $0x1f0] sm:$0xff]  ;;  %v8146_v41 = vld [vmem:[%s11681_s15 + $0x1f8] sm:$0xff] }
 0x6bc   : > { %v9514_v61 = vadd.f32 %v7872_v6, %v14111_v29  ;;  %v7874_v12 = vpop.f32.mrb[185].mxu0  ;;  %v8275_v33 = vmul.f32 %v14123_v14, %v8199_v52  ;;  %v8276_v30 = vmul.f32 %v14126_v26, %v8200_v59  ;;  %v8202_v47 = vmul.f32 %v8138_v45, %v8074_v50 }
 0x6bd   : > { %v9515_v40 = vadd.f32 %v7874_v12, %v14114_v35  ;;  %v7876_v48 = vpop.f32.mrb[186].mxu0  ;;  %v8277_v57 = vmul.f32 %v14123_v14, %v8201_v21 }
 0x6be   : > { %vm7947_vm8 = vcmp.gt.f32.partialorder %v9514_v61, 0.0  ;;  %v8011_v9 = vmul.f32 0.2, %v9514_v61  ;;  %v9516_v34 = vadd.f32 %v7876_v48, %v14111_v29  ;;  %v7878_v5 = vpop.f32.mrb[187].mxu0  ;;  %v8365_v22 = vadd.f32 %v8276_v30, %v8275_v33 }
 0x6bf   : > { %vm7948_vm9 = vcmp.gt.f32.partialorder %v9515_v40, 0.0  ;;  %v8012_v37 = vmul.f32 0.2, %v9515_v40  ;;  %v9517_v36 = vadd.f32 %v7878_v5, %v14114_v35  ;;  %v8278_v28 = vmul.f32 %v14126_v26, %v8202_v47  ;;  %v14314_v47 = vld [vmem:[#allocation2] ss:$0 sm:$0xff] }
 0x6c0   : > { %v8075_v60 = vsel %vm7947_vm8, %v9514_v61, %v8011_v9  ;;  %vm7949_vm10 = vcmp.gt.f32.partialorder %v9516_v34, 0.0  ;;  %v8013_v44 = vmul.f32 0.2, %v9516_v34  ;;  %8366 = vadd.xlane.f32.xlu0 %v8365_v22 }
 0x6c1   : > { %v8076_v2 = vsel %vm7948_vm9, %v9515_v40, %v8012_v37  ;;  %vm7950_vm11 = vcmp.gt.f32.partialorder %v9517_v36, 0.0  ;;  %v8014_v3 = vmul.f32 0.2, %v9517_v36  ;;  %v8368_v32 = vadd.f32 %v8278_v28, %v8277_v57 }
 0x6c2   : > { %v8077_v13 = vsel %vm7949_vm10, %v9516_v34, %v8013_v44  ;;  %v8203_v55 = vmul.f32 %v8139_v39, %v8075_v60  ;;  %v8204_v43 = vmul.f32 %v8140_v54, %v8076_v2 }
 0x6c3   : > { %v8078_v1 = vsel %vm7950_vm11, %v9517_v36, %v8014_v3  ;;  %8369 = vadd.xlane.f32.xlu1 %v8368_v32  ;;  %v7882_v46 = vpop.f32.mrb[188].mxu0  ;;  %v8205_v24 = vmul.f32 %v8141_v0, %v8077_v13 }
 0x6c4   : > { %v9518_v17 = vadd.f32 %v7882_v46, %v14111_v29  ;;  %v7884_v19 = vpop.f32.mrb[189].mxu0  ;;  %v8279_v27 = vmul.f32 %v14123_v14, %v8203_v55  ;;  %v8280_v53 = vmul.f32 %v14126_v26, %v8204_v43  ;;  %v8206_v63 = vmul.f32 %v8142_v31, %v8078_v1 }
 0x6c5   : > { %v9519_v7 = vadd.f32 %v7884_v19, %v14114_v35  ;;  %v7886_v23 = vpop.f32.mrb[190].mxu0  ;;  %v8281_v16 = vmul.f32 %v14123_v14, %v8205_v24 }
 0x6c6   : > { %vm7951_vm12 = vcmp.gt.f32.partialorder %v9518_v17, 0.0  ;;  %v8015_v51 = vmul.f32 0.2, %v9518_v17  ;;  %v9520_v38 = vadd.f32 %v7886_v23, %v14111_v29  ;;  %v7888_v8 = vpop.f32.mrb[191].mxu0  ;;  %v8371_v4 = vadd.f32 %v8280_v53, %v8279_v27 }
 0x6c7   : > { %vm7952_vm13 = vcmp.gt.f32.partialorder %v9519_v7, 0.0  ;;  %v8016_v58 = vmul.f32 0.2, %v9519_v7  ;;  %v9521_v10 = vadd.f32 %v7888_v8, %v14114_v35  ;;  %v8282_v11 = vmul.f32 %v14126_v26, %v8206_v63 }
 0x6c8   : > { %v8079_v25 = vsel %vm7951_vm12, %v9518_v17, %v8015_v51  ;;  %vm7953_vm14 = vcmp.gt.f32.partialorder %v9520_v38, 0.0  ;;  %v8017_v56 = vmul.f32 0.2, %v9520_v38  ;;  %8372 = vadd.xlane.f32.xlu0 %v8371_v4 }
 0x6c9   : > { %v8080_v49 = vsel %vm7952_vm13, %v9519_v7, %v8016_v58  ;;  %vm7954_vm15 = vcmp.gt.f32.partialorder %v9521_v10, 0.0  ;;  %v8018_v15 = vmul.f32 0.2, %v9521_v10  ;;  %v8374_v29 = vadd.f32 %v8282_v11, %v8281_v16 }
 0x6ca   : > { %v8081_v45 = vsel %vm7953_vm14, %v9520_v38, %v8017_v56  ;;  %v8207_v42 = vmul.f32 %v8143_v18, %v8079_v25  ;;  %v8208_v52 = vmul.f32 %v8144_v62, %v8080_v49 }
 0x6cb   : > { %v8082_v59 = vsel %vm7954_vm15, %v9521_v10, %v8018_v15  ;;  %8375 = vadd.xlane.f32.xlu1 %v8374_v29  ;;  %v8209_v35 = vmul.f32 %v8145_v20, %v8081_v45 }
 0x6cc   : > { %v8283_v50 = vmul.f32 %v14123_v14, %v8207_v42  ;;  %v8284_v6 = vmul.f32 %v14126_v26, %v8208_v52  ;;  %v8210_v21 = vmul.f32 %v8146_v41, %v8082_v59 }
 0x6cd   : > { %v8285_v61 = vmul.f32 %v14123_v14, %v8209_v35 }
 0x6ce   : > { %v8377_v12 = vadd.f32 %v8284_v6, %v8283_v50  ;;  %v8286_v33 = vmul.f32 %v14126_v26, %v8210_v21 }
 0x6d0   : > { %8378 = vadd.xlane.f32.xlu0 %v8377_v12  ;;  %v8380_v30 = vadd.f32 %v8286_v33, %v8285_v61 }
 0x6d2   : > { %8381 = vadd.xlane.f32.xlu1 %v8380_v30 }
 0x6e5   : > { %v8289_v40 = vpop.xlane.xlu0 %8288 }
 0x6e6   : > { %v8390_v48 = vadd.f32 %v14314_v47, %v8289_v40 }
 0x6e8   : > { %v9285_v57 = vmul.f32 -1.442695, %v8390_v48 }
 0x6e9   : > { %v8292_v9 = vpop.xlane.xlu0 %8291 }
 0x6ea   : > { %10593 = vpow2.f32 %v9285_v57  ;;  %v8391_v34 = vadd.f32 %v14314_v47, %v8292_v9 }
 0x6ec   : > { %v9286_v5 = vmul.f32 -1.442695, %v8391_v34 }
 0x6ed   : > { %v8295_v22 = vpop.xlane.xlu1 %8294 }
 0x6ee   : > { %10595 = vpow2.f32 %v9286_v5  ;;  %v8392_v14 = vadd.f32 %v14314_v47, %v8295_v22 }
 0x6f0   : > { %v9287_v37 = vmul.f32 -1.442695, %v8392_v14 }
 0x6f1   : > { %v8298_v26 = vpop.xlane.xlu1 %8297 }
 0x6f2   : > { %10597 = vpow2.f32 %v9287_v37  ;;  %v8393_v36 = vadd.f32 %v14314_v47, %v8298_v26 }
 0x6f4   : > { %v10594_v28 = vpop.eup %10593  ;;  %v9288_v39 = vmul.f32 -1.442695, %v8393_v36 }
 0x6f5   : > { %v8518_v54 = vadd.f32 1.0, %v10594_v28  ;;  %v8301_v60 = vpop.xlane.xlu0 %8300 }
 0x6f6   : > { %10599 = vpow2.f32 %v9288_v39  ;;  %v8394_v44 = vadd.f32 %v14314_v47, %v8301_v60 }
 0x6f7   : > { %10601 = vrcp.f32 %v8518_v54 }
 0x6f8   : > { %v10596_v0 = vpop.eup %10595  ;;  %v9289_v2 = vmul.f32 -1.442695, %v8394_v44  ;;  %v8304_v3 = vpop.xlane.xlu1 %8303 }
 0x6f9   : > { %v8519_v32 = vadd.f32 1.0, %v10596_v0  ;;  %v8395_v31 = vadd.f32 %v14314_v47, %v8304_v3 }
 0x6fa   : > { %10603 = vpow2.f32 %v9289_v2 }
 0x6fb   : > { %10605 = vrcp.f32 %v8519_v32  ;;  %v9290_v13 = vmul.f32 -1.442695, %v8395_v31 }
 0x6fc   : > { %v10598_v55 = vpop.eup %10597 }
 0x6fd   : > { %v8520_v43 = vadd.f32 1.0, %v10598_v55  ;;  %10607 = vpow2.f32 %v9290_v13  ;;  %v8307_v1 = vpop.xlane.xlu0 %8306 }
 0x6fe   : > { %v8396_v46 = vadd.f32 %v14314_v47, %v8307_v1 }
 0x6ff   : > { %10609 = vrcp.f32 %v8520_v43 }
 0x700   : > { %v10600_v24 = vpop.eup %10599  ;;  %v9291_v17 = vmul.f32 -1.442695, %v8396_v46  ;;  %v8310_v19 = vpop.xlane.xlu1 %8309 }
 0x701   : > { %v10602_v27 = vpop.eup %10601  ;;  %v8521_v53 = vadd.f32 1.0, %v10600_v24  ;;  %v8397_v63 = vadd.f32 %v14314_v47, %v8310_v19 }
 0x702   : > { %8615 = vst.msk [vmem:[%s14326_s16] sm:$0xff] %vm8614_vm0, %v10602_v27  ;;  %10611 = vpow2.f32 %v9291_v17 }
 0x703   : > { %10613 = vrcp.f32 %v8521_v53  ;;  %v9292_v7 = vmul.f32 -1.442695, %v8397_v63 }
 0x704   : > { %v10604_v23 = vpop.eup %10603 }
 0x705   : > { %v10606_v16 = vpop.eup %10605  ;;  %v8522_v51 = vadd.f32 1.0, %v10604_v23  ;;  %10615 = vpow2.f32 %v9292_v7  ;;  %v8313_v38 = vpop.xlane.xlu0 %8312 }
 0x706   : > { %8616 = vst.msk [vmem:[%s14326_s16 + $0x8] sm:$0xff] %vm8614_vm0, %v10606_v16  ;;  %v8398_v8 = vadd.f32 %v14314_v47, %v8313_v38 }
 0x707   : > { %v10608_v4 = vpop.eup %10607  ;;  %10617 = vrcp.f32 %v8522_v51 }
 0x708   : > { %v8523_v58 = vadd.f32 1.0, %v10608_v4  ;;  %v9293_v10 = vmul.f32 -1.442695, %v8398_v8  ;;  %v8316_v11 = vpop.xlane.xlu1 %8315 }
 0x709   : > { %v10610_v18 = vpop.eup %10609  ;;  %v8399_v62 = vadd.f32 %v14314_v47, %v8316_v11 }
 0x70a   : > { %8617 = vst.msk [vmem:[%s14326_s16 + $0x10] sm:$0xff] %vm8614_vm0, %v10610_v18  ;;  %10619 = vrcp.f32 %v8523_v58 }
 0x70b   : > { %10621 = vpow2.f32 %v9293_v10  ;;  %v9294_v25 = vmul.f32 -1.442695, %v8399_v62 }
 0x70c   : > { %v10612_v56 = vpop.eup %10611 }
 0x70d   : > { %v10614_v20 = vpop.eup %10613  ;;  %v8524_v49 = vadd.f32 1.0, %v10612_v56  ;;  %10623 = vpow2.f32 %v9294_v25  ;;  %v8319_v15 = vpop.xlane.xlu0 %8318 }
 0x70e   : > { %8618 = vst.msk [vmem:[%s14326_s16 + $0x18] sm:$0xff] %vm8614_vm0, %v10614_v20  ;;  %v8400_v29 = vadd.f32 %v14314_v47, %v8319_v15 }
 0x70f   : > { %v10616_v41 = vpop.eup %10615  ;;  %10625 = vrcp.f32 %v8524_v49 }
 0x710   : > { %v8525_v45 = vadd.f32 1.0, %v10616_v41  ;;  %v9295_v42 = vmul.f32 -1.442695, %v8400_v29  ;;  %v8322_v52 = vpop.xlane.xlu1 %8321 }
 0x711   : > { %v10618_v59 = vpop.eup %10617  ;;  %v8401_v35 = vadd.f32 %v14314_v47, %v8322_v52 }
 0x712   : > { %8619 = vst.msk [vmem:[%s14326_s16 + $0x20] sm:$0xff] %vm8614_vm0, %v10618_v59  ;;  %10627 = vrcp.f32 %v8525_v45 }
 0x713   : > { %10629 = vpow2.f32 %v9295_v42  ;;  %v9296_v50 = vmul.f32 -1.442695, %v8401_v35 }
 0x714   : > { %v10620_v6 = vpop.eup %10619 }
 0x715   : > { %v10622_v21 = vpop.eup %10621  ;;  %8620 = vst.msk [vmem:[%s14326_s16 + $0x28] sm:$0xff] %vm8614_vm0, %v10620_v6  ;;  %10631 = vpow2.f32 %v9296_v50  ;;  %v8325_v61 = vpop.xlane.xlu0 %8324 }
 0x716   : > { %v8526_v12 = vadd.f32 1.0, %v10622_v21  ;;  %v8402_v33 = vadd.f32 %v14314_v47, %v8325_v61 }
 0x717   : > { %v10624_v30 = vpop.eup %10623 }
 0x718   : > { %10633 = vrcp.f32 %v8526_v12  ;;  %v8527_v40 = vadd.f32 1.0, %v10624_v30  ;;  %v9297_v48 = vmul.f32 -1.442695, %v8402_v33  ;;  %v8328_v57 = vpop.xlane.xlu1 %8327 }
 0x719   : > { %v10626_v9 = vpop.eup %10625  ;;  %v8403_v34 = vadd.f32 %v14314_v47, %v8328_v57 }
 0x71a   : > { %8621 = vst.msk [vmem:[%s14326_s16 + $0x30] sm:$0xff] %vm8614_vm0, %v10626_v9  ;;  %10635 = vrcp.f32 %v8527_v40 }
 0x71b   : > { %10637 = vpow2.f32 %v9297_v48  ;;  %v9298_v5 = vmul.f32 -1.442695, %v8403_v34 }
 0x71c   : > { %v10628_v22 = vpop.eup %10627 }
 0x71d   : > { %v10630_v14 = vpop.eup %10629  ;;  %8622 = vst.msk [vmem:[%s14326_s16 + $0x38] sm:$0xff] %vm8614_vm0, %v10628_v22  ;;  %10639 = vpow2.f32 %v9298_v5  ;;  %v8331_v37 = vpop.xlane.xlu0 %8330 }
 0x71e   : > { %v8528_v26 = vadd.f32 1.0, %v10630_v14  ;;  %v8404_v36 = vadd.f32 %v14314_v47, %v8331_v37 }
 0x71f   : > { %v10632_v28 = vpop.eup %10631 }
 0x720   : > { %10641 = vrcp.f32 %v8528_v26  ;;  %v8529_v39 = vadd.f32 1.0, %v10632_v28  ;;  %v9299_v54 = vmul.f32 -1.442695, %v8404_v36  ;;  %v8334_v60 = vpop.xlane.xlu1 %8333 }
 0x721   : > { %v8405_v44 = vadd.f32 %v14314_v47, %v8334_v60 }
 0x722   : > { %v10634_v0 = vpop.eup %10633  ;;  %10643 = vrcp.f32 %v8529_v39 }
 0x723   : > { %8623 = vst.msk [vmem:[%s14326_s16 + $0x40] sm:$0xff] %vm8614_vm0, %v10634_v0  ;;  %10645 = vpow2.f32 %v9299_v54  ;;  %v9300_v2 = vmul.f32 -1.442695, %v8405_v44 }
 0x724   : > { %v10636_v3 = vpop.eup %10635 }
 0x725   : > { %v10638_v32 = vpop.eup %10637  ;;  %8624 = vst.msk [vmem:[%s14326_s16 + $0x48] sm:$0xff] %vm8614_vm0, %v10636_v3  ;;  %10647 = vpow2.f32 %v9300_v2  ;;  %v8337_v31 = vpop.xlane.xlu0 %8336 }
 0x726   : > { %v8530_v13 = vadd.f32 1.0, %v10638_v32  ;;  %v8406_v55 = vadd.f32 %v14314_v47, %v8337_v31 }
 0x727   : > { %v10640_v43 = vpop.eup %10639 }
 0x728   : > { %10649 = vrcp.f32 %v8530_v13  ;;  %v8531_v1 = vadd.f32 1.0, %v10640_v43  ;;  %v9301_v46 = vmul.f32 -1.442695, %v8406_v55  ;;  %v8340_v24 = vpop.xlane.xlu1 %8339 }
 0x729   : > { %v8407_v17 = vadd.f32 %v14314_v47, %v8340_v24 }
 0x72a   : > { %v10642_v19 = vpop.eup %10641  ;;  %10651 = vrcp.f32 %v8531_v1 }
 0x72b   : > { %8625 = vst.msk [vmem:[%s14326_s16 + $0x50] sm:$0xff] %vm8614_vm0, %v10642_v19  ;;  %10653 = vpow2.f32 %v9301_v46  ;;  %v9302_v27 = vmul.f32 -1.442695, %v8407_v17 }
 0x72c   : > { %v10644_v53 = vpop.eup %10643 }
 0x72d   : > { %v10646_v63 = vpop.eup %10645  ;;  %8626 = vst.msk [vmem:[%s14326_s16 + $0x58] sm:$0xff] %vm8614_vm0, %v10644_v53  ;;  %10655 = vpow2.f32 %v9302_v27  ;;  %v8343_v7 = vpop.xlane.xlu0 %8342 }
 0x72e   : > { %v8532_v23 = vadd.f32 1.0, %v10646_v63  ;;  %v8408_v16 = vadd.f32 %v14314_v47, %v8343_v7 }
 0x72f   : > { %v10648_v51 = vpop.eup %10647 }
 0x730   : > { %10657 = vrcp.f32 %v8532_v23  ;;  %v8533_v38 = vadd.f32 1.0, %v10648_v51  ;;  %v9303_v8 = vmul.f32 -1.442695, %v8408_v16  ;;  %v8346_v4 = vpop.xlane.xlu1 %8345 }
 0x731   : > { %v8409_v58 = vadd.f32 %v14314_v47, %v8346_v4 }
 0x732   : > { %v10650_v10 = vpop.eup %10649  ;;  %10659 = vrcp.f32 %v8533_v38 }
 0x733   : > { %8627 = vst.msk [vmem:[%s14326_s16 + $0x60] sm:$0xff] %vm8614_vm0, %v10650_v10  ;;  %10661 = vpow2.f32 %v9303_v8  ;;  %v9304_v11 = vmul.f32 -1.442695, %v8409_v58 }
 0x734   : > { %v10652_v18 = vpop.eup %10651 }
 0x735   : > { %v10654_v62 = vpop.eup %10653  ;;  %8628 = vst.msk [vmem:[%s14326_s16 + $0x68] sm:$0xff] %vm8614_vm0, %v10652_v18  ;;  %10663 = vpow2.f32 %v9304_v11  ;;  %v8349_v25 = vpop.xlane.xlu0 %8348 }
 0x736   : > { %v8534_v56 = vadd.f32 1.0, %v10654_v62  ;;  %v8410_v20 = vadd.f32 %v14314_v47, %v8349_v25 }
 0x737   : > { %v10656_v49 = vpop.eup %10655 }
 0x738   : > { %10665 = vrcp.f32 %v8534_v56  ;;  %v8535_v15 = vadd.f32 1.0, %v10656_v49  ;;  %v9305_v29 = vmul.f32 -1.442695, %v8410_v20  ;;  %v8352_v41 = vpop.xlane.xlu1 %8351 }
 0x739   : > { %v8411_v45 = vadd.f32 %v14314_v47, %v8352_v41 }
 0x73a   : > { %v10658_v42 = vpop.eup %10657  ;;  %10667 = vrcp.f32 %v8535_v15 }
 0x73b   : > { %8629 = vst.msk [vmem:[%s14326_s16 + $0x70] sm:$0xff] %vm8614_vm0, %v10658_v42  ;;  %10669 = vpow2.f32 %v9305_v29  ;;  %v9306_v52 = vmul.f32 -1.442695, %v8411_v45 }
 0x73c   : > { %v10660_v59 = vpop.eup %10659 }
 0x73d   : > { %v10662_v35 = vpop.eup %10661  ;;  %8630 = vst.msk [vmem:[%s14326_s16 + $0x78] sm:$0xff] %vm8614_vm0, %v10660_v59  ;;  %10671 = vpow2.f32 %v9306_v52  ;;  %v8355_v50 = vpop.xlane.xlu0 %8354 }
 0x73e   : > { %v8536_v6 = vadd.f32 1.0, %v10662_v35  ;;  %v8412_v21 = vadd.f32 %v14314_v47, %v8355_v50 }
 0x73f   : > { %v10664_v61 = vpop.eup %10663 }
 0x740   : > { %10673 = vrcp.f32 %v8536_v6  ;;  %v8537_v12 = vadd.f32 1.0, %v10664_v61  ;;  %v9307_v33 = vmul.f32 -1.442695, %v8412_v21  ;;  %v8358_v30 = vpop.xlane.xlu1 %8357 }
 0x741   : > { %v8413_v40 = vadd.f32 %v14314_v47, %v8358_v30 }
 0x742   : > { %v10666_v48 = vpop.eup %10665  ;;  %10675 = vrcp.f32 %v8537_v12 }
 0x743   : > { %8631 = vst.msk [vmem:[%s14326_s16 + $0x80] sm:$0xff] %vm8614_vm0, %v10666_v48  ;;  %10677 = vpow2.f32 %v9307_v33  ;;  %v9308_v57 = vmul.f32 -1.442695, %v8413_v40 }
 0x744   : > { %v10668_v9 = vpop.eup %10667 }
 0x745   : > { %v10670_v34 = vpop.eup %10669  ;;  %8632 = vst.msk [vmem:[%s14326_s16 + $0x88] sm:$0xff] %vm8614_vm0, %v10668_v9  ;;  %10679 = vpow2.f32 %v9308_v57  ;;  %v8361_v5 = vpop.xlane.xlu0 %8360 }
 0x746   : > { %v8538_v22 = vadd.f32 1.0, %v10670_v34  ;;  %v8414_v14 = vadd.f32 %v14314_v47, %v8361_v5 }
 0x747   : > { %v10672_v37 = vpop.eup %10671 }
 0x748   : > { %10681 = vrcp.f32 %v8538_v22  ;;  %v8539_v26 = vadd.f32 1.0, %v10672_v37  ;;  %v9309_v36 = vmul.f32 -1.442695, %v8414_v14  ;;  %v8364_v28 = vpop.xlane.xlu1 %8363 }
 0x749   : > { %v8415_v39 = vadd.f32 %v14314_v47, %v8364_v28 }
 0x74a   : > { %v10674_v54 = vpop.eup %10673  ;;  %10683 = vrcp.f32 %v8539_v26 }
 0x74b   : > { %8633 = vst.msk [vmem:[%s14326_s16 + $0x90] sm:$0xff] %vm8614_vm0, %v10674_v54  ;;  %10685 = vpow2.f32 %v9309_v36  ;;  %v9310_v60 = vmul.f32 -1.442695, %v8415_v39 }
 0x74c   : > { %v10676_v44 = vpop.eup %10675 }
 0x74d   : > { %v10678_v0 = vpop.eup %10677  ;;  %8634 = vst.msk [vmem:[%s14326_s16 + $0x98] sm:$0xff] %vm8614_vm0, %v10676_v44  ;;  %10687 = vpow2.f32 %v9310_v60  ;;  %v8367_v2 = vpop.xlane.xlu0 %8366 }
 0x74e   : > { %v8540_v3 = vadd.f32 1.0, %v10678_v0  ;;  %v8416_v32 = vadd.f32 %v14314_v47, %v8367_v2 }
 0x74f   : > { %v10680_v31 = vpop.eup %10679 }
 0x750   : > { %10689 = vrcp.f32 %v8540_v3  ;;  %v8541_v13 = vadd.f32 1.0, %v10680_v31  ;;  %v9311_v55 = vmul.f32 -1.442695, %v8416_v32  ;;  %v8370_v43 = vpop.xlane.xlu1 %8369 }
 0x751   : > { %v8417_v1 = vadd.f32 %v14314_v47, %v8370_v43 }
 0x752   : > { %v10682_v46 = vpop.eup %10681  ;;  %10691 = vrcp.f32 %v8541_v13 }
 0x753   : > { %8635 = vst.msk [vmem:[%s14326_s16 + $0xa0] sm:$0xff] %vm8614_vm0, %v10682_v46  ;;  %10693 = vpow2.f32 %v9311_v55  ;;  %v9312_v24 = vmul.f32 -1.442695, %v8417_v1 }
 0x754   : > { %v10684_v17 = vpop.eup %10683 }
 0x755   : > { %v10686_v19 = vpop.eup %10685  ;;  %8636 = vst.msk [vmem:[%s14326_s16 + $0xa8] sm:$0xff] %vm8614_vm0, %v10684_v17  ;;  %10695 = vpow2.f32 %v9312_v24  ;;  %v8373_v27 = vpop.xlane.xlu0 %8372 }
 0x756   : > { %v8542_v53 = vadd.f32 1.0, %v10686_v19  ;;  %v8418_v63 = vadd.f32 %v14314_v47, %v8373_v27 }
 0x757   : > { %v10688_v7 = vpop.eup %10687 }
 0x758   : > { %10697 = vrcp.f32 %v8542_v53  ;;  %v8543_v23 = vadd.f32 1.0, %v10688_v7  ;;  %v9313_v16 = vmul.f32 -1.442695, %v8418_v63  ;;  %v8376_v51 = vpop.xlane.xlu1 %8375 }
 0x759   : > { %v8419_v38 = vadd.f32 %v14314_v47, %v8376_v51 }
 0x75a   : > { %v10690_v8 = vpop.eup %10689  ;;  %10699 = vrcp.f32 %v8543_v23 }
 0x75b   : > { %8637 = vst.msk [vmem:[%s14326_s16 + $0xb0] sm:$0xff] %vm8614_vm0, %v10690_v8  ;;  %10701 = vpow2.f32 %v9313_v16  ;;  %v9314_v4 = vmul.f32 -1.442695, %v8419_v38 }
 0x75c   : > { %v10692_v58 = vpop.eup %10691 }
 0x75d   : > { %v10694_v10 = vpop.eup %10693  ;;  %8638 = vst.msk [vmem:[%s14326_s16 + $0xb8] sm:$0xff] %vm8614_vm0, %v10692_v58  ;;  %10703 = vpow2.f32 %v9314_v4  ;;  %v8379_v11 = vpop.xlane.xlu0 %8378 }
 0x75e   : > { %v8544_v18 = vadd.f32 1.0, %v10694_v10  ;;  %v8420_v62 = vadd.f32 %v14314_v47, %v8379_v11 }
 0x75f   : > { %v10696_v25 = vpop.eup %10695  ;;  %v8382_v56 = vpop.xlane.xlu1 %8381 }
 0x760   : > { %10705 = vrcp.f32 %v8544_v18  ;;  %v8545_v20 = vadd.f32 1.0, %v10696_v25  ;;  %v9315_v49 = vmul.f32 -1.442695, %v8420_v62  ;;  %v8421_v15 = vadd.f32 %v14314_v47, %v8382_v56 }
 0x762   : > { %v10698_v29 = vpop.eup %10697  ;;  %10707 = vrcp.f32 %v8545_v20  ;;  %v9316_v41 = vmul.f32 -1.442695, %v8421_v15 }
 0x763   : > { %8639 = vst.msk [vmem:[%s14326_s16 + $0xc0] sm:$0xff] %vm8614_vm0, %v10698_v29  ;;  %10709 = vpow2.f32 %v9315_v49 }
 0x764   : > { %v10700_v45 = vpop.eup %10699  ;;  %10711 = vpow2.f32 %v9316_v41 }
 0x765   : > { %v10702_v42 = vpop.eup %10701  ;;  %8640 = vst.msk [vmem:[%s14326_s16 + $0xc8] sm:$0xff] %vm8614_vm0, %v10700_v45 }
 0x766   : > { %v8546_v52 = vadd.f32 1.0, %v10702_v42 }
 0x767   : > { %v10704_v59 = vpop.eup %10703 }
 0x768   : > { %10713 = vrcp.f32 %v8546_v52  ;;  %v8547_v35 = vadd.f32 1.0, %v10704_v59 }
 0x76a   : > { %v10706_v47 = vpop.eup %10705  ;;  %10715 = vrcp.f32 %v8547_v35 }
 0x76b   : > { %8641 = vst.msk [vmem:[%s14326_s16 + $0xd0] sm:$0xff] %vm8614_vm0, %v10706_v47 }
 0x76c   : > { %v10708_v50 = vpop.eup %10707 }
 0x76d   : > { %v10710_v6 = vpop.eup %10709  ;;  %8642 = vst.msk [vmem:[%s14326_s16 + $0xd8] sm:$0xff] %vm8614_vm0, %v10708_v50 }
 0x76e   : > { %v10712_v21 = vpop.eup %10711  ;;  %v8548_v61 = vadd.f32 1.0, %v10710_v6 }
 0x76f   : > { %v8549_v12 = vadd.f32 1.0, %v10712_v21 }
 0x770   : > { %10717 = vrcp.f32 %v8548_v61 }
 0x771   : > { %10719 = vrcp.f32 %v8549_v12 }
 0x772   : > { %v10714_v33 = vpop.eup %10713 }
 0x773   : > { %8643 = vst.msk [vmem:[%s14326_s16 + $0xe0] sm:$0xff] %vm8614_vm0, %v10714_v33 }
 0x774   : > { %v10716_v30 = vpop.eup %10715 }
 0x775   : > { %8644 = vst.msk [vmem:[%s14326_s16 + $0xe8] sm:$0xff] %vm8614_vm0, %v10716_v30 }
 0x77a   : > { %v10718_v40 = vpop.eup %10717 }
 0x77b   : > { %v10720_v48 = vpop.eup %10719  ;;  %8645 = vst.msk [vmem:[%s14326_s16 + $0xf0] sm:$0xff] %vm8614_vm0, %v10718_v40 }
 0x77c   : > { %8646 = vst.msk [vmem:[%s14326_s16 + $0xf8] sm:$0xff] %vm8614_vm0, %v10720_v48 }
 0x77d   : > { %11052 = shalt.err (!%p11049_p3)
}
 0x77e   : > { %s11053_s21 = scalar_lea.hbm %s14417_s9, 4096  ;;  %s11057_s22 = scalar_lea.hbm %s14915_s2, 8192 }
 0x77f   : > { %p11054_p1 = scmp.ne.s32.totalorder %s14417_s9, %s11053_s21  ;;  %p11058_p7 = scmp.lt.u32.totalorder %s14417_s9, %s14915_s2 }
 0x780   : > { %p11059_p0 = scmp.lt.u32.totalorder %s11057_s22, %s11053_s21  ;;  %p11061_p13 = scmp.lt.u32.totalorder %s11053_s21, %s14417_s9 }
 0x781   : > { %p11055_p2 = pnand %p11054_p1, %p14916_p11 }
 0x782   : > { %p11060_p5 = por %p11059_p0, %p11058_p7 }
 0x783   : > { %p11056_p8 = pneg %p11055_p2 }
 0x784   : > { %p11062_p9 = por %p11061_p13, %p11060_p5 }
 0x786   : > { %p11063_p6 = pnand %p11062_p9, %p11056_p8 }
 0x788   : > { %11066 = shalt.err (!%p11063_p6)
}
 0x789   : > { %s11164_s4 = smov 128   ;;  %s11165_s15 = smov 8  }
 0x78a   : > { %10006 = dma.vmem_to_hbm [thread:$0]  (%p14916_p11), %s14419_s14, 4096, %s14417_s9, %s8648_s11, %s11164_s4, %s11164_s4, %s11165_s15  }
 0x78b PF: > { %s14917_s16 = sld [smem:[#allocation31_spill]]  ;;  %s14918_s19 = sld [smem:[#allocation36_spill]] }
 0x78c   : > { %p14920_p10 = scmp.ge.s32.totalorder %s11141_s26, 2 }
 0x791   : > { %s8676_s1 = sand.u32 1, %s14917_s16   ;;  %p14919_p4 = scmp.ne.s32.totalorder %s14918_s19, 0 }
 0x792   : > { %s8677_s30 = scalar_lea.sflag [#allocation5], %s8676_s1 }
 0x793   : > { %p10044_p12 = pnand %p14920_p10, %p14919_p4 }
 0x795   : > { %11124 = dma.done.wait (!%p10044_p12), %s8677_s30, 4096  }
 0x796   : > { %11126 = vsyncadd (!%p10044_p12), %s8677_s30, 4294963200  ;;  %s14921_s26 = sld [smem:[#allocation34_spill]]  ;;  %s14922_s28 = sld [smem:[#allocation32_spill]] }
 0x797   : > { %s14923_s25 = sld [smem:[#allocation35_spill]]  ;;  %s14924_s23 = smov %s11133_s24 }
 0x79c   : > { %p32_p3 = scmp.ge.s32.totalorder %s14921_s26, 4   ;;  %s14925_s24 = smov %s14922_s28 }
 0x79e   :  { %34 = sbr.rel (!%p32_p3) target bundleno = 16 (0x10), region = 176 }
 0x7a5   :  { %8682 = vsyncpa [#allocation4], 1 }
 0x7a6   :  { %8684 = vsyncpa [#allocation4 + $0x1], 1 }
 0x7a7   :  { %8685 = vsyncpa [#allocation7], 1 }
 0x7a8   :  { %8686 = vsyncpa [#allocation10], 1 }
 0x7a9   :  { %8688 = vsyncpa [#allocation10 + $0x1], 1 }
 0x7aa   :  { %8689 = vsyncpa [#allocation13], 1 }
 0x7ab   :  { %8690 = vsyncpa [#allocation5], 1 }
 0x7ac   :  { %8692 = vsyncpa [#allocation5 + $0x1], 1 }

</bundles_post_ra>
